<compile_context>
chip_gen: v7x
topology: tpu7x:2x2x1
jax: 0.10.0
libtpu: 0.0.40
codegen_flags: <defaults>
</compile_context>

<pallas_src>
import functools

import numpy as np

import jax
import jax.numpy as jnp
from jax.experimental import pallas as pl
from jax.experimental.pallas import tpu as pltpu


# ------------------------------ fused kernel --------------------------------

def rasternet_kernel(
    patches1_ref, w1_ref, b1_ref,     # conv1 (im2col GEMM, K padded to 64)
    g2_ref, w2_ref, b2_ref,           # conv2 (stacked gather-by-matmul im2col)
    g3_ref, w3_ref, b3_ref,           # conv3 (stacked gather-by-matmul im2col)
    w4_ref, b4_ref,                   # conv4 (1x1)
    w5_ref, b5_ref,                   # conv5 (1x1)
    pool_ref,                         # per-tile global spatial mean as a matmul
    w6_ref, b6_ref,                   # fc1 (+ folded BN1d)
    w7_ref, b7_ref,                   # fc2 (lane-padded classes)
    out_ref,
    acc2_ref, acc3_ref,               # f32 VMEM accumulators (v7x MRB-friendly)
    *, mode, compute_dtype):

    def mm(a, b):
        # MXU matmul; operands fed in `compute_dtype` (bf16 default), f32 acc.
        return jnp.dot(a.astype(compute_dtype), b.astype(compute_dtype),
                       preferred_element_type=jnp.float32)

    def conv3x3_s2(h_prev, g_ref, w_ref, b_ref, acc_ref):
        """3x3 / stride-2 / pad-1 conv.  ONE stacked 0/1 gather matmul fetches
        all 9 im2col taps at once (rows are tap-major); the 9 per-tap weight
        GEMMs read static row-slices of that result and accumulate into a VMEM
        scratch ref.  Padding taps are all-zero rows of the gather matrix."""
        m_out = acc_ref.shape[0]
        p_all = mm(g_ref[...], h_prev)                       # (9*m_out, c_in)
        acc_ref[...] = jnp.zeros_like(acc_ref)
        for tap in range(9):                                 # static unroll
            acc_ref[...] += mm(p_all[tap * m_out:(tap + 1) * m_out, :],
                               w_ref[tap])
        return jnp.maximum(acc_ref[...] + b_ref[...], 0.0)

    # conv1 + BN + ReLU : (tile_n*H/2*W/2, 64) @ (64, 32)
    h = jnp.maximum(mm(patches1_ref[...], w1_ref[...]) + b1_ref[...], 0.0)
    # conv2 + BN + ReLU : -> (tile_n*H/4*W/4, 64)
    h = conv3x3_s2(h, g2_ref, w2_ref, b2_ref, acc2_ref)
    # conv3 + BN + ReLU : -> (tile_n*H/8*W/8, 128)
    h = conv3x3_s2(h, g3_ref, w3_ref, b3_ref, acc3_ref)
    # conv4 / conv5 (1x1 convs) + BN + ReLU
    h = jnp.maximum(mm(h, w4_ref[...]) + b4_ref[...], 0.0)      # (-, 256)
    h = jnp.maximum(mm(h, w5_ref[...]) + b5_ref[...], 0.0)      # (-, 512)
    # global spatial mean pool : (tile_n, tile_n*spatial) @ (tile_n*spatial, 512)
    h = mm(pool_ref[...], h)                                    # (tile_n, 512)
    # fc1 + BN1d + ReLU
    h = jnp.maximum(mm(h, w6_ref[...]) + b6_ref[...], 0.0)      # (tile_n, 256)
    # fc2 (classification: padded lanes carry a -1e30 f32 bias; regression: 0)
    logits = mm(h, w7_ref[...]) + b7_ref[...]                   # (tile_n, Cpad)

    if mode == "classification":
        m = jnp.max(logits, axis=-1, keepdims=True)
        shifted = logits - m
        lse = jnp.log(jnp.sum(jnp.exp(shifted), axis=-1, keepdims=True))
        out_ref[...] = (shifted - lse).astype(out_ref.dtype)
    else:  # regression (padded lanes are finite; sliced off by the wrapper)
        out_ref[...] = (1.0 / (1.0 + jnp.exp(-logits))).astype(out_ref.dtype)


# ------------------------- weight / constant prep ---------------------------

def _fold_bn(lin_bias, gamma, beta, mean, var, eps=1e-5):
    """Fold eval-mode BatchNorm into a per-channel (scale, bias) applied to the
    conv/linear output (which already includes `lin_bias`)."""
    scale = gamma / jnp.sqrt(var + eps)
    return scale, beta + scale * (lin_bias - mean)


def _conv_gemm_weights(p):
    """(Cout, Cin, k, k) torch conv weight + folded BN ->
       (k*k, Cin, Cout) tap-major GEMM weights (tap = kh*k + kw), (1, Cout) bias."""
    cout, cin, k, _ = p["w"].shape
    w = jnp.transpose(p["w"], (2, 3, 1, 0)).reshape(k * k, cin, cout)
    scale, bias = _fold_bn(p["b"], p["gamma"], p["beta"], p["mean"], p["var"])
    return w * scale[None, None, :], bias.reshape(1, cout)


def _im2col_3x3_s2_p1(x):
    """NHWC -> im2col rows for a 3x3 stride-2 pad-1 conv.
       Rows ordered (n, out_row, out_col); cols ordered (kh, kw, cin)."""
    n, hh, ww, c = x.shape
    ho, wo = hh // 2, ww // 2
    xp = jnp.pad(x, ((0, 0), (1, 1), (1, 1), (0, 0)))
    cols = []
    for kh in range(3):
        for kw in range(3):
            cols.append(xp[:, kh:kh + 2 * ho:2, kw:kw + 2 * wo:2, :])
    return jnp.concatenate(cols, axis=-1).reshape(n * ho * wo, 9 * c)


def _gather_mat_stacked(tile_n, hi, wi):
    """(9*tile_n*ho*wo, tile_n*hi*wi) 0/1 matrix, rows tap-major and
    block-diagonal over the tile's images: row tap*m_out + p selects the source
    row of tap `tap` for output pixel p of a 3x3 stride-2 pad-1 conv (taps that
    hit the zero padding stay all-zero rows).  Size is per-TILE, i.e. constant
    w.r.t. the total batch."""
    ho, wo = hi // 2, wi // 2
    m_out = tile_n * ho * wo
    g = np.zeros((9 * m_out, tile_n * hi * wi), np.float32)
    for kh in range(3):
        for kw in range(3):
            tap = kh * 3 + kw
            for b in range(tile_n):
                for u in range(ho):
                    i = 2 * u + kh - 1
                    if not 0 <= i < hi:
                        continue
                    for v in range(wo):
                        j = 2 * v + kw - 1
                        if 0 <= j < wi:
                            g[tap * m_out + (b * ho + u) * wo + v,
                              (b * hi + i) * wi + j] = 1.0
    return g


def _pool_mat(tile_n, spatial):
    p = np.zeros((tile_n, tile_n * spatial), np.float32)
    for b in range(tile_n):
        p[b, b * spatial:(b + 1) * spatial] = 1.0 / spatial
    return p


# ------------------------------- forward ------------------------------------

def rasternet_forward(x_nchw, params, mode="classification",
                      mxu_dtype=jnp.bfloat16, tile_n=8):
    if mode not in ("classification", "regression"):
        raise Exception("Invalid mode: {}".format(mode))

    n, cin, hh, ww = x_nchw.shape
    assert hh % 8 == 0 and ww % 8 == 0, "spatial dims must be divisible by 8"
    n_classes = params["fc2"]["w"].shape[1]
    cpad = ((n_classes + 127) // 128) * 128          # lane-dense output store

    n_tiles = -(-n // tile_n)
    n_pad = n_tiles * tile_n
    if n_pad != n:                                   # pad batch to tile multiple
        x_nchw = jnp.concatenate(
            [x_nchw, jnp.zeros((n_pad - n, cin, hh, ww), x_nchw.dtype)], axis=0)

    s1 = (hh // 2) * (ww // 2)                       # spatial after conv1
    s2 = (hh // 4) * (ww // 4)                       # after conv2
    s3 = (hh // 8) * (ww // 8)                       # after conv3 (pooled)
    m1, m2, m3 = tile_n * s1, tile_n * s2, tile_n * s3   # per-tile GEMM M dims

    # --- XLA-side, once-per-trace prep --------------------------------------
    x = jnp.transpose(x_nchw, (0, 2, 3, 1))          # NCHW -> NHWC
    patches1 = _im2col_3x3_s2_p1(x)                  # (n_pad*s1, 9*cin)
    kdim = 9 * cin
    kpad = ((kdim + 63) // 64) * 64                  # align conv1 contraction dim
    patches1 = jnp.pad(patches1, ((0, 0), (0, kpad - kdim)))

    w1, b1 = _conv_gemm_weights(params["conv1"])
    w1 = jnp.pad(w1.reshape(kdim, -1), ((0, kpad - kdim), (0, 0)))  # (kpad, 32)
    w2, b2 = _conv_gemm_weights(params["conv2"])     # (9, 32, 64)
    w3, b3 = _conv_gemm_weights(params["conv3"])     # (9, 64, 128)
    w4, b4 = _conv_gemm_weights(params["conv4"])
    w4 = w4[0]                                       # (128, 256)
    w5, b5 = _conv_gemm_weights(params["conv5"])
    w5 = w5[0]                                       # (256, 512)

    p = params["fc1"]
    s6, sb6 = _fold_bn(p["b"], p["gamma"], p["beta"], p["mean"], p["var"])
    w6 = p["w"] * s6[None, :]                        # (512, 256)
    b6 = sb6.reshape(1, -1)

    p = params["fc2"]
    pad_fill = -1e30 if mode == "classification" else 0.0
    w7 = jnp.zeros((p["w"].shape[0], cpad), jnp.float32).at[:, :n_classes].set(p["w"])
    b7 = jnp.full((1, cpad), pad_fill, jnp.float32).at[0, :n_classes].set(p["b"])

    # per-TILE constant gather / pool matrices (independent of total batch)
    g2 = jnp.asarray(_gather_mat_stacked(tile_n, hh // 2, ww // 2))  # (9*m2, m1)
    g3 = jnp.asarray(_gather_mat_stacked(tile_n, hh // 4, ww // 4))  # (9*m3, m2)
    pool = jnp.asarray(_pool_mat(tile_n, s3))                        # (tile_n, m3)

    cd = mxu_dtype                                   # biases stay f32
    ops = [patches1.astype(cd), w1.astype(cd), b1,
           g2.astype(cd), w2.astype(cd), b2,
           g3.astype(cd), w3.astype(cd), b3,
           w4.astype(cd), b4,
           w5.astype(cd), b5,
           pool.astype(cd),
           w6.astype(cd), b6,
           w7.astype(cd), b7]

    # streamed (per batch tile) vs resident (constant index_map) BlockSpecs
    def resident(arr):
        nd = arr.ndim
        return pl.BlockSpec(arr.shape, lambda i, nd=nd: (0,) * nd)

    in_specs = ([pl.BlockSpec((m1, kpad), lambda i: (i, 0))]
                + [resident(o) for o in ops[1:]])
    out_specs = pl.BlockSpec((tile_n, cpad), lambda i: (i, 0))

    # advisory cost estimate + explicit VMEM budget (weights + 2x streamed tile)
    tile_flops = 2 * (m1 * kpad * 32
                      + 9 * m2 * m1 * 32 + 9 * m2 * 32 * 64
                      + 9 * m3 * m2 * 64 + 9 * m3 * 64 * 128
                      + m3 * 128 * 256 + m3 * 256 * 512
                      + tile_n * m3 * 512
                      + tile_n * 512 * 256 + tile_n * 256 * cpad)
    cost = pl.CostEstimate(
        flops=int(tile_flops * n_tiles),
        transcendentals=int(n_pad * (cpad + 1)),
        bytes_accessed=int(sum(int(o.size) * o.dtype.itemsize for o in ops)
                           + n_pad * cpad * 4))
    resident_bytes = sum(int(o.size) * o.dtype.itemsize for o in ops[1:])
    tile_bytes = m1 * kpad * ops[0].dtype.itemsize + tile_n * cpad * 4
    vmem_limit = int(min(64 * 1024 * 1024,
                         max(32 * 1024 * 1024,
                             2 * (resident_bytes + tile_bytes) + 8 * 1024 * 1024)))

    kern = functools.partial(rasternet_kernel, mode=mode, compute_dtype=cd)
    out = pl.pallas_call(
        kern,
        out_shape=jax.ShapeDtypeStruct((n_pad, cpad), jnp.float32),
        grid_spec=pltpu.PrefetchScalarGridSpec(
            num_scalar_prefetch=0,
            grid=(n_tiles,),
            in_specs=in_specs,
            out_specs=out_specs,
            scratch_shapes=[pltpu.VMEM((m2, 64), jnp.float32),
                            pltpu.VMEM((m3, 128), jnp.float32)]),
        compiler_params=pltpu.CompilerParams(
            dimension_semantics=("parallel",),
            vmem_limit_bytes=vmem_limit),
        cost_estimate=cost,
    )(*ops)
    return out[:n, :n_classes]


# ------------------------- pure-XLA reference (check) ------------------------

def _reference_forward(x_nchw, params, mode="classification"):
    """Non-Pallas eval-mode reference mirroring the PyTorch module."""
    def bn(y, p):
        scale = p["gamma"] / jnp.sqrt(p["var"] + 1e-5)
        return y * scale + (p["beta"] - scale * p["mean"])

    x = jnp.transpose(x_nchw, (0, 2, 3, 1))
    for name in ("conv1", "conv2", "conv3"):
        p = params[name]
        n, hh, ww, c = x.shape
        pat = _im2col_3x3_s2_p1(x)
        wmat = jnp.transpose(p["w"], (2, 3, 1, 0)).reshape(9 * c, -1)
        y = jax.nn.relu(bn(pat @ wmat + p["b"][None, :], p))
        x = y.reshape(n, hh // 2, ww // 2, -1)
    for name in ("conv4", "conv5"):
        p = params[name]
        n, hh, ww, c = x.shape
        wmat = p["w"].reshape(-1, c).T
        y = jax.nn.relu(bn(x.reshape(-1, c) @ wmat + p["b"][None, :], p))
        x = y.reshape(n, hh, ww, -1)
    n, hh, ww, c = x.shape
    h = jnp.mean(x.reshape(n, hh * ww, c), axis=1)
    p = params["fc1"]
    h = jax.nn.relu(bn(h @ p["w"] + p["b"][None, :], p))
    p = params["fc2"]
    logits = h @ p["w"] + p["b"][None, :]
    if mode == "classification":
        return jax.nn.log_softmax(logits, axis=-1)
    return jax.nn.sigmoid(logits)


# --------------------------- deterministic params ---------------------------

def _conv_params(key, cin, cout, k):
    k1, k2, k3, k4, k5, k6 = jax.random.split(key, 6)
    return dict(
        w=jax.random.normal(k1, (cout, cin, k, k), jnp.float32) / ((cin * k * k) ** 0.5),
        b=0.1 * jax.random.normal(k2, (cout,), jnp.float32),
        gamma=1.0 + 0.1 * jax.random.normal(k3, (cout,), jnp.float32),
        beta=0.1 * jax.random.normal(k4, (cout,), jnp.float32),
        mean=0.1 * jax.random.normal(k5, (cout,), jnp.float32),
        var=1.0 + 0.5 * jax.random.uniform(k6, (cout,), jnp.float32),
    )


def _fc_params(key, cin, cout, with_bn):
    ks = jax.random.split(key, 6)
    p = dict(
        w=jax.random.normal(ks[0], (cin, cout), jnp.float32) / (cin ** 0.5),
        b=0.1 * jax.random.normal(ks[1], (cout,), jnp.float32),
    )
    if with_bn:
        p.update(
            gamma=1.0 + 0.1 * jax.random.normal(ks[2], (cout,), jnp.float32),
            beta=0.1 * jax.random.normal(ks[3], (cout,), jnp.float32),
            mean=0.1 * jax.random.normal(ks[4], (cout,), jnp.float32),
            var=1.0 + 0.5 * jax.random.uniform(ks[5], (cout,), jnp.float32),
        )
    return p


def init_params(key, n_classes):
    k1, k2, k3, k4, k5, k6, k7 = jax.random.split(key, 7)
    return dict(
        conv1=_conv_params(k1, 5, 32, 3),
        conv2=_conv_params(k2, 32, 64, 3),
        conv3=_conv_params(k3, 64, 128, 3),
        conv4=_conv_params(k4, 128, 256, 1),
        conv5=_conv_params(k5, 256, 512, 1),
        fc1=_fc_params(k6, 512, 256, with_bn=True),
        fc2=_fc_params(k7, 256, n_classes, with_bn=False),
    )


# ---------------------------------- main ------------------------------------

if __name__ == "__main__":
    n_classes = 10
    key = jax.random.PRNGKey(0)
    kx, kp = jax.random.split(key)

    x = jax.random.normal(kx, (2, 5, 16, 16), jnp.float32)   # NCHW, 5 input channels
    params = init_params(kp, n_classes)

    fwd = jax.jit(rasternet_forward,
                  static_argnames=("mode", "mxu_dtype", "tile_n"))

    # pure-XLA eval-mode reference
    ref = _reference_forward(x, params, mode="classification")

    # 1) f32 MXU feed: tight numerical cross-check of the fused kernel math.
    out_f32 = jax.block_until_ready(
        fwd(x, params, mode="classification", mxu_dtype=jnp.float32))
    err_f32 = float(jnp.max(jnp.abs(out_f32 - ref)))
    assert err_f32 < 2e-3, err_f32

    # 2) default bf16 MXU feed (f32 accumulate / epilogue): the perf path.
    out = jax.block_until_ready(fwd(x, params, mode="classification"))
    assert out.shape == (2, n_classes), out.shape
    assert bool(jnp.all(jnp.isfinite(out)))
    row_sums = jnp.exp(out).sum(axis=-1)
    assert bool(jnp.all(jnp.abs(row_sums - 1.0) < 1e-3)), row_sums
    err_bf16 = float(jnp.max(jnp.abs(out - ref)))   # bf16 quantization tolerance
    assert err_bf16 < 0.3, err_bf16

    print("KERNEL_OK")
</pallas_src>

<mosaic_0001>
module attributes {stable_mosaic.version = 11 : i64} {
  func.func @rasternet_kernel(%arg0: i32, %arg1: memref<512x64xf32, #tpu.memory_space<vmem>>, %arg2: memref<64x32xf32, #tpu.memory_space<vmem>>, %arg3: memref<1x32xf32, #tpu.memory_space<vmem>>, %arg4: memref<1152x512xf32, #tpu.memory_space<vmem>>, %arg5: memref<9x32x64xf32, #tpu.memory_space<vmem>>, %arg6: memref<1x64xf32, #tpu.memory_space<vmem>>, %arg7: memref<288x128xf32, #tpu.memory_space<vmem>>, %arg8: memref<9x64x128xf32, #tpu.memory_space<vmem>>, %arg9: memref<1x128xf32, #tpu.memory_space<vmem>>, %arg10: memref<128x256xf32, #tpu.memory_space<vmem>>, %arg11: memref<1x256xf32, #tpu.memory_space<vmem>>, %arg12: memref<256x512xf32, #tpu.memory_space<vmem>>, %arg13: memref<1x512xf32, #tpu.memory_space<vmem>>, %arg14: memref<8x32xf32, #tpu.memory_space<vmem>>, %arg15: memref<512x256xf32, #tpu.memory_space<vmem>>, %arg16: memref<1x256xf32, #tpu.memory_space<vmem>>, %arg17: memref<256x128xf32, #tpu.memory_space<vmem>>, %arg18: memref<1x128xf32, #tpu.memory_space<vmem>>, %arg19: memref<8x128xf32, #tpu.memory_space<vmem>>, %arg20: memref<128x64xf32, #tpu.memory_space<vmem>>, %arg21: memref<32x128xf32, #tpu.memory_space<vmem>>) attributes {dimension_semantics = [#tpu.dimension_semantics<parallel>], iteration_bounds = array<i64: 1>, scalar_prefetch = 0 : i64, scratch_operands = 2 : i64, tpu.core_type = #tpu.core_type<tc>, window_params = [{transform_indices = @transform_0, window_bounds = array<i64: 512, 64>}, {pipeline_mode = #tpu.pipeline_mode<synchronous>, transform_indices = @transform_1, window_bounds = array<i64: 64, 32>}, {pipeline_mode = #tpu.pipeline_mode<synchronous>, transform_indices = @transform_2, window_bounds = array<i64: 1, 32>}, {pipeline_mode = #tpu.pipeline_mode<synchronous>, transform_indices = @transform_3, window_bounds = array<i64: 1152, 512>}, {pipeline_mode = #tpu.pipeline_mode<synchronous>, transform_indices = @transform_4, window_bounds = array<i64: 9, 32, 64>}, {pipeline_mode = #tpu.pipeline_mode<synchronous>, transform_indices = @transform_5, window_bounds = array<i64: 1, 64>}, {pipeline_mode = #tpu.pipeline_mode<synchronous>, transform_indices = @transform_6, window_bounds = array<i64: 288, 128>}, {pipeline_mode = #tpu.pipeline_mode<synchronous>, transform_indices = @transform_7, window_bounds = array<i64: 9, 64, 128>}, {pipeline_mode = #tpu.pipeline_mode<synchronous>, transform_indices = @transform_8, window_bounds = array<i64: 1, 128>}, {pipeline_mode = #tpu.pipeline_mode<synchronous>, transform_indices = @transform_9, window_bounds = array<i64: 128, 256>}, {pipeline_mode = #tpu.pipeline_mode<synchronous>, transform_indices = @transform_10, window_bounds = array<i64: 1, 256>}, {pipeline_mode = #tpu.pipeline_mode<synchronous>, transform_indices = @transform_11, window_bounds = array<i64: 256, 512>}, {pipeline_mode = #tpu.pipeline_mode<synchronous>, transform_indices = @transform_12, window_bounds = array<i64: 1, 512>}, {pipeline_mode = #tpu.pipeline_mode<synchronous>, transform_indices = @transform_13, window_bounds = array<i64: 8, 32>}, {pipeline_mode = #tpu.pipeline_mode<synchronous>, transform_indices = @transform_14, window_bounds = array<i64: 512, 256>}, {pipeline_mode = #tpu.pipeline_mode<synchronous>, transform_indices = @transform_15, window_bounds = array<i64: 1, 256>}, {pipeline_mode = #tpu.pipeline_mode<synchronous>, transform_indices = @transform_16, window_bounds = array<i64: 256, 128>}, {pipeline_mode = #tpu.pipeline_mode<synchronous>, transform_indices = @transform_17, window_bounds = array<i64: 1, 128>}, {transform_indices = @transform_18, window_bounds = array<i64: 8, 128>}]} {
    %c0 = arith.constant 0 : index
    %c0_0 = arith.constant 0 : index
    %0 = vector.load %arg1[%c0, %c0_0] : memref<512x64xf32, #tpu.memory_space<vmem>>, vector<512x64xf32>
    %c0_1 = arith.constant 0 : index
    %c0_2 = arith.constant 0 : index
    %1 = vector.load %arg2[%c0_1, %c0_2] : memref<64x32xf32, #tpu.memory_space<vmem>>, vector<64x32xf32>
    %cst = arith.constant dense<0.000000e+00> : vector<512x32xf32>
    %2 = tpu.matmul %0, %1, %cst {dimension_numbers = #tpu.dot_dimension_numbers<[1], [0], [0], [1], [0, 0, 1, 1], [], []>} : vector<512x64xf32>, vector<64x32xf32>, vector<512x32xf32> -> vector<512x32xf32>
    %c0_3 = arith.constant 0 : index
    %c0_4 = arith.constant 0 : index
    %3 = vector.load %arg3[%c0_3, %c0_4] : memref<1x32xf32, #tpu.memory_space<vmem>>, vector<1x32xf32>
    %4 = vector.broadcast %3 : vector<1x32xf32> to vector<512x32xf32>
    %5 = arith.addf %2, %4 : vector<512x32xf32>
    %cst_5 = arith.constant 0.000000e+00 : f32
    %6 = vector.broadcast %cst_5 : f32 to vector<512x32xf32>
    %7 = arith.maximumf %5, %6 : vector<512x32xf32>
    %c0_6 = arith.constant 0 : index
    %c0_7 = arith.constant 0 : index
    %8 = vector.load %arg4[%c0_6, %c0_7] : memref<1152x512xf32, #tpu.memory_space<vmem>>, vector<1152x512xf32>
    %cst_8 = arith.constant dense<0.000000e+00> : vector<1152x32xf32>
    %9 = tpu.matmul %8, %7, %cst_8 {dimension_numbers = #tpu.dot_dimension_numbers<[1], [0], [0], [1], [0, 0, 1, 1], [], []>} : vector<1152x512xf32>, vector<512x32xf32>, vector<1152x32xf32> -> vector<1152x32xf32>
    %cst_9 = arith.constant 0.000000e+00 : f32
    %10 = vector.broadcast %cst_9 : f32 to vector<128x64xf32>
    %c0_10 = arith.constant 0 : index
    %c0_11 = arith.constant 0 : index
    %11 = vector.load %arg20[%c0_10, %c0_11] : memref<128x64xf32, #tpu.memory_space<vmem>>, vector<128x64xf32>
    tpu.vector_store %arg20[%c0_10, %c0_11], %10 {strides = array<i32>} : memref<128x64xf32, #tpu.memory_space<vmem>>, vector<128x64xf32>,
    %c0_12 = arith.constant 0 : index
    %c0_13 = arith.constant 0 : index
    %12 = vector.load %arg20[%c0_12, %c0_13] : memref<128x64xf32, #tpu.memory_space<vmem>>, vector<128x64xf32>
    %13 = vector.extract_strided_slice %9 {offsets = [0, 0], sizes = [128, 32], strides = [1, 1]} : vector<1152x32xf32> to vector<128x32xf32>
    %c0_14 = arith.constant 0 : index
    %c0_15 = arith.constant 0 : index
    %c0_16 = arith.constant 0 : index
    %14 = vector.load %arg5[%c0_14, %c0_15, %c0_16] : memref<9x32x64xf32, #tpu.memory_space<vmem>>, vector<1x32x64xf32>
    %15 = vector.shape_cast %14 : vector<1x32x64xf32> to vector<32x64xf32>
    %cst_17 = arith.constant dense<0.000000e+00> : vector<128x64xf32>
    %16 = tpu.matmul %13, %15, %cst_17 {dimension_numbers = #tpu.dot_dimension_numbers<[1], [0], [0], [1], [0, 0, 1, 1], [], []>} : vector<128x32xf32>, vector<32x64xf32>, vector<128x64xf32> -> vector<128x64xf32>
    %17 = arith.addf %12, %16 : vector<128x64xf32>
    %c0_18 = arith.constant 0 : index
    %c0_19 = arith.constant 0 : index
    %18 = vector.load %arg20[%c0_18, %c0_19] : memref<128x64xf32, #tpu.memory_space<vmem>>, vector<128x64xf32>
    tpu.vector_store %arg20[%c0_18, %c0_19], %17 {strides = array<i32>} : memref<128x64xf32, #tpu.memory_space<vmem>>, vector<128x64xf32>,
    %c0_20 = arith.constant 0 : index
    %c0_21 = arith.constant 0 : index
    %19 = vector.load %arg20[%c0_20, %c0_21] : memref<128x64xf32, #tpu.memory_space<vmem>>, vector<128x64xf32>
    %20 = vector.extract_strided_slice %9 {offsets = [128, 0], sizes = [128, 32], strides = [1, 1]} : vector<1152x32xf32> to vector<128x32xf32>
    %c1 = arith.constant 1 : index
    %c0_22 = arith.constant 0 : index
    %c0_23 = arith.constant 0 : index
    %21 = vector.load %arg5[%c1, %c0_22, %c0_23] : memref<9x32x64xf32, #tpu.memory_space<vmem>>, vector<1x32x64xf32>
    %22 = vector.shape_cast %21 : vector<1x32x64xf32> to vector<32x64xf32>
    %cst_24 = arith.constant dense<0.000000e+00> : vector<128x64xf32>
    %23 = tpu.matmul %20, %22, %cst_24 {dimension_numbers = #tpu.dot_dimension_numbers<[1], [0], [0], [1], [0, 0, 1, 1], [], []>} : vector<128x32xf32>, vector<32x64xf32>, vector<128x64xf32> -> vector<128x64xf32>
    %24 = arith.addf %19, %23 : vector<128x64xf32>
    %c0_25 = arith.constant 0 : index
    %c0_26 = arith.constant 0 : index
    %25 = vector.load %arg20[%c0_25, %c0_26] : memref<128x64xf32, #tpu.memory_space<vmem>>, vector<128x64xf32>
    tpu.vector_store %arg20[%c0_25, %c0_26], %24 {strides = array<i32>} : memref<128x64xf32, #tpu.memory_space<vmem>>, vector<128x64xf32>,
    %c0_27 = arith.constant 0 : index
    %c0_28 = arith.constant 0 : index
    %26 = vector.load %arg20[%c0_27, %c0_28] : memref<128x64xf32, #tpu.memory_space<vmem>>, vector<128x64xf32>
    %27 = vector.extract_strided_slice %9 {offsets = [256, 0], sizes = [128, 32], strides = [1, 1]} : vector<1152x32xf32> to vector<128x32xf32>
    %c2 = arith.constant 2 : index
    %c0_29 = arith.constant 0 : index
    %c0_30 = arith.constant 0 : index
    %28 = vector.load %arg5[%c2, %c0_29, %c0_30] : memref<9x32x64xf32, #tpu.memory_space<vmem>>, vector<1x32x64xf32>
    %29 = vector.shape_cast %28 : vector<1x32x64xf32> to vector<32x64xf32>
    %cst_31 = arith.constant dense<0.000000e+00> : vector<128x64xf32>
    %30 = tpu.matmul %27, %29, %cst_31 {dimension_numbers = #tpu.dot_dimension_numbers<[1], [0], [0], [1], [0, 0, 1, 1], [], []>} : vector<128x32xf32>, vector<32x64xf32>, vector<128x64xf32> -> vector<128x64xf32>
    %31 = arith.addf %26, %30 : vector<128x64xf32>
    %c0_32 = arith.constant 0 : index
    %c0_33 = arith.constant 0 : index
    %32 = vector.load %arg20[%c0_32, %c0_33] : memref<128x64xf32, #tpu.memory_space<vmem>>, vector<128x64xf32>
    tpu.vector_store %arg20[%c0_32, %c0_33], %31 {strides = array<i32>} : memref<128x64xf32, #tpu.memory_space<vmem>>, vector<128x64xf32>,
    %c0_34 = arith.constant 0 : index
    %c0_35 = arith.constant 0 : index
    %33 = vector.load %arg20[%c0_34, %c0_35] : memref<128x64xf32, #tpu.memory_space<vmem>>, vector<128x64xf32>
    %34 = vector.extract_strided_slice %9 {offsets = [384, 0], sizes = [128, 32], strides = [1, 1]} : vector<1152x32xf32> to vector<128x32xf32>
    %c3 = arith.constant 3 : index
    %c0_36 = arith.constant 0 : index
    %c0_37 = arith.constant 0 : index
    %35 = vector.load %arg5[%c3, %c0_36, %c0_37] : memref<9x32x64xf32, #tpu.memory_space<vmem>>, vector<1x32x64xf32>
    %36 = vector.shape_cast %35 : vector<1x32x64xf32> to vector<32x64xf32>
    %cst_38 = arith.constant dense<0.000000e+00> : vector<128x64xf32>
    %37 = tpu.matmul %34, %36, %cst_38 {dimension_numbers = #tpu.dot_dimension_numbers<[1], [0], [0], [1], [0, 0, 1, 1], [], []>} : vector<128x32xf32>, vector<32x64xf32>, vector<128x64xf32> -> vector<128x64xf32>
    %38 = arith.addf %33, %37 : vector<128x64xf32>
    %c0_39 = arith.constant 0 : index
    %c0_40 = arith.constant 0 : index
    %39 = vector.load %arg20[%c0_39, %c0_40] : memref<128x64xf32, #tpu.memory_space<vmem>>, vector<128x64xf32>
    tpu.vector_store %arg20[%c0_39, %c0_40], %38 {strides = array<i32>} : memref<128x64xf32, #tpu.memory_space<vmem>>, vector<128x64xf32>,
    %c0_41 = arith.constant 0 : index
    %c0_42 = arith.constant 0 : index
    %40 = vector.load %arg20[%c0_41, %c0_42] : memref<128x64xf32, #tpu.memory_space<vmem>>, vector<128x64xf32>
    %41 = vector.extract_strided_slice %9 {offsets = [512, 0], sizes = [128, 32], strides = [1, 1]} : vector<1152x32xf32> to vector<128x32xf32>
    %c4 = arith.constant 4 : index
    %c0_43 = arith.constant 0 : index
    %c0_44 = arith.constant 0 : index
    %42 = vector.load %arg5[%c4, %c0_43, %c0_44] : memref<9x32x64xf32, #tpu.memory_space<vmem>>, vector<1x32x64xf32>
    %43 = vector.shape_cast %42 : vector<1x32x64xf32> to vector<32x64xf32>
    %cst_45 = arith.constant dense<0.000000e+00> : vector<128x64xf32>
    %44 = tpu.matmul %41, %43, %cst_45 {dimension_numbers = #tpu.dot_dimension_numbers<[1], [0], [0], [1], [0, 0, 1, 1], [], []>} : vector<128x32xf32>, vector<32x64xf32>, vector<128x64xf32> -> vector<128x64xf32>
    %45 = arith.addf %40, %44 : vector<128x64xf32>
    %c0_46 = arith.constant 0 : index
    %c0_47 = arith.constant 0 : index
    %46 = vector.load %arg20[%c0_46, %c0_47] : memref<128x64xf32, #tpu.memory_space<vmem>>, vector<128x64xf32>
    tpu.vector_store %arg20[%c0_46, %c0_47], %45 {strides = array<i32>} : memref<128x64xf32, #tpu.memory_space<vmem>>, vector<128x64xf32>,
    %c0_48 = arith.constant 0 : index
    %c0_49 = arith.constant 0 : index
    %47 = vector.load %arg20[%c0_48, %c0_49] : memref<128x64xf32, #tpu.memory_space<vmem>>, vector<128x64xf32>
    %48 = vector.extract_strided_slice %9 {offsets = [640, 0], sizes = [128, 32], strides = [1, 1]} : vector<1152x32xf32> to vector<128x32xf32>
    %c5 = arith.constant 5 : index
    %c0_50 = arith.constant 0 : index
    %c0_51 = arith.constant 0 : index
    %49 = vector.load %arg5[%c5, %c0_50, %c0_51] : memref<9x32x64xf32, #tpu.memory_space<vmem>>, vector<1x32x64xf32>
    %50 = vector.shape_cast %49 : vector<1x32x64xf32> to vector<32x64xf32>
    %cst_52 = arith.constant dense<0.000000e+00> : vector<128x64xf32>
    %51 = tpu.matmul %48, %50, %cst_52 {dimension_numbers = #tpu.dot_dimension_numbers<[1], [0], [0], [1], [0, 0, 1, 1], [], []>} : vector<128x32xf32>, vector<32x64xf32>, vector<128x64xf32> -> vector<128x64xf32>
    %52 = arith.addf %47, %51 : vector<128x64xf32>
    %c0_53 = arith.constant 0 : index
    %c0_54 = arith.constant 0 : index
    %53 = vector.load %arg20[%c0_53, %c0_54] : memref<128x64xf32, #tpu.memory_space<vmem>>, vector<128x64xf32>
    tpu.vector_store %arg20[%c0_53, %c0_54], %52 {strides = array<i32>} : memref<128x64xf32, #tpu.memory_space<vmem>>, vector<128x64xf32>,
    %c0_55 = arith.constant 0 : index
    %c0_56 = arith.constant 0 : index
    %54 = vector.load %arg20[%c0_55, %c0_56] : memref<128x64xf32, #tpu.memory_space<vmem>>, vector<128x64xf32>
    %55 = vector.extract_strided_slice %9 {offsets = [768, 0], sizes = [128, 32], strides = [1, 1]} : vector<1152x32xf32> to vector<128x32xf32>
    %c6 = arith.constant 6 : index
    %c0_57 = arith.constant 0 : index
    %c0_58 = arith.constant 0 : index
    %56 = vector.load %arg5[%c6, %c0_57, %c0_58] : memref<9x32x64xf32, #tpu.memory_space<vmem>>, vector<1x32x64xf32>
    %57 = vector.shape_cast %56 : vector<1x32x64xf32> to vector<32x64xf32>
    %cst_59 = arith.constant dense<0.000000e+00> : vector<128x64xf32>
    %58 = tpu.matmul %55, %57, %cst_59 {dimension_numbers = #tpu.dot_dimension_numbers<[1], [0], [0], [1], [0, 0, 1, 1], [], []>} : vector<128x32xf32>, vector<32x64xf32>, vector<128x64xf32> -> vector<128x64xf32>
    %59 = arith.addf %54, %58 : vector<128x64xf32>
    %c0_60 = arith.constant 0 : index
    %c0_61 = arith.constant 0 : index
    %60 = vector.load %arg20[%c0_60, %c0_61] : memref<128x64xf32, #tpu.memory_space<vmem>>, vector<128x64xf32>
    tpu.vector_store %arg20[%c0_60, %c0_61], %59 {strides = array<i32>} : memref<128x64xf32, #tpu.memory_space<vmem>>, vector<128x64xf32>,
    %c0_62 = arith.constant 0 : index
    %c0_63 = arith.constant 0 : index
    %61 = vector.load %arg20[%c0_62, %c0_63] : memref<128x64xf32, #tpu.memory_space<vmem>>, vector<128x64xf32>
    %62 = vector.extract_strided_slice %9 {offsets = [896, 0], sizes = [128, 32], strides = [1, 1]} : vector<1152x32xf32> to vector<128x32xf32>
    %c7 = arith.constant 7 : index
    %c0_64 = arith.constant 0 : index
    %c0_65 = arith.constant 0 : index
    %63 = vector.load %arg5[%c7, %c0_64, %c0_65] : memref<9x32x64xf32, #tpu.memory_space<vmem>>, vector<1x32x64xf32>
    %64 = vector.shape_cast %63 : vector<1x32x64xf32> to vector<32x64xf32>
    %cst_66 = arith.constant dense<0.000000e+00> : vector<128x64xf32>
    %65 = tpu.matmul %62, %64, %cst_66 {dimension_numbers = #tpu.dot_dimension_numbers<[1], [0], [0], [1], [0, 0, 1, 1], [], []>} : vector<128x32xf32>, vector<32x64xf32>, vector<128x64xf32> -> vector<128x64xf32>
    %66 = arith.addf %61, %65 : vector<128x64xf32>
    %c0_67 = arith.constant 0 : index
    %c0_68 = arith.constant 0 : index
    %67 = vector.load %arg20[%c0_67, %c0_68] : memref<128x64xf32, #tpu.memory_space<vmem>>, vector<128x64xf32>
    tpu.vector_store %arg20[%c0_67, %c0_68], %66 {strides = array<i32>} : memref<128x64xf32, #tpu.memory_space<vmem>>, vector<128x64xf32>,
    %c0_69 = arith.constant 0 : index
    %c0_70 = arith.constant 0 : index
    %68 = vector.load %arg20[%c0_69, %c0_70] : memref<128x64xf32, #tpu.memory_space<vmem>>, vector<128x64xf32>
    %69 = vector.extract_strided_slice %9 {offsets = [1024, 0], sizes = [128, 32], strides = [1, 1]} : vector<1152x32xf32> to vector<128x32xf32>
    %c8 = arith.constant 8 : index
    %c0_71 = arith.constant 0 : index
    %c0_72 = arith.constant 0 : index
    %70 = vector.load %arg5[%c8, %c0_71, %c0_72] : memref<9x32x64xf32, #tpu.memory_space<vmem>>, vector<1x32x64xf32>
    %71 = vector.shape_cast %70 : vector<1x32x64xf32> to vector<32x64xf32>
    %cst_73 = arith.constant dense<0.000000e+00> : vector<128x64xf32>
    %72 = tpu.matmul %69, %71, %cst_73 {dimension_numbers = #tpu.dot_dimension_numbers<[1], [0], [0], [1], [0, 0, 1, 1], [], []>} : vector<128x32xf32>, vector<32x64xf32>, vector<128x64xf32> -> vector<128x64xf32>
    %73 = arith.addf %68, %72 : vector<128x64xf32>
    %c0_74 = arith.constant 0 : index
    %c0_75 = arith.constant 0 : index
    %74 = vector.load %arg20[%c0_74, %c0_75] : memref<128x64xf32, #tpu.memory_space<vmem>>, vector<128x64xf32>
    tpu.vector_store %arg20[%c0_74, %c0_75], %73 {strides = array<i32>} : memref<128x64xf32, #tpu.memory_space<vmem>>, vector<128x64xf32>,
    %c0_76 = arith.constant 0 : index
    %c0_77 = arith.constant 0 : index
    %75 = vector.load %arg20[%c0_76, %c0_77] : memref<128x64xf32, #tpu.memory_space<vmem>>, vector<128x64xf32>
    %c0_78 = arith.constant 0 : index
    %c0_79 = arith.constant 0 : index
    %76 = vector.load %arg6[%c0_78, %c0_79] : memref<1x64xf32, #tpu.memory_space<vmem>>, vector<1x64xf32>
    %77 = vector.broadcast %76 : vector<1x64xf32> to vector<128x64xf32>
    %78 = arith.addf %75, %77 : vector<128x64xf32>
    %cst_80 = arith.constant 0.000000e+00 : f32
    %79 = vector.broadcast %cst_80 : f32 to vector<128x64xf32>
    %80 = arith.maximumf %78, %79 : vector<128x64xf32>
    %c0_81 = arith.constant 0 : index
    %c0_82 = arith.constant 0 : index
    %81 = vector.load %arg7[%c0_81, %c0_82] : memref<288x128xf32, #tpu.memory_space<vmem>>, vector<288x128xf32>
    %cst_83 = arith.constant dense<0.000000e+00> : vector<288x64xf32>
    %82 = tpu.matmul %81, %80, %cst_83 {dimension_numbers = #tpu.dot_dimension_numbers<[1], [0], [0], [1], [0, 0, 1, 1], [], []>} : vector<288x128xf32>, vector<128x64xf32>, vector<288x64xf32> -> vector<288x64xf32>
    %cst_84 = arith.constant 0.000000e+00 : f32
    %83 = vector.broadcast %cst_84 : f32 to vector<32x128xf32>
    %c0_85 = arith.constant 0 : index
    %c0_86 = arith.constant 0 : index
    %84 = vector.load %arg21[%c0_85, %c0_86] : memref<32x128xf32, #tpu.memory_space<vmem>>, vector<32x128xf32>
    tpu.vector_store %arg21[%c0_85, %c0_86], %83 {strides = array<i32>} : memref<32x128xf32, #tpu.memory_space<vmem>>, vector<32x128xf32>,
    %c0_87 = arith.constant 0 : index
    %c0_88 = arith.constant 0 : index
    %85 = vector.load %arg21[%c0_87, %c0_88] : memref<32x128xf32, #tpu.memory_space<vmem>>, vector<32x128xf32>
    %86 = vector.extract_strided_slice %82 {offsets = [0, 0], sizes = [32, 64], strides = [1, 1]} : vector<288x64xf32> to vector<32x64xf32>
    %c0_89 = arith.constant 0 : index
    %c0_90 = arith.constant 0 : index
    %c0_91 = arith.constant 0 : index
    %87 = vector.load %arg8[%c0_89, %c0_90, %c0_91] : memref<9x64x128xf32, #tpu.memory_space<vmem>>, vector<1x64x128xf32>
    %88 = vector.shape_cast %87 : vector<1x64x128xf32> to vector<64x128xf32>
    %cst_92 = arith.constant dense<0.000000e+00> : vector<32x128xf32>
    %89 = tpu.matmul %86, %88, %cst_92 {dimension_numbers = #tpu.dot_dimension_numbers<[1], [0], [0], [1], [0, 0, 1, 1], [], []>} : vector<32x64xf32>, vector<64x128xf32>, vector<32x128xf32> -> vector<32x128xf32>
    %90 = arith.addf %85, %89 : vector<32x128xf32>
    %c0_93 = arith.constant 0 : index
    %c0_94 = arith.constant 0 : index
    %91 = vector.load %arg21[%c0_93, %c0_94] : memref<32x128xf32, #tpu.memory_space<vmem>>, vector<32x128xf32>
    tpu.vector_store %arg21[%c0_93, %c0_94], %90 {strides = array<i32>} : memref<32x128xf32, #tpu.memory_space<vmem>>, vector<32x128xf32>,
    %c0_95 = arith.constant 0 : index
    %c0_96 = arith.constant 0 : index
    %92 = vector.load %arg21[%c0_95, %c0_96] : memref<32x128xf32, #tpu.memory_space<vmem>>, vector<32x128xf32>
    %93 = vector.extract_strided_slice %82 {offsets = [32, 0], sizes = [32, 64], strides = [1, 1]} : vector<288x64xf32> to vector<32x64xf32>
    %c1_97 = arith.constant 1 : index
    %c0_98 = arith.constant 0 : index
    %c0_99 = arith.constant 0 : index
    %94 = vector.load %arg8[%c1_97, %c0_98, %c0_99] : memref<9x64x128xf32, #tpu.memory_space<vmem>>, vector<1x64x128xf32>
    %95 = vector.shape_cast %94 : vector<1x64x128xf32> to vector<64x128xf32>
    %cst_100 = arith.constant dense<0.000000e+00> : vector<32x128xf32>
    %96 = tpu.matmul %93, %95, %cst_100 {dimension_numbers = #tpu.dot_dimension_numbers<[1], [0], [0], [1], [0, 0, 1, 1], [], []>} : vector<32x64xf32>, vector<64x128xf32>, vector<32x128xf32> -> vector<32x128xf32>
    %97 = arith.addf %92, %96 : vector<32x128xf32>
    %c0_101 = arith.constant 0 : index
    %c0_102 = arith.constant 0 : index
    %98 = vector.load %arg21[%c0_101, %c0_102] : memref<32x128xf32, #tpu.memory_space<vmem>>, vector<32x128xf32>
    tpu.vector_store %arg21[%c0_101, %c0_102], %97 {strides = array<i32>} : memref<32x128xf32, #tpu.memory_space<vmem>>, vector<32x128xf32>,
    %c0_103 = arith.constant 0 : index
    %c0_104 = arith.constant 0 : index
    %99 = vector.load %arg21[%c0_103, %c0_104] : memref<32x128xf32, #tpu.memory_space<vmem>>, vector<32x128xf32>
    %100 = vector.extract_strided_slice %82 {offsets = [64, 0], sizes = [32, 64], strides = [1, 1]} : vector<288x64xf32> to vector<32x64xf32>
    %c2_105 = arith.constant 2 : index
    %c0_106 = arith.constant 0 : index
    %c0_107 = arith.constant 0 : index
    %101 = vector.load %arg8[%c2_105, %c0_106, %c0_107] : memref<9x64x128xf32, #tpu.memory_space<vmem>>, vector<1x64x128xf32>
    %102 = vector.shape_cast %101 : vector<1x64x128xf32> to vector<64x128xf32>
    %cst_108 = arith.constant dense<0.000000e+00> : vector<32x128xf32>
    %103 = tpu.matmul %100, %102, %cst_108 {dimension_numbers = #tpu.dot_dimension_numbers<[1], [0], [0], [1], [0, 0, 1, 1], [], []>} : vector<32x64xf32>, vector<64x128xf32>, vector<32x128xf32> -> vector<32x128xf32>
    %104 = arith.addf %99, %103 : vector<32x128xf32>
    %c0_109 = arith.constant 0 : index
    %c0_110 = arith.constant 0 : index
    %105 = vector.load %arg21[%c0_109, %c0_110] : memref<32x128xf32, #tpu.memory_space<vmem>>, vector<32x128xf32>
    tpu.vector_store %arg21[%c0_109, %c0_110], %104 {strides = array<i32>} : memref<32x128xf32, #tpu.memory_space<vmem>>, vector<32x128xf32>,
    %c0_111 = arith.constant 0 : index
    %c0_112 = arith.constant 0 : index
    %106 = vector.load %arg21[%c0_111, %c0_112] : memref<32x128xf32, #tpu.memory_space<vmem>>, vector<32x128xf32>
    %107 = vector.extract_strided_slice %82 {offsets = [96, 0], sizes = [32, 64], strides = [1, 1]} : vector<288x64xf32> to vector<32x64xf32>
    %c3_113 = arith.constant 3 : index
    %c0_114 = arith.constant 0 : index
    %c0_115 = arith.constant 0 : index
    %108 = vector.load %arg8[%c3_113, %c0_114, %c0_115] : memref<9x64x128xf32, #tpu.memory_space<vmem>>, vector<1x64x128xf32>
    %109 = vector.shape_cast %108 : vector<1x64x128xf32> to vector<64x128xf32>
    %cst_116 = arith.constant dense<0.000000e+00> : vector<32x128xf32>
    %110 = tpu.matmul %107, %109, %cst_116 {dimension_numbers = #tpu.dot_dimension_numbers<[1], [0], [0], [1], [0, 0, 1, 1], [], []>} : vector<32x64xf32>, vector<64x128xf32>, vector<32x128xf32> -> vector<32x128xf32>
    %111 = arith.addf %106, %110 : vector<32x128xf32>
    %c0_117 = arith.constant 0 : index
    %c0_118 = arith.constant 0 : index
    %112 = vector.load %arg21[%c0_117, %c0_118] : memref<32x128xf32, #tpu.memory_space<vmem>>, vector<32x128xf32>
    tpu.vector_store %arg21[%c0_117, %c0_118], %111 {strides = array<i32>} : memref<32x128xf32, #tpu.memory_space<vmem>>, vector<32x128xf32>,
    %c0_119 = arith.constant 0 : index
    %c0_120 = arith.constant 0 : index
    %113 = vector.load %arg21[%c0_119, %c0_120] : memref<32x128xf32, #tpu.memory_space<vmem>>, vector<32x128xf32>
    %114 = vector.extract_strided_slice %82 {offsets = [128, 0], sizes = [32, 64], strides = [1, 1]} : vector<288x64xf32> to vector<32x64xf32>
    %c4_121 = arith.constant 4 : index
    %c0_122 = arith.constant 0 : index
    %c0_123 = arith.constant 0 : index
    %115 = vector.load %arg8[%c4_121, %c0_122, %c0_123] : memref<9x64x128xf32, #tpu.memory_space<vmem>>, vector<1x64x128xf32>
    %116 = vector.shape_cast %115 : vector<1x64x128xf32> to vector<64x128xf32>
    %cst_124 = arith.constant dense<0.000000e+00> : vector<32x128xf32>
    %117 = tpu.matmul %114, %116, %cst_124 {dimension_numbers = #tpu.dot_dimension_numbers<[1], [0], [0], [1], [0, 0, 1, 1], [], []>} : vector<32x64xf32>, vector<64x128xf32>, vector<32x128xf32> -> vector<32x128xf32>
    %118 = arith.addf %113, %117 : vector<32x128xf32>
    %c0_125 = arith.constant 0 : index
    %c0_126 = arith.constant 0 : index
    %119 = vector.load %arg21[%c0_125, %c0_126] : memref<32x128xf32, #tpu.memory_space<vmem>>, vector<32x128xf32>
    tpu.vector_store %arg21[%c0_125, %c0_126], %118 {strides = array<i32>} : memref<32x128xf32, #tpu.memory_space<vmem>>, vector<32x128xf32>,
    %c0_127 = arith.constant 0 : index
    %c0_128 = arith.constant 0 : index
    %120 = vector.load %arg21[%c0_127, %c0_128] : memref<32x128xf32, #tpu.memory_space<vmem>>, vector<32x128xf32>
    %121 = vector.extract_strided_slice %82 {offsets = [160, 0], sizes = [32, 64], strides = [1, 1]} : vector<288x64xf32> to vector<32x64xf32>
    %c5_129 = arith.constant 5 : index
    %c0_130 = arith.constant 0 : index
    %c0_131 = arith.constant 0 : index
    %122 = vector.load %arg8[%c5_129, %c0_130, %c0_131] : memref<9x64x128xf32, #tpu.memory_space<vmem>>, vector<1x64x128xf32>
    %123 = vector.shape_cast %122 : vector<1x64x128xf32> to vector<64x128xf32>
    %cst_132 = arith.constant dense<0.000000e+00> : vector<32x128xf32>
    %124 = tpu.matmul %121, %123, %cst_132 {dimension_numbers = #tpu.dot_dimension_numbers<[1], [0], [0], [1], [0, 0, 1, 1], [], []>} : vector<32x64xf32>, vector<64x128xf32>, vector<32x128xf32> -> vector<32x128xf32>
    %125 = arith.addf %120, %124 : vector<32x128xf32>
    %c0_133 = arith.constant 0 : index
    %c0_134 = arith.constant 0 : index
    %126 = vector.load %arg21[%c0_133, %c0_134] : memref<32x128xf32, #tpu.memory_space<vmem>>, vector<32x128xf32>
    tpu.vector_store %arg21[%c0_133, %c0_134], %125 {strides = array<i32>} : memref<32x128xf32, #tpu.memory_space<vmem>>, vector<32x128xf32>,
    %c0_135 = arith.constant 0 : index
    %c0_136 = arith.constant 0 : index
    %127 = vector.load %arg21[%c0_135, %c0_136] : memref<32x128xf32, #tpu.memory_space<vmem>>, vector<32x128xf32>
    %128 = vector.extract_strided_slice %82 {offsets = [192, 0], sizes = [32, 64], strides = [1, 1]} : vector<288x64xf32> to vector<32x64xf32>
    %c6_137 = arith.constant 6 : index
    %c0_138 = arith.constant 0 : index
    %c0_139 = arith.constant 0 : index
    %129 = vector.load %arg8[%c6_137, %c0_138, %c0_139] : memref<9x64x128xf32, #tpu.memory_space<vmem>>, vector<1x64x128xf32>
    %130 = vector.shape_cast %129 : vector<1x64x128xf32> to vector<64x128xf32>
    %cst_140 = arith.constant dense<0.000000e+00> : vector<32x128xf32>
    %131 = tpu.matmul %128, %130, %cst_140 {dimension_numbers = #tpu.dot_dimension_numbers<[1], [0], [0], [1], [0, 0, 1, 1], [], []>} : vector<32x64xf32>, vector<64x128xf32>, vector<32x128xf32> -> vector<32x128xf32>
    %132 = arith.addf %127, %131 : vector<32x128xf32>
    %c0_141 = arith.constant 0 : index
    %c0_142 = arith.constant 0 : index
    %133 = vector.load %arg21[%c0_141, %c0_142] : memref<32x128xf32, #tpu.memory_space<vmem>>, vector<32x128xf32>
    tpu.vector_store %arg21[%c0_141, %c0_142], %132 {strides = array<i32>} : memref<32x128xf32, #tpu.memory_space<vmem>>, vector<32x128xf32>,
    %c0_143 = arith.constant 0 : index
    %c0_144 = arith.constant 0 : index
    %134 = vector.load %arg21[%c0_143, %c0_144] : memref<32x128xf32, #tpu.memory_space<vmem>>, vector<32x128xf32>
    %135 = vector.extract_strided_slice %82 {offsets = [224, 0], sizes = [32, 64], strides = [1, 1]} : vector<288x64xf32> to vector<32x64xf32>
    %c7_145 = arith.constant 7 : index
    %c0_146 = arith.constant 0 : index
    %c0_147 = arith.constant 0 : index
    %136 = vector.load %arg8[%c7_145, %c0_146, %c0_147] : memref<9x64x128xf32, #tpu.memory_space<vmem>>, vector<1x64x128xf32>
    %137 = vector.shape_cast %136 : vector<1x64x128xf32> to vector<64x128xf32>
    %cst_148 = arith.constant dense<0.000000e+00> : vector<32x128xf32>
    %138 = tpu.matmul %135, %137, %cst_148 {dimension_numbers = #tpu.dot_dimension_numbers<[1], [0], [0], [1], [0, 0, 1, 1], [], []>} : vector<32x64xf32>, vector<64x128xf32>, vector<32x128xf32> -> vector<32x128xf32>
    %139 = arith.addf %134, %138 : vector<32x128xf32>
    %c0_149 = arith.constant 0 : index
    %c0_150 = arith.constant 0 : index
    %140 = vector.load %arg21[%c0_149, %c0_150] : memref<32x128xf32, #tpu.memory_space<vmem>>, vector<32x128xf32>
    tpu.vector_store %arg21[%c0_149, %c0_150], %139 {strides = array<i32>} : memref<32x128xf32, #tpu.memory_space<vmem>>, vector<32x128xf32>,
    %c0_151 = arith.constant 0 : index
    %c0_152 = arith.constant 0 : index
    %141 = vector.load %arg21[%c0_151, %c0_152] : memref<32x128xf32, #tpu.memory_space<vmem>>, vector<32x128xf32>
    %142 = vector.extract_strided_slice %82 {offsets = [256, 0], sizes = [32, 64], strides = [1, 1]} : vector<288x64xf32> to vector<32x64xf32>
    %c8_153 = arith.constant 8 : index
    %c0_154 = arith.constant 0 : index
    %c0_155 = arith.constant 0 : index
    %143 = vector.load %arg8[%c8_153, %c0_154, %c0_155] : memref<9x64x128xf32, #tpu.memory_space<vmem>>, vector<1x64x128xf32>
    %144 = vector.shape_cast %143 : vector<1x64x128xf32> to vector<64x128xf32>
    %cst_156 = arith.constant dense<0.000000e+00> : vector<32x128xf32>
    %145 = tpu.matmul %142, %144, %cst_156 {dimension_numbers = #tpu.dot_dimension_numbers<[1], [0], [0], [1], [0, 0, 1, 1], [], []>} : vector<32x64xf32>, vector<64x128xf32>, vector<32x128xf32> -> vector<32x128xf32>
    %146 = arith.addf %141, %145 : vector<32x128xf32>
    %c0_157 = arith.constant 0 : index
    %c0_158 = arith.constant 0 : index
    %147 = vector.load %arg21[%c0_157, %c0_158] : memref<32x128xf32, #tpu.memory_space<vmem>>, vector<32x128xf32>
    tpu.vector_store %arg21[%c0_157, %c0_158], %146 {strides = array<i32>} : memref<32x128xf32, #tpu.memory_space<vmem>>, vector<32x128xf32>,
    %c0_159 = arith.constant 0 : index
    %c0_160 = arith.constant 0 : index
    %148 = vector.load %arg21[%c0_159, %c0_160] : memref<32x128xf32, #tpu.memory_space<vmem>>, vector<32x128xf32>
    %c0_161 = arith.constant 0 : index
    %c0_162 = arith.constant 0 : index
    %149 = vector.load %arg9[%c0_161, %c0_162] : memref<1x128xf32, #tpu.memory_space<vmem>>, vector<1x128xf32>
    %150 = vector.broadcast %149 : vector<1x128xf32> to vector<32x128xf32>
    %151 = arith.addf %148, %150 : vector<32x128xf32>
    %cst_163 = arith.constant 0.000000e+00 : f32
    %152 = vector.broadcast %cst_163 : f32 to vector<32x128xf32>
    %153 = arith.maximumf %151, %152 : vector<32x128xf32>
    %c0_164 = arith.constant 0 : index
    %c0_165 = arith.constant 0 : index
    %154 = vector.load %arg10[%c0_164, %c0_165] : memref<128x256xf32, #tpu.memory_space<vmem>>, vector<128x256xf32>
    %cst_166 = arith.constant dense<0.000000e+00> : vector<32x256xf32>
    %155 = tpu.matmul %153, %154, %cst_166 {dimension_numbers = #tpu.dot_dimension_numbers<[1], [0], [0], [1], [0, 0, 1, 1], [], []>} : vector<32x128xf32>, vector<128x256xf32>, vector<32x256xf32> -> vector<32x256xf32>
    %c0_167 = arith.constant 0 : index
    %c0_168 = arith.constant 0 : index
    %156 = vector.load %arg11[%c0_167, %c0_168] : memref<1x256xf32, #tpu.memory_space<vmem>>, vector<1x256xf32>
    %157 = vector.broadcast %156 : vector<1x256xf32> to vector<32x256xf32>
    %158 = arith.addf %155, %157 : vector<32x256xf32>
    %cst_169 = arith.constant 0.000000e+00 : f32
    %159 = vector.broadcast %cst_169 : f32 to vector<32x256xf32>
    %160 = arith.maximumf %158, %159 : vector<32x256xf32>
    %c0_170 = arith.constant 0 : index
    %c0_171 = arith.constant 0 : index
    %161 = vector.load %arg12[%c0_170, %c0_171] : memref<256x512xf32, #tpu.memory_space<vmem>>, vector<256x512xf32>
    %cst_172 = arith.constant dense<0.000000e+00> : vector<32x512xf32>
    %162 = tpu.matmul %160, %161, %cst_172 {dimension_numbers = #tpu.dot_dimension_numbers<[1], [0], [0], [1], [0, 0, 1, 1], [], []>} : vector<32x256xf32>, vector<256x512xf32>, vector<32x512xf32> -> vector<32x512xf32>
    %c0_173 = arith.constant 0 : index
    %c0_174 = arith.constant 0 : index
    %163 = vector.load %arg13[%c0_173, %c0_174] : memref<1x512xf32, #tpu.memory_space<vmem>>, vector<1x512xf32>
    %164 = vector.broadcast %163 : vector<1x512xf32> to vector<32x512xf32>
    %165 = arith.addf %162, %164 : vector<32x512xf32>
    %cst_175 = arith.constant 0.000000e+00 : f32
    %166 = vector.broadcast %cst_175 : f32 to vector<32x512xf32>
    %167 = arith.maximumf %165, %166 : vector<32x512xf32>
    %c0_176 = arith.constant 0 : index
    %c0_177 = arith.constant 0 : index
    %168 = vector.load %arg14[%c0_176, %c0_177] : memref<8x32xf32, #tpu.memory_space<vmem>>, vector<8x32xf32>
    %cst_178 = arith.constant dense<0.000000e+00> : vector<8x512xf32>
    %169 = tpu.matmul %168, %167, %cst_178 {dimension_numbers = #tpu.dot_dimension_numbers<[1], [0], [0], [1], [0, 0, 1, 1], [], []>} : vector<8x32xf32>, vector<32x512xf32>, vector<8x512xf32> -> vector<8x512xf32>
    %c0_179 = arith.constant 0 : index
    %c0_180 = arith.constant 0 : index
    %170 = vector.load %arg15[%c0_179, %c0_180] : memref<512x256xf32, #tpu.memory_space<vmem>>, vector<512x256xf32>
    %cst_181 = arith.constant dense<0.000000e+00> : vector<8x256xf32>
    %171 = tpu.matmul %169, %170, %cst_181 {dimension_numbers = #tpu.dot_dimension_numbers<[1], [0], [0], [1], [0, 0, 1, 1], [], []>} : vector<8x512xf32>, vector<512x256xf32>, vector<8x256xf32> -> vector<8x256xf32>
    %c0_182 = arith.constant 0 : index
    %c0_183 = arith.constant 0 : index
    %172 = vector.load %arg16[%c0_182, %c0_183] : memref<1x256xf32, #tpu.memory_space<vmem>>, vector<1x256xf32>
    %173 = vector.broadcast %172 : vector<1x256xf32> to vector<8x256xf32>
    %174 = arith.addf %171, %173 : vector<8x256xf32>
    %cst_184 = arith.constant 0.000000e+00 : f32
    %175 = vector.broadcast %cst_184 : f32 to vector<8x256xf32>
    %176 = arith.maximumf %174, %175 : vector<8x256xf32>
    %c0_185 = arith.constant 0 : index
    %c0_186 = arith.constant 0 : index
    %177 = vector.load %arg17[%c0_185, %c0_186] : memref<256x128xf32, #tpu.memory_space<vmem>>, vector<256x128xf32>
    %cst_187 = arith.constant dense<0.000000e+00> : vector<8x128xf32>
    %178 = tpu.matmul %176, %177, %cst_187 {dimension_numbers = #tpu.dot_dimension_numbers<[1], [0], [0], [1], [0, 0, 1, 1], [], []>} : vector<8x256xf32>, vector<256x128xf32>, vector<8x128xf32> -> vector<8x128xf32>
    %c0_188 = arith.constant 0 : index
    %c0_189 = arith.constant 0 : index
    %179 = vector.load %arg18[%c0_188, %c0_189] : memref<1x128xf32, #tpu.memory_space<vmem>>, vector<1x128xf32>
    %180 = vector.broadcast %179 : vector<1x128xf32> to vector<8x128xf32>
    %181 = arith.addf %178, %180 : vector<8x128xf32>
    %cst_190 = arith.constant dense<0xFF800000> : vector<8xf32>
    %182 = vector.multi_reduction <maximumf>, %181, %cst_190 [1] : vector<8x128xf32> to vector<8xf32>
    %183 = vector.shape_cast %182 : vector<8xf32> to vector<8x1xf32>
    %184 = vector.broadcast %183 : vector<8x1xf32> to vector<8x128xf32>
    %185 = arith.subf %181, %184 : vector<8x128xf32>
    %186 = math.exp %185 : vector<8x128xf32>
    %cst_191 = arith.constant dense<0.000000e+00> : vector<8xf32>
    %187 = vector.multi_reduction <add>, %186, %cst_191 [1] : vector<8x128xf32> to vector<8xf32>
    %188 = vector.shape_cast %187 : vector<8xf32> to vector<8x1xf32>
    %189 = math.log %188 : vector<8x1xf32>
    %190 = vector.broadcast %189 : vector<8x1xf32> to vector<8x128xf32>
    %191 = arith.subf %185, %190 : vector<8x128xf32>
    %c0_192 = arith.constant 0 : index
    %c0_193 = arith.constant 0 : index
    %192 = vector.load %arg19[%c0_192, %c0_193] : memref<8x128xf32, #tpu.memory_space<vmem>>, vector<8x128xf32>
    tpu.vector_store %arg19[%c0_192, %c0_193], %191 {strides = array<i32>} : memref<8x128xf32, #tpu.memory_space<vmem>>, vector<8x128xf32>,
    return
  }
  func.func @transform_0(%arg0: i32) -> (i32, i32) {
    %c0_i32 = arith.constant 0 : i32
    %c0_i32_0 = arith.constant 0 : i32
    return %arg0, %c0_i32 : i32, i32
  }
  func.func @transform_1(%arg0: i32) -> (i32, i32) {
    %c0_i32 = arith.constant 0 : i32
    %c0_i32_0 = arith.constant 0 : i32
    %c0_i32_1 = arith.constant 0 : i32
    return %c0_i32, %c0_i32_0 : i32, i32
  }
  func.func @transform_2(%arg0: i32) -> (i32, i32) {
    %c0_i32 = arith.constant 0 : i32
    %c0_i32_0 = arith.constant 0 : i32
    %c0_i32_1 = arith.constant 0 : i32
    return %c0_i32, %c0_i32_0 : i32, i32
  }
  func.func @transform_3(%arg0: i32) -> (i32, i32) {
    %c0_i32 = arith.constant 0 : i32
    %c0_i32_0 = arith.constant 0 : i32
    %c0_i32_1 = arith.constant 0 : i32
    return %c0_i32, %c0_i32_0 : i32, i32
  }
  func.func @transform_4(%arg0: i32) -> (i32, i32, i32) {
    %c0_i32 = arith.constant 0 : i32
    %c0_i32_0 = arith.constant 0 : i32
    %c0_i32_1 = arith.constant 0 : i32
    %c0_i32_2 = arith.constant 0 : i32
    return %c0_i32, %c0_i32_0, %c0_i32_1 : i32, i32, i32
  }
  func.func @transform_5(%arg0: i32) -> (i32, i32) {
    %c0_i32 = arith.constant 0 : i32
    %c0_i32_0 = arith.constant 0 : i32
    %c0_i32_1 = arith.constant 0 : i32
    return %c0_i32, %c0_i32_0 : i32, i32
  }
  func.func @transform_6(%arg0: i32) -> (i32, i32) {
    %c0_i32 = arith.constant 0 : i32
    %c0_i32_0 = arith.constant 0 : i32
    %c0_i32_1 = arith.constant 0 : i32
    return %c0_i32, %c0_i32_0 : i32, i32
  }
  func.func @transform_7(%arg0: i32) -> (i32, i32, i32) {
    %c0_i32 = arith.constant 0 : i32
    %c0_i32_0 = arith.constant 0 : i32
    %c0_i32_1 = arith.constant 0 : i32
    %c0_i32_2 = arith.constant 0 : i32
    return %c0_i32, %c0_i32_0, %c0_i32_1 : i32, i32, i32
  }
  func.func @transform_8(%arg0: i32) -> (i32, i32) {
    %c0_i32 = arith.constant 0 : i32
    %c0_i32_0 = arith.constant 0 : i32
    %c0_i32_1 = arith.constant 0 : i32
    return %c0_i32, %c0_i32_0 : i32, i32
  }
  func.func @transform_9(%arg0: i32) -> (i32, i32) {
    %c0_i32 = arith.constant 0 : i32
    %c0_i32_0 = arith.constant 0 : i32
    %c0_i32_1 = arith.constant 0 : i32
    return %c0_i32, %c0_i32_0 : i32, i32
  }
  func.func @transform_10(%arg0: i32) -> (i32, i32) {
    %c0_i32 = arith.constant 0 : i32
    %c0_i32_0 = arith.constant 0 : i32
    %c0_i32_1 = arith.constant 0 : i32
    return %c0_i32, %c0_i32_0 : i32, i32
  }
  func.func @transform_11(%arg0: i32) -> (i32, i32) {
    %c0_i32 = arith.constant 0 : i32
    %c0_i32_0 = arith.constant 0 : i32
    %c0_i32_1 = arith.constant 0 : i32
    return %c0_i32, %c0_i32_0 : i32, i32
  }
  func.func @transform_12(%arg0: i32) -> (i32, i32) {
    %c0_i32 = arith.constant 0 : i32
    %c0_i32_0 = arith.constant 0 : i32
    %c0_i32_1 = arith.constant 0 : i32
    return %c0_i32, %c0_i32_0 : i32, i32
  }
  func.func @transform_13(%arg0: i32) -> (i32, i32) {
    %c0_i32 = arith.constant 0 : i32
    %c0_i32_0 = arith.constant 0 : i32
    %c0_i32_1 = arith.constant 0 : i32
    return %c0_i32, %c0_i32_0 : i32, i32
  }
  func.func @transform_14(%arg0: i32) -> (i32, i32) {
    %c0_i32 = arith.constant 0 : i32
    %c0_i32_0 = arith.constant 0 : i32
    %c0_i32_1 = arith.constant 0 : i32
    return %c0_i32, %c0_i32_0 : i32, i32
  }
  func.func @transform_15(%arg0: i32) -> (i32, i32) {
    %c0_i32 = arith.constant 0 : i32
    %c0_i32_0 = arith.constant 0 : i32
    %c0_i32_1 = arith.constant 0 : i32
    return %c0_i32, %c0_i32_0 : i32, i32
  }
  func.func @transform_16(%arg0: i32) -> (i32, i32) {
    %c0_i32 = arith.constant 0 : i32
    %c0_i32_0 = arith.constant 0 : i32
    %c0_i32_1 = arith.constant 0 : i32
    return %c0_i32, %c0_i32_0 : i32, i32
  }
  func.func @transform_17(%arg0: i32) -> (i32, i32) {
    %c0_i32 = arith.constant 0 : i32
    %c0_i32_0 = arith.constant 0 : i32
    %c0_i32_1 = arith.constant 0 : i32
    return %c0_i32, %c0_i32_0 : i32, i32
  }
  func.func @transform_18(%arg0: i32) -> (i32, i32) {
    %c0_i32 = arith.constant 0 : i32
    %c0_i32_0 = arith.constant 0 : i32
    return %arg0, %c0_i32 : i32, i32
  }
}

</mosaic_0001>

<bundles_post_ra>
// kernel: rasternet_forward.1
= control target key start
LH: loop header
LB: loop body
LE: loop exit
PB: predicated region body
PF: predicated region fallthrough
CT: control target
= control target key end

     0   :  { %vm138_vm0 = vcmask 523264   ;;  %v10106_v56 = vmov 0.0|0.0   ;;  %vm2962_vm1 = vcmask 261120   ;;  %s14414_s1 = inlined_call_operand.vmem [shape: f32[64,32], index: 1, kind: input, shape index: {}]   ;;  %s14415_s0 = inlined_call_operand.vmem [shape: f32[512,64], index: 0, kind: input, shape index: {}]   ;;  %s14416_s3 = inlined_call_operand.vmem [shape: f32[1152,512], index: 3, kind: input, shape index: {}]   ;;  %s14417_s2 = inlined_call_operand.vmem [shape: f32[1,32], index: 2, kind: input, shape index: {}]   ;;  %s14418_s4 = inlined_call_operand.vmem [shape: f32[9,32,64], index: 4, kind: input, shape index: {}]   ;;  %s14419_s6 = inlined_call_operand.vmem [shape: f32[288,128], index: 6, kind: input, shape index: {}]   ;;  %s14420_s5 = inlined_call_operand.vmem [shape: f32[1,64], index: 5, kind: input, shape index: {}]   ;;  %s14421_s7 = inlined_call_operand.vmem [shape: f32[9,64,128], index: 7, kind: input, shape index: {}]   ;;  %s14422_s9 = inlined_call_operand.vmem [shape: f32[128,256], index: 9, kind: input, shape index: {}]   ;;  %s14423_s11 = inlined_call_operand.vmem [shape: f32[256,512], index: 11, kind: input, shape index: {}]   ;;  %s14424_s8 = inlined_call_operand.vmem [shape: f32[1,128], index: 8, kind: input, shape index: {}]   ;;  %s14425_s10 = inlined_call_operand.vmem [shape: f32[1,256], index: 10, kind: input, shape index: {}]   ;;  %s14426_s12 = inlined_call_operand.vmem [shape: f32[1,512], index: 12, kind: input, shape index: {}]   ;;  %s14427_s13 = inlined_call_operand.vmem [shape: f32[8,32], index: 13, kind: input, shape index: {}]   ;;  %s14428_s14 = inlined_call_operand.vmem [shape: f32[512,256], index: 14, kind: input, shape index: {}]   ;;  %s14429_s16 = inlined_call_operand.vmem [shape: f32[256,128], index: 16, kind: input, shape index: {}]   ;;  %s14430_s15 = inlined_call_operand.vmem [shape: f32[1,256], index: 15, kind: input, shape index: {}]   ;;  %s14431_s17 = inlined_call_operand.vmem [shape: f32[1,128], index: 17, kind: input, shape index: {}]   ;;  %s14432_s18 = inlined_call_operand.vmem [shape: f32[8,128], index: 18, kind: output, shape index: {}]  }
   0x1   :  { %14436 = sst [smem:[#allocation4_spill]] %s14414_s1  ;;  %9788 = vmatprep.subr.bf16.mxu1 %v10106_v56 }
   0x2   :  { %14437 = sst [smem:[#allocation5_spill]] %s14415_s0  ;;  %s14439_s29 = sld [smem:[#allocation4_spill]] }
   0x3   :  { %14438 = sst [smem:[#allocation6_spill]] %s14416_s3  ;;  %s14440_s27 = sld [smem:[#allocation5_spill]] }
   0x4   :  { %s14441_s1 = sld [smem:[#allocation6_spill]] }
   0x8   :  { %v123_v0 = vld [vmem:[%s14439_s29] sm:$0xff]  ;;  %v124_v1 = vld [vmem:[%s14439_s29 + $0x8] sm:$0xff]  ;;  %v125_v2 = vld [vmem:[%s14439_s29 + $0x10] sm:$0xff] }
   0x9   :  { %v9092_v3 = vpack.c.bf16 %v124_v1, %v123_v0  ;;  %v126_v4 = vld [vmem:[%s14439_s29 + $0x18] sm:$0xff]  ;;  %v127_v6 = vld [vmem:[%s14439_s29 + $0x20] sm:$0xff]  ;;  %v128_v7 = vld [vmem:[%s14439_s29 + $0x28] sm:$0xff] }
   0xa   :  { %v9096_v5 = vpack.c.bf16 %v126_v4, %v125_v2  ;;  %v59_v8 = vld [vmem:[%s14440_s27] sm:$0xff]  ;;  %v9100_v9 = vpack.c.bf16 %v128_v7, %v127_v6  ;;  %v129_v10 = vld [vmem:[%s14439_s29 + $0x30] sm:$0xff]  ;;  %v130_v11 = vld [vmem:[%s14439_s29 + $0x38] sm:$0xff] }
   0xb   :  { %9093 = vmatprep.subr.bf16.mxu0 %v9092_v3  ;;  %8424 = vmatprep.mubr.msk.f32.mxu0 %vm138_vm0, %v59_v8  ;;  %v9104_v12 = vpack.c.bf16 %v130_v11, %v129_v10  ;;  %v60_v13 = vld [vmem:[%s14440_s27 + $0x8] sm:$0xff]  ;;  %v61_v14 = vld [vmem:[%s14440_s27 + $0x10] sm:$0xff]  ;;  %v62_v15 = vld [vmem:[%s14440_s27 + $0x18] sm:$0xff] }
   0xc   :  { %9095 = vmatpush3.bf16.msra.mxu0 %v9092_v3  ;;  %v63_v16 = vld [vmem:[%s14440_s27 + $0x20] sm:$0xff]  ;;  %v64_v17 = vld [vmem:[%s14440_s27 + $0x28] sm:$0xff]  ;;  %v65_v18 = vld [vmem:[%s14440_s27 + $0x30] sm:$0xff] }
   0xd   :  { %9097 = vmatprep.subr.bf16.mxu0 %v9096_v5  ;;  %v66_v19 = vld [vmem:[%s14440_s27 + $0x38] sm:$0xff]  ;;  %v67_v20 = vld [vmem:[%s14440_s27 + $0x40] sm:$0xff]  ;;  %v68_v21 = vld [vmem:[%s14440_s27 + $0x48] sm:$0xff] }
   0xe   :  { %v69_v22 = vld [vmem:[%s14440_s27 + $0x50] sm:$0xff]  ;;  %v70_v23 = vld [vmem:[%s14440_s27 + $0x58] sm:$0xff]  ;;  %v71_v24 = vld [vmem:[%s14440_s27 + $0x60] sm:$0xff] }
   0xf   :  { %v72_v25 = vld [vmem:[%s14440_s27 + $0x68] sm:$0xff]  ;;  %v73_v26 = vld [vmem:[%s14440_s27 + $0x70] sm:$0xff]  ;;  %v74_v27 = vld [vmem:[%s14440_s27 + $0x78] sm:$0xff] }
  0x10   :  { %9099 = vmatpush3.bf16.msra.mxu0 %v9096_v5  ;;  %v75_v28 = vld [vmem:[%s14440_s27 + $0x80] sm:$0xff]  ;;  %v76_v29 = vld [vmem:[%s14440_s27 + $0x88] sm:$0xff]  ;;  %v77_v30 = vld [vmem:[%s14440_s27 + $0x90] sm:$0xff] }
  0x11   :  { %9101 = vmatprep.subr.bf16.mxu0 %v9100_v9  ;;  %v78_v31 = vld [vmem:[%s14440_s27 + $0x98] sm:$0xff]  ;;  %v79_v32 = vld [vmem:[%s14440_s27 + $0xa0] sm:$0xff]  ;;  %v80_v33 = vld [vmem:[%s14440_s27 + $0xa8] sm:$0xff] }
  0x12   :  { %v81_v34 = vld [vmem:[%s14440_s27 + $0xb0] sm:$0xff]  ;;  %v82_v35 = vld [vmem:[%s14440_s27 + $0xb8] sm:$0xff]  ;;  %v83_v36 = vld [vmem:[%s14440_s27 + $0xc0] sm:$0xff] }
  0x13   :  { %v84_v37 = vld [vmem:[%s14440_s27 + $0xc8] sm:$0xff]  ;;  %v85_v38 = vld [vmem:[%s14440_s27 + $0xd0] sm:$0xff]  ;;  %v86_v39 = vld [vmem:[%s14440_s27 + $0xd8] sm:$0xff] }
  0x14   :  { %9103 = vmatpush3.bf16.msra.mxu0 %v9100_v9  ;;  %v87_v40 = vld [vmem:[%s14440_s27 + $0xe0] sm:$0xff]  ;;  %v88_v41 = vld [vmem:[%s14440_s27 + $0xe8] sm:$0xff]  ;;  %v89_v42 = vld [vmem:[%s14440_s27 + $0xf0] sm:$0xff] }
  0x15   :  { %9105 = vmatprep.subr.bf16.mxu0 %v9104_v12  ;;  %v90_v43 = vld [vmem:[%s14440_s27 + $0xf8] sm:$0xff]  ;;  %v91_v44 = vld [vmem:[%s14440_s27 + $0x100] sm:$0xff]  ;;  %v92_v45 = vld [vmem:[%s14440_s27 + $0x108] sm:$0xff] }
  0x16   :  { %v93_v46 = vld [vmem:[%s14440_s27 + $0x110] sm:$0xff]  ;;  %v94_v47 = vld [vmem:[%s14440_s27 + $0x118] sm:$0xff]  ;;  %v95_v48 = vld [vmem:[%s14440_s27 + $0x120] sm:$0xff] }
  0x17   :  { %v96_v49 = vld [vmem:[%s14440_s27 + $0x128] sm:$0xff]  ;;  %v97_v50 = vld [vmem:[%s14440_s27 + $0x130] sm:$0xff]  ;;  %v98_v51 = vld [vmem:[%s14440_s27 + $0x138] sm:$0xff] }
  0x18   :  { %9107 = vmatpush3.bf16.msra.mxu0 %v9104_v12  ;;  %v99_v52 = vld [vmem:[%s14440_s27 + $0x140] sm:$0xff]  ;;  %v100_v53 = vld [vmem:[%s14440_s27 + $0x148] sm:$0xff]  ;;  %v101_v54 = vld [vmem:[%s14440_s27 + $0x150] sm:$0xff] }
  0x19   :  { %v102_v55 = vld [vmem:[%s14440_s27 + $0x158] sm:$0xff]  ;;  %9108 = vmatprep.subr.bf16.mxu0 %v10106_v56  ;;  %v103_v57 = vld [vmem:[%s14440_s27 + $0x160] sm:$0xff]  ;;  %v104_v58 = vld [vmem:[%s14440_s27 + $0x168] sm:$0xff] }
  0x1a   :  { %v105_v59 = vld [vmem:[%s14440_s27 + $0x170] sm:$0xff]  ;;  %v106_v60 = vld [vmem:[%s14440_s27 + $0x178] sm:$0xff]  ;;  %v897_v61 = vld [vmem:[%s14441_s1 + $0x3a8] sm:$0xff] }
  0x1b   :  { %8425 = vmatmul.mubr.msk.f32.vlgmr.msra.gmra.mrb[0].mxu0 %vm138_vm0, %v60_v13  ;;  %1565 = vmatprep.mubr.f32.mxu1 %v897_v61  ;;  %v107_v62 = vld [vmem:[%s14440_s27 + $0x180] sm:$0xff]  ;;  %v108_v63 = vld [vmem:[%s14440_s27 + $0x188] sm:$0xff]  ;;  %v109_v0 = vld [vmem:[%s14440_s27 + $0x190] sm:$0xff] }
  0x1c   :  { %8427 = vmatprep.mubr.msk.f32.mxu0 %vm138_vm0, %v61_v14  ;;  %v110_v1 = vld [vmem:[%s14440_s27 + $0x198] sm:$0xff]  ;;  %v10443_v2 = vld [vmem:[%s14417_s2] ss:$0 sm:$0xff] }
  0x1f   :  { %8428 = vmatmul.mubr.msk.f32.gmra.mrb[2].mxu0 %vm138_vm0, %v62_v15 }
  0x20   :  { %8430 = vmatprep.mubr.msk.f32.mxu0 %vm138_vm0, %v63_v16 }
  0x23   :  { %8431 = vmatmul.mubr.msk.f32.gmra.mrb[4].mxu0 %vm138_vm0, %v64_v17 }
  0x24   :  { %8433 = vmatprep.mubr.msk.f32.mxu0 %vm138_vm0, %v65_v18 }
  0x27   :  { %8434 = vmatmul.mubr.msk.f32.gmra.mrb[6].mxu0 %vm138_vm0, %v66_v19 }
  0x28   :  { %8436 = vmatprep.mubr.msk.f32.mxu0 %vm138_vm0, %v67_v20 }
  0x2b   :  { %8437 = vmatmul.mubr.msk.f32.gmra.mrb[8].mxu0 %vm138_vm0, %v68_v21 }
  0x2c   :  { %8439 = vmatprep.mubr.msk.f32.mxu0 %vm138_vm0, %v69_v22 }
  0x2f   :  { %8440 = vmatmul.mubr.msk.f32.gmra.mrb[10].mxu0 %vm138_vm0, %v70_v23 }
  0x30   :  { %8442 = vmatprep.mubr.msk.f32.mxu0 %vm138_vm0, %v71_v24  ;;  %v111_v24 = vld [vmem:[%s14440_s27 + $0x1a0] sm:$0xff] }
  0x33   :  { %8443 = vmatmul.mubr.msk.f32.gmra.mrb[12].mxu0 %vm138_vm0, %v72_v25 }
  0x34   :  { %8445 = vmatprep.mubr.msk.f32.mxu0 %vm138_vm0, %v73_v26 }
  0x37   :  { %8446 = vmatmul.mubr.msk.f32.gmra.mrb[14].mxu0 %vm138_vm0, %v74_v27 }
  0x38   :  { %8448 = vmatprep.mubr.msk.f32.mxu0 %vm138_vm0, %v75_v28 }
  0x3b   :  { %8449 = vmatmul.mubr.msk.f32.gmra.mrb[16].mxu0 %vm138_vm0, %v76_v29 }
  0x3c   :  { %8451 = vmatprep.mubr.msk.f32.mxu0 %vm138_vm0, %v77_v30  ;;  %v112_v30 = vld [vmem:[%s14440_s27 + $0x1a8] sm:$0xff] }
  0x3f   :  { %8452 = vmatmul.mubr.msk.f32.gmra.mrb[18].mxu0 %vm138_vm0, %v78_v31 }
  0x40   :  { %8454 = vmatprep.mubr.msk.f32.mxu0 %vm138_vm0, %v79_v32 }
  0x43   :  { %8455 = vmatmul.mubr.msk.f32.gmra.mrb[20].mxu0 %vm138_vm0, %v80_v33 }
  0x44   :  { %8457 = vmatprep.mubr.msk.f32.mxu0 %vm138_vm0, %v81_v34 }
  0x47   :  { %8458 = vmatmul.mubr.msk.f32.gmra.mrb[22].mxu0 %vm138_vm0, %v82_v35 }
  0x48   :  { %8460 = vmatprep.mubr.msk.f32.mxu0 %vm138_vm0, %v83_v36 }
  0x4b   :  { %8461 = vmatmul.mubr.msk.f32.gmra.mrb[24].mxu0 %vm138_vm0, %v84_v37 }
  0x4c   :  { %8463 = vmatprep.mubr.msk.f32.mxu0 %vm138_vm0, %v85_v38 }
  0x4f   :  { %8464 = vmatmul.mubr.msk.f32.gmra.mrb[26].mxu0 %vm138_vm0, %v86_v39 }
  0x50   :  { %8466 = vmatprep.mubr.msk.f32.mxu0 %vm138_vm0, %v87_v40 }
  0x53   :  { %8467 = vmatmul.mubr.msk.f32.gmra.mrb[28].mxu0 %vm138_vm0, %v88_v41 }
  0x54   :  { %8469 = vmatprep.mubr.msk.f32.mxu0 %vm138_vm0, %v89_v42 }
  0x57   :  { %8470 = vmatmul.mubr.msk.f32.gmra.mrb[30].mxu0 %vm138_vm0, %v90_v43 }
  0x58   :  { %8472 = vmatprep.mubr.msk.f32.mxu0 %vm138_vm0, %v91_v44 }
  0x5b   :  { %8473 = vmatmul.mubr.msk.f32.gmra.mrb[32].mxu0 %vm138_vm0, %v92_v45 }
  0x5c   :  { %8475 = vmatprep.mubr.msk.f32.mxu0 %vm138_vm0, %v93_v46 }
  0x5f   :  { %8476 = vmatmul.mubr.msk.f32.gmra.mrb[34].mxu0 %vm138_vm0, %v94_v47 }
  0x60   :  { %8478 = vmatprep.mubr.msk.f32.mxu0 %vm138_vm0, %v95_v48 }
  0x63   :  { %8479 = vmatmul.mubr.msk.f32.gmra.mrb[36].mxu0 %vm138_vm0, %v96_v49 }
  0x64   :  { %8481 = vmatprep.mubr.msk.f32.mxu0 %vm138_vm0, %v97_v50 }
  0x67   :  { %8482 = vmatmul.mubr.msk.f32.gmra.mrb[38].mxu0 %vm138_vm0, %v98_v51 }
  0x68   :  { %8484 = vmatprep.mubr.msk.f32.mxu0 %vm138_vm0, %v99_v52 }
  0x6b   :  { %8485 = vmatmul.mubr.msk.f32.gmra.mrb[40].mxu0 %vm138_vm0, %v100_v53 }
  0x6c   :  { %8487 = vmatprep.mubr.msk.f32.mxu0 %vm138_vm0, %v101_v54 }
  0x6f   :  { %8488 = vmatmul.mubr.msk.f32.gmra.mrb[42].mxu0 %vm138_vm0, %v102_v55 }
  0x70   :  { %8490 = vmatprep.mubr.msk.f32.mxu0 %vm138_vm0, %v103_v57 }
  0x73   :  { %8491 = vmatmul.mubr.msk.f32.gmra.mrb[44].mxu0 %vm138_vm0, %v104_v58 }
  0x74   :  { %8493 = vmatprep.mubr.msk.f32.mxu0 %vm138_vm0, %v105_v59 }
  0x77   :  { %8494 = vmatmul.mubr.msk.f32.gmra.mrb[46].mxu0 %vm138_vm0, %v106_v60 }
  0x78   :  { %8496 = vmatprep.mubr.msk.f32.mxu0 %vm138_vm0, %v107_v62 }
  0x7b   :  { %8497 = vmatmul.mubr.msk.f32.gmra.mrb[48].mxu0 %vm138_vm0, %v108_v63 }
  0x7c   :  { %8499 = vmatprep.mubr.msk.f32.mxu0 %vm138_vm0, %v109_v0 }
  0x7f   :  { %8500 = vmatmul.mubr.msk.f32.gmra.mrb[50].mxu0 %vm138_vm0, %v110_v1 }
  0x80   :  { %8502 = vmatprep.mubr.msk.f32.mxu0 %vm138_vm0, %v111_v24 }
  0x83   :  { %8503 = vmatmul.mubr.msk.f32.gmra.mrb[52].mxu0 %vm138_vm0, %v112_v30 }
  0xee   :  { %v8426_v3 = vpop.f32.mrb[0].mxu0 }
  0xef   :  { %v403_v4 = vadd.f32 %v8426_v3, %v10443_v2  ;;  %v397_v5 = vpop.f32.mrb[1].mxu0 }
  0xf0   :  { %v398_v6 = vadd.f32 %v10443_v2, %v397_v5 }
  0xf1   :  { %v717_v7 = vmax.f32 %v403_v4, 0.0 }
  0xf2   :  { %v716_v8 = vmax.f32 %v398_v6, 0.0  ;;  %v8429_v9 = vpop.f32.mrb[2].mxu0 }
  0xf3   :  { %v413_v10 = vadd.f32 %v8429_v9, %v10443_v2  ;;  %v407_v11 = vpop.f32.mrb[3].mxu0 }
  0xf4   :  { %v9109_v12 = vpack.c.bf16 %v717_v7, %v716_v8  ;;  %v408_v13 = vadd.f32 %v10443_v2, %v407_v11 }
  0xf5   :  { %v719_v14 = vmax.f32 %v413_v10, 0.0 }
  0xf6   :  { %v718_v15 = vmax.f32 %v408_v13, 0.0  ;;  %v8432_v16 = vpop.f32.mrb[4].mxu0  ;;  %9110 = vmatpush1.bf16.msra.mxu0 %v9109_v12  ;;  %9804 = vmatpush1.bf16.msra.mxu1 %v9109_v12 }
  0xf7   :  { %v423_v17 = vadd.f32 %v8432_v16, %v10443_v2  ;;  %v417_v18 = vpop.f32.mrb[5].mxu0  ;;  %9111 = vmatprep.subr.bf16.mxu0 %v10106_v56  ;;  %9789 = vmatprep.subr.bf16.mxu1 %v10106_v56 }
  0xf8   :  { %v9112_v19 = vpack.c.bf16 %v719_v14, %v718_v15  ;;  %v418_v20 = vadd.f32 %v10443_v2, %v417_v18  ;;  %v113_v18 = vld [vmem:[%s14440_s27 + $0x1b0] sm:$0xff] }
  0xf9   :  { %v721_v21 = vmax.f32 %v423_v17, 0.0  ;;  %8505 = vmatprep.mubr.msk.f32.mxu0 %vm138_vm0, %v113_v18 }
  0xfa   :  { %v720_v22 = vmax.f32 %v418_v20, 0.0  ;;  %v8435_v23 = vpop.f32.mrb[6].mxu0  ;;  %9113 = vmatpush1.bf16.msra.mxu0 %v9112_v19  ;;  %9805 = vmatpush1.bf16.msra.mxu1 %v9112_v19 }
  0xfb   :  { %v433_v25 = vadd.f32 %v8435_v23, %v10443_v2  ;;  %v427_v26 = vpop.f32.mrb[7].mxu0  ;;  %9114 = vmatprep.subr.bf16.mxu0 %v10106_v56  ;;  %9790 = vmatprep.subr.bf16.mxu1 %v10106_v56 }
  0xfc   :  { %v9115_v27 = vpack.c.bf16 %v721_v21, %v720_v22  ;;  %v428_v28 = vadd.f32 %v10443_v2, %v427_v26  ;;  %v114_v21 = vld [vmem:[%s14440_s27 + $0x1b8] sm:$0xff] }
  0xfd   :  { %v723_v29 = vmax.f32 %v433_v25, 0.0  ;;  %8506 = vmatmul.mubr.msk.f32.gmra.mrb[54].mxu0 %vm138_vm0, %v114_v21 }
  0xfe   :  { %v722_v31 = vmax.f32 %v428_v28, 0.0  ;;  %v8438_v32 = vpop.f32.mrb[8].mxu0  ;;  %9116 = vmatpush1.bf16.msra.mxu0 %v9115_v27  ;;  %9806 = vmatpush1.bf16.msra.mxu1 %v9115_v27 }
  0xff   :  { %v443_v33 = vadd.f32 %v8438_v32, %v10443_v2  ;;  %v437_v34 = vpop.f32.mrb[9].mxu0  ;;  %9117 = vmatprep.subr.bf16.mxu0 %v10106_v56  ;;  %9791 = vmatprep.subr.bf16.mxu1 %v10106_v56 }
 0x100   :  { %v9118_v35 = vpack.c.bf16 %v723_v29, %v722_v31  ;;  %v438_v36 = vadd.f32 %v10443_v2, %v437_v34 }
 0x101   :  { %v725_v37 = vmax.f32 %v443_v33, 0.0 }
 0x102   :  { %v724_v38 = vmax.f32 %v438_v36, 0.0  ;;  %v8441_v39 = vpop.f32.mrb[10].mxu0  ;;  %9119 = vmatpush1.bf16.msra.mxu0 %v9118_v35  ;;  %9807 = vmatpush1.bf16.msra.mxu1 %v9118_v35 }
 0x103   :  { %v453_v40 = vadd.f32 %v8441_v39, %v10443_v2  ;;  %v447_v41 = vpop.f32.mrb[11].mxu0  ;;  %9120 = vmatprep.subr.bf16.mxu0 %v10106_v56  ;;  %9792 = vmatprep.subr.bf16.mxu1 %v10106_v56 }
 0x104   :  { %v9121_v42 = vpack.c.bf16 %v725_v37, %v724_v38  ;;  %v448_v43 = vadd.f32 %v10443_v2, %v447_v41 }
 0x105   :  { %v727_v44 = vmax.f32 %v453_v40, 0.0 }
 0x106   :  { %v726_v45 = vmax.f32 %v448_v43, 0.0  ;;  %v8444_v46 = vpop.f32.mrb[12].mxu0  ;;  %9122 = vmatpush1.bf16.msra.mxu0 %v9121_v42  ;;  %9808 = vmatpush1.bf16.msra.mxu1 %v9121_v42 }
 0x107   :  { %v463_v47 = vadd.f32 %v8444_v46, %v10443_v2  ;;  %v457_v48 = vpop.f32.mrb[13].mxu0  ;;  %9123 = vmatprep.subr.bf16.mxu0 %v10106_v56  ;;  %9793 = vmatprep.subr.bf16.mxu1 %v10106_v56 }
 0x108   :  { %v9124_v49 = vpack.c.bf16 %v727_v44, %v726_v45  ;;  %v458_v50 = vadd.f32 %v10443_v2, %v457_v48 }
 0x109   :  { %v729_v51 = vmax.f32 %v463_v47, 0.0 }
 0x10a   :  { %v728_v52 = vmax.f32 %v458_v50, 0.0  ;;  %v8447_v53 = vpop.f32.mrb[14].mxu0  ;;  %9125 = vmatpush1.bf16.msra.mxu0 %v9124_v49  ;;  %9809 = vmatpush1.bf16.msra.mxu1 %v9124_v49 }
 0x10b   :  { %v473_v54 = vadd.f32 %v8447_v53, %v10443_v2  ;;  %v467_v55 = vpop.f32.mrb[15].mxu0  ;;  %9126 = vmatprep.subr.bf16.mxu0 %v10106_v56  ;;  %9794 = vmatprep.subr.bf16.mxu1 %v10106_v56 }
 0x10c   :  { %v9127_v57 = vpack.c.bf16 %v729_v51, %v728_v52  ;;  %v468_v58 = vadd.f32 %v10443_v2, %v467_v55 }
 0x10d   :  { %v731_v59 = vmax.f32 %v473_v54, 0.0 }
 0x10e   :  { %v730_v60 = vmax.f32 %v468_v58, 0.0  ;;  %v8450_v61 = vpop.f32.mrb[16].mxu0  ;;  %9128 = vmatpush1.bf16.msra.mxu0 %v9127_v57  ;;  %9810 = vmatpush1.bf16.msra.mxu1 %v9127_v57 }
 0x10f   :  { %v483_v62 = vadd.f32 %v8450_v61, %v10443_v2  ;;  %v477_v63 = vpop.f32.mrb[17].mxu0  ;;  %9129 = vmatprep.subr.bf16.mxu0 %v10106_v56  ;;  %9795 = vmatprep.subr.bf16.mxu1 %v10106_v56 }
 0x110   :  { %v9130_v0 = vpack.c.bf16 %v731_v59, %v730_v60  ;;  %v478_v1 = vadd.f32 %v10443_v2, %v477_v63 }
 0x111   :  { %v733_v3 = vmax.f32 %v483_v62, 0.0 }
 0x112   :  { %v732_v4 = vmax.f32 %v478_v1, 0.0  ;;  %v8453_v5 = vpop.f32.mrb[18].mxu0  ;;  %9131 = vmatpush1.bf16.msra.mxu0 %v9130_v0  ;;  %9811 = vmatpush1.bf16.msra.mxu1 %v9130_v0  ;;  %v896_v0 = vld [vmem:[%s14441_s1 + $0x3a0] sm:$0xff] }
 0x113   :  { %v493_v6 = vadd.f32 %v8453_v5, %v10443_v2  ;;  %v487_v7 = vpop.f32.mrb[19].mxu0  ;;  %9132 = vmatprep.subr.bf16.mxu0 %v10106_v56  ;;  %9796 = vmatprep.subr.bf16.mxu1 %v10106_v56 }
 0x114   :  { %v9133_v8 = vpack.c.bf16 %v733_v3, %v732_v4  ;;  %v488_v9 = vadd.f32 %v10443_v2, %v487_v7  ;;  %v901_v3 = vld [vmem:[%s14441_s1 + $0x3c8] sm:$0xff] }
 0x115   :  { %v735_v10 = vmax.f32 %v493_v6, 0.0 }
 0x116   :  { %v734_v11 = vmax.f32 %v488_v9, 0.0  ;;  %v8456_v12 = vpop.f32.mrb[20].mxu0  ;;  %9134 = vmatpush1.bf16.msra.mxu0 %v9133_v8  ;;  %9812 = vmatpush1.bf16.msra.mxu1 %v9133_v8  ;;  %v115_v9 = vld [vmem:[%s14440_s27 + $0x1c0] sm:$0xff] }
 0x117   :  { %v503_v13 = vadd.f32 %v8456_v12, %v10443_v2  ;;  %v497_v14 = vpop.f32.mrb[21].mxu0  ;;  %9135 = vmatprep.subr.bf16.mxu0 %v10106_v56  ;;  %9797 = vmatprep.subr.bf16.mxu1 %v10106_v56 }
 0x118   :  { %v9136_v15 = vpack.c.bf16 %v735_v10, %v734_v11  ;;  %v498_v16 = vadd.f32 %v10443_v2, %v497_v14  ;;  %v116_v10 = vld [vmem:[%s14440_s27 + $0x1c8] sm:$0xff]  ;;  %v900_v11 = vld [vmem:[%s14441_s1 + $0x3c0] sm:$0xff]  ;;  %8508 = vmatprep.mubr.msk.f32.mxu0 %vm138_vm0, %v115_v9 }
 0x119   :  { %v737_v17 = vmax.f32 %v503_v13, 0.0  ;;  %v905_v14 = vld [vmem:[%s14441_s1 + $0x3e8] sm:$0xff]  ;;  %8509 = vmatmul.mubr.msk.f32.gmra.mrb[56].mxu0 %vm138_vm0, %v116_v10 }
 0x11a   :  { %v736_v19 = vmax.f32 %v498_v16, 0.0  ;;  %v8459_v20 = vpop.f32.mrb[22].mxu0  ;;  %9137 = vmatpush1.bf16.msra.mxu0 %v9136_v15  ;;  %9813 = vmatpush1.bf16.msra.mxu1 %v9136_v15  ;;  %v953_v10 = vld [vmem:[%s14441_s1 + $0x568] sm:$0xff] }
 0x11b   :  { %v513_v22 = vadd.f32 %v8459_v20, %v10443_v2  ;;  %v507_v23 = vpop.f32.mrb[23].mxu0  ;;  %9138 = vmatprep.subr.bf16.mxu0 %v10106_v56  ;;  %9798 = vmatprep.subr.bf16.mxu1 %v10106_v56  ;;  %v904_v20 = vld [vmem:[%s14441_s1 + $0x3e0] sm:$0xff] }
 0x11c   :  { %v9139_v24 = vpack.c.bf16 %v737_v17, %v736_v19  ;;  %v508_v25 = vadd.f32 %v10443_v2, %v507_v23  ;;  %v909_v23 = vld [vmem:[%s14441_s1 + $0x408] sm:$0xff] }
 0x11d   :  { %v739_v26 = vmax.f32 %v513_v22, 0.0 }
 0x11e   :  { %v738_v27 = vmax.f32 %v508_v25, 0.0  ;;  %v8462_v28 = vpop.f32.mrb[24].mxu0  ;;  %9140 = vmatpush1.bf16.msra.mxu0 %v9139_v24  ;;  %9814 = vmatpush1.bf16.msra.mxu1 %v9139_v24 }
 0x11f   :  { %v523_v29 = vadd.f32 %v8462_v28, %v10443_v2  ;;  %v517_v30 = vpop.f32.mrb[25].mxu0  ;;  %9141 = vmatprep.subr.bf16.mxu0 %v10106_v56  ;;  %9799 = vmatprep.subr.bf16.mxu1 %v10106_v56 }
 0x120   :  { %v9142_v31 = vpack.c.bf16 %v739_v26, %v738_v27  ;;  %v518_v32 = vadd.f32 %v10443_v2, %v517_v30 }
 0x121   :  { %v741_v33 = vmax.f32 %v523_v29, 0.0  ;;  %v908_v29 = vld [vmem:[%s14441_s1 + $0x400] sm:$0xff] }
 0x122   :  { %v740_v34 = vmax.f32 %v518_v32, 0.0  ;;  %v8465_v35 = vpop.f32.mrb[26].mxu0  ;;  %9143 = vmatpush1.bf16.msra.mxu0 %v9142_v31  ;;  %9815 = vmatpush1.bf16.msra.mxu1 %v9142_v31  ;;  %v913_v32 = vld [vmem:[%s14441_s1 + $0x428] sm:$0xff] }
 0x123   :  { %v533_v36 = vadd.f32 %v8465_v35, %v10443_v2  ;;  %v527_v37 = vpop.f32.mrb[27].mxu0  ;;  %9144 = vmatprep.subr.bf16.mxu0 %v10106_v56  ;;  %9800 = vmatprep.subr.bf16.mxu1 %v10106_v56 }
 0x124   :  { %v9145_v38 = vpack.c.bf16 %v741_v33, %v740_v34  ;;  %v528_v39 = vadd.f32 %v10443_v2, %v527_v37 }
 0x125   :  { %v743_v40 = vmax.f32 %v533_v36, 0.0 }
 0x126   :  { %v742_v41 = vmax.f32 %v528_v39, 0.0  ;;  %v8468_v42 = vpop.f32.mrb[28].mxu0  ;;  %9146 = vmatpush1.bf16.msra.mxu0 %v9145_v38  ;;  %9816 = vmatpush1.bf16.msra.mxu1 %v9145_v38  ;;  %v912_v38 = vld [vmem:[%s14441_s1 + $0x420] sm:$0xff] }
 0x127   :  { %v543_v43 = vadd.f32 %v8468_v42, %v10443_v2  ;;  %v537_v44 = vpop.f32.mrb[29].mxu0  ;;  %9147 = vmatprep.subr.bf16.mxu0 %v10106_v56  ;;  %9801 = vmatprep.subr.bf16.mxu1 %v10106_v56 }
 0x128   :  { %v9148_v45 = vpack.c.bf16 %v743_v40, %v742_v41  ;;  %v538_v46 = vadd.f32 %v10443_v2, %v537_v44  ;;  %v917_v40 = vld [vmem:[%s14441_s1 + $0x448] sm:$0xff] }
 0x129   :  { %v745_v47 = vmax.f32 %v543_v43, 0.0  ;;  %v916_v43 = vld [vmem:[%s14441_s1 + $0x440] sm:$0xff] }
 0x12a   :  { %v744_v48 = vmax.f32 %v538_v46, 0.0  ;;  %v8471_v49 = vpop.f32.mrb[30].mxu0  ;;  %9149 = vmatpush1.bf16.msra.mxu0 %v9148_v45  ;;  %9817 = vmatpush1.bf16.msra.mxu1 %v9148_v45  ;;  %v921_v46 = vld [vmem:[%s14441_s1 + $0x468] sm:$0xff] }
 0x12b   :  { %v553_v50 = vadd.f32 %v8471_v49, %v10443_v2  ;;  %v547_v51 = vpop.f32.mrb[31].mxu0  ;;  %9150 = vmatprep.subr.bf16.mxu0 %v10106_v56  ;;  %9802 = vmatprep.subr.bf16.mxu1 %v10106_v56 }
 0x12c   :  { %v9151_v52 = vpack.c.bf16 %v745_v47, %v744_v48  ;;  %v548_v53 = vadd.f32 %v10443_v2, %v547_v51  ;;  %v925_v51 = vld [vmem:[%s14441_s1 + $0x488] sm:$0xff] }
 0x12d   :  { %v747_v54 = vmax.f32 %v553_v50, 0.0  ;;  %v920_v50 = vld [vmem:[%s14441_s1 + $0x460] sm:$0xff] }
 0x12e   :  { %v746_v55 = vmax.f32 %v548_v53, 0.0  ;;  %9152 = vmatpush1.bf16.msra.mxu0 %v9151_v52  ;;  %9818 = vmatpush1.bf16.msra.mxu1 %v9151_v52  ;;  %v8474_v57 = vpop.f32.mrb[32].mxu0  ;;  %v924_v53 = vld [vmem:[%s14441_s1 + $0x480] sm:$0xff] }
 0x12f   :  { %v563_v58 = vadd.f32 %v8474_v57, %v10443_v2  ;;  %9153 = vmatprep.subr.bf16.mxu0 %v10106_v56  ;;  %9803 = vmatprep.subr.bf16.mxu1 %v10106_v56  ;;  %v557_v59 = vpop.f32.mrb[33].mxu0  ;;  %v118_v57 = vld [vmem:[%s14440_s27 + $0x1d8] sm:$0xff] }
 0x130   :  { %v9154_v60 = vpack.c.bf16 %v747_v54, %v746_v55  ;;  %v558_v61 = vadd.f32 %v10443_v2, %v557_v59  ;;  %v929_v54 = vld [vmem:[%s14441_s1 + $0x4a8] sm:$0xff]  ;;  %v117_v55 = vld [vmem:[%s14440_s27 + $0x1d0] sm:$0xff] }
 0x131   :  { %v749_v62 = vmax.f32 %v563_v58, 0.0  ;;  %v928_v58 = vld [vmem:[%s14441_s1 + $0x4a0] sm:$0xff]  ;;  %8511 = vmatprep.mubr.msk.f32.mxu0 %vm138_vm0, %v117_v55  ;;  %v933_v59 = vld [vmem:[%s14441_s1 + $0x4c8] sm:$0xff] }
 0x132   :  { %v748_v63 = vmax.f32 %v558_v61, 0.0  ;;  %9155 = vmatpush1.bf16.msra.mxu0 %v9154_v60  ;;  %9819 = vmatpush1.bf16.msra.mxu1 %v9154_v60  ;;  %v8477_v1 = vpop.f32.mrb[34].mxu0  ;;  %v932_v60 = vld [vmem:[%s14441_s1 + $0x4c0] sm:$0xff]  ;;  %v937_v61 = vld [vmem:[%s14441_s1 + $0x4e8] sm:$0xff] }
 0x133   :  { %9156 = vmatprep.subr.bf16.mxu1 %v10106_v56  ;;  %v573_v4 = vadd.f32 %v8477_v1, %v10443_v2  ;;  %v567_v5 = vpop.f32.mrb[35].mxu0  ;;  %8512 = vmatmul.mubr.msk.f32.gmra.mrb[58].mxu0 %vm138_vm0, %v118_v57  ;;  %v945_v1 = vld [vmem:[%s14441_s1 + $0x528] sm:$0xff]  ;;  %v1004_v55 = vld [vmem:[%s14441_s1 + $0x700] sm:$0xff] }
 0x134   :  { %v9157_v6 = vpack.c.bf16 %v749_v62, %v748_v63  ;;  %v568_v7 = vadd.f32 %v10443_v2, %v567_v5  ;;  %v936_v62 = vld [vmem:[%s14441_s1 + $0x4e0] sm:$0xff]  ;;  %v941_v63 = vld [vmem:[%s14441_s1 + $0x508] sm:$0xff] }
 0x135   :  { %1566 = vmatmul.mubr.f32.vlgmr.msra.gmra.mrb[0].mxu1 %v896_v0  ;;  %v751_v8 = vmax.f32 %v573_v4, 0.0  ;;  %v940_v0 = vld [vmem:[%s14441_s1 + $0x500] sm:$0xff]  ;;  %v949_v4 = vld [vmem:[%s14441_s1 + $0x548] sm:$0xff] }
 0x136   :  { %1570 = vmatprep.mubr.f32.mxu1 %v901_v3  ;;  %9158 = vmatpush1.bf16.msra.mxu1 %v9157_v6  ;;  %v750_v12 = vmax.f32 %v568_v7, 0.0  ;;  %v8480_v13 = vpop.f32.mrb[36].mxu0  ;;  %v944_v3 = vld [vmem:[%s14441_s1 + $0x520] sm:$0xff]  ;;  %v1009_v57 = vld [vmem:[%s14441_s1 + $0x728] sm:$0xff] }
 0x137   :  { %9159 = vmatprep.subr.bf16.mxu1 %v10106_v56  ;;  %v583_v15 = vadd.f32 %v8480_v13, %v10443_v2  ;;  %v577_v16 = vpop.f32.mrb[37].mxu0  ;;  %v952_v13 = vld [vmem:[%s14441_s1 + $0x560] sm:$0xff] }
 0x138   :  { %v9160_v17 = vpack.c.bf16 %v751_v8, %v750_v12  ;;  %v578_v18 = vadd.f32 %v10443_v2, %v577_v16  ;;  %v948_v8 = vld [vmem:[%s14441_s1 + $0x540] sm:$0xff] }
 0x139   :  { %1571 = vmatmul.mubr.f32.gmra.mrb[2].mxu1 %v900_v11  ;;  %v753_v19 = vmax.f32 %v583_v15, 0.0  ;;  %v957_v15 = vld [vmem:[%s14441_s1 + $0x588] sm:$0xff]  ;;  %v119_v16 = vld [vmem:[%s14440_s27 + $0x1e0] sm:$0xff] }
 0x13a   :  { %1575 = vmatprep.mubr.f32.mxu1 %v905_v14  ;;  %9161 = vmatpush1.bf16.msra.mxu1 %v9160_v17  ;;  %v752_v21 = vmax.f32 %v578_v18, 0.0  ;;  %v8483_v22 = vpop.f32.mrb[38].mxu0  ;;  %v956_v17 = vld [vmem:[%s14441_s1 + $0x580] sm:$0xff]  ;;  %v120_v18 = vld [vmem:[%s14440_s27 + $0x1e8] sm:$0xff] }
 0x13b   :  { %9162 = vmatprep.subr.bf16.mxu1 %v10106_v56  ;;  %v593_v24 = vadd.f32 %v8483_v22, %v10443_v2  ;;  %v587_v25 = vpop.f32.mrb[39].mxu0  ;;  %8514 = vmatprep.mubr.msk.f32.mxu0 %vm138_vm0, %v119_v16  ;;  %v964_v22 = vld [vmem:[%s14441_s1 + $0x5c0] sm:$0xff] }
 0x13c   :  { %v9163_v26 = vpack.c.bf16 %v753_v19, %v752_v21  ;;  %v588_v27 = vadd.f32 %v10443_v2, %v587_v25  ;;  %v961_v19 = vld [vmem:[%s14441_s1 + $0x5a8] sm:$0xff]  ;;  %8515 = vmatmul.mubr.msk.f32.gmra.mrb[60].mxu0 %vm138_vm0, %v120_v18 }
 0x13d   :  { %1576 = vmatmul.mubr.f32.gmra.mrb[4].mxu1 %v904_v20  ;;  %v755_v28 = vmax.f32 %v593_v24, 0.0  ;;  %v960_v20 = vld [vmem:[%s14441_s1 + $0x5a0] sm:$0xff]  ;;  %v965_v21 = vld [vmem:[%s14441_s1 + $0x5c8] sm:$0xff] }
 0x13e   :  { %1580 = vmatprep.mubr.f32.mxu1 %v909_v23  ;;  %9164 = vmatpush1.bf16.msra.mxu1 %v9163_v26  ;;  %v754_v30 = vmax.f32 %v588_v27, 0.0  ;;  %v8486_v31 = vpop.f32.mrb[40].mxu0  ;;  %v969_v23 = vld [vmem:[%s14441_s1 + $0x5e8] sm:$0xff]  ;;  %v968_v24 = vld [vmem:[%s14441_s1 + $0x5e0] sm:$0xff] }
 0x13f   :  { %9165 = vmatprep.subr.bf16.mxu1 %v10106_v56  ;;  %v603_v33 = vadd.f32 %v8486_v31, %v10443_v2  ;;  %v597_v34 = vpop.f32.mrb[41].mxu0  ;;  %v973_v25 = vld [vmem:[%s14441_s1 + $0x608] sm:$0xff]  ;;  %v972_v26 = vld [vmem:[%s14441_s1 + $0x600] sm:$0xff] }
 0x140   :  { %v9166_v35 = vpack.c.bf16 %v755_v28, %v754_v30  ;;  %v598_v36 = vadd.f32 %v10443_v2, %v597_v34  ;;  %v977_v27 = vld [vmem:[%s14441_s1 + $0x628] sm:$0xff] }
 0x141   :  { %1581 = vmatmul.mubr.f32.gmra.mrb[6].mxu1 %v908_v29  ;;  %v757_v37 = vmax.f32 %v603_v33, 0.0  ;;  %v976_v29 = vld [vmem:[%s14441_s1 + $0x620] sm:$0xff]  ;;  %v1037_v18 = vld [vmem:[%s14441_s1 + $0x808] sm:$0xff] }
 0x142   :  { %1585 = vmatprep.mubr.f32.mxu1 %v913_v32  ;;  %9167 = vmatpush1.bf16.msra.mxu1 %v9166_v35  ;;  %v756_v39 = vmax.f32 %v598_v36, 0.0  ;;  %v8489_v42 = vpop.f32.mrb[42].mxu0  ;;  %v981_v32 = vld [vmem:[%s14441_s1 + $0x648] sm:$0xff]  ;;  %v980_v36 = vld [vmem:[%s14441_s1 + $0x640] sm:$0xff] }
 0x143   :  { %9168 = vmatprep.subr.bf16.mxu1 %v10106_v56  ;;  %v613_v44 = vadd.f32 %v8489_v42, %v10443_v2  ;;  %v607_v45 = vpop.f32.mrb[43].mxu0  ;;  %v122_v42 = vld [vmem:[%s14440_s27 + $0x1f8] sm:$0xff] }
 0x144   :  { %v9169_v41 = vpack.c.bf16 %v757_v37, %v756_v39  ;;  %v608_v47 = vadd.f32 %v10443_v2, %v607_v45  ;;  %v985_v37 = vld [vmem:[%s14441_s1 + $0x668] sm:$0xff]  ;;  %v984_v39 = vld [vmem:[%s14441_s1 + $0x660] sm:$0xff] }
 0x145   :  { %1586 = vmatmul.mubr.f32.gmra.mrb[8].mxu1 %v912_v38  ;;  %v759_v48 = vmax.f32 %v613_v44, 0.0  ;;  %v993_v44 = vld [vmem:[%s14441_s1 + $0x6a8] sm:$0xff]  ;;  %v992_v45 = vld [vmem:[%s14441_s1 + $0x6a0] sm:$0xff] }
 0x146   :  { %1590 = vmatprep.mubr.f32.mxu1 %v917_v40  ;;  %9170 = vmatpush1.bf16.msra.mxu1 %v9169_v41  ;;  %v758_v49 = vmax.f32 %v608_v47, 0.0  ;;  %v8492_v5 = vpop.f32.mrb[44].mxu0  ;;  %v121_v40 = vld [vmem:[%s14440_s27 + $0x1f0] sm:$0xff]  ;;  %v989_v41 = vld [vmem:[%s14441_s1 + $0x688] sm:$0xff]  ;;  %v996_v47 = vld [vmem:[%s14441_s1 + $0x6c0] sm:$0xff] }
 0x147   :  { %9171 = vmatprep.subr.bf16.mxu1 %v10106_v56  ;;  %v623_v6 = vadd.f32 %v8492_v5, %v10443_v2  ;;  %v617_v7 = vpop.f32.mrb[45].mxu0  ;;  %8517 = vmatprep.mubr.msk.f32.mxu0 %vm138_vm0, %v121_v40  ;;  %v1025_v5 = vld [vmem:[%s14441_s1 + $0x7a8] sm:$0xff]  ;;  %v1064_v40 = vld [vmem:[%s14441_s1 + $0x8e0] sm:$0xff] }
 0x148   :  { %v9172_v52 = vpack.c.bf16 %v759_v48, %v758_v49  ;;  %v618_v9 = vadd.f32 %v10443_v2, %v617_v7  ;;  %8518 = vmatmul.mubr.msk.f32.gmra.mrb[62].mxu0 %vm138_vm0, %v122_v42  ;;  %v1001_v49 = vld [vmem:[%s14441_s1 + $0x6e8] sm:$0xff]  ;;  %v1068_v42 = vld [vmem:[%s14441_s1 + $0x900] sm:$0xff] }
 0x149   :  { %1591 = vmatmul.mubr.f32.gmra.mrb[10].mxu1 %v916_v43  ;;  %v761_v11 = vmax.f32 %v623_v6, 0.0  ;;  %v988_v43 = vld [vmem:[%s14441_s1 + $0x680] sm:$0xff] }
 0x14a   :  { %1595 = vmatprep.mubr.f32.mxu1 %v921_v46  ;;  %9173 = vmatpush1.bf16.msra.mxu1 %v9172_v52  ;;  %v760_v12 = vmax.f32 %v618_v9, 0.0  ;;  %v8495_v28 = vpop.f32.mrb[46].mxu0  ;;  %v997_v46 = vld [vmem:[%s14441_s1 + $0x6c8] sm:$0xff]  ;;  %v1024_v6 = vld [vmem:[%s14441_s1 + $0x7a0] sm:$0xff] }
 0x14b   :  { %9174 = vmatprep.subr.bf16.mxu1 %v10106_v56  ;;  %v627_v30 = vpop.f32.mrb[47].mxu0  ;;  %v633_v31 = vadd.f32 %v8495_v28, %v10443_v2  ;;  %v1005_v52 = vld [vmem:[%s14441_s1 + $0x708] sm:$0xff] }
 0x14c   :  { %v9175_v14 = vpack.c.bf16 %v761_v11, %v760_v12  ;;  %v628_v33 = vadd.f32 %v10443_v2, %v627_v30  ;;  %v1057_v28 = vld [vmem:[%s14441_s1 + $0x8a8] sm:$0xff] }
 0x14d   :  { %1596 = vmatmul.mubr.f32.gmra.mrb[12].mxu1 %v920_v50  ;;  %v763_v34 = vmax.f32 %v633_v31, 0.0  ;;  %v1061_v30 = vld [vmem:[%s14441_s1 + $0x8c8] sm:$0xff] }
 0x14e   :  { %1600 = vmatprep.mubr.f32.mxu1 %v925_v51  ;;  %9176 = vmatpush1.bf16.msra.mxu1 %v9175_v14  ;;  %v762_v35 = vmax.f32 %v628_v33, 0.0  ;;  %v8498_v48 = vpop.f32.mrb[48].mxu0  ;;  %v1000_v51 = vld [vmem:[%s14441_s1 + $0x6e0] sm:$0xff] }
 0x14f   :  { %9177 = vmatprep.subr.bf16.mxu1 %v10106_v56  ;;  %v637_v50 = vpop.f32.mrb[49].mxu0 }
 0x150   :  { %v9178_v38 = vpack.c.bf16 %v763_v34, %v762_v35  ;;  %v1060_v35 = vld [vmem:[%s14441_s1 + $0x8c0] sm:$0xff] }
 0x151   :  { %1601 = vmatmul.mubr.f32.gmra.mrb[14].mxu1 %v924_v53  ;;  %v638_v53 = vadd.f32 %v10443_v2, %v637_v50  ;;  %v1084_v50 = vld [vmem:[%s14441_s1 + $0x980] sm:$0xff] }
 0x152   :  { %1605 = vmatprep.mubr.f32.mxu1 %v929_v54  ;;  %9179 = vmatpush1.bf16.msra.mxu1 %v9178_v38  ;;  %v643_v54 = vadd.f32 %v8498_v48, %v10443_v2  ;;  %v8501_v7 = vpop.f32.mrb[50].mxu0  ;;  %v1080_v48 = vld [vmem:[%s14441_s1 + $0x960] sm:$0xff] }
 0x153   :  { %9180 = vmatprep.subr.bf16.mxu1 %v10106_v56  ;;  %v653_v9 = vadd.f32 %v8501_v7, %v10443_v2  ;;  %v1113_v7 = vld [vmem:[%s14441_s1 + $0xa68] sm:$0xff] }
 0x155   :  { %1606 = vmatmul.mubr.f32.gmra.mrb[16].mxu1 %v928_v58  ;;  %v764_v58 = vmax.f32 %v638_v53, 0.0  ;;  %v767_v12 = vmax.f32 %v653_v9, 0.0  ;;  %v1117_v9 = vld [vmem:[%s14441_s1 + $0xa88] sm:$0xff] }
 0x156   :  { %1610 = vmatprep.mubr.f32.mxu1 %v933_v59  ;;  %v765_v59 = vmax.f32 %v643_v54, 0.0 }
 0x159   :  { %1611 = vmatmul.mubr.f32.gmra.mrb[18].mxu1 %v932_v60  ;;  %v9181_v60 = vpack.c.bf16 %v765_v59, %v764_v58  ;;  %v1093_v58 = vld [vmem:[%s14441_s1 + $0x9c8] sm:$0xff] }
 0x15a   :  { %1615 = vmatprep.mubr.f32.mxu1 %v937_v61  ;;  %v1008_v61 = vld [vmem:[%s14441_s1 + $0x720] sm:$0xff] }
 0x15b   :  { %9182 = vmatpush1.bf16.msra.mxu1 %v9181_v60 }
 0x15c   :  { %9183 = vmatprep.subr.bf16.mxu1 %v10106_v56 }
 0x15d   :  { %1616 = vmatmul.mubr.f32.gmra.mrb[20].mxu1 %v936_v62  ;;  %v1013_v62 = vld [vmem:[%s14441_s1 + $0x748] sm:$0xff] }
 0x15e   :  { %1620 = vmatprep.mubr.f32.mxu1 %v941_v63  ;;  %v1012_v63 = vld [vmem:[%s14441_s1 + $0x740] sm:$0xff] }
 0x161   :  { %1621 = vmatmul.mubr.f32.gmra.mrb[22].mxu1 %v940_v0  ;;  %v1017_v0 = vld [vmem:[%s14441_s1 + $0x768] sm:$0xff] }
 0x162   :  { %1625 = vmatprep.mubr.f32.mxu1 %v945_v1  ;;  %v1016_v1 = vld [vmem:[%s14441_s1 + $0x760] sm:$0xff] }
 0x165   :  { %1626 = vmatmul.mubr.f32.gmra.mrb[24].mxu1 %v944_v3  ;;  %v1021_v3 = vld [vmem:[%s14441_s1 + $0x788] sm:$0xff] }
 0x166   :  { %1630 = vmatprep.mubr.f32.mxu1 %v949_v4  ;;  %v1020_v4 = vld [vmem:[%s14441_s1 + $0x780] sm:$0xff] }
 0x169   :  { %1631 = vmatmul.mubr.f32.gmra.mrb[26].mxu1 %v948_v8  ;;  %v1029_v8 = vld [vmem:[%s14441_s1 + $0x7c8] sm:$0xff] }
 0x16a   :  { %1635 = vmatprep.mubr.f32.mxu1 %v953_v10  ;;  %v647_v10 = vpop.f32.mrb[51].mxu0 }
 0x16b   :  { %v648_v11 = vadd.f32 %v10443_v2, %v647_v10  ;;  %v8504_v31 = vpop.f32.mrb[52].mxu0 }
 0x16c   :  { %v657_v33 = vpop.f32.mrb[53].mxu0 }
 0x16d   :  { %1636 = vmatmul.mubr.f32.gmra.mrb[28].mxu1 %v952_v13  ;;  %v1028_v13 = vld [vmem:[%s14441_s1 + $0x7c0] sm:$0xff]  ;;  %v766_v14 = vmax.f32 %v648_v11, 0.0  ;;  %v658_v34 = vadd.f32 %v10443_v2, %v657_v33 }
 0x16e   :  { %1640 = vmatprep.mubr.f32.mxu1 %v957_v15  ;;  %v1033_v15 = vld [vmem:[%s14441_s1 + $0x7e8] sm:$0xff]  ;;  %v10925_v11 = vld [vmem:[%s14417_s2] ss:$0 sm:$0xff] }
 0x16f   :  { %v9184_v16 = vpack.c.bf16 %v767_v12, %v766_v14  ;;  %v768_v38 = vmax.f32 %v658_v34, 0.0 }
 0x171   :  { %1641 = vmatmul.mubr.f32.gmra.mrb[30].mxu1 %v956_v17  ;;  %v1032_v17 = vld [vmem:[%s14441_s1 + $0x7e0] sm:$0xff] }
 0x172   :  { %1645 = vmatprep.mubr.f32.mxu1 %v961_v19  ;;  %9185 = vmatpush1.bf16.msra.mxu1 %v9184_v16  ;;  %v1036_v19 = vld [vmem:[%s14441_s1 + $0x800] sm:$0xff] }
 0x173   :  { %9186 = vmatprep.subr.bf16.mxu1 %v10106_v56 }
 0x175   :  { %1646 = vmatmul.mubr.f32.gmra.mrb[32].mxu1 %v960_v20  ;;  %v1041_v20 = vld [vmem:[%s14441_s1 + $0x828] sm:$0xff] }
 0x176   :  { %1650 = vmatprep.mubr.f32.mxu1 %v965_v21  ;;  %v1040_v21 = vld [vmem:[%s14441_s1 + $0x820] sm:$0xff] }
 0x179   :  { %1651 = vmatmul.mubr.f32.gmra.mrb[34].mxu1 %v964_v22  ;;  %v1045_v22 = vld [vmem:[%s14441_s1 + $0x848] sm:$0xff] }
 0x17a   :  { %1655 = vmatprep.mubr.f32.mxu1 %v969_v23  ;;  %v1044_v23 = vld [vmem:[%s14441_s1 + $0x840] sm:$0xff] }
 0x17d   :  { %1656 = vmatmul.mubr.f32.gmra.mrb[36].mxu1 %v968_v24  ;;  %v1049_v24 = vld [vmem:[%s14441_s1 + $0x868] sm:$0xff] }
 0x17e   :  { %1660 = vmatprep.mubr.f32.mxu1 %v973_v25  ;;  %v1048_v25 = vld [vmem:[%s14441_s1 + $0x860] sm:$0xff] }
 0x181   :  { %1661 = vmatmul.mubr.f32.gmra.mrb[38].mxu1 %v972_v26  ;;  %v1053_v26 = vld [vmem:[%s14441_s1 + $0x888] sm:$0xff] }
 0x182   :  { %1665 = vmatprep.mubr.f32.mxu1 %v977_v27  ;;  %v1052_v27 = vld [vmem:[%s14441_s1 + $0x880] sm:$0xff] }
 0x185   :  { %1666 = vmatmul.mubr.f32.gmra.mrb[40].mxu1 %v976_v29  ;;  %v1056_v29 = vld [vmem:[%s14441_s1 + $0x8a0] sm:$0xff] }
 0x186   :  { %1670 = vmatprep.mubr.f32.mxu1 %v981_v32  ;;  %v663_v32 = vadd.f32 %v8504_v31, %v10443_v2 }
 0x189   :  { %1671 = vmatmul.mubr.f32.gmra.mrb[42].mxu1 %v980_v36  ;;  %v769_v36 = vmax.f32 %v663_v32, 0.0  ;;  %v1145_v32 = vld [vmem:[%s14441_s1 + $0xb68] sm:$0xff] }
 0x18a   :  { %1675 = vmatprep.mubr.f32.mxu1 %v985_v37  ;;  %v1065_v37 = vld [vmem:[%s14441_s1 + $0x8e8] sm:$0xff] }
 0x18d   :  { %1676 = vmatmul.mubr.f32.gmra.mrb[44].mxu1 %v984_v39  ;;  %v9187_v39 = vpack.c.bf16 %v769_v36, %v768_v38 }
 0x18e   :  { %1680 = vmatprep.mubr.f32.mxu1 %v989_v41  ;;  %v1069_v41 = vld [vmem:[%s14441_s1 + $0x908] sm:$0xff] }
 0x18f   :  { %9188 = vmatpush1.bf16.msra.mxu1 %v9187_v39  ;;  %v1149_v39 = vld [vmem:[%s14441_s1 + $0xb88] sm:$0xff] }
 0x190   :  { %9189 = vmatprep.subr.bf16.mxu1 %v10106_v56 }
 0x191   :  { %1681 = vmatmul.mubr.f32.gmra.mrb[46].mxu1 %v988_v43  ;;  %v1073_v43 = vld [vmem:[%s14441_s1 + $0x928] sm:$0xff] }
 0x192   :  { %1685 = vmatprep.mubr.f32.mxu1 %v993_v44  ;;  %v1072_v44 = vld [vmem:[%s14441_s1 + $0x920] sm:$0xff] }
 0x195   :  { %1686 = vmatmul.mubr.f32.gmra.mrb[48].mxu1 %v992_v45  ;;  %v1077_v45 = vld [vmem:[%s14441_s1 + $0x948] sm:$0xff] }
 0x196   :  { %1690 = vmatprep.mubr.f32.mxu1 %v997_v46  ;;  %v1076_v46 = vld [vmem:[%s14441_s1 + $0x940] sm:$0xff] }
 0x199   :  { %1691 = vmatmul.mubr.f32.gmra.mrb[50].mxu1 %v996_v47  ;;  %v1081_v47 = vld [vmem:[%s14441_s1 + $0x968] sm:$0xff] }
 0x19a   :  { %1695 = vmatprep.mubr.f32.mxu1 %v1001_v49  ;;  %v1085_v49 = vld [vmem:[%s14441_s1 + $0x988] sm:$0xff] }
 0x19d   :  { %1696 = vmatmul.mubr.f32.gmra.mrb[52].mxu1 %v1000_v51  ;;  %v1089_v51 = vld [vmem:[%s14441_s1 + $0x9a8] sm:$0xff] }
 0x19e   :  { %1700 = vmatprep.mubr.f32.mxu1 %v1005_v52 }
 0x1a1   :  { %1701 = vmatmul.mubr.f32.gmra.mrb[54].mxu1 %v1004_v55  ;;  %v1088_v55 = vld [vmem:[%s14441_s1 + $0x9a0] sm:$0xff] }
 0x1a2   :  { %1705 = vmatprep.mubr.f32.mxu1 %v1009_v57 }
 0x1a5   :  { %1706 = vmatmul.mubr.f32.gmra.mrb[56].mxu1 %v1008_v61  ;;  %v1092_v61 = vld [vmem:[%s14441_s1 + $0x9c0] sm:$0xff] }
 0x1a6   :  { %1710 = vmatprep.mubr.f32.mxu1 %v1013_v62 }
 0x1a9   :  { %1711 = vmatmul.mubr.f32.gmra.mrb[58].mxu1 %v1012_v63  ;;  %v1097_v63 = vld [vmem:[%s14441_s1 + $0x9e8] sm:$0xff] }
 0x1aa   :  { %1715 = vmatprep.mubr.f32.mxu1 %v1017_v0  ;;  %v1101_v0 = vld [vmem:[%s14441_s1 + $0xa08] sm:$0xff] }
 0x1ad   :  { %1716 = vmatmul.mubr.f32.gmra.mrb[60].mxu1 %v1016_v1  ;;  %v1100_v1 = vld [vmem:[%s14441_s1 + $0xa00] sm:$0xff] }
 0x1ae   :  { %1720 = vmatprep.mubr.f32.mxu1 %v1021_v3  ;;  %v1105_v3 = vld [vmem:[%s14441_s1 + $0xa28] sm:$0xff] }
 0x1b1   :  { %1721 = vmatmul.mubr.f32.gmra.mrb[62].mxu1 %v1020_v4  ;;  %v1104_v4 = vld [vmem:[%s14441_s1 + $0xa20] sm:$0xff] }
 0x1b2   :  { %1725 = vmatprep.mubr.f32.mxu1 %v1025_v5  ;;  %v1109_v5 = vld [vmem:[%s14441_s1 + $0xa48] sm:$0xff] }
 0x1b5   :  { %1726 = vmatmul.mubr.f32.gmra.mrb[64].mxu1 %v1024_v6  ;;  %v1108_v6 = vld [vmem:[%s14441_s1 + $0xa40] sm:$0xff] }
 0x1b6   :  { %1730 = vmatprep.mubr.f32.mxu1 %v1029_v8  ;;  %v1112_v8 = vld [vmem:[%s14441_s1 + $0xa60] sm:$0xff] }
 0x1b9   :  { %1731 = vmatmul.mubr.f32.gmra.mrb[66].mxu1 %v1028_v13 }
 0x1ba   :  { %1735 = vmatprep.mubr.f32.mxu1 %v1033_v15  ;;  %v1116_v15 = vld [vmem:[%s14441_s1 + $0xa80] sm:$0xff] }
 0x1bd   :  { %1736 = vmatmul.mubr.f32.gmra.mrb[68].mxu1 %v1032_v17  ;;  %v1121_v17 = vld [vmem:[%s14441_s1 + $0xaa8] sm:$0xff] }
 0x1be   :  { %1740 = vmatprep.mubr.f32.mxu1 %v1037_v18 }
 0x1c1   :  { %1741 = vmatmul.mubr.f32.gmra.mrb[70].mxu1 %v1036_v19 }
 0x1c2   :  { %1745 = vmatprep.mubr.f32.mxu1 %v1041_v20  ;;  %v1120_v20 = vld [vmem:[%s14441_s1 + $0xaa0] sm:$0xff] }
 0x1c5   :  { %1746 = vmatmul.mubr.f32.gmra.mrb[72].mxu1 %v1040_v21  ;;  %v1125_v21 = vld [vmem:[%s14441_s1 + $0xac8] sm:$0xff] }
 0x1c6   :  { %1750 = vmatprep.mubr.f32.mxu1 %v1045_v22  ;;  %v1124_v22 = vld [vmem:[%s14441_s1 + $0xac0] sm:$0xff] }
 0x1c9   :  { %1751 = vmatmul.mubr.f32.gmra.mrb[74].mxu1 %v1044_v23  ;;  %v1129_v23 = vld [vmem:[%s14441_s1 + $0xae8] sm:$0xff] }
 0x1ca   :  { %1755 = vmatprep.mubr.f32.mxu1 %v1049_v24  ;;  %v1128_v24 = vld [vmem:[%s14441_s1 + $0xae0] sm:$0xff] }
 0x1cd   :  { %1756 = vmatmul.mubr.f32.gmra.mrb[76].mxu1 %v1048_v25  ;;  %v1133_v25 = vld [vmem:[%s14441_s1 + $0xb08] sm:$0xff] }
 0x1ce   :  { %1760 = vmatprep.mubr.f32.mxu1 %v1053_v26  ;;  %v1132_v26 = vld [vmem:[%s14441_s1 + $0xb00] sm:$0xff] }
 0x1d0   :  { %v8507_v52 = vpop.f32.mrb[54].mxu0 }
 0x1d1   :  { %1761 = vmatmul.mubr.f32.gmra.mrb[78].mxu1 %v1052_v27  ;;  %v673_v53 = vadd.f32 %v8507_v52, %v10443_v2  ;;  %v667_v54 = vpop.f32.mrb[55].mxu0  ;;  %v1137_v27 = vld [vmem:[%s14441_s1 + $0xb28] sm:$0xff] }
 0x1d2   :  { %1765 = vmatprep.mubr.f32.mxu1 %v1057_v28  ;;  %v668_v57 = vadd.f32 %v10443_v2, %v667_v54  ;;  %v1096_v2 = vld [vmem:[%s14441_s1 + $0x9e0] sm:$0xff] }
 0x1d3   :  { %v771_v59 = vmax.f32 %v673_v53, 0.0  ;;  %v1136_v28 = vld [vmem:[%s14441_s1 + $0xb20] sm:$0xff]  ;;  %v1173_v53 = vld [vmem:[%s14441_s1 + $0xc48] sm:$0xff] }
 0x1d4   :  { %v770_v60 = vmax.f32 %v668_v57, 0.0 }
 0x1d5   :  { %1766 = vmatmul.mubr.f32.gmra.mrb[80].mxu1 %v1056_v29  ;;  %v1141_v29 = vld [vmem:[%s14441_s1 + $0xb48] sm:$0xff] }
 0x1d6   :  { %1770 = vmatprep.mubr.f32.mxu1 %v1061_v30  ;;  %v9190_v62 = vpack.c.bf16 %v771_v59, %v770_v60  ;;  %v1140_v30 = vld [vmem:[%s14441_s1 + $0xb40] sm:$0xff] }
 0x1d7   :  { %v1172_v59 = vld [vmem:[%s14441_s1 + $0xc40] sm:$0xff] }
 0x1d8   :  { %9191 = vmatpush1.bf16.msra.mxu1 %v9190_v62 }
 0x1d9   :  { %1771 = vmatmul.mubr.f32.gmra.mrb[82].mxu1 %v1060_v35  ;;  %9192 = vmatprep.subr.bf16.mxu1 %v10106_v56 }
 0x1da   :  { %1775 = vmatprep.mubr.f32.mxu1 %v1065_v37  ;;  %v1144_v37 = vld [vmem:[%s14441_s1 + $0xb60] sm:$0xff] }
 0x1dd   :  { %1776 = vmatmul.mubr.f32.gmra.mrb[84].mxu1 %v1064_v40 }
 0x1de   :  { %1780 = vmatprep.mubr.f32.mxu1 %v1069_v41  ;;  %v1148_v41 = vld [vmem:[%s14441_s1 + $0xb80] sm:$0xff] }
 0x1e1   :  { %1781 = vmatmul.mubr.f32.gmra.mrb[86].mxu1 %v1068_v42  ;;  %v1153_v42 = vld [vmem:[%s14441_s1 + $0xba8] sm:$0xff] }
 0x1e2   :  { %1785 = vmatprep.mubr.f32.mxu1 %v1073_v43  ;;  %v1152_v43 = vld [vmem:[%s14441_s1 + $0xba0] sm:$0xff] }
 0x1e5   :  { %1786 = vmatmul.mubr.f32.gmra.mrb[88].mxu1 %v1072_v44  ;;  %v1157_v44 = vld [vmem:[%s14441_s1 + $0xbc8] sm:$0xff] }
 0x1e6   :  { %1790 = vmatprep.mubr.f32.mxu1 %v1077_v45  ;;  %v1156_v45 = vld [vmem:[%s14441_s1 + $0xbc0] sm:$0xff] }
 0x1e9   :  { %1791 = vmatmul.mubr.f32.gmra.mrb[90].mxu1 %v1076_v46  ;;  %v1161_v46 = vld [vmem:[%s14441_s1 + $0xbe8] sm:$0xff] }
 0x1ea   :  { %1795 = vmatprep.mubr.f32.mxu1 %v1081_v47  ;;  %v1160_v47 = vld [vmem:[%s14441_s1 + $0xbe0] sm:$0xff] }
 0x1ec   :  { %v8510_v10 = vpop.f32.mrb[56].mxu0 }
 0x1ed   :  { %1796 = vmatmul.mubr.f32.gmra.mrb[92].mxu1 %v1080_v48  ;;  %v683_v12 = vadd.f32 %v10925_v11, %v8510_v10  ;;  %v677_v13 = vpop.f32.mrb[57].mxu0  ;;  %v1165_v48 = vld [vmem:[%s14441_s1 + $0xc08] sm:$0xff] }
 0x1ee   :  { %1800 = vmatprep.mubr.f32.mxu1 %v1085_v49  ;;  %v678_v14 = vadd.f32 %v10925_v11, %v677_v13  ;;  %v1164_v49 = vld [vmem:[%s14441_s1 + $0xc00] sm:$0xff] }
 0x1ef   :  { %v773_v16 = vmax.f32 %v683_v12, 0.0  ;;  %v1200_v12 = vld [vmem:[%s14441_s1 + $0xd20] sm:$0xff] }
 0x1f0   :  { %v772_v18 = vmax.f32 %v678_v14, 0.0 }
 0x1f1   :  { %1801 = vmatmul.mubr.f32.gmra.mrb[94].mxu1 %v1084_v50  ;;  %v1169_v50 = vld [vmem:[%s14441_s1 + $0xc28] sm:$0xff] }
 0x1f2   :  { %1805 = vmatprep.mubr.f32.mxu1 %v1089_v51  ;;  %v9193_v19 = vpack.c.bf16 %v773_v16, %v772_v18  ;;  %v1168_v51 = vld [vmem:[%s14441_s1 + $0xc20] sm:$0xff] }
 0x1f4   :  { %9194 = vmatpush1.bf16.msra.mxu1 %v9193_v19  ;;  %v1204_v19 = vld [vmem:[%s14441_s1 + $0xd40] sm:$0xff] }
 0x1f5   :  { %1806 = vmatmul.mubr.f32.gmra.mrb[96].mxu1 %v1088_v55  ;;  %9195 = vmatprep.subr.bf16.mxu1 %v10106_v56 }
 0x1f6   :  { %1810 = vmatprep.mubr.f32.mxu1 %v1093_v58 }
 0x1f9   :  { %1811 = vmatmul.mubr.f32.gmra.mrb[98].mxu1 %v1092_v61  ;;  %v1177_v61 = vld [vmem:[%s14441_s1 + $0xc68] sm:$0xff] }
 0x1fa   :  { %1815 = vmatprep.mubr.f32.mxu1 %v1097_v63  ;;  %v1176_v63 = vld [vmem:[%s14441_s1 + $0xc60] sm:$0xff] }
 0x1fd   :  { %1816 = vmatmul.mubr.f32.gmra.mrb[100].mxu1 %v1096_v2  ;;  %v1181_v2 = vld [vmem:[%s14441_s1 + $0xc88] sm:$0xff] }
 0x1fe   :  { %1820 = vmatprep.mubr.f32.mxu1 %v1101_v0  ;;  %v1180_v0 = vld [vmem:[%s14441_s1 + $0xc80] sm:$0xff] }
 0x201   :  { %1821 = vmatmul.mubr.f32.gmra.mrb[102].mxu1 %v1100_v1  ;;  %v1185_v1 = vld [vmem:[%s14441_s1 + $0xca8] sm:$0xff] }
 0x202   :  { %1825 = vmatprep.mubr.f32.mxu1 %v1105_v3  ;;  %v1184_v3 = vld [vmem:[%s14441_s1 + $0xca0] sm:$0xff] }
 0x205   :  { %1826 = vmatmul.mubr.f32.gmra.mrb[104].mxu1 %v1104_v4  ;;  %v1188_v4 = vld [vmem:[%s14441_s1 + $0xcc0] sm:$0xff] }
 0x206   :  { %1830 = vmatprep.mubr.f32.mxu1 %v1109_v5  ;;  %v8513_v31 = vpop.f32.mrb[58].mxu0  ;;  %v1193_v5 = vld [vmem:[%s14441_s1 + $0xce8] sm:$0xff] }
 0x207   :  { %v693_v33 = vadd.f32 %v10925_v11, %v8513_v31  ;;  %v687_v34 = vpop.f32.mrb[59].mxu0  ;;  %v781_v31 = vld [vmem:[%s14441_s1 + $0x8] sm:$0xff] }
 0x208   :  { %v688_v35 = vadd.f32 %v10925_v11, %v687_v34  ;;  %1420 = vmatprep.mubr.f32.mxu0 %v781_v31  ;;  %v1233_v34 = vld [vmem:[%s14441_s1 + $0xe28] sm:$0xff] }
 0x209   :  { %1831 = vmatmul.mubr.f32.gmra.mrb[106].mxu1 %v1108_v6  ;;  %v775_v36 = vmax.f32 %v693_v33, 0.0  ;;  %v1192_v6 = vld [vmem:[%s14441_s1 + $0xce0] sm:$0xff]  ;;  %v845_v31 = vld [vmem:[%s14441_s1 + $0x208] sm:$0xff] }
 0x20a   :  { %1835 = vmatprep.mubr.f32.mxu1 %v1113_v7  ;;  %v774_v38 = vmax.f32 %v688_v35, 0.0  ;;  %v1197_v7 = vld [vmem:[%s14441_s1 + $0xd08] sm:$0xff]  ;;  %v780_v33 = vld [vmem:[%s14441_s1] sm:$0xff] }
 0x20b   :  { %1421 = vmatmul.mubr.f32.vlgmr.msra.gmra.mrb[64].mxu0 %v780_v33  ;;  %v785_v35 = vld [vmem:[%s14441_s1 + $0x28] sm:$0xff] }
 0x20c   :  { %v9196_v40 = vpack.c.bf16 %v775_v36, %v774_v38  ;;  %v1232_v36 = vld [vmem:[%s14441_s1 + $0xe20] sm:$0xff]  ;;  %1425 = vmatprep.mubr.f32.mxu0 %v785_v35  ;;  %v1237_v38 = vld [vmem:[%s14441_s1 + $0xe48] sm:$0xff] }
 0x20d   :  { %1836 = vmatmul.mubr.f32.gmra.mrb[108].mxu1 %v1112_v8  ;;  %v1196_v8 = vld [vmem:[%s14441_s1 + $0xd00] sm:$0xff]  ;;  %v1297_v33 = vld [vmem:[%s14441_s1 + $0x1028] sm:$0xff] }
 0x20e   :  { %1840 = vmatprep.mubr.f32.mxu1 %v1117_v9  ;;  %9197 = vmatpush1.bf16.msra.mxu1 %v9196_v40  ;;  %v1201_v9 = vld [vmem:[%s14441_s1 + $0xd28] sm:$0xff]  ;;  %v1236_v40 = vld [vmem:[%s14441_s1 + $0xe40] sm:$0xff] }
 0x20f   :  { %9198 = vmatprep.subr.bf16.mxu1 %v10106_v56  ;;  %v8516_v52 = vpop.f32.mrb[60].mxu0  ;;  %v849_v35 = vld [vmem:[%s14441_s1 + $0x228] sm:$0xff] }
 0x210   :  { %v703_v54 = vadd.f32 %v10925_v11, %v8516_v52  ;;  %v697_v55 = vpop.f32.mrb[61].mxu0  ;;  %v1248_v52 = vld [vmem:[%s14441_s1 + $0xea0] sm:$0xff] }
 0x211   :  { %1841 = vmatmul.mubr.f32.gmra.mrb[110].mxu1 %v1116_v15  ;;  %v698_v57 = vadd.f32 %v10925_v11, %v697_v55  ;;  %v1205_v15 = vld [vmem:[%s14441_s1 + $0xd48] sm:$0xff] }
 0x212   :  { %1845 = vmatprep.mubr.f32.mxu1 %v1121_v17  ;;  %v777_v58 = vmax.f32 %v703_v54, 0.0  ;;  %v1253_v54 = vld [vmem:[%s14441_s1 + $0xec8] sm:$0xff] }
 0x213   :  { %v776_v60 = vmax.f32 %v698_v57, 0.0  ;;  %v805_v55 = vld [vmem:[%s14441_s1 + $0xc8] sm:$0xff]  ;;  %v1252_v57 = vld [vmem:[%s14441_s1 + $0xec0] sm:$0xff] }
 0x215   :  { %1846 = vmatmul.mubr.f32.gmra.mrb[112].mxu1 %v1120_v20  ;;  %v9199_v62 = vpack.c.bf16 %v777_v58, %v776_v60  ;;  %v1209_v20 = vld [vmem:[%s14441_s1 + $0xd68] sm:$0xff]  ;;  %v804_v58 = vld [vmem:[%s14441_s1 + $0xc0] sm:$0xff] }
 0x216   :  { %1850 = vmatprep.mubr.f32.mxu1 %v1125_v21  ;;  %v809_v60 = vld [vmem:[%s14441_s1 + $0xe8] sm:$0xff] }
 0x217   :  { %9200 = vmatpush1.bf16.msra.mxu1 %v9199_v62  ;;  %v808_v62 = vld [vmem:[%s14441_s1 + $0xe0] sm:$0xff] }
 0x218   :  { %9201 = vmatprep.subr.bf16.mxu1 %v10106_v56  ;;  %v1189_v56 = vld [vmem:[%s14441_s1 + $0xcc8] sm:$0xff] }
 0x219   :  { %1851 = vmatmul.mubr.f32.gmra.mrb[114].mxu1 %v1124_v22  ;;  %v1208_v22 = vld [vmem:[%s14441_s1 + $0xd60] sm:$0xff] }
 0x21a   :  { %1855 = vmatprep.mubr.f32.mxu1 %v1129_v23  ;;  %v1212_v23 = vld [vmem:[%s14441_s1 + $0xd80] sm:$0xff] }
 0x21b   :  { %v8519_v10 = vpop.f32.mrb[62].mxu0 }
 0x21c   :  { %v713_v13 = vadd.f32 %v10925_v11, %v8519_v10  ;;  %v707_v14 = vpop.f32.mrb[63].mxu0  ;;  %v1273_v10 = vld [vmem:[%s14441_s1 + $0xf68] sm:$0xff] }
 0x21d   :  { %1856 = vmatmul.mubr.f32.gmra.mrb[116].mxu1 %v1128_v24  ;;  %v708_v16 = vadd.f32 %v10925_v11, %v707_v14  ;;  %v1213_v11 = vld [vmem:[%s14441_s1 + $0xd88] sm:$0xff]  ;;  %v824_v14 = vld [vmem:[%s14441_s1 + $0x160] sm:$0xff] }
 0x21e   :  { %1860 = vmatprep.mubr.f32.mxu1 %v1133_v25  ;;  %v779_v17 = vmax.f32 %v713_v13, 0.0  ;;  %v1217_v24 = vld [vmem:[%s14441_s1 + $0xda8] sm:$0xff]  ;;  %v1216_v25 = vld [vmem:[%s14441_s1 + $0xda0] sm:$0xff] }
 0x21f   :  { %v778_v18 = vmax.f32 %v708_v16, 0.0  ;;  %v1272_v13 = vld [vmem:[%s14441_s1 + $0xf60] sm:$0xff]  ;;  %v829_v16 = vld [vmem:[%s14441_s1 + $0x188] sm:$0xff] }
 0x221   :  { %1861 = vmatmul.mubr.f32.gmra.mrb[118].mxu1 %v1132_v26  ;;  %v9202_v21 = vpack.c.bf16 %v779_v17, %v778_v18  ;;  %v1221_v26 = vld [vmem:[%s14441_s1 + $0xdc8] sm:$0xff]  ;;  %v1276_v17 = vld [vmem:[%s14441_s1 + $0xf80] sm:$0xff] }
 0x222   :  { %1865 = vmatprep.mubr.f32.mxu1 %v1137_v27  ;;  %v1220_v27 = vld [vmem:[%s14441_s1 + $0xdc0] sm:$0xff] }
 0x223   :  { %9203 = vmatpush1.bf16.msra.mxu1 %v9202_v21  ;;  %v828_v18 = vld [vmem:[%s14441_s1 + $0x180] sm:$0xff] }
 0x224   :  { %v1280_v21 = vld [vmem:[%s14441_s1 + $0xfa0] sm:$0xff] }
 0x225   :  { %1866 = vmatmul.mubr.f32.gmra.mrb[120].mxu1 %v1136_v28  ;;  %v1225_v28 = vld [vmem:[%s14441_s1 + $0xde8] sm:$0xff] }
 0x226   :  { %1870 = vmatprep.mubr.f32.mxu1 %v1141_v29  ;;  %v1224_v29 = vld [vmem:[%s14441_s1 + $0xde0] sm:$0xff] }
 0x229   :  { %1871 = vmatmul.mubr.f32.gmra.mrb[122].mxu1 %v1140_v30  ;;  %v1229_v30 = vld [vmem:[%s14441_s1 + $0xe08] sm:$0xff] }
 0x22a   :  { %1875 = vmatprep.mubr.f32.mxu1 %v1145_v32  ;;  %v1228_v32 = vld [vmem:[%s14441_s1 + $0xe00] sm:$0xff] }
 0x22d   :  { %1876 = vmatmul.mubr.f32.gmra.mrb[124].mxu1 %v1144_v37  ;;  %v784_v37 = vld [vmem:[%s14441_s1 + $0x20] sm:$0xff] }
 0x22e   :  { %1880 = vmatprep.mubr.f32.mxu1 %v1149_v39  ;;  %1426 = vmatmul.mubr.f32.gmra.mrb[66].mxu0 %v784_v37  ;;  %v789_v39 = vld [vmem:[%s14441_s1 + $0x48] sm:$0xff] }
 0x22f   :  { %1430 = vmatprep.mubr.f32.mxu0 %v789_v39  ;;  %v1301_v37 = vld [vmem:[%s14441_s1 + $0x1048] sm:$0xff] }
 0x230   :  { %v853_v39 = vld [vmem:[%s14441_s1 + $0x248] sm:$0xff] }
 0x231   :  { %1881 = vmatmul.mubr.f32.gmra.mrb[126].mxu1 %v1148_v41  ;;  %v788_v41 = vld [vmem:[%s14441_s1 + $0x40] sm:$0xff] }
 0x232   :  { %1885 = vmatprep.mubr.f32.mxu1 %v1153_v42  ;;  %v1241_v42 = vld [vmem:[%s14441_s1 + $0xe68] sm:$0xff]  ;;  %1431 = vmatmul.mubr.f32.gmra.mrb[68].mxu0 %v788_v41 }
 0x233   :  { %v1305_v41 = vld [vmem:[%s14441_s1 + $0x1068] sm:$0xff] }
 0x235   :  { %1886 = vmatmul.mubr.f32.gmra.mrb[128].mxu1 %v1152_v43  ;;  %v793_v43 = vld [vmem:[%s14441_s1 + $0x68] sm:$0xff] }
 0x236   :  { %1890 = vmatprep.mubr.f32.mxu1 %v1157_v44  ;;  %v1240_v44 = vld [vmem:[%s14441_s1 + $0xe60] sm:$0xff]  ;;  %1435 = vmatprep.mubr.f32.mxu0 %v793_v43  ;;  %v857_v43 = vld [vmem:[%s14441_s1 + $0x268] sm:$0xff] }
 0x239   :  { %1891 = vmatmul.mubr.f32.gmra.mrb[130].mxu1 %v1156_v45  ;;  %v792_v45 = vld [vmem:[%s14441_s1 + $0x60] sm:$0xff] }
 0x23a   :  { %1895 = vmatprep.mubr.f32.mxu1 %v1161_v46  ;;  %v1245_v46 = vld [vmem:[%s14441_s1 + $0xe88] sm:$0xff]  ;;  %1436 = vmatmul.mubr.f32.gmra.mrb[70].mxu0 %v792_v45 }
 0x23b   :  { %v1309_v45 = vld [vmem:[%s14441_s1 + $0x1088] sm:$0xff] }
 0x23d   :  { %1896 = vmatmul.mubr.f32.gmra.mrb[132].mxu1 %v1160_v47  ;;  %v797_v47 = vld [vmem:[%s14441_s1 + $0x88] sm:$0xff] }
 0x23e   :  { %1900 = vmatprep.mubr.f32.mxu1 %v1165_v48  ;;  %v1244_v48 = vld [vmem:[%s14441_s1 + $0xe80] sm:$0xff]  ;;  %1440 = vmatprep.mubr.f32.mxu0 %v797_v47  ;;  %v861_v47 = vld [vmem:[%s14441_s1 + $0x288] sm:$0xff] }
 0x241   :  { %1901 = vmatmul.mubr.f32.gmra.mrb[134].mxu1 %v1164_v49  ;;  %v796_v49 = vld [vmem:[%s14441_s1 + $0x80] sm:$0xff] }
 0x242   :  { %1905 = vmatprep.mubr.f32.mxu1 %v1169_v50  ;;  %v1249_v50 = vld [vmem:[%s14441_s1 + $0xea8] sm:$0xff]  ;;  %1441 = vmatmul.mubr.f32.gmra.mrb[72].mxu0 %v796_v49 }
 0x243   :  { %v1313_v49 = vld [vmem:[%s14441_s1 + $0x10a8] sm:$0xff] }
 0x245   :  { %1906 = vmatmul.mubr.f32.gmra.mrb[136].mxu1 %v1168_v51  ;;  %v801_v51 = vld [vmem:[%s14441_s1 + $0xa8] sm:$0xff] }
 0x246   :  { %1910 = vmatprep.mubr.f32.mxu1 %v1173_v53  ;;  %1445 = vmatprep.mubr.f32.mxu0 %v801_v51  ;;  %v800_v53 = vld [vmem:[%s14441_s1 + $0xa0] sm:$0xff]  ;;  %v865_v51 = vld [vmem:[%s14441_s1 + $0x2a8] sm:$0xff] }
 0x247   :  { %1446 = vmatmul.mubr.f32.gmra.mrb[74].mxu0 %v800_v53  ;;  %v1317_v53 = vld [vmem:[%s14441_s1 + $0x10c8] sm:$0xff] }
 0x248   :  { %1450 = vmatprep.mubr.f32.mxu0 %v805_v55  ;;  %v869_v55 = vld [vmem:[%s14441_s1 + $0x2c8] sm:$0xff] }
 0x249   :  { %1911 = vmatmul.mubr.f32.gmra.mrb[138].mxu1 %v1172_v59  ;;  %v1257_v59 = vld [vmem:[%s14441_s1 + $0xee8] sm:$0xff] }
 0x24a   :  { %1915 = vmatprep.mubr.f32.mxu1 %v1177_v61  ;;  %v1256_v61 = vld [vmem:[%s14441_s1 + $0xee0] sm:$0xff] }
 0x24b   :  { %1451 = vmatmul.mubr.f32.gmra.mrb[76].mxu0 %v804_v58  ;;  %v1321_v58 = vld [vmem:[%s14441_s1 + $0x10e8] sm:$0xff] }
 0x24c   :  { %1455 = vmatprep.mubr.f32.mxu0 %v809_v60  ;;  %v873_v60 = vld [vmem:[%s14441_s1 + $0x2e8] sm:$0xff] }
 0x24d   :  { %1916 = vmatmul.mubr.f32.gmra.mrb[140].mxu1 %v1176_v63  ;;  %v1261_v63 = vld [vmem:[%s14441_s1 + $0xf08] sm:$0xff] }
 0x24e   :  { %1920 = vmatprep.mubr.f32.mxu1 %v1181_v2  ;;  %v813_v2 = vld [vmem:[%s14441_s1 + $0x108] sm:$0xff] }
 0x24f   :  { %1456 = vmatmul.mubr.f32.gmra.mrb[78].mxu0 %v808_v62  ;;  %v1325_v62 = vld [vmem:[%s14441_s1 + $0x1108] sm:$0xff] }
 0x250   :  { %1460 = vmatprep.mubr.f32.mxu0 %v813_v2  ;;  %v877_v2 = vld [vmem:[%s14441_s1 + $0x308] sm:$0xff] }
 0x251   :  { %1921 = vmatmul.mubr.f32.gmra.mrb[142].mxu1 %v1180_v0  ;;  %v1260_v0 = vld [vmem:[%s14441_s1 + $0xf00] sm:$0xff] }
 0x252   :  { %1925 = vmatprep.mubr.f32.mxu1 %v1185_v1  ;;  %v812_v1 = vld [vmem:[%s14441_s1 + $0x100] sm:$0xff] }
 0x253   :  { %1461 = vmatmul.mubr.f32.gmra.mrb[80].mxu0 %v812_v1  ;;  %v1329_v1 = vld [vmem:[%s14441_s1 + $0x1128] sm:$0xff] }
 0x255   :  { %1926 = vmatmul.mubr.f32.gmra.mrb[144].mxu1 %v1184_v3  ;;  %v1265_v3 = vld [vmem:[%s14441_s1 + $0xf28] sm:$0xff] }
 0x256   :  { %1930 = vmatprep.mubr.f32.mxu1 %v1189_v56  ;;  %v817_v56 = vld [vmem:[%s14441_s1 + $0x128] sm:$0xff] }
 0x257   :  { %1465 = vmatprep.mubr.f32.mxu0 %v817_v56  ;;  %v881_v56 = vld [vmem:[%s14441_s1 + $0x328] sm:$0xff] }
 0x259   :  { %1931 = vmatmul.mubr.f32.gmra.mrb[146].mxu1 %v1188_v4  ;;  %v1264_v4 = vld [vmem:[%s14441_s1 + $0xf20] sm:$0xff] }
 0x25a   :  { %1935 = vmatprep.mubr.f32.mxu1 %v1193_v5  ;;  %v816_v5 = vld [vmem:[%s14441_s1 + $0x120] sm:$0xff] }
 0x25b   :  { %1466 = vmatmul.mubr.f32.gmra.mrb[82].mxu0 %v816_v5  ;;  %v1333_v5 = vld [vmem:[%s14441_s1 + $0x1148] sm:$0xff] }
 0x25d   :  { %1936 = vmatmul.mubr.f32.gmra.mrb[148].mxu1 %v1192_v6  ;;  %v1269_v6 = vld [vmem:[%s14441_s1 + $0xf48] sm:$0xff] }
 0x25e   :  { %1940 = vmatprep.mubr.f32.mxu1 %v1197_v7  ;;  %v821_v7 = vld [vmem:[%s14441_s1 + $0x148] sm:$0xff] }
 0x25f   :  { %1470 = vmatprep.mubr.f32.mxu0 %v821_v7  ;;  %v885_v7 = vld [vmem:[%s14441_s1 + $0x348] sm:$0xff] }
 0x261   :  { %1941 = vmatmul.mubr.f32.gmra.mrb[150].mxu1 %v1196_v8  ;;  %v1268_v8 = vld [vmem:[%s14441_s1 + $0xf40] sm:$0xff] }
 0x262   :  { %1945 = vmatprep.mubr.f32.mxu1 %v1201_v9  ;;  %v820_v9 = vld [vmem:[%s14441_s1 + $0x140] sm:$0xff] }
 0x263   :  { %1471 = vmatmul.mubr.f32.gmra.mrb[84].mxu0 %v820_v9  ;;  %v1337_v9 = vld [vmem:[%s14441_s1 + $0x1168] sm:$0xff] }
 0x265   :  { %1946 = vmatmul.mubr.f32.gmra.mrb[152].mxu1 %v1200_v12  ;;  %v825_v12 = vld [vmem:[%s14441_s1 + $0x168] sm:$0xff] }
 0x266   :  { %1950 = vmatprep.mubr.f32.mxu1 %v1205_v15  ;;  %1475 = vmatprep.mubr.f32.mxu0 %v825_v12  ;;  %v1277_v15 = vld [vmem:[%s14441_s1 + $0xf88] sm:$0xff] }
 0x267   :  { %1476 = vmatmul.mubr.f32.gmra.mrb[86].mxu0 %v824_v14  ;;  %v889_v12 = vld [vmem:[%s14441_s1 + $0x368] sm:$0xff] }
 0x268   :  { %1480 = vmatprep.mubr.f32.mxu0 %v829_v16  ;;  %v1341_v14 = vld [vmem:[%s14441_s1 + $0x1188] sm:$0xff] }
 0x269   :  { %1951 = vmatmul.mubr.f32.gmra.mrb[154].mxu1 %v1204_v19  ;;  %v1281_v19 = vld [vmem:[%s14441_s1 + $0xfa8] sm:$0xff] }
 0x26a   :  { %1955 = vmatprep.mubr.f32.mxu1 %v1209_v20  ;;  %v833_v20 = vld [vmem:[%s14441_s1 + $0x1a8] sm:$0xff] }
 0x26b   :  { %1481 = vmatmul.mubr.f32.gmra.mrb[88].mxu0 %v828_v18  ;;  %v893_v16 = vld [vmem:[%s14441_s1 + $0x388] sm:$0xff] }
 0x26c   :  { %1485 = vmatprep.mubr.f32.mxu0 %v833_v20  ;;  %v1345_v18 = vld [vmem:[%s14441_s1 + $0x11a8] sm:$0xff]  ;;  %v1344_v20 = vld [vmem:[%s14441_s1 + $0x11a0] sm:$0xff] }
 0x26d   :  { %1956 = vmatmul.mubr.f32.gmra.mrb[156].mxu1 %v1208_v22  ;;  %v1285_v22 = vld [vmem:[%s14441_s1 + $0xfc8] sm:$0xff] }
 0x26e   :  { %1960 = vmatprep.mubr.f32.mxu1 %v1213_v11  ;;  %v832_v11 = vld [vmem:[%s14441_s1 + $0x1a0] sm:$0xff] }
 0x26f   :  { %1486 = vmatmul.mubr.f32.gmra.mrb[90].mxu0 %v832_v11  ;;  %v1353_v11 = vld [vmem:[%s14441_s1 + $0x11e8] sm:$0xff] }
 0x271   :  { %1961 = vmatmul.mubr.f32.gmra.mrb[158].mxu1 %v1212_v23  ;;  %v837_v23 = vld [vmem:[%s14441_s1 + $0x1c8] sm:$0xff] }
 0x272   :  { %1965 = vmatprep.mubr.f32.mxu1 %v1217_v24  ;;  %v1284_v24 = vld [vmem:[%s14441_s1 + $0xfc0] sm:$0xff]  ;;  %1490 = vmatprep.mubr.f32.mxu0 %v837_v23 }
 0x273   :  { %v1352_v23 = vld [vmem:[%s14441_s1 + $0x11e0] sm:$0xff] }
 0x275   :  { %1966 = vmatmul.mubr.f32.gmra.mrb[160].mxu1 %v1216_v25  ;;  %v1289_v25 = vld [vmem:[%s14441_s1 + $0xfe8] sm:$0xff] }
 0x276   :  { %1970 = vmatprep.mubr.f32.mxu1 %v1221_v26  ;;  %v836_v26 = vld [vmem:[%s14441_s1 + $0x1c0] sm:$0xff] }
 0x277   :  { %1491 = vmatmul.mubr.f32.gmra.mrb[92].mxu0 %v836_v26  ;;  %v787_v26 = vld [vmem:[%s14441_s1 + $0x38] sm:$0xff] }
 0x279   :  { %1971 = vmatmul.mubr.f32.gmra.mrb[162].mxu1 %v1220_v27  ;;  %v841_v27 = vld [vmem:[%s14441_s1 + $0x1e8] sm:$0xff] }
 0x27a   :  { %1975 = vmatprep.mubr.f32.mxu1 %v1225_v28  ;;  %v1288_v28 = vld [vmem:[%s14441_s1 + $0xfe0] sm:$0xff]  ;;  %1495 = vmatprep.mubr.f32.mxu0 %v841_v27  ;;  %v786_v27 = vld [vmem:[%s14441_s1 + $0x30] sm:$0xff] }
 0x27d   :  { %1976 = vmatmul.mubr.f32.gmra.mrb[164].mxu1 %v1224_v29  ;;  %v1293_v29 = vld [vmem:[%s14441_s1 + $0x1008] sm:$0xff] }
 0x27e   :  { %1980 = vmatprep.mubr.f32.mxu1 %v1229_v30  ;;  %v840_v30 = vld [vmem:[%s14441_s1 + $0x1e0] sm:$0xff] }
 0x27f   :  { %1496 = vmatmul.mubr.f32.gmra.mrb[94].mxu0 %v840_v30  ;;  %v795_v30 = vld [vmem:[%s14441_s1 + $0x78] sm:$0xff] }
 0x280   :  { %1500 = vmatprep.mubr.f32.mxu0 %v845_v31  ;;  %v794_v31 = vld [vmem:[%s14441_s1 + $0x70] sm:$0xff] }
 0x281   :  { %1981 = vmatmul.mubr.f32.gmra.mrb[166].mxu1 %v1228_v32  ;;  %v1292_v32 = vld [vmem:[%s14441_s1 + $0x1000] sm:$0xff] }
 0x282   :  { %1985 = vmatprep.mubr.f32.mxu1 %v1233_v34  ;;  %v844_v34 = vld [vmem:[%s14441_s1 + $0x200] sm:$0xff] }
 0x283   :  { %1501 = vmatmul.mubr.f32.gmra.mrb[96].mxu0 %v844_v34  ;;  %v803_v34 = vld [vmem:[%s14441_s1 + $0xb8] sm:$0xff] }
 0x284   :  { %1505 = vmatprep.mubr.f32.mxu0 %v849_v35  ;;  %v802_v35 = vld [vmem:[%s14441_s1 + $0xb0] sm:$0xff] }
 0x285   :  { %1986 = vmatmul.mubr.f32.gmra.mrb[168].mxu1 %v1232_v36  ;;  %v1296_v36 = vld [vmem:[%s14441_s1 + $0x1020] sm:$0xff] }
 0x286   :  { %1990 = vmatprep.mubr.f32.mxu1 %v1237_v38  ;;  %v848_v38 = vld [vmem:[%s14441_s1 + $0x220] sm:$0xff] }
 0x287   :  { %1506 = vmatmul.mubr.f32.gmra.mrb[98].mxu0 %v848_v38  ;;  %v811_v38 = vld [vmem:[%s14441_s1 + $0xf8] sm:$0xff] }
 0x288   :  { %1510 = vmatprep.mubr.f32.mxu0 %v853_v39  ;;  %v810_v39 = vld [vmem:[%s14441_s1 + $0xf0] sm:$0xff] }
 0x289   :  { %1991 = vmatmul.mubr.f32.gmra.mrb[170].mxu1 %v1236_v40  ;;  %v1300_v40 = vld [vmem:[%s14441_s1 + $0x1040] sm:$0xff] }
 0x28a   :  { %1995 = vmatprep.mubr.f32.mxu1 %v1241_v42  ;;  %v852_v42 = vld [vmem:[%s14441_s1 + $0x240] sm:$0xff] }
 0x28b   :  { %1511 = vmatmul.mubr.f32.gmra.mrb[100].mxu0 %v852_v42  ;;  %v819_v42 = vld [vmem:[%s14441_s1 + $0x138] sm:$0xff] }
 0x28c   :  { %1515 = vmatprep.mubr.f32.mxu0 %v857_v43  ;;  %v818_v43 = vld [vmem:[%s14441_s1 + $0x130] sm:$0xff] }
 0x28d   :  { %1996 = vmatmul.mubr.f32.gmra.mrb[172].mxu1 %v1240_v44  ;;  %v1304_v44 = vld [vmem:[%s14441_s1 + $0x1060] sm:$0xff] }
 0x28e   :  { %2000 = vmatprep.mubr.f32.mxu1 %v1245_v46  ;;  %v856_v46 = vld [vmem:[%s14441_s1 + $0x260] sm:$0xff] }
 0x28f   :  { %1516 = vmatmul.mubr.f32.gmra.mrb[102].mxu0 %v856_v46  ;;  %v827_v46 = vld [vmem:[%s14441_s1 + $0x178] sm:$0xff] }
 0x290   :  { %1520 = vmatprep.mubr.f32.mxu0 %v861_v47  ;;  %v826_v47 = vld [vmem:[%s14441_s1 + $0x170] sm:$0xff] }
 0x291   :  { %2001 = vmatmul.mubr.f32.gmra.mrb[174].mxu1 %v1244_v48  ;;  %v1308_v48 = vld [vmem:[%s14441_s1 + $0x1080] sm:$0xff] }
 0x292   :  { %2005 = vmatprep.mubr.f32.mxu1 %v1249_v50  ;;  %v860_v50 = vld [vmem:[%s14441_s1 + $0x280] sm:$0xff] }
 0x293   :  { %1521 = vmatmul.mubr.f32.gmra.mrb[104].mxu0 %v860_v50  ;;  %v835_v50 = vld [vmem:[%s14441_s1 + $0x1b8] sm:$0xff] }
 0x294   :  { %1525 = vmatprep.mubr.f32.mxu0 %v865_v51  ;;  %v834_v51 = vld [vmem:[%s14441_s1 + $0x1b0] sm:$0xff] }
 0x295   :  { %2006 = vmatmul.mubr.f32.gmra.mrb[176].mxu1 %v1248_v52  ;;  %v1312_v52 = vld [vmem:[%s14441_s1 + $0x10a0] sm:$0xff] }
 0x296   :  { %2010 = vmatprep.mubr.f32.mxu1 %v1253_v54  ;;  %v864_v54 = vld [vmem:[%s14441_s1 + $0x2a0] sm:$0xff] }
 0x297   :  { %1526 = vmatmul.mubr.f32.gmra.mrb[106].mxu0 %v864_v54 }
 0x298   :  { %1530 = vmatprep.mubr.f32.mxu0 %v869_v55  ;;  %v838_v55 = vld [vmem:[%s14441_s1 + $0x1d0] sm:$0xff] }
 0x299   :  { %2011 = vmatmul.mubr.f32.gmra.mrb[178].mxu1 %v1252_v57  ;;  %v1316_v57 = vld [vmem:[%s14441_s1 + $0x10c0] sm:$0xff] }
 0x29a   :  { %2015 = vmatprep.mubr.f32.mxu1 %v1257_v59  ;;  %v868_v59 = vld [vmem:[%s14441_s1 + $0x2c0] sm:$0xff] }
 0x29b   :  { %1531 = vmatmul.mubr.f32.gmra.mrb[108].mxu0 %v868_v59 }
 0x29c   :  { %1535 = vmatprep.mubr.f32.mxu0 %v873_v60  ;;  %v842_v60 = vld [vmem:[%s14441_s1 + $0x1f0] sm:$0xff] }
 0x29d   :  { %2016 = vmatmul.mubr.f32.gmra.mrb[180].mxu1 %v1256_v61  ;;  %v1320_v61 = vld [vmem:[%s14441_s1 + $0x10e0] sm:$0xff] }
 0x29e   :  { %2020 = vmatprep.mubr.f32.mxu1 %v1261_v63  ;;  %v872_v63 = vld [vmem:[%s14441_s1 + $0x2e0] sm:$0xff] }
 0x29f   :  { %1536 = vmatmul.mubr.f32.gmra.mrb[110].mxu0 %v872_v63 }
 0x2a0   :  { %1540 = vmatprep.mubr.f32.mxu0 %v877_v2  ;;  %v846_v2 = vld [vmem:[%s14441_s1 + $0x210] sm:$0xff] }
 0x2a1   :  { %2021 = vmatmul.mubr.f32.gmra.mrb[182].mxu1 %v1260_v0  ;;  %v1324_v0 = vld [vmem:[%s14441_s1 + $0x1100] sm:$0xff] }
 0x2a2   :  { %2025 = vmatprep.mubr.f32.mxu1 %v1265_v3  ;;  %v876_v3 = vld [vmem:[%s14441_s1 + $0x300] sm:$0xff] }
 0x2a3   :  { %1541 = vmatmul.mubr.f32.gmra.mrb[112].mxu0 %v876_v3 }
 0x2a4   :  { %1545 = vmatprep.mubr.f32.mxu0 %v881_v56  ;;  %v850_v56 = vld [vmem:[%s14441_s1 + $0x230] sm:$0xff] }
 0x2a5   :  { %2026 = vmatmul.mubr.f32.gmra.mrb[184].mxu1 %v1264_v4  ;;  %v1328_v4 = vld [vmem:[%s14441_s1 + $0x1120] sm:$0xff] }
 0x2a6   :  { %2030 = vmatprep.mubr.f32.mxu1 %v1269_v6  ;;  %v880_v6 = vld [vmem:[%s14441_s1 + $0x320] sm:$0xff] }
 0x2a7   :  { %1546 = vmatmul.mubr.f32.gmra.mrb[114].mxu0 %v880_v6 }
 0x2a8   :  { %1550 = vmatprep.mubr.f32.mxu0 %v885_v7  ;;  %v854_v7 = vld [vmem:[%s14441_s1 + $0x250] sm:$0xff] }
 0x2a9   :  { %2031 = vmatmul.mubr.f32.gmra.mrb[186].mxu1 %v1268_v8  ;;  %v1332_v8 = vld [vmem:[%s14441_s1 + $0x1140] sm:$0xff] }
 0x2aa   :  { %2035 = vmatprep.mubr.f32.mxu1 %v1273_v10  ;;  %v884_v10 = vld [vmem:[%s14441_s1 + $0x340] sm:$0xff] }
 0x2ab   :  { %1551 = vmatmul.mubr.f32.gmra.mrb[116].mxu0 %v884_v10 }
 0x2ac   :  { %1555 = vmatprep.mubr.f32.mxu0 %v889_v12  ;;  %v858_v12 = vld [vmem:[%s14441_s1 + $0x270] sm:$0xff] }
 0x2ad   :  { %2036 = vmatmul.mubr.f32.gmra.mrb[188].mxu1 %v1272_v13  ;;  %v1336_v13 = vld [vmem:[%s14441_s1 + $0x1160] sm:$0xff] }
 0x2ae   :  { %2040 = vmatprep.mubr.f32.mxu1 %v1277_v15  ;;  %v888_v15 = vld [vmem:[%s14441_s1 + $0x360] sm:$0xff] }
 0x2af   :  { %1556 = vmatmul.mubr.f32.gmra.mrb[118].mxu0 %v888_v15 }
 0x2b0   :  { %1560 = vmatprep.mubr.f32.mxu0 %v893_v16  ;;  %v862_v16 = vld [vmem:[%s14441_s1 + $0x290] sm:$0xff] }
 0x2b1   :  { %2041 = vmatmul.mubr.f32.gmra.mrb[190].mxu1 %v1276_v17  ;;  %v1340_v17 = vld [vmem:[%s14441_s1 + $0x1180] sm:$0xff] }
 0x2b2   :  { %2045 = vmatprep.mubr.f32.mxu1 %v1281_v19  ;;  %v892_v19 = vld [vmem:[%s14441_s1 + $0x380] sm:$0xff] }
 0x2b3   :  { %1561 = vmatmul.mubr.f32.gmra.mrb[120].mxu0 %v892_v19  ;;  %v2958_v19 = vld [vmem:[%s14418_s4] sm:$0xff] }
 0x2b5   :  { %2046 = vmatmul.mubr.f32.gmra.mrb[192].mxu1 %v1280_v21  ;;  %v1349_v21 = vld [vmem:[%s14441_s1 + $0x11c8] sm:$0xff] }
 0x2b6   :  { %2050 = vmatprep.mubr.f32.mxu1 %v1285_v22  ;;  %v1348_v22 = vld [vmem:[%s14441_s1 + $0x11c0] sm:$0xff] }
 0x2b9   :  { %2051 = vmatmul.mubr.f32.gmra.mrb[194].mxu1 %v1284_v24  ;;  %v783_v24 = vld [vmem:[%s14441_s1 + $0x18] sm:$0xff] }
 0x2ba   :  { %2055 = vmatprep.mubr.f32.mxu1 %v1289_v25  ;;  %v782_v25 = vld [vmem:[%s14441_s1 + $0x10] sm:$0xff] }
 0x2bd   :  { %2056 = vmatmul.mubr.f32.gmra.mrb[196].mxu1 %v1288_v28  ;;  %v791_v28 = vld [vmem:[%s14441_s1 + $0x58] sm:$0xff] }
 0x2be   :  { %2060 = vmatprep.mubr.f32.mxu1 %v1293_v29  ;;  %v790_v29 = vld [vmem:[%s14441_s1 + $0x50] sm:$0xff] }
 0x2c1   :  { %2061 = vmatmul.mubr.f32.gmra.mrb[198].mxu1 %v1292_v32  ;;  %v799_v32 = vld [vmem:[%s14441_s1 + $0x98] sm:$0xff] }
 0x2c2   :  { %2065 = vmatprep.mubr.f32.mxu1 %v1297_v33  ;;  %v798_v33 = vld [vmem:[%s14441_s1 + $0x90] sm:$0xff] }
 0x2c5   :  { %2066 = vmatmul.mubr.f32.gmra.mrb[200].mxu1 %v1296_v36  ;;  %v807_v36 = vld [vmem:[%s14441_s1 + $0xd8] sm:$0xff] }
 0x2c6   :  { %2070 = vmatprep.mubr.f32.mxu1 %v1301_v37  ;;  %v806_v37 = vld [vmem:[%s14441_s1 + $0xd0] sm:$0xff] }
 0x2c9   :  { %2071 = vmatmul.mubr.f32.gmra.mrb[202].mxu1 %v1300_v40  ;;  %v815_v40 = vld [vmem:[%s14441_s1 + $0x118] sm:$0xff] }
 0x2ca   :  { %2075 = vmatprep.mubr.f32.mxu1 %v1305_v41  ;;  %v814_v41 = vld [vmem:[%s14441_s1 + $0x110] sm:$0xff] }
 0x2cd   :  { %2076 = vmatmul.mubr.f32.gmra.mrb[204].mxu1 %v1304_v44  ;;  %v823_v44 = vld [vmem:[%s14441_s1 + $0x158] sm:$0xff] }
 0x2ce   :  { %2080 = vmatprep.mubr.f32.mxu1 %v1309_v45  ;;  %v822_v45 = vld [vmem:[%s14441_s1 + $0x150] sm:$0xff] }
 0x2d1   :  { %2081 = vmatmul.mubr.f32.gmra.mrb[206].mxu1 %v1308_v48  ;;  %v831_v48 = vld [vmem:[%s14441_s1 + $0x198] sm:$0xff] }
 0x2d2   :  { %2085 = vmatprep.mubr.f32.mxu1 %v1313_v49  ;;  %v830_v49 = vld [vmem:[%s14441_s1 + $0x190] sm:$0xff] }
 0x2d5   :  { %2086 = vmatmul.mubr.f32.gmra.mrb[208].mxu1 %v1312_v52  ;;  %v839_v52 = vld [vmem:[%s14441_s1 + $0x1d8] sm:$0xff] }
 0x2d6   :  { %2090 = vmatprep.mubr.f32.mxu1 %v1317_v53 }
 0x2d9   :  { %2091 = vmatmul.mubr.f32.gmra.mrb[210].mxu1 %v1316_v57  ;;  %v843_v57 = vld [vmem:[%s14441_s1 + $0x1f8] sm:$0xff] }
 0x2da   :  { %2095 = vmatprep.mubr.f32.mxu1 %v1321_v58 }
 0x2dd   :  { %2096 = vmatmul.mubr.f32.gmra.mrb[212].mxu1 %v1320_v61  ;;  %v847_v61 = vld [vmem:[%s14441_s1 + $0x218] sm:$0xff] }
 0x2de   :  { %2100 = vmatprep.mubr.f32.mxu1 %v1325_v62 }
 0x2e1   :  { %2101 = vmatmul.mubr.f32.gmra.mrb[214].mxu1 %v1324_v0  ;;  %v851_v0 = vld [vmem:[%s14441_s1 + $0x238] sm:$0xff] }
 0x2e2   :  { %2105 = vmatprep.mubr.f32.mxu1 %v1329_v1 }
 0x2e5   :  { %2106 = vmatmul.mubr.f32.gmra.mrb[216].mxu1 %v1328_v4  ;;  %v855_v4 = vld [vmem:[%s14441_s1 + $0x258] sm:$0xff] }
 0x2e6   :  { %2110 = vmatprep.mubr.f32.mxu1 %v1333_v5 }
 0x2e9   :  { %2111 = vmatmul.mubr.f32.gmra.mrb[218].mxu1 %v1332_v8  ;;  %v859_v8 = vld [vmem:[%s14441_s1 + $0x278] sm:$0xff] }
 0x2ea   :  { %2115 = vmatprep.mubr.f32.mxu1 %v1337_v9 }
 0x2ed   :  { %2116 = vmatmul.mubr.f32.gmra.mrb[220].mxu1 %v1336_v13  ;;  %v863_v13 = vld [vmem:[%s14441_s1 + $0x298] sm:$0xff] }
 0x2ee   :  { %2120 = vmatprep.mubr.f32.mxu1 %v1341_v14 }
 0x2f1   :  { %2121 = vmatmul.mubr.f32.gmra.mrb[222].mxu1 %v1340_v17  ;;  %v867_v17 = vld [vmem:[%s14441_s1 + $0x2b8] sm:$0xff] }
 0x2f2   :  { %2125 = vmatprep.mubr.f32.mxu1 %v1345_v18 }
 0x2f5   :  { %2126 = vmatmul.mubr.f32.gmra.mrb[224].mxu1 %v1344_v20  ;;  %v2959_v20 = vld [vmem:[%s14418_s4 + $0x8] sm:$0xff] }
 0x2f6   :  { %2130 = vmatprep.mubr.f32.mxu1 %v1349_v21 }
 0x2f9   :  { %2131 = vmatmul.mubr.f32.gmra.mrb[226].mxu1 %v1348_v22  ;;  %v9204_v22 = vpack.c.bf16 %v2959_v20, %v2958_v19  ;;  %v903_v19 = vld [vmem:[%s14441_s1 + $0x3d8] sm:$0xff] }
 0x2fa   :  { %2135 = vmatprep.mubr.f32.mxu1 %v1353_v11  ;;  %v866_v11 = vld [vmem:[%s14441_s1 + $0x2b0] sm:$0xff] }
 0x2fb   :  { %9205 = vmatprep.subr.bf16.mxu0 %v9204_v22 }
 0x2fc   :  { %9207 = vmatpush3.bf16.msra.mxu0 %v9204_v22  ;;  %v902_v22 = vld [vmem:[%s14441_s1 + $0x3d0] sm:$0xff] }
 0x2fd   :  { %2136 = vmatmul.mubr.f32.gmra.mrb[228].mxu1 %v1352_v23  ;;  %v11623_v23 = vpop.f32.mrb[64].mxu0 }
 0x2fe   :  { %2205 = vmatprep.mubr.f32.mxu1 %v783_v24  ;;  %v871_v24 = vld [vmem:[%s14441_s1 + $0x2d8] sm:$0xff] }
 0x301   :  { %2206 = vmatmul.mubr.f32.vlgmr.msra.gmra.mrb[230].mxu1 %v782_v25  ;;  %v1424_v25 = vpop.f32.mrb[65].mxu0 }
 0x302   :  { %2210 = vmatprep.mubr.f32.mxu1 %v787_v26 }
 0x305   :  { %2211 = vmatmul.mubr.f32.gmra.mrb[232].mxu1 %v786_v27  ;;  %v2960_v27 = vld [vmem:[%s14418_s4 + $0x10] sm:$0xff] }
 0x306   :  { %2215 = vmatprep.mubr.f32.mxu1 %v791_v28  ;;  %v2961_v28 = vld [vmem:[%s14418_s4 + $0x18] sm:$0xff] }
 0x309   :  { %2216 = vmatmul.mubr.f32.gmra.mrb[234].mxu1 %v790_v29 }
 0x30a   :  { %2220 = vmatprep.mubr.f32.mxu1 %v795_v30  ;;  %v9208_v30 = vpack.c.bf16 %v2961_v28, %v2960_v27  ;;  %v906_v27 = vld [vmem:[%s14441_s1 + $0x3f0] sm:$0xff]  ;;  %v911_v28 = vld [vmem:[%s14441_s1 + $0x418] sm:$0xff] }
 0x30c   :  { %9209 = vmatprep.subr.bf16.mxu0 %v9208_v30 }
 0x30d   :  { %2221 = vmatmul.mubr.f32.gmra.mrb[236].mxu1 %v794_v31  ;;  %v870_v31 = vld [vmem:[%s14441_s1 + $0x2d0] sm:$0xff]  ;;  %9211 = vmatpush3.bf16.msra.mxu0 %v9208_v30 }
 0x30e   :  { %2225 = vmatprep.mubr.f32.mxu1 %v799_v32  ;;  %v875_v32 = vld [vmem:[%s14441_s1 + $0x2f8] sm:$0xff] }
 0x311   :  { %2226 = vmatmul.mubr.f32.gmra.mrb[238].mxu1 %v798_v33  ;;  %v11642_v33 = vpop.f32.mrb[66].mxu0 }
 0x312   :  { %2230 = vmatprep.mubr.f32.mxu1 %v803_v34 }
 0x315   :  { %2231 = vmatmul.mubr.f32.gmra.mrb[240].mxu1 %v802_v35  ;;  %v1429_v35 = vpop.f32.mrb[67].mxu0 }
 0x316   :  { %2235 = vmatprep.mubr.f32.mxu1 %v807_v36 }
 0x319   :  { %2236 = vmatmul.mubr.f32.gmra.mrb[242].mxu1 %v806_v37  ;;  %v874_v37 = vld [vmem:[%s14441_s1 + $0x2f0] sm:$0xff] }
 0x31a   :  { %2240 = vmatprep.mubr.f32.mxu1 %v811_v38  ;;  %v879_v38 = vld [vmem:[%s14441_s1 + $0x318] sm:$0xff] }
 0x31d   :  { %2241 = vmatmul.mubr.f32.gmra.mrb[244].mxu1 %v810_v39  ;;  %v11652_v39 = vpop.f32.mrb[68].mxu0 }
 0x31e   :  { %2245 = vmatprep.mubr.f32.mxu1 %v815_v40 }
 0x321   :  { %2246 = vmatmul.mubr.f32.gmra.mrb[246].mxu1 %v814_v41  ;;  %v1434_v41 = vpop.f32.mrb[69].mxu0 }
 0x322   :  { %2250 = vmatprep.mubr.f32.mxu1 %v819_v42 }
 0x325   :  { %2251 = vmatmul.mubr.f32.gmra.mrb[248].mxu1 %v818_v43  ;;  %v878_v43 = vld [vmem:[%s14441_s1 + $0x310] sm:$0xff] }
 0x326   :  { %2255 = vmatprep.mubr.f32.mxu1 %v823_v44  ;;  %v883_v44 = vld [vmem:[%s14441_s1 + $0x338] sm:$0xff] }
 0x329   :  { %2256 = vmatmul.mubr.f32.gmra.mrb[250].mxu1 %v822_v45  ;;  %v11662_v45 = vpop.f32.mrb[70].mxu0 }
 0x32a   :  { %2260 = vmatprep.mubr.f32.mxu1 %v827_v46 }
 0x32d   :  { %2261 = vmatmul.mubr.f32.gmra.mrb[252].mxu1 %v826_v47  ;;  %v1439_v47 = vpop.f32.mrb[71].mxu0 }
 0x32e   :  { %2265 = vmatprep.mubr.f32.mxu1 %v831_v48 }
 0x331   :  { %2266 = vmatmul.mubr.f32.gmra.mrb[254].mxu1 %v830_v49  ;;  %v882_v49 = vld [vmem:[%s14441_s1 + $0x330] sm:$0xff] }
 0x332   :  { %2270 = vmatprep.mubr.f32.mxu1 %v835_v50  ;;  %v887_v50 = vld [vmem:[%s14441_s1 + $0x358] sm:$0xff] }
 0x334   :  { %v11556_v53 = vpop.f32.mrb[150].mxu1 }
 0x335   :  { %v1944_v54 = vpop.f32.mrb[151].mxu1  ;;  %2271 = vmatmul.mubr.f32.gmra.mrb[150].mxu1 %v834_v51  ;;  %v11672_v51 = vpop.f32.mrb[72].mxu0 }
 0x336   :  { %2275 = vmatprep.mubr.f32.mxu1 %v839_v52  ;;  %v1444_v54 = vpop.f32.mrb[73].mxu0 }
 0x338   :  { %v11564_v58 = vpop.f32.mrb[152].mxu1 }
 0x339   :  { %v1949_v59 = vpop.f32.mrb[153].mxu1  ;;  %2276 = vmatmul.mubr.f32.gmra.mrb[152].mxu1 %v838_v55 }
 0x33a   :  { %2280 = vmatprep.mubr.f32.mxu1 %v843_v57  ;;  %v886_v57 = vld [vmem:[%s14441_s1 + $0x350] sm:$0xff]  ;;  %v891_v59 = vld [vmem:[%s14441_s1 + $0x378] sm:$0xff] }
 0x33c   :  { %v11572_v62 = vpop.f32.mrb[154].mxu1 }
 0x33d   :  { %v1954_v63 = vpop.f32.mrb[155].mxu1  ;;  %2281 = vmatmul.mubr.f32.gmra.mrb[154].mxu1 %v842_v60  ;;  %v11682_v60 = vpop.f32.mrb[74].mxu0 }
 0x33e   :  { %2285 = vmatprep.mubr.f32.mxu1 %v847_v61  ;;  %v1449_v63 = vpop.f32.mrb[75].mxu0 }
 0x340   :  { %v11580_v1 = vpop.f32.mrb[156].mxu1 }
 0x341   :  { %v1959_v3 = vpop.f32.mrb[157].mxu1  ;;  %2286 = vmatmul.mubr.f32.gmra.mrb[156].mxu1 %v846_v2 }
 0x342   :  { %2290 = vmatprep.mubr.f32.mxu1 %v851_v0  ;;  %v890_v0 = vld [vmem:[%s14441_s1 + $0x370] sm:$0xff]  ;;  %v895_v3 = vld [vmem:[%s14441_s1 + $0x398] sm:$0xff] }
 0x344   :  { %v11588_v5 = vpop.f32.mrb[158].mxu1 }
 0x345   :  { %v1964_v6 = vpop.f32.mrb[159].mxu1  ;;  %2291 = vmatmul.mubr.f32.gmra.mrb[158].mxu1 %v850_v56  ;;  %v11692_v56 = vpop.f32.mrb[76].mxu0 }
 0x346   :  { %2295 = vmatprep.mubr.f32.mxu1 %v855_v4  ;;  %v1454_v6 = vpop.f32.mrb[77].mxu0 }
 0x348   :  { %v11596_v9 = vpop.f32.mrb[160].mxu1 }
 0x349   :  { %v1969_v10 = vpop.f32.mrb[161].mxu1  ;;  %2296 = vmatmul.mubr.f32.gmra.mrb[160].mxu1 %v854_v7 }
 0x34a   :  { %2300 = vmatprep.mubr.f32.mxu1 %v859_v8  ;;  %v894_v8 = vld [vmem:[%s14441_s1 + $0x390] sm:$0xff]  ;;  %v899_v10 = vld [vmem:[%s14441_s1 + $0x3b8] sm:$0xff] }
 0x34c   :  { %v11604_v14 = vpop.f32.mrb[162].mxu1 }
 0x34d   :  { %v1974_v15 = vpop.f32.mrb[163].mxu1  ;;  %2301 = vmatmul.mubr.f32.gmra.mrb[162].mxu1 %v858_v12  ;;  %v11702_v12 = vpop.f32.mrb[78].mxu0 }
 0x34e   :  { %2305 = vmatprep.mubr.f32.mxu1 %v863_v13  ;;  %v1459_v15 = vpop.f32.mrb[79].mxu0 }
 0x34f   :  { %v11712_v20 = vpop.f32.mrb[80].mxu0 }
 0x350   :  { %v11612_v18 = vpop.f32.mrb[164].mxu1 }
 0x351   :  { %v1979_v21 = vpop.f32.mrb[165].mxu1  ;;  %2306 = vmatmul.mubr.f32.gmra.mrb[164].mxu1 %v862_v16 }
 0x352   :  { %2310 = vmatprep.mubr.f32.mxu1 %v867_v17  ;;  %v898_v17 = vld [vmem:[%s14441_s1 + $0x3b0] sm:$0xff]  ;;  %v1464_v21 = vpop.f32.mrb[81].mxu0 }
 0x354   :  { %v11628_v26 = vpop.f32.mrb[166].mxu1 }
 0x355   :  { %v1984_v29 = vpop.f32.mrb[167].mxu1  ;;  %2311 = vmatmul.mubr.f32.gmra.mrb[166].mxu1 %v866_v11  ;;  %v907_v11 = vld [vmem:[%s14441_s1 + $0x3f8] sm:$0xff] }
 0x356   :  { %2315 = vmatprep.mubr.f32.mxu1 %v871_v24  ;;  %v11720_v24 = vpop.f32.mrb[82].mxu0 }
 0x357   :  { %v1469_v25 = vpop.f32.mrb[83].mxu0 }
 0x358   :  { %v11644_v34 = vpop.f32.mrb[168].mxu1  ;;  %v11728_v29 = vpop.f32.mrb[84].mxu0 }
 0x359   :  { %v1989_v36 = vpop.f32.mrb[169].mxu1  ;;  %2316 = vmatmul.mubr.f32.gmra.mrb[168].mxu1 %v870_v31  ;;  %v1474_v30 = vpop.f32.mrb[85].mxu0  ;;  %v910_v31 = vld [vmem:[%s14441_s1 + $0x410] sm:$0xff] }
 0x35a   :  { %2320 = vmatprep.mubr.f32.mxu1 %v875_v32  ;;  %v915_v32 = vld [vmem:[%s14441_s1 + $0x438] sm:$0xff]  ;;  %v11736_v35 = vpop.f32.mrb[86].mxu0 }
 0x35b   :  { %v1479_v36 = vpop.f32.mrb[87].mxu0  ;;  %v947_v30 = vld [vmem:[%s14441_s1 + $0x538] sm:$0xff] }
 0x35c   :  { %v11654_v40 = vpop.f32.mrb[170].mxu1  ;;  %v11744_v41 = vpop.f32.mrb[88].mxu0  ;;  %v946_v36 = vld [vmem:[%s14441_s1 + $0x530] sm:$0xff] }
 0x35d   :  { %v1994_v42 = vpop.f32.mrb[171].mxu1  ;;  %2321 = vmatmul.mubr.f32.gmra.mrb[170].mxu1 %v874_v37  ;;  %v914_v37 = vld [vmem:[%s14441_s1 + $0x430] sm:$0xff] }
 0x35e   :  { %2325 = vmatprep.mubr.f32.mxu1 %v879_v38  ;;  %v919_v38 = vld [vmem:[%s14441_s1 + $0x458] sm:$0xff]  ;;  %v1484_v42 = vpop.f32.mrb[89].mxu0 }
 0x35f   :  { %v11752_v47 = vpop.f32.mrb[90].mxu0 }
 0x360   :  { %v11664_v46 = vpop.f32.mrb[172].mxu1 }
 0x361   :  { %v1999_v48 = vpop.f32.mrb[173].mxu1  ;;  %2326 = vmatmul.mubr.f32.gmra.mrb[172].mxu1 %v878_v43  ;;  %v918_v43 = vld [vmem:[%s14441_s1 + $0x450] sm:$0xff] }
 0x362   :  { %2330 = vmatprep.mubr.f32.mxu1 %v883_v44  ;;  %v923_v44 = vld [vmem:[%s14441_s1 + $0x478] sm:$0xff]  ;;  %v1489_v48 = vpop.f32.mrb[91].mxu0 }
 0x363   :  { %v11760_v54 = vpop.f32.mrb[92].mxu0 }
 0x364   :  { %v11674_v52 = vpop.f32.mrb[174].mxu1 }
 0x365   :  { %v2004_v55 = vpop.f32.mrb[175].mxu1  ;;  %2331 = vmatmul.mubr.f32.gmra.mrb[174].mxu1 %v882_v49  ;;  %v922_v49 = vld [vmem:[%s14441_s1 + $0x470] sm:$0xff] }
 0x366   :  { %2335 = vmatprep.mubr.f32.mxu1 %v887_v50  ;;  %v927_v50 = vld [vmem:[%s14441_s1 + $0x498] sm:$0xff]  ;;  %v1494_v55 = vpop.f32.mrb[93].mxu0 }
 0x367   :  { %v11768_v63 = vpop.f32.mrb[94].mxu0  ;;  %v959_v55 = vld [vmem:[%s14441_s1 + $0x598] sm:$0xff] }
 0x368   :  { %v11684_v61 = vpop.f32.mrb[176].mxu1 }
 0x369   :  { %v2009_v2 = vpop.f32.mrb[177].mxu1  ;;  %2336 = vmatmul.mubr.f32.gmra.mrb[176].mxu1 %v886_v57  ;;  %v926_v57 = vld [vmem:[%s14441_s1 + $0x490] sm:$0xff] }
 0x36a   :  { %2340 = vmatprep.mubr.f32.mxu1 %v891_v59  ;;  %v931_v59 = vld [vmem:[%s14441_s1 + $0x4b8] sm:$0xff]  ;;  %v7696_v2 = vld [vmem:[%s14418_s4 + $0x20] sm:$0xff] }
 0x36c   :  { %v11694_v4 = vpop.f32.mrb[178].mxu1 }
 0x36d   :  { %v2014_v7 = vpop.f32.mrb[179].mxu1  ;;  %2341 = vmatmul.mubr.f32.gmra.mrb[178].mxu1 %v890_v0  ;;  %v7697_v0 = vld [vmem:[%s14418_s4 + $0x28] sm:$0xff] }
 0x36e   :  { %2345 = vmatprep.mubr.f32.mxu1 %v895_v3  ;;  %v1499_v3 = vpop.f32.mrb[95].mxu0  ;;  %v11776_v6 = vpack.c.bf16 %v7697_v0, %v7696_v2  ;;  %v930_v7 = vld [vmem:[%s14441_s1 + $0x4b0] sm:$0xff]  ;;  %v963_v0 = vld [vmem:[%s14441_s1 + $0x5b8] sm:$0xff] }
 0x36f   :  { %v958_v2 = vld [vmem:[%s14441_s1 + $0x590] sm:$0xff] }
 0x370   :  { %v11704_v13 = vpop.f32.mrb[180].mxu1  ;;  %9213 = vmatprep.subr.bf16.mxu0 %v11776_v6 }
 0x371   :  { %v2019_v16 = vpop.f32.mrb[181].mxu1  ;;  %2346 = vmatmul.mubr.f32.gmra.mrb[180].mxu1 %v894_v8  ;;  %v935_v8 = vld [vmem:[%s14441_s1 + $0x4d8] sm:$0xff] }
 0x372   :  { %2350 = vmatprep.mubr.f32.mxu1 %v899_v10  ;;  %v11785_v10 = vpop.f32.mrb[96].mxu0  ;;  %v934_v16 = vld [vmem:[%s14441_s1 + $0x4d0] sm:$0xff] }
 0x373   :  { %v1504_v15 = vpop.f32.mrb[97].mxu0 }
 0x374   :  { %v967_v15 = vld [vmem:[%s14441_s1 + $0x5d8] sm:$0xff] }
 0x375   :  { %2351 = vmatmul.mubr.f32.gmra.mrb[0].mxu1 %v898_v17  ;;  %v939_v17 = vld [vmem:[%s14441_s1 + $0x4f8] sm:$0xff] }
 0x376   :  { %2355 = vmatprep.mubr.f32.mxu1 %v903_v19  ;;  %v11793_v19 = vpop.f32.mrb[98].mxu0 }
 0x377   :  { %v1509_v21 = vpop.f32.mrb[99].mxu0 }
 0x378   :  { %v11801_v25 = vpop.f32.mrb[100].mxu0  ;;  %v966_v21 = vld [vmem:[%s14441_s1 + $0x5d0] sm:$0xff] }
 0x379   :  { %2356 = vmatmul.mubr.f32.gmra.mrb[2].mxu1 %v902_v22  ;;  %v938_v22 = vld [vmem:[%s14441_s1 + $0x4f0] sm:$0xff] }
 0x37a   :  { %2360 = vmatprep.mubr.f32.mxu1 %v907_v11  ;;  %v943_v11 = vld [vmem:[%s14441_s1 + $0x518] sm:$0xff] }
 0x37d   :  { %2361 = vmatmul.mubr.f32.gmra.mrb[4].mxu1 %v906_v27  ;;  %v1514_v27 = vpop.f32.mrb[101].mxu0 }
 0x37e   :  { %2365 = vmatprep.mubr.f32.mxu1 %v911_v28  ;;  %v942_v28 = vld [vmem:[%s14441_s1 + $0x510] sm:$0xff] }
 0x381   :  { %2366 = vmatmul.mubr.f32.gmra.mrb[6].mxu1 %v910_v31  ;;  %v11809_v31 = vpop.f32.mrb[102].mxu0 }
 0x382   :  { %2370 = vmatprep.mubr.f32.mxu1 %v915_v32  ;;  %v1519_v32 = vpop.f32.mrb[103].mxu0 }
 0x385   :  { %2371 = vmatmul.mubr.f32.gmra.mrb[8].mxu1 %v914_v37  ;;  %v951_v37 = vld [vmem:[%s14441_s1 + $0x558] sm:$0xff] }
 0x386   :  { %2375 = vmatprep.mubr.f32.mxu1 %v919_v38  ;;  %v11817_v38 = vpop.f32.mrb[104].mxu0 }
 0x387   :  { %v1524_v42 = vpop.f32.mrb[105].mxu0 }
 0x388   :  { %v11825_v48 = vpop.f32.mrb[106].mxu0  ;;  %v979_v42 = vld [vmem:[%s14441_s1 + $0x638] sm:$0xff] }
 0x389   :  { %2376 = vmatmul.mubr.f32.gmra.mrb[10].mxu1 %v918_v43  ;;  %v950_v43 = vld [vmem:[%s14441_s1 + $0x550] sm:$0xff] }
 0x38a   :  { %2380 = vmatprep.mubr.f32.mxu1 %v923_v44  ;;  %v955_v44 = vld [vmem:[%s14441_s1 + $0x578] sm:$0xff] }
 0x38d   :  { %2381 = vmatmul.mubr.f32.gmra.mrb[12].mxu1 %v922_v49  ;;  %v1529_v49 = vpop.f32.mrb[107].mxu0 }
 0x38e   :  { %2385 = vmatprep.mubr.f32.mxu1 %v927_v50  ;;  %v954_v50 = vld [vmem:[%s14441_s1 + $0x570] sm:$0xff] }
 0x38f   :  { %v978_v49 = vld [vmem:[%s14441_s1 + $0x630] sm:$0xff] }
 0x391   :  { %2386 = vmatmul.mubr.f32.gmra.mrb[14].mxu1 %v926_v57  ;;  %v11833_v57 = vpop.f32.mrb[108].mxu0 }
 0x392   :  { %2390 = vmatprep.mubr.f32.mxu1 %v931_v59  ;;  %v1534_v59 = vpop.f32.mrb[109].mxu0 }
 0x393   :  { %v11841_v3 = vpop.f32.mrb[110].mxu0 }
 0x395   :  { %2391 = vmatmul.mubr.f32.gmra.mrb[16].mxu1 %v930_v7  ;;  %v1539_v7 = vpop.f32.mrb[111].mxu0 }
 0x396   :  { %2395 = vmatprep.mubr.f32.mxu1 %v935_v8  ;;  %v962_v8 = vld [vmem:[%s14441_s1 + $0x5b0] sm:$0xff] }
 0x397   :  { %v986_v7 = vld [vmem:[%s14441_s1 + $0x670] sm:$0xff] }
 0x399   :  { %2396 = vmatmul.mubr.f32.gmra.mrb[18].mxu1 %v934_v16  ;;  %v11849_v16 = vpop.f32.mrb[112].mxu0 }
 0x39a   :  { %2400 = vmatprep.mubr.f32.mxu1 %v939_v17  ;;  %v1544_v17 = vpop.f32.mrb[113].mxu0 }
 0x39b   :  { %v995_v17 = vld [vmem:[%s14441_s1 + $0x6b8] sm:$0xff] }
 0x39d   :  { %2401 = vmatmul.mubr.f32.gmra.mrb[20].mxu1 %v938_v22  ;;  %v971_v22 = vld [vmem:[%s14441_s1 + $0x5f8] sm:$0xff] }
 0x39e   :  { %2405 = vmatprep.mubr.f32.mxu1 %v943_v11  ;;  %v11857_v11 = vpop.f32.mrb[114].mxu0 }
 0x39f   :  { %v1549_v27 = vpop.f32.mrb[115].mxu0 }
 0x3a0   :  { %v11865_v32 = vpop.f32.mrb[116].mxu0 }
 0x3a1   :  { %2406 = vmatmul.mubr.f32.gmra.mrb[22].mxu1 %v942_v28  ;;  %v970_v28 = vld [vmem:[%s14441_s1 + $0x5f0] sm:$0xff] }
 0x3a2   :  { %2410 = vmatprep.mubr.f32.mxu1 %v947_v30  ;;  %v975_v30 = vld [vmem:[%s14441_s1 + $0x618] sm:$0xff] }
 0x3a5   :  { %2411 = vmatmul.mubr.f32.gmra.mrb[24].mxu1 %v946_v36  ;;  %v1554_v36 = vpop.f32.mrb[117].mxu0 }
 0x3a6   :  { %2415 = vmatprep.mubr.f32.mxu1 %v951_v37  ;;  %v974_v37 = vld [vmem:[%s14441_s1 + $0x610] sm:$0xff] }
 0x3a7   :  { %v998_v36 = vld [vmem:[%s14441_s1 + $0x6d0] sm:$0xff] }
 0x3a9   :  { %2416 = vmatmul.mubr.f32.gmra.mrb[26].mxu1 %v950_v43  ;;  %v11873_v43 = vpop.f32.mrb[118].mxu0 }
 0x3aa   :  { %2420 = vmatprep.mubr.f32.mxu1 %v955_v44  ;;  %v1559_v44 = vpop.f32.mrb[119].mxu0 }
 0x3ad   :  { %2421 = vmatmul.mubr.f32.gmra.mrb[28].mxu1 %v954_v50  ;;  %v983_v50 = vld [vmem:[%s14441_s1 + $0x658] sm:$0xff] }
 0x3ae   :  { %2425 = vmatprep.mubr.f32.mxu1 %v959_v55  ;;  %v11881_v55 = vpop.f32.mrb[120].mxu0 }
 0x3af   :  { %v1564_v59 = vpop.f32.mrb[121].mxu0 }
 0x3b1   :  { %2426 = vmatmul.mubr.f32.gmra.mrb[30].mxu1 %v958_v2  ;;  %v982_v2 = vld [vmem:[%s14441_s1 + $0x650] sm:$0xff] }
 0x3b2   :  { %2430 = vmatprep.mubr.f32.mxu1 %v963_v0  ;;  %v987_v0 = vld [vmem:[%s14441_s1 + $0x678] sm:$0xff] }
 0x3b5   :  { %2431 = vmatmul.mubr.f32.gmra.mrb[32].mxu1 %v962_v8  ;;  %v991_v8 = vld [vmem:[%s14441_s1 + $0x698] sm:$0xff] }
 0x3b6   :  { %2435 = vmatprep.mubr.f32.mxu1 %v967_v15  ;;  %v990_v15 = vld [vmem:[%s14441_s1 + $0x690] sm:$0xff] }
 0x3b9   :  { %2436 = vmatmul.mubr.f32.gmra.mrb[34].mxu1 %v966_v21  ;;  %v994_v21 = vld [vmem:[%s14441_s1 + $0x6b0] sm:$0xff] }
 0x3ba   :  { %2440 = vmatprep.mubr.f32.mxu1 %v971_v22  ;;  %v999_v22 = vld [vmem:[%s14441_s1 + $0x6d8] sm:$0xff] }
 0x3bd   :  { %2441 = vmatmul.mubr.f32.gmra.mrb[36].mxu1 %v970_v28 }
 0x3be   :  { %2445 = vmatprep.mubr.f32.mxu1 %v975_v30 }
 0x3c1   :  { %2446 = vmatmul.mubr.f32.gmra.mrb[38].mxu1 %v974_v37  ;;  %v7698_v37 = vld [vmem:[%s14418_s4 + $0x30] sm:$0xff] }
 0x3c2   :  { %2450 = vmatprep.mubr.f32.mxu1 %v979_v42  ;;  %v7699_v42 = vld [vmem:[%s14418_s4 + $0x38] sm:$0xff] }
 0x3c3   :  { %v9216_v59 = vpack.c.bf16 %v7699_v42, %v7698_v37 }
 0x3c5   :  { %2451 = vmatmul.mubr.f32.gmra.mrb[40].mxu1 %v978_v49 }
 0x3c6   :  { %2455 = vmatprep.mubr.f32.mxu1 %v983_v50 }
 0x3c9   :  { %2456 = vmatmul.mubr.f32.gmra.mrb[42].mxu1 %v982_v2  ;;  %v1002_v2 = vld [vmem:[%s14441_s1 + $0x6f0] sm:$0xff] }
 0x3ca   :  { %2460 = vmatprep.mubr.f32.mxu1 %v987_v0  ;;  %v7716_v0 = vld [vmem:[%s14418_s4 + $0x40] sm:$0xff] }
 0x3cd   :  { %2461 = vmatmul.mubr.f32.gmra.mrb[44].mxu1 %v986_v7  ;;  %v7717_v7 = vld [vmem:[%s14418_s4 + $0x48] sm:$0xff] }
 0x3ce   :  { %2465 = vmatprep.mubr.f32.mxu1 %v991_v8 }
 0x3d1   :  { %2466 = vmatmul.mubr.f32.gmra.mrb[46].mxu1 %v990_v15 }
 0x3d2   :  { %2470 = vmatprep.mubr.f32.mxu1 %v995_v17 }
 0x3d4   :  { %v2207_v27 = vpop.f32.mrb[230].mxu1 }
 0x3d5   :  { %v2208_v28 = vadd.f32 %v2207_v27, %v11623_v23  ;;  %v2209_v30 = vpop.f32.mrb[231].mxu1  ;;  %2471 = vmatmul.mubr.f32.gmra.mrb[48].mxu1 %v994_v21  ;;  %v1003_v23 = vld [vmem:[%s14441_s1 + $0x6f8] sm:$0xff]  ;;  %v11937_v21 = vpack.c.bf16 %v7717_v7, %v7716_v0 }
 0x3d6   :  { %2475 = vmatprep.mubr.f32.mxu1 %v999_v22  ;;  %v1006_v22 = vld [vmem:[%s14441_s1 + $0x710] sm:$0xff]  ;;  %v1011_v27 = vld [vmem:[%s14441_s1 + $0x738] sm:$0xff] }
 0x3d7   :  { %8528 = vmatprep.mubr.msk.f32.mxu0 %vm2962_vm1, %v2208_v28  ;;  %v1010_v30 = vld [vmem:[%s14441_s1 + $0x730] sm:$0xff] }
 0x3d8   :  { %v2212_v44 = vpop.f32.mrb[232].mxu1 }
 0x3d9   :  { %v2213_v49 = vadd.f32 %v2212_v44, %v11642_v33  ;;  %v2214_v50 = vpop.f32.mrb[233].mxu1  ;;  %2476 = vmatmul.mubr.f32.gmra.mrb[50].mxu1 %v998_v36  ;;  %v1007_v33 = vld [vmem:[%s14441_s1 + $0x718] sm:$0xff] }
 0x3da   :  { %2480 = vmatprep.mubr.f32.mxu1 %v1003_v23  ;;  %v1015_v36 = vld [vmem:[%s14441_s1 + $0x758] sm:$0xff] }
 0x3db   :  { %8529 = vmatmul.mubr.msk.f32.vlgmr.msra.gmra.mrb[122].mxu0 %vm2962_vm1, %v2213_v49  ;;  %v1019_v44 = vld [vmem:[%s14441_s1 + $0x778] sm:$0xff] }
 0x3dc   :  { %v2217_v8 = vpop.f32.mrb[234].mxu1  ;;  %9215 = vmatpush3.bf16.msra.mxu0 %v11776_v6 }
 0x3dd   :  { %v2218_v15 = vadd.f32 %v2217_v8, %v11652_v39  ;;  %v2219_v17 = vpop.f32.mrb[235].mxu1  ;;  %2481 = vmatmul.mubr.f32.gmra.mrb[52].mxu1 %v1002_v2  ;;  %9217 = vmatprep.subr.bf16.mxu0 %v9216_v59  ;;  %v1023_v2 = vld [vmem:[%s14441_s1 + $0x798] sm:$0xff] }
 0x3de   :  { %2485 = vmatprep.mubr.f32.mxu1 %v1007_v33  ;;  %v1027_v8 = vld [vmem:[%s14441_s1 + $0x7b8] sm:$0xff] }
 0x3df   :  { %8531 = vmatprep.mubr.msk.f32.mxu0 %vm2962_vm1, %v2218_v15 }
 0x3e0   :  { %v2222_v28 = vpop.f32.mrb[236].mxu1  ;;  %9219 = vmatpush3.bf16.msra.mxu0 %v9216_v59 }
 0x3e1   :  { %v2223_v39 = vadd.f32 %v2222_v28, %v11662_v45  ;;  %v2224_v6 = vpop.f32.mrb[237].mxu1  ;;  %2486 = vmatmul.mubr.f32.gmra.mrb[54].mxu1 %v1006_v22  ;;  %9221 = vmatprep.subr.bf16.mxu0 %v11937_v21  ;;  %v1014_v45 = vld [vmem:[%s14441_s1 + $0x750] sm:$0xff] }
 0x3e2   :  { %2490 = vmatprep.mubr.f32.mxu1 %v1011_v27  ;;  %v1031_v27 = vld [vmem:[%s14441_s1 + $0x7d8] sm:$0xff] }
 0x3e3   :  { %8532 = vmatmul.mubr.msk.f32.gmra.mrb[124].mxu0 %vm2962_vm1, %v2223_v39 }
 0x3e4   :  { %v2227_v37 = vpop.f32.mrb[238].mxu1 }
 0x3e5   :  { %v2228_v42 = vadd.f32 %v2227_v37, %v11672_v51  ;;  %v2229_v23 = vpop.f32.mrb[239].mxu1  ;;  %2491 = vmatmul.mubr.f32.gmra.mrb[56].mxu1 %v1010_v30  ;;  %v1018_v51 = vld [vmem:[%s14441_s1 + $0x770] sm:$0xff]  ;;  %v1035_v30 = vld [vmem:[%s14441_s1 + $0x7f8] sm:$0xff] }
 0x3e6   :  { %2495 = vmatprep.mubr.f32.mxu1 %v1015_v36  ;;  %v1039_v23 = vld [vmem:[%s14441_s1 + $0x818] sm:$0xff] }
 0x3e7   :  { %8534 = vmatprep.mubr.msk.f32.mxu0 %vm2962_vm1, %v2228_v42 }
 0x3e8   :  { %v2232_v49 = vpop.f32.mrb[240].mxu1 }
 0x3e9   :  { %v2233_v50 = vadd.f32 %v2232_v49, %v11682_v60  ;;  %v2234_v59 = vpop.f32.mrb[241].mxu1  ;;  %2496 = vmatmul.mubr.f32.gmra.mrb[58].mxu1 %v1014_v45  ;;  %v1022_v60 = vld [vmem:[%s14441_s1 + $0x790] sm:$0xff] }
 0x3ea   :  { %2500 = vmatprep.mubr.f32.mxu1 %v1019_v44 }
 0x3eb   :  { %8535 = vmatmul.mubr.msk.f32.gmra.mrb[126].mxu0 %vm2962_vm1, %v2233_v50  ;;  %v1043_v50 = vld [vmem:[%s14441_s1 + $0x838] sm:$0xff] }
 0x3ec   :  { %v2237_v0 = vpop.f32.mrb[242].mxu1 }
 0x3ed   :  { %v2238_v7 = vadd.f32 %v2237_v0, %v11692_v56  ;;  %v2239_v33 = vpop.f32.mrb[243].mxu1  ;;  %2501 = vmatmul.mubr.f32.gmra.mrb[60].mxu1 %v1018_v51  ;;  %v1026_v56 = vld [vmem:[%s14441_s1 + $0x7b0] sm:$0xff]  ;;  %v1047_v0 = vld [vmem:[%s14441_s1 + $0x858] sm:$0xff] }
 0x3ee   :  { %2505 = vmatprep.mubr.f32.mxu1 %v1023_v2 }
 0x3ef   :  { %8537 = vmatprep.mubr.msk.f32.mxu0 %vm2962_vm1, %v2238_v7 }
 0x3f0   :  { %v2242_v15 = vpop.f32.mrb[244].mxu1 }
 0x3f1   :  { %v2243_v17 = vadd.f32 %v2242_v15, %v11702_v12  ;;  %v2244_v22 = vpop.f32.mrb[245].mxu1  ;;  %2506 = vmatmul.mubr.f32.gmra.mrb[62].mxu1 %v1022_v60  ;;  %v1030_v12 = vld [vmem:[%s14441_s1 + $0x7d0] sm:$0xff] }
 0x3f2   :  { %2510 = vmatprep.mubr.f32.mxu1 %v1027_v8  ;;  %v1051_v8 = vld [vmem:[%s14441_s1 + $0x878] sm:$0xff] }
 0x3f3   :  { %8538 = vmatmul.mubr.msk.f32.gmra.mrb[128].mxu0 %vm2962_vm1, %v2243_v17 }
 0x3f4   :  { %v2247_v28 = vpop.f32.mrb[246].mxu1 }
 0x3f5   :  { %v2248_v39 = vadd.f32 %v2247_v28, %v11712_v20  ;;  %v2249_v6 = vpop.f32.mrb[247].mxu1  ;;  %2511 = vmatmul.mubr.f32.gmra.mrb[64].mxu1 %v1026_v56  ;;  %v1034_v20 = vld [vmem:[%s14441_s1 + $0x7f0] sm:$0xff]  ;;  %v1055_v56 = vld [vmem:[%s14441_s1 + $0x898] sm:$0xff] }
 0x3f6   :  { %2515 = vmatprep.mubr.f32.mxu1 %v1031_v27  ;;  %v1059_v6 = vld [vmem:[%s14441_s1 + $0x8b8] sm:$0xff] }
 0x3f7   :  { %8540 = vmatprep.mubr.msk.f32.mxu0 %vm2962_vm1, %v2248_v39 }
 0x3f8   :  { %v2252_v36 = vpop.f32.mrb[248].mxu1 }
 0x3f9   :  { %v2253_v37 = vadd.f32 %v2252_v36, %v11720_v24  ;;  %v2254_v42 = vpop.f32.mrb[249].mxu1  ;;  %2516 = vmatmul.mubr.f32.gmra.mrb[66].mxu1 %v1030_v12  ;;  %v1038_v24 = vld [vmem:[%s14441_s1 + $0x810] sm:$0xff] }
 0x3fa   :  { %2520 = vmatprep.mubr.f32.mxu1 %v1035_v30 }
 0x3fb   :  { %8541 = vmatmul.mubr.msk.f32.gmra.mrb[130].mxu0 %vm2962_vm1, %v2253_v37  ;;  %v1063_v37 = vld [vmem:[%s14441_s1 + $0x8d8] sm:$0xff] }
 0x3fc   :  { %v2257_v45 = vpop.f32.mrb[250].mxu1 }
 0x3fd   :  { %v2258_v44 = vadd.f32 %v2257_v45, %v11728_v29  ;;  %v2259_v49 = vpop.f32.mrb[251].mxu1  ;;  %2521 = vmatmul.mubr.f32.gmra.mrb[68].mxu1 %v1034_v20  ;;  %v1042_v29 = vld [vmem:[%s14441_s1 + $0x830] sm:$0xff] }
 0x3fe   :  { %2525 = vmatprep.mubr.f32.mxu1 %v1039_v23  ;;  %v7718_v45 = vld [vmem:[%s14418_s4 + $0x50] sm:$0xff] }
 0x3ff   :  { %8543 = vmatprep.mubr.msk.f32.mxu0 %vm2962_vm1, %v2258_v44  ;;  %v7719_v44 = vld [vmem:[%s14418_s4 + $0x58] sm:$0xff] }
 0x400   :  { %v2262_v59 = vpop.f32.mrb[252].mxu1 }
 0x401   :  { %v2263_v51 = vadd.f32 %v2262_v59, %v11736_v35  ;;  %v2264_v2 = vpop.f32.mrb[253].mxu1  ;;  %2526 = vmatmul.mubr.f32.gmra.mrb[70].mxu1 %v1038_v24  ;;  %v1046_v35 = vld [vmem:[%s14441_s1 + $0x850] sm:$0xff]  ;;  %v9224_v59 = vpack.c.bf16 %v7719_v44, %v7718_v45  ;;  %v1095_v45 = vld [vmem:[%s14441_s1 + $0x9d8] sm:$0xff] }
 0x402   :  { %2530 = vmatprep.mubr.f32.mxu1 %v1043_v50  ;;  %v7736_v2 = vld [vmem:[%s14418_s4 + $0x60] sm:$0xff] }
 0x403   :  { %8544 = vmatmul.mubr.msk.f32.gmra.mrb[132].mxu0 %vm2962_vm1, %v2263_v51  ;;  %v1066_v51 = vld [vmem:[%s14441_s1 + $0x8f0] sm:$0xff] }
 0x404   :  { %v2267_v7 = vpop.f32.mrb[254].mxu1 }
 0x405   :  { %v2268_v33 = vadd.f32 %v2267_v7, %v11744_v41  ;;  %v2269_v60 = vpop.f32.mrb[255].mxu1  ;;  %2531 = vmatmul.mubr.f32.gmra.mrb[72].mxu1 %v1042_v29  ;;  %v1050_v41 = vld [vmem:[%s14441_s1 + $0x870] sm:$0xff]  ;;  %v7737_v29 = vld [vmem:[%s14418_s4 + $0x68] sm:$0xff] }
 0x406   :  { %2535 = vmatprep.mubr.f32.mxu1 %v1047_v0  ;;  %v12081_v60 = vpack.c.bf16 %v7737_v29, %v7736_v2  ;;  %v1103_v2 = vld [vmem:[%s14441_s1 + $0xa18] sm:$0xff] }
 0x407   :  { %8546 = vmatprep.mubr.msk.f32.mxu0 %vm2962_vm1, %v2268_v33 }
 0x408   :  { %v2272_v15 = vpop.f32.mrb[150].mxu1 }
 0x409   :  { %v2273_v17 = vadd.f32 %v2272_v15, %v11752_v47  ;;  %v2274_v22 = vpop.f32.mrb[151].mxu1  ;;  %2536 = vmatmul.mubr.f32.gmra.mrb[74].mxu1 %v1046_v35  ;;  %v1054_v47 = vld [vmem:[%s14441_s1 + $0x890] sm:$0xff] }
 0x40a   :  { %2540 = vmatprep.mubr.f32.mxu1 %v1051_v8  ;;  %v1070_v35 = vld [vmem:[%s14441_s1 + $0x910] sm:$0xff]  ;;  %v1075_v8 = vld [vmem:[%s14441_s1 + $0x938] sm:$0xff] }
 0x40b   :  { %8547 = vmatmul.mubr.msk.f32.gmra.mrb[134].mxu0 %vm2962_vm1, %v2273_v17  ;;  %v1074_v17 = vld [vmem:[%s14441_s1 + $0x930] sm:$0xff]  ;;  %v1079_v22 = vld [vmem:[%s14441_s1 + $0x958] sm:$0xff] }
 0x40c   :  { %v2277_v27 = vpop.f32.mrb[152].mxu1 }
 0x40d   :  { %v2278_v28 = vadd.f32 %v2277_v27, %v11760_v54  ;;  %v2279_v39 = vpop.f32.mrb[153].mxu1  ;;  %2541 = vmatmul.mubr.f32.gmra.mrb[76].mxu1 %v1050_v41  ;;  %v1058_v54 = vld [vmem:[%s14441_s1 + $0x8b0] sm:$0xff] }
 0x40e   :  { %2545 = vmatprep.mubr.f32.mxu1 %v1055_v56  ;;  %v10107_v39 = vmov 0.0  }
 0x40f   :  { %8549 = vmatprep.mubr.msk.f32.mxu0 %vm2962_vm1, %v2278_v28  ;;  %v1083_v28 = vld [vmem:[%s14441_s1 + $0x978] sm:$0xff]  ;;  %2927 = vst.msk [vmem:[#allocation2 + $0x8] sm:$0xff] %vm138_vm0, %v10107_v39  ;;  %2926 = vst.msk [vmem:[#allocation2] sm:$0xff] %vm138_vm0, %v10107_v39 }
 0x410   :  { %v2282_v12 = vpop.f32.mrb[154].mxu1  ;;  %2928 = vst.msk [vmem:[#allocation2 + $0x10] sm:$0xff] %vm138_vm0, %v10107_v39  ;;  %2929 = vst.msk [vmem:[#allocation2 + $0x18] sm:$0xff] %vm138_vm0, %v10107_v39 }
 0x411   :  { %v2283_v30 = vadd.f32 %v2282_v12, %v11768_v63  ;;  %v2284_v36 = vpop.f32.mrb[155].mxu1  ;;  %2546 = vmatmul.mubr.f32.gmra.mrb[78].mxu1 %v1054_v47  ;;  %v1062_v63 = vld [vmem:[%s14441_s1 + $0x8d0] sm:$0xff]  ;;  %2930 = vst.msk [vmem:[#allocation2 + $0x20] sm:$0xff] %vm138_vm0, %v10107_v39  ;;  %2931 = vst.msk [vmem:[#allocation2 + $0x28] sm:$0xff] %vm138_vm0, %v10107_v39 }
 0x412   :  { %2550 = vmatprep.mubr.f32.mxu1 %v1059_v6  ;;  %2932 = vst.msk [vmem:[#allocation2 + $0x30] sm:$0xff] %vm138_vm0, %v10107_v39  ;;  %2933 = vst.msk [vmem:[#allocation2 + $0x38] sm:$0xff] %vm138_vm0, %v10107_v39  ;;  %v1082_v12 = vld [vmem:[%s14441_s1 + $0x970] sm:$0xff] }
 0x413   :  { %8550 = vmatmul.mubr.msk.f32.gmra.mrb[136].mxu0 %vm2962_vm1, %v2283_v30  ;;  %2934 = vst.msk [vmem:[#allocation2 + $0x40] sm:$0xff] %vm138_vm0, %v10107_v39  ;;  %2935 = vst.msk [vmem:[#allocation2 + $0x48] sm:$0xff] %vm138_vm0, %v10107_v39  ;;  %v1087_v30 = vld [vmem:[%s14441_s1 + $0x998] sm:$0xff] }
 0x414   :  { %v2287_v42 = vpop.f32.mrb[156].mxu1  ;;  %2936 = vst.msk [vmem:[#allocation2 + $0x50] sm:$0xff] %vm138_vm0, %v10107_v39  ;;  %2937 = vst.msk [vmem:[#allocation2 + $0x58] sm:$0xff] %vm138_vm0, %v10107_v39 }
 0x415   :  { %v2288_v20 = vadd.f32 %v2287_v42, %v11785_v10  ;;  %v2289_v23 = vpop.f32.mrb[157].mxu1  ;;  %2551 = vmatmul.mubr.f32.gmra.mrb[80].mxu1 %v1058_v54  ;;  %v1067_v10 = vld [vmem:[%s14441_s1 + $0x8f8] sm:$0xff]  ;;  %2938 = vst.msk [vmem:[#allocation2 + $0x60] sm:$0xff] %vm138_vm0, %v10107_v39  ;;  %2939 = vst.msk [vmem:[#allocation2 + $0x68] sm:$0xff] %vm138_vm0, %v10107_v39 }
 0x416   :  { %2555 = vmatprep.mubr.f32.mxu1 %v1063_v37  ;;  %2940 = vst.msk [vmem:[#allocation2 + $0x70] sm:$0xff] %vm138_vm0, %v10107_v39  ;;  %2941 = vst.msk [vmem:[#allocation2 + $0x78] sm:$0xff] %vm138_vm0, %v10107_v39  ;;  %v1091_v42 = vld [vmem:[%s14441_s1 + $0x9b8] sm:$0xff] }
 0x417   :  { %8560 = vmatprep.mubr.msk.f32.mxu0 %vm2962_vm1, %v2288_v20 }
 0x418   :  { %v2292_v49 = vpop.f32.mrb[158].mxu1 }
 0x419   :  { %v2293_v24 = vadd.f32 %v2292_v49, %v11793_v19  ;;  %v2294_v50 = vpop.f32.mrb[159].mxu1  ;;  %2556 = vmatmul.mubr.f32.gmra.mrb[82].mxu1 %v1062_v63  ;;  %v1071_v19 = vld [vmem:[%s14441_s1 + $0x918] sm:$0xff] }
 0x41a   :  { %2560 = vmatprep.mubr.f32.mxu1 %v1067_v10 }
 0x41b   :  { %8561 = vmatmul.mubr.msk.f32.vlgmr.msra.gmra.mrb[138].mxu0 %vm2962_vm1, %v2293_v24  ;;  %v1099_v24 = vld [vmem:[%s14441_s1 + $0x9f8] sm:$0xff] }
 0x41c   :  { %v2297_v0 = vpop.f32.mrb[160].mxu1  ;;  %9223 = vmatpush3.bf16.msra.mxu0 %v11937_v21 }
 0x41d   :  { %v2298_v7 = vadd.f32 %v2297_v0, %v11801_v25  ;;  %v2299_v33 = vpop.f32.mrb[161].mxu1  ;;  %2561 = vmatmul.mubr.f32.gmra.mrb[84].mxu1 %v1066_v51  ;;  %9225 = vmatprep.subr.bf16.mxu0 %v9224_v59 }
 0x41e   :  { %2565 = vmatprep.mubr.f32.mxu1 %v1071_v19 }
 0x41f   :  { %8563 = vmatprep.mubr.msk.f32.mxu0 %vm2962_vm1, %v2298_v7  ;;  %v1107_v7 = vld [vmem:[%s14441_s1 + $0xa38] sm:$0xff] }
 0x420   :  { %v2302_v15 = vpop.f32.mrb[162].mxu1  ;;  %9227 = vmatpush3.bf16.msra.mxu0 %v9224_v59 }
 0x421   :  { %v2303_v25 = vadd.f32 %v2302_v15, %v11809_v31  ;;  %v2304_v21 = vpop.f32.mrb[163].mxu1  ;;  %2566 = vmatmul.mubr.f32.gmra.mrb[86].mxu1 %v1070_v35  ;;  %9229 = vmatprep.subr.bf16.mxu0 %v12081_v60  ;;  %v1078_v31 = vld [vmem:[%s14441_s1 + $0x950] sm:$0xff]  ;;  %v1111_v15 = vld [vmem:[%s14441_s1 + $0xa58] sm:$0xff] }
 0x422   :  { %2570 = vmatprep.mubr.f32.mxu1 %v1075_v8 }
 0x423   :  { %8564 = vmatmul.mubr.msk.f32.gmra.mrb[140].mxu0 %vm2962_vm1, %v2303_v25 }
 0x424   :  { %v2307_v41 = vpop.f32.mrb[164].mxu1 }
 0x425   :  { %v2308_v56 = vadd.f32 %v2307_v41, %v11817_v38  ;;  %v2309_v27 = vpop.f32.mrb[165].mxu1  ;;  %2571 = vmatmul.mubr.f32.gmra.mrb[88].mxu1 %v1074_v17 }
 0x426   :  { %2575 = vmatprep.mubr.f32.mxu1 %v1079_v22  ;;  %v1115_v22 = vld [vmem:[%s14441_s1 + $0xa78] sm:$0xff] }
 0x427   :  { %8566 = vmatprep.mubr.msk.f32.mxu0 %vm2962_vm1, %v2308_v56  ;;  %v1119_v27 = vld [vmem:[%s14441_s1 + $0xa98] sm:$0xff] }
 0x428   :  { %v2312_v38 = vpop.f32.mrb[166].mxu1 }
 0x429   :  { %v2313_v47 = vadd.f32 %v2312_v38, %v11825_v48  ;;  %v2314_v6 = vpop.f32.mrb[167].mxu1  ;;  %2576 = vmatmul.mubr.f32.gmra.mrb[90].mxu1 %v1078_v31  ;;  %v1086_v48 = vld [vmem:[%s14441_s1 + $0x990] sm:$0xff] }
 0x42a   :  { %2580 = vmatprep.mubr.f32.mxu1 %v1083_v28  ;;  %v1118_v38 = vld [vmem:[%s14441_s1 + $0xa90] sm:$0xff] }
 0x42b   :  { %8567 = vmatmul.mubr.msk.f32.gmra.mrb[142].mxu0 %vm2962_vm1, %v2313_v47  ;;  %v1123_v47 = vld [vmem:[%s14441_s1 + $0xab8] sm:$0xff] }
 0x42c   :  { %v2317_v36 = vpop.f32.mrb[168].mxu1 }
 0x42d   :  { %v2318_v54 = vadd.f32 %v2317_v36, %v11833_v57  ;;  %v2319_v37 = vpop.f32.mrb[169].mxu1  ;;  %2581 = vmatmul.mubr.f32.gmra.mrb[92].mxu1 %v1082_v12  ;;  %v1090_v57 = vld [vmem:[%s14441_s1 + $0x9b0] sm:$0xff]  ;;  %v1127_v36 = vld [vmem:[%s14441_s1 + $0xad8] sm:$0xff] }
 0x42e   :  { %2585 = vmatprep.mubr.f32.mxu1 %v1087_v30  ;;  %v1122_v30 = vld [vmem:[%s14441_s1 + $0xab0] sm:$0xff] }
 0x42f   :  { %8569 = vmatprep.mubr.msk.f32.mxu0 %vm2962_vm1, %v2318_v54  ;;  %v7738_v37 = vld [vmem:[%s14418_s4 + $0x70] sm:$0xff] }
 0x430   :  { %v2322_v20 = vpop.f32.mrb[170].mxu1 }
 0x431   :  { %v2323_v23 = vadd.f32 %v2322_v20, %v11841_v3  ;;  %v2324_v63 = vpop.f32.mrb[171].mxu1  ;;  %2586 = vmatmul.mubr.f32.gmra.mrb[94].mxu1 %v1086_v48  ;;  %v1094_v3 = vld [vmem:[%s14441_s1 + $0x9d0] sm:$0xff]  ;;  %v7739_v48 = vld [vmem:[%s14418_s4 + $0x78] sm:$0xff] }
 0x432   :  { %2590 = vmatprep.mubr.f32.mxu1 %v1091_v42  ;;  %v1126_v20 = vld [vmem:[%s14441_s1 + $0xad0] sm:$0xff]  ;;  %v9232_v63 = vpack.c.bf16 %v7739_v48, %v7738_v37  ;;  %v1171_v48 = vld [vmem:[%s14441_s1 + $0xc38] sm:$0xff] }
 0x433   :  { %8570 = vmatmul.mubr.msk.f32.gmra.mrb[144].mxu0 %vm2962_vm1, %v2323_v23  ;;  %v1131_v23 = vld [vmem:[%s14441_s1 + $0xaf8] sm:$0xff]  ;;  %v1166_v37 = vld [vmem:[%s14441_s1 + $0xc10] sm:$0xff] }
 0x434   :  { %v2327_v44 = vpop.f32.mrb[172].mxu1 }
 0x435   :  { %v2328_v10 = vadd.f32 %v2327_v44, %v11849_v16  ;;  %v2329_v49 = vpop.f32.mrb[173].mxu1  ;;  %2591 = vmatmul.mubr.f32.gmra.mrb[96].mxu1 %v1090_v57  ;;  %v1098_v16 = vld [vmem:[%s14441_s1 + $0x9f0] sm:$0xff]  ;;  %v7757_v44 = vld [vmem:[%s14418_s4 + $0x88] sm:$0xff] }
 0x436   :  { %2595 = vmatprep.mubr.f32.mxu1 %v1095_v45  ;;  %v7756_v45 = vld [vmem:[%s14418_s4 + $0x80] sm:$0xff]  ;;  %v1130_v49 = vld [vmem:[%s14441_s1 + $0xaf0] sm:$0xff] }
 0x437   :  { %8572 = vmatprep.mubr.msk.f32.mxu0 %vm2962_vm1, %v2328_v10 }
 0x438   :  { %v2332_v50 = vpop.f32.mrb[174].mxu1 }
 0x439   :  { %v2333_v59 = vadd.f32 %v2332_v50, %v11857_v11  ;;  %v2334_v51 = vpop.f32.mrb[175].mxu1  ;;  %2596 = vmatmul.mubr.f32.gmra.mrb[98].mxu1 %v1094_v3  ;;  %v1102_v11 = vld [vmem:[%s14441_s1 + $0xa10] sm:$0xff]  ;;  %v1135_v3 = vld [vmem:[%s14441_s1 + $0xb18] sm:$0xff] }
 0x43a   :  { %2600 = vmatprep.mubr.f32.mxu1 %v1099_v24  ;;  %v12251_v24 = vpack.c.bf16 %v7757_v44, %v7756_v45  ;;  %v1134_v51 = vld [vmem:[%s14441_s1 + $0xb10] sm:$0xff] }
 0x43b   :  { %8573 = vmatmul.mubr.msk.f32.gmra.mrb[146].mxu0 %vm2962_vm1, %v2333_v59  ;;  %v1174_v44 = vld [vmem:[%s14441_s1 + $0xc50] sm:$0xff] }
 0x43c   :  { %v2337_v29 = vpop.f32.mrb[176].mxu1 }
 0x43d   :  { %v2338_v19 = vadd.f32 %v2337_v29, %v11865_v32  ;;  %v2339_v0 = vpop.f32.mrb[177].mxu1  ;;  %2601 = vmatmul.mubr.f32.gmra.mrb[100].mxu1 %v1098_v16  ;;  %v1106_v32 = vld [vmem:[%s14441_s1 + $0xa30] sm:$0xff] }
 0x43e   :  { %2605 = vmatprep.mubr.f32.mxu1 %v1103_v2  ;;  %v1138_v29 = vld [vmem:[%s14441_s1 + $0xb30] sm:$0xff] }
 0x43f   :  { %8575 = vmatprep.mubr.msk.f32.mxu0 %vm2962_vm1, %v2338_v19  ;;  %v1143_v19 = vld [vmem:[%s14441_s1 + $0xb58] sm:$0xff] }
 0x440   :  { %v2342_v33 = vpop.f32.mrb[178].mxu1 }
 0x441   :  { %v2343_v35 = vadd.f32 %v2342_v33, %v11873_v43  ;;  %v2344_v8 = vpop.f32.mrb[179].mxu1  ;;  %2606 = vmatmul.mubr.f32.gmra.mrb[102].mxu1 %v1102_v11  ;;  %v1110_v43 = vld [vmem:[%s14441_s1 + $0xa50] sm:$0xff]  ;;  %v1147_v33 = vld [vmem:[%s14441_s1 + $0xb78] sm:$0xff] }
 0x442   :  { %2610 = vmatprep.mubr.f32.mxu1 %v1107_v7  ;;  %v1142_v7 = vld [vmem:[%s14441_s1 + $0xb50] sm:$0xff] }
 0x443   :  { %8576 = vmatmul.mubr.msk.f32.gmra.mrb[148].mxu0 %vm2962_vm1, %v2343_v35 }
 0x444   :  { %v2347_v25 = vpop.f32.mrb[180].mxu1 }
 0x445   :  { %v2348_v21 = vadd.f32 %v2347_v25, %v11881_v55  ;;  %v2349_v17 = vpop.f32.mrb[181].mxu1  ;;  %2611 = vmatmul.mubr.f32.gmra.mrb[104].mxu1 %v1106_v32  ;;  %v1114_v55 = vld [vmem:[%s14441_s1 + $0xa70] sm:$0xff] }
 0x446   :  { %2615 = vmatprep.mubr.f32.mxu1 %v1111_v15  ;;  %v1146_v32 = vld [vmem:[%s14441_s1 + $0xb70] sm:$0xff]  ;;  %v1151_v15 = vld [vmem:[%s14441_s1 + $0xb98] sm:$0xff] }
 0x447   :  { %8578 = vmatprep.mubr.msk.f32.mxu0 %vm2962_vm1, %v2348_v21  ;;  %v1150_v17 = vld [vmem:[%s14441_s1 + $0xb90] sm:$0xff] }
 0x448   :  { %v2352_v41 = vpop.f32.mrb[0].mxu1 }
 0x449   :  { %v2354_v56 = vpop.f32.mrb[1].mxu1  ;;  %2616 = vmatmul.mubr.f32.gmra.mrb[106].mxu1 %v1110_v43  ;;  %8579 = vmatmul.mubr.msk.f32.gmra.mrb[150].mxu0 %vm2962_vm1, %v2352_v41  ;;  %v1155_v43 = vld [vmem:[%s14441_s1 + $0xbb8] sm:$0xff] }
 0x44a   :  { %2620 = vmatprep.mubr.f32.mxu1 %v1115_v22  ;;  %v1154_v56 = vld [vmem:[%s14441_s1 + $0xbb0] sm:$0xff] }
 0x44c   :  { %v2357_v31 = vpop.f32.mrb[2].mxu1 }
 0x44d   :  { %v2359_v28 = vpop.f32.mrb[3].mxu1  ;;  %2621 = vmatmul.mubr.f32.gmra.mrb[108].mxu1 %v1114_v55  ;;  %8581 = vmatprep.mubr.msk.f32.mxu0 %vm2962_vm1, %v2357_v31  ;;  %v1159_v55 = vld [vmem:[%s14441_s1 + $0xbd8] sm:$0xff] }
 0x44e   :  { %2625 = vmatprep.mubr.f32.mxu1 %v1119_v27  ;;  %v1158_v28 = vld [vmem:[%s14441_s1 + $0xbd0] sm:$0xff] }
 0x450   :  { %v2362_v6 = vpop.f32.mrb[4].mxu1 }
 0x451   :  { %v2364_v12 = vpop.f32.mrb[5].mxu1  ;;  %2626 = vmatmul.mubr.f32.gmra.mrb[110].mxu1 %v1118_v38  ;;  %8582 = vmatmul.mubr.msk.f32.gmra.mrb[152].mxu0 %vm2962_vm1, %v2362_v6  ;;  %v1163_v38 = vld [vmem:[%s14441_s1 + $0xbf8] sm:$0xff] }
 0x452   :  { %2630 = vmatprep.mubr.f32.mxu1 %v1123_v47  ;;  %v1162_v12 = vld [vmem:[%s14441_s1 + $0xbf0] sm:$0xff] }
 0x454   :  { %v2367_v54 = vpop.f32.mrb[6].mxu1 }
 0x455   :  { %v2369_v42 = vpop.f32.mrb[7].mxu1  ;;  %2631 = vmatmul.mubr.f32.gmra.mrb[112].mxu1 %v1122_v30  ;;  %8592 = vmatprep.mubr.msk.f32.mxu0 %vm2962_vm1, %v2367_v54  ;;  %v1167_v30 = vld [vmem:[%s14441_s1 + $0xc18] sm:$0xff] }
 0x456   :  { %2635 = vmatprep.mubr.f32.mxu1 %v1127_v36 }
 0x458   :  { %v2372_v57 = vpop.f32.mrb[8].mxu1 }
 0x459   :  { %v2374_v10 = vpop.f32.mrb[9].mxu1  ;;  %2636 = vmatmul.mubr.f32.gmra.mrb[114].mxu1 %v1126_v20  ;;  %8593 = vmatmul.mubr.msk.f32.vlgmr.msra.gmra.mrb[154].mxu0 %vm2962_vm1, %v2372_v57 }
 0x45a   :  { %2640 = vmatprep.mubr.f32.mxu1 %v1131_v23  ;;  %9231 = vmatpush3.bf16.msra.mxu0 %v12081_v60  ;;  %v1139_v60 = vld [vmem:[%s14441_s1 + $0xb38] sm:$0xff]  ;;  %v1170_v23 = vld [vmem:[%s14441_s1 + $0xc30] sm:$0xff] }
 0x45b   :  { %9233 = vmatprep.subr.bf16.mxu0 %v9232_v63  ;;  %v1179_v10 = vld [vmem:[%s14441_s1 + $0xc78] sm:$0xff] }
 0x45c   :  { %v2377_v50 = vpop.f32.mrb[10].mxu1 }
 0x45d   :  { %v2379_v59 = vpop.f32.mrb[11].mxu1  ;;  %2641 = vmatmul.mubr.f32.gmra.mrb[116].mxu1 %v1130_v49  ;;  %8595 = vmatprep.mubr.msk.f32.mxu0 %vm2962_vm1, %v2377_v50  ;;  %v1178_v50 = vld [vmem:[%s14441_s1 + $0xc70] sm:$0xff] }
 0x45e   :  { %2645 = vmatprep.mubr.f32.mxu1 %v1135_v3  ;;  %9235 = vmatpush3.bf16.msra.mxu0 %v9232_v63  ;;  %v1175_v63 = vld [vmem:[%s14441_s1 + $0xc58] sm:$0xff] }
 0x45f   :  { %9237 = vmatprep.subr.bf16.mxu0 %v12251_v24  ;;  %v1183_v59 = vld [vmem:[%s14441_s1 + $0xc98] sm:$0xff] }
 0x460   :  { %v2382_v16 = vpop.f32.mrb[12].mxu1 }
 0x461   :  { %v2384_v2 = vpop.f32.mrb[13].mxu1  ;;  %2646 = vmatmul.mubr.f32.gmra.mrb[118].mxu1 %v1134_v51  ;;  %8596 = vmatmul.mubr.msk.f32.gmra.mrb[156].mxu0 %vm2962_vm1, %v2382_v16  ;;  %v1182_v16 = vld [vmem:[%s14441_s1 + $0xc90] sm:$0xff] }
 0x462   :  { %2650 = vmatprep.mubr.f32.mxu1 %v1139_v60  ;;  %v1187_v2 = vld [vmem:[%s14441_s1 + $0xcb8] sm:$0xff] }
 0x464   :  { %v2387_v0 = vpop.f32.mrb[14].mxu1 }
 0x465   :  { %v2389_v11 = vpop.f32.mrb[15].mxu1  ;;  %2651 = vmatmul.mubr.f32.gmra.mrb[120].mxu1 %v1138_v29  ;;  %8598 = vmatprep.mubr.msk.f32.mxu0 %vm2962_vm1, %v2387_v0  ;;  %v1186_v0 = vld [vmem:[%s14441_s1 + $0xcb0] sm:$0xff] }
 0x466   :  { %2655 = vmatprep.mubr.f32.mxu1 %v1143_v19  ;;  %v1191_v11 = vld [vmem:[%s14441_s1 + $0xcd8] sm:$0xff] }
 0x468   :  { %v2392_v35 = vpop.f32.mrb[16].mxu1 }
 0x469   :  { %v2394_v8 = vpop.f32.mrb[17].mxu1  ;;  %2656 = vmatmul.mubr.f32.gmra.mrb[122].mxu1 %v1142_v7  ;;  %8599 = vmatmul.mubr.msk.f32.gmra.mrb[158].mxu0 %vm2962_vm1, %v2392_v35  ;;  %v7759_v35 = vld [vmem:[%s14418_s4 + $0x98] sm:$0xff] }
 0x46a   :  { %2660 = vmatprep.mubr.f32.mxu1 %v1147_v33  ;;  %v7758_v33 = vld [vmem:[%s14418_s4 + $0x90] sm:$0xff] }
 0x46c   :  { %v2397_v25 = vpop.f32.mrb[18].mxu1 }
 0x46d   :  { %v2399_v21 = vpop.f32.mrb[19].mxu1  ;;  %2661 = vmatmul.mubr.f32.gmra.mrb[124].mxu1 %v1146_v32  ;;  %8601 = vmatprep.mubr.msk.f32.mxu0 %vm2962_vm1, %v2397_v25  ;;  %v1190_v32 = vld [vmem:[%s14441_s1 + $0xcd0] sm:$0xff]  ;;  %v9240_v25 = vpack.c.bf16 %v7759_v35, %v7758_v33 }
 0x46e   :  { %2665 = vmatprep.mubr.f32.mxu1 %v1151_v15  ;;  %v1195_v15 = vld [vmem:[%s14441_s1 + $0xcf8] sm:$0xff]  ;;  %v1222_v35 = vld [vmem:[%s14441_s1 + $0xdd0] sm:$0xff] }
 0x470   :  { %v2402_v22 = vpop.f32.mrb[20].mxu1 }
 0x471   :  { %v2404_v41 = vpop.f32.mrb[21].mxu1  ;;  %2666 = vmatmul.mubr.f32.gmra.mrb[126].mxu1 %v1150_v17  ;;  %8602 = vmatmul.mubr.msk.f32.gmra.mrb[160].mxu0 %vm2962_vm1, %v2402_v22  ;;  %v7776_v17 = vld [vmem:[%s14418_s4 + $0xa0] sm:$0xff] }
 0x472   :  { %2670 = vmatprep.mubr.f32.mxu1 %v1155_v43  ;;  %v7777_v43 = vld [vmem:[%s14418_s4 + $0xa8] sm:$0xff]  ;;  %v1194_v41 = vld [vmem:[%s14441_s1 + $0xcf0] sm:$0xff] }
 0x474   :  { %v2407_v27 = vpop.f32.mrb[22].mxu1 }
 0x475   :  { %v2409_v31 = vpop.f32.mrb[23].mxu1  ;;  %2671 = vmatmul.mubr.f32.gmra.mrb[128].mxu1 %v1154_v56  ;;  %8604 = vmatprep.mubr.msk.f32.mxu0 %vm2962_vm1, %v2407_v27  ;;  %v1199_v56 = vld [vmem:[%s14441_s1 + $0xd18] sm:$0xff] }
 0x476   :  { %2675 = vmatprep.mubr.f32.mxu1 %v1159_v55  ;;  %v12379_v55 = vpack.c.bf16 %v7777_v43, %v7776_v17  ;;  %v1226_v43 = vld [vmem:[%s14441_s1 + $0xdf0] sm:$0xff] }
 0x478   :  { %v2412_v47 = vpop.f32.mrb[24].mxu1 }
 0x479   :  { %v2414_v6 = vpop.f32.mrb[25].mxu1  ;;  %2676 = vmatmul.mubr.f32.gmra.mrb[130].mxu1 %v1158_v28  ;;  %8605 = vmatmul.mubr.msk.f32.gmra.mrb[162].mxu0 %vm2962_vm1, %v2412_v47  ;;  %v1198_v28 = vld [vmem:[%s14441_s1 + $0xd10] sm:$0xff] }
 0x47a   :  { %2680 = vmatprep.mubr.f32.mxu1 %v1163_v38  ;;  %v1202_v6 = vld [vmem:[%s14441_s1 + $0xd30] sm:$0xff] }
 0x47c   :  { %v2417_v36 = vpop.f32.mrb[26].mxu1 }
 0x47d   :  { %v2419_v54 = vpop.f32.mrb[27].mxu1  ;;  %2681 = vmatmul.mubr.f32.gmra.mrb[132].mxu1 %v1162_v12  ;;  %8607 = vmatprep.mubr.msk.f32.mxu0 %vm2962_vm1, %v2417_v36  ;;  %v1207_v12 = vld [vmem:[%s14441_s1 + $0xd58] sm:$0xff] }
 0x47e   :  { %2685 = vmatprep.mubr.f32.mxu1 %v1167_v30  ;;  %v1206_v54 = vld [vmem:[%s14441_s1 + $0xd50] sm:$0xff] }
 0x480   :  { %v2422_v42 = vpop.f32.mrb[28].mxu1 }
 0x481   :  { %v2424_v20 = vpop.f32.mrb[29].mxu1  ;;  %2686 = vmatmul.mubr.f32.gmra.mrb[134].mxu1 %v1166_v37  ;;  %8608 = vmatmul.mubr.msk.f32.gmra.mrb[164].mxu0 %vm2962_vm1, %v2422_v42  ;;  %v1211_v37 = vld [vmem:[%s14441_s1 + $0xd78] sm:$0xff] }
 0x482   :  { %2690 = vmatprep.mubr.f32.mxu1 %v1171_v48  ;;  %v1210_v20 = vld [vmem:[%s14441_s1 + $0xd70] sm:$0xff] }
 0x484   :  { %v2427_v57 = vpop.f32.mrb[30].mxu1 }
 0x485   :  { %v2429_v45 = vpop.f32.mrb[31].mxu1  ;;  %2691 = vmatmul.mubr.f32.gmra.mrb[136].mxu1 %v1170_v23  ;;  %8610 = vmatprep.mubr.msk.f32.mxu0 %vm2962_vm1, %v2427_v57  ;;  %v1215_v23 = vld [vmem:[%s14441_s1 + $0xd98] sm:$0xff]  ;;  %v2943_v57 = vld [vmem:[#allocation2 + $0x8] sm:$0xff] }
 0x486   :  { %2695 = vmatprep.mubr.f32.mxu1 %v1175_v63 }
 0x488   :  { %v2432_v49 = vpop.f32.mrb[32].mxu1 }
 0x489   :  { %v2434_v3 = vpop.f32.mrb[33].mxu1  ;;  %2696 = vmatmul.mubr.f32.gmra.mrb[138].mxu1 %v1174_v44  ;;  %8611 = vmatmul.mubr.msk.f32.gmra.mrb[166].mxu0 %vm2962_vm1, %v2432_v49  ;;  %v2942_v44 = vld [vmem:[#allocation2] sm:$0xff]  ;;  %v1214_v49 = vld [vmem:[%s14441_s1 + $0xd90] sm:$0xff] }
 0x48a   :  { %2700 = vmatprep.mubr.f32.mxu1 %v1179_v10 }
 0x48c   :  { %v2437_v51 = vpop.f32.mrb[34].mxu1 }
 0x48d   :  { %v2439_v60 = vpop.f32.mrb[35].mxu1  ;;  %2701 = vmatmul.mubr.f32.gmra.mrb[140].mxu1 %v1178_v50  ;;  %8613 = vmatprep.mubr.msk.f32.mxu0 %vm2962_vm1, %v2437_v51 }
 0x48e   :  { %2705 = vmatprep.mubr.f32.mxu1 %v1183_v59  ;;  %v1219_v59 = vld [vmem:[%s14441_s1 + $0xdb8] sm:$0xff] }
 0x490   :  { %v2442_v29 = vpop.f32.mrb[36].mxu1 }
 0x491   :  { %v2444_v19 = vpop.f32.mrb[37].mxu1  ;;  %2706 = vmatmul.mubr.f32.gmra.mrb[142].mxu1 %v1182_v16  ;;  %8614 = vmatmul.mubr.msk.f32.gmra.mrb[168].mxu0 %vm2962_vm1, %v2442_v29  ;;  %v1223_v29 = vld [vmem:[%s14441_s1 + $0xdd8] sm:$0xff] }
 0x492   :  { %2710 = vmatprep.mubr.f32.mxu1 %v1187_v2  ;;  %v1218_v2 = vld [vmem:[%s14441_s1 + $0xdb0] sm:$0xff] }
 0x494   :  { %v2447_v7 = vpop.f32.mrb[38].mxu1 }
 0x495   :  { %v2449_v8 = vpop.f32.mrb[39].mxu1  ;;  %2711 = vmatmul.mubr.f32.gmra.mrb[144].mxu1 %v1186_v0  ;;  %8624 = vmatprep.mubr.msk.f32.mxu0 %vm2962_vm1, %v2447_v7  ;;  %v2945_v0 = vld [vmem:[#allocation2 + $0x18] sm:$0xff]  ;;  %v2944_v7 = vld [vmem:[#allocation2 + $0x10] sm:$0xff] }
 0x496   :  { %2715 = vmatprep.mubr.f32.mxu1 %v1191_v11 }
 0x498   :  { %v2452_v21 = vpop.f32.mrb[40].mxu1 }
 0x499   :  { %v2454_v22 = vpop.f32.mrb[41].mxu1  ;;  %2716 = vmatmul.mubr.f32.gmra.mrb[146].mxu1 %v1190_v32  ;;  %8625 = vmatmul.mubr.msk.f32.vlgmr.msra.gmra.mrb[170].mxu0 %vm2962_vm1, %v2452_v21 }
 0x49a   :  { %2720 = vmatprep.mubr.f32.mxu1 %v1195_v15  ;;  %9239 = vmatpush3.bf16.msra.mxu0 %v12251_v24  ;;  %v1203_v24 = vld [vmem:[%s14441_s1 + $0xd38] sm:$0xff] }
 0x49b   :  { %9241 = vmatprep.subr.bf16.mxu0 %v9240_v25  ;;  %v1227_v15 = vld [vmem:[%s14441_s1 + $0xdf8] sm:$0xff] }
 0x49c   :  { %v2457_v27 = vpop.f32.mrb[42].mxu1  ;;  %v1231_v22 = vld [vmem:[%s14441_s1 + $0xe18] sm:$0xff] }
 0x49d   :  { %v2459_v31 = vpop.f32.mrb[43].mxu1  ;;  %2721 = vmatmul.mubr.f32.gmra.mrb[148].mxu1 %v1194_v41  ;;  %8627 = vmatprep.mubr.msk.f32.mxu0 %vm2962_vm1, %v2457_v27 }
 0x49e   :  { %2725 = vmatprep.mubr.f32.mxu1 %v1199_v56  ;;  %9243 = vmatpush3.bf16.msra.mxu0 %v9240_v25  ;;  %v2947_v56 = vld [vmem:[#allocation2 + $0x28] sm:$0xff]  ;;  %v2946_v31 = vld [vmem:[#allocation2 + $0x20] sm:$0xff] }
 0x49f   :  { %9245 = vmatprep.subr.bf16.mxu0 %v12379_v55 }
 0x4a0   :  { %v2462_v38 = vpop.f32.mrb[44].mxu1 }
 0x4a1   :  { %v2464_v47 = vpop.f32.mrb[45].mxu1  ;;  %2726 = vmatmul.mubr.f32.gmra.mrb[230].mxu1 %v1198_v28  ;;  %8628 = vmatmul.mubr.msk.f32.gmra.mrb[172].mxu0 %vm2962_vm1, %v2462_v38 }
 0x4a2   :  { %2730 = vmatprep.mubr.f32.mxu1 %v1203_v24  ;;  %v1230_v24 = vld [vmem:[%s14441_s1 + $0xe10] sm:$0xff] }
 0x4a4   :  { %v2467_v30 = vpop.f32.mrb[46].mxu1 }
 0x4a5   :  { %v2469_v36 = vpop.f32.mrb[47].mxu1  ;;  %2731 = vmatmul.mubr.f32.gmra.mrb[232].mxu1 %v1202_v6  ;;  %8630 = vmatprep.mubr.msk.f32.mxu0 %vm2962_vm1, %v2467_v30  ;;  %v1235_v6 = vld [vmem:[%s14441_s1 + $0xe38] sm:$0xff] }
 0x4a6   :  { %2735 = vmatprep.mubr.f32.mxu1 %v1207_v12 }
 0x4a8   :  { %v2472_v48 = vpop.f32.mrb[48].mxu1 }
 0x4a9   :  { %v2474_v42 = vpop.f32.mrb[49].mxu1  ;;  %2736 = vmatmul.mubr.f32.gmra.mrb[234].mxu1 %v1206_v54  ;;  %8631 = vmatmul.mubr.msk.f32.gmra.mrb[174].mxu0 %vm2962_vm1, %v2472_v48  ;;  %v1234_v54 = vld [vmem:[%s14441_s1 + $0xe30] sm:$0xff] }
 0x4aa   :  { %2740 = vmatprep.mubr.f32.mxu1 %v1211_v37  ;;  %v1239_v37 = vld [vmem:[%s14441_s1 + $0xe58] sm:$0xff] }
 0x4ab   :  { %v2949_v42 = vld [vmem:[#allocation2 + $0x38] sm:$0xff] }
 0x4ac   :  { %v2477_v63 = vpop.f32.mrb[50].mxu1 }
 0x4ad   :  { %v2479_v45 = vpop.f32.mrb[51].mxu1  ;;  %2741 = vmatmul.mubr.f32.gmra.mrb[236].mxu1 %v1210_v20  ;;  %8633 = vmatprep.mubr.msk.f32.mxu0 %vm2962_vm1, %v2477_v63 }
 0x4ae   :  { %v8530_v10 = vpop.f32.mrb[122].mxu0  ;;  %2745 = vmatprep.mubr.f32.mxu1 %v1215_v23  ;;  %v2948_v23 = vld [vmem:[#allocation2 + $0x30] sm:$0xff] }
 0x4af   :  { %v3157_v3 = vadd.f32 %v8530_v10, %v2943_v57  ;;  %v3077_v50 = vpop.f32.mrb[123].mxu0  ;;  %v1238_v57 = vld [vmem:[%s14441_s1 + $0xe50] sm:$0xff]  ;;  %v1243_v10 = vld [vmem:[%s14441_s1 + $0xe78] sm:$0xff] }
 0x4b0   :  { %v3156_v51 = vadd.f32 %v3077_v50, %v2942_v44  ;;  %v2482_v60 = vpop.f32.mrb[52].mxu1 }
 0x4b1   :  { %3173 = vst.msk [vmem:[#allocation2 + $0x8] sm:$0xff] %vm138_vm0, %v3157_v3  ;;  %v2484_v16 = vpop.f32.mrb[53].mxu1  ;;  %2746 = vmatmul.mubr.f32.gmra.mrb[238].mxu1 %v1214_v49  ;;  %8634 = vmatmul.mubr.msk.f32.gmra.mrb[176].mxu0 %vm2962_vm1, %v2482_v60 }
 0x4b2   :  { %3172 = vst.msk [vmem:[#allocation2] sm:$0xff] %vm138_vm0, %v3156_v51  ;;  %2750 = vmatprep.mubr.f32.mxu1 %v1219_v59  ;;  %v1242_v59 = vld [vmem:[%s14441_s1 + $0xe70] sm:$0xff]  ;;  %v1247_v51 = vld [vmem:[%s14441_s1 + $0xe98] sm:$0xff]  ;;  %v2951_v16 = vld [vmem:[#allocation2 + $0x48] sm:$0xff] }
 0x4b4   :  { %v2487_v19 = vpop.f32.mrb[54].mxu1 }
 0x4b5   :  { %v2489_v11 = vpop.f32.mrb[55].mxu1  ;;  %2751 = vmatmul.mubr.f32.gmra.mrb[240].mxu1 %v1218_v2  ;;  %8636 = vmatprep.mubr.msk.f32.mxu0 %vm2962_vm1, %v2487_v19 }
 0x4b6   :  { %v8533_v33 = vpop.f32.mrb[124].mxu0  ;;  %2755 = vmatprep.mubr.f32.mxu1 %v1223_v29  ;;  %v2950_v29 = vld [vmem:[#allocation2 + $0x40] sm:$0xff] }
 0x4b7   :  { %v3159_v8 = vadd.f32 %v8533_v33, %v2945_v0  ;;  %v3087_v32 = vpop.f32.mrb[125].mxu0  ;;  %v1246_v0 = vld [vmem:[%s14441_s1 + $0xe90] sm:$0xff]  ;;  %v1251_v33 = vld [vmem:[%s14441_s1 + $0xeb8] sm:$0xff] }
 0x4b8   :  { %v3158_v25 = vadd.f32 %v3087_v32, %v2944_v7  ;;  %v2492_v21 = vpop.f32.mrb[56].mxu1 }
 0x4b9   :  { %3175 = vst.msk [vmem:[#allocation2 + $0x18] sm:$0xff] %vm138_vm0, %v3159_v8  ;;  %v2494_v17 = vpop.f32.mrb[57].mxu1  ;;  %2756 = vmatmul.mubr.f32.gmra.mrb[242].mxu1 %v1222_v35  ;;  %8637 = vmatmul.mubr.msk.f32.gmra.mrb[178].mxu0 %vm2962_vm1, %v2492_v21 }
 0x4ba   :  { %3174 = vst.msk [vmem:[#allocation2 + $0x10] sm:$0xff] %vm138_vm0, %v3158_v25  ;;  %2760 = vmatprep.mubr.f32.mxu1 %v1227_v15  ;;  %v1250_v15 = vld [vmem:[%s14441_s1 + $0xeb0] sm:$0xff]  ;;  %v1255_v25 = vld [vmem:[%s14441_s1 + $0xed8] sm:$0xff] }
 0x4bb   :  { %v2953_v17 = vld [vmem:[#allocation2 + $0x58] sm:$0xff] }
 0x4bc   :  { %v2497_v41 = vpop.f32.mrb[58].mxu1 }
 0x4bd   :  { %v2499_v27 = vpop.f32.mrb[59].mxu1  ;;  %2761 = vmatmul.mubr.f32.gmra.mrb[244].mxu1 %v1226_v43  ;;  %8639 = vmatprep.mubr.msk.f32.mxu0 %vm2962_vm1, %v2497_v41  ;;  %v7778_v43 = vld [vmem:[%s14418_s4 + $0xb0] sm:$0xff] }
 0x4be   :  { %v8536_v28 = vpop.f32.mrb[126].mxu0  ;;  %2765 = vmatprep.mubr.f32.mxu1 %v1231_v22  ;;  %v7779_v22 = vld [vmem:[%s14418_s4 + $0xb8] sm:$0xff] }
 0x4bf   :  { %v3161_v38 = vadd.f32 %v8536_v28, %v2947_v56  ;;  %v3097_v47 = vpop.f32.mrb[127].mxu0  ;;  %v2952_v56 = vld [vmem:[#allocation2 + $0x50] sm:$0xff] }
 0x4c0   :  { %v3160_v12 = vadd.f32 %v3097_v47, %v2946_v31  ;;  %v2502_v30 = vpop.f32.mrb[60].mxu1  ;;  %v1254_v31 = vld [vmem:[%s14441_s1 + $0xed0] sm:$0xff]  ;;  %v9248_v47 = vpack.c.bf16 %v7779_v22, %v7778_v43  ;;  %v3189_v22 = vld [vmem:[#allocation2 + $0x8] sm:$0xff] }
 0x4c1   :  { %3177 = vst.msk [vmem:[#allocation2 + $0x28] sm:$0xff] %vm138_vm0, %v3161_v38  ;;  %v2504_v36 = vpop.f32.mrb[61].mxu1  ;;  %2766 = vmatmul.mubr.f32.gmra.mrb[246].mxu1 %v1230_v24  ;;  %8640 = vmatmul.mubr.msk.f32.gmra.mrb[180].mxu0 %vm2962_vm1, %v2502_v30  ;;  %v1259_v38 = vld [vmem:[%s14441_s1 + $0xef8] sm:$0xff]  ;;  %v7796_v30 = vld [vmem:[%s14418_s4 + $0xc0] sm:$0xff] }
 0x4c2   :  { %3176 = vst.msk [vmem:[#allocation2 + $0x20] sm:$0xff] %vm138_vm0, %v3160_v12  ;;  %2770 = vmatprep.mubr.f32.mxu1 %v1235_v6  ;;  %v7797_v36 = vld [vmem:[%s14418_s4 + $0xc8] sm:$0xff] }
 0x4c4   :  { %v2507_v48 = vpop.f32.mrb[62].mxu1 }
 0x4c5   :  { %v2509_v20 = vpop.f32.mrb[63].mxu1  ;;  %2771 = vmatmul.mubr.f32.gmra.mrb[248].mxu1 %v1234_v54  ;;  %8642 = vmatprep.mubr.msk.f32.mxu0 %vm2962_vm1, %v2507_v48  ;;  %v1263_v48 = vld [vmem:[%s14441_s1 + $0xf18] sm:$0xff] }
 0x4c6   :  { %v8539_v63 = vpop.f32.mrb[128].mxu0  ;;  %2775 = vmatprep.mubr.f32.mxu1 %v1239_v37  ;;  %v1258_v37 = vld [vmem:[%s14441_s1 + $0xef0] sm:$0xff] }
 0x4c7   :  { %v3163_v45 = vadd.f32 %v8539_v63, %v2949_v42  ;;  %v3107_v44 = vpop.f32.mrb[129].mxu0  ;;  %v12519_v42 = vpack.c.bf16 %v7797_v36, %v7796_v30  ;;  %v1287_v30 = vld [vmem:[%s14441_s1 + $0xfd8] sm:$0xff] }
 0x4c8   :  { %v3162_v49 = vadd.f32 %v3107_v44, %v2948_v23  ;;  %v2512_v3 = vpop.f32.mrb[64].mxu1  ;;  %v2955_v23 = vld [vmem:[#allocation2 + $0x68] sm:$0xff] }
 0x4c9   :  { %3179 = vst.msk [vmem:[#allocation2 + $0x38] sm:$0xff] %vm138_vm0, %v3163_v45  ;;  %v2514_v50 = vpop.f32.mrb[65].mxu1  ;;  %2776 = vmatmul.mubr.f32.gmra.mrb[250].mxu1 %v1238_v57  ;;  %8643 = vmatmul.mubr.msk.f32.gmra.mrb[182].mxu0 %vm2962_vm1, %v2512_v3  ;;  %v2954_v57 = vld [vmem:[#allocation2 + $0x60] sm:$0xff] }
 0x4ca   :  { %3178 = vst.msk [vmem:[#allocation2 + $0x30] sm:$0xff] %vm138_vm0, %v3162_v49  ;;  %2780 = vmatprep.mubr.f32.mxu1 %v1243_v10  ;;  %v1267_v49 = vld [vmem:[%s14441_s1 + $0xf38] sm:$0xff] }
 0x4cc   :  { %v2517_v60 = vpop.f32.mrb[66].mxu1 }
 0x4cd   :  { %v2519_v2 = vpop.f32.mrb[67].mxu1  ;;  %2781 = vmatmul.mubr.f32.gmra.mrb[252].mxu1 %v1242_v59  ;;  %8645 = vmatprep.mubr.msk.f32.mxu0 %vm2962_vm1, %v2517_v60  ;;  %v1271_v60 = vld [vmem:[%s14441_s1 + $0xf58] sm:$0xff] }
 0x4ce   :  { %v8542_v19 = vpop.f32.mrb[130].mxu0  ;;  %2785 = vmatprep.mubr.f32.mxu1 %v1247_v51  ;;  %v1266_v51 = vld [vmem:[%s14441_s1 + $0xf30] sm:$0xff]  ;;  %v2957_v2 = vld [vmem:[#allocation2 + $0x78] sm:$0xff] }
 0x4cf   :  { %v3165_v11 = vadd.f32 %v8542_v19, %v2951_v16  ;;  %v3117_v7 = vpop.f32.mrb[131].mxu0  ;;  %v2956_v19 = vld [vmem:[#allocation2 + $0x70] sm:$0xff] }
 0x4d0   :  { %v3164_v35 = vadd.f32 %v3117_v7, %v2950_v29  ;;  %v2522_v8 = vpop.f32.mrb[68].mxu1 }
 0x4d1   :  { %3181 = vst.msk [vmem:[#allocation2 + $0x48] sm:$0xff] %vm138_vm0, %v3165_v11  ;;  %v2524_v32 = vpop.f32.mrb[69].mxu1  ;;  %2786 = vmatmul.mubr.f32.gmra.mrb[254].mxu1 %v1246_v0  ;;  %8646 = vmatmul.mubr.msk.f32.gmra.mrb[184].mxu0 %vm2962_vm1, %v2522_v8  ;;  %v1270_v11 = vld [vmem:[%s14441_s1 + $0xf50] sm:$0xff] }
 0x4d2   :  { %3180 = vst.msk [vmem:[#allocation2 + $0x40] sm:$0xff] %vm138_vm0, %v3164_v35  ;;  %2790 = vmatprep.mubr.f32.mxu1 %v1251_v33  ;;  %v1275_v35 = vld [vmem:[%s14441_s1 + $0xf78] sm:$0xff] }
 0x4d4   :  { %v2527_v21 = vpop.f32.mrb[70].mxu1 }
 0x4d5   :  { %v2529_v41 = vpop.f32.mrb[71].mxu1  ;;  %2791 = vmatmul.mubr.f32.gmra.mrb[150].mxu1 %v1250_v15  ;;  %8656 = vmatprep.mubr.msk.f32.mxu0 %vm2962_vm1, %v2527_v21  ;;  %v1279_v21 = vld [vmem:[%s14441_s1 + $0xf98] sm:$0xff] }
 0x4d6   :  { %v8545_v27 = vpop.f32.mrb[132].mxu0  ;;  %2795 = vmatprep.mubr.f32.mxu1 %v1255_v25  ;;  %v1274_v25 = vld [vmem:[%s14441_s1 + $0xf70] sm:$0xff] }
 0x4d7   :  { %v3167_v28 = vadd.f32 %v8545_v27, %v2953_v17  ;;  %v3127_v24 = vpop.f32.mrb[133].mxu0 }
 0x4d8   :  { %v3166_v6 = vadd.f32 %v3127_v24, %v2952_v56  ;;  %v2532_v12 = vpop.f32.mrb[72].mxu1  ;;  %v1278_v56 = vld [vmem:[%s14441_s1 + $0xf90] sm:$0xff]  ;;  %v1283_v24 = vld [vmem:[%s14441_s1 + $0xfb8] sm:$0xff] }
 0x4d9   :  { %3183 = vst.msk [vmem:[#allocation2 + $0x58] sm:$0xff] %vm138_vm0, %v3167_v28  ;;  %v2534_v54 = vpop.f32.mrb[73].mxu1  ;;  %2796 = vmatmul.mubr.f32.gmra.mrb[152].mxu1 %v1254_v31  ;;  %8657 = vmatmul.mubr.msk.f32.vlgmr.msra.gmra.mrb[186].mxu0 %vm2962_vm1, %v2532_v12  ;;  %v3188_v31 = vld [vmem:[#allocation2] sm:$0xff]  ;;  %v1282_v12 = vld [vmem:[%s14441_s1 + $0xfb0] sm:$0xff] }
 0x4da   :  { %3182 = vst.msk [vmem:[#allocation2 + $0x50] sm:$0xff] %vm138_vm0, %v3166_v6  ;;  %2800 = vmatprep.mubr.f32.mxu1 %v1259_v38  ;;  %9247 = vmatpush3.bf16.msra.mxu0 %v12379_v55  ;;  %v1262_v55 = vld [vmem:[%s14441_s1 + $0xf10] sm:$0xff] }
 0x4db   :  { %9249 = vmatprep.subr.bf16.mxu0 %v9248_v47 }
 0x4dc   :  { %v2537_v20 = vpop.f32.mrb[74].mxu1 }
 0x4dd   :  { %v2539_v63 = vpop.f32.mrb[75].mxu1  ;;  %2801 = vmatmul.mubr.f32.gmra.mrb[154].mxu1 %v1258_v37  ;;  %8659 = vmatprep.mubr.msk.f32.mxu0 %vm2962_vm1, %v2537_v20  ;;  %v3191_v37 = vld [vmem:[#allocation2 + $0x18] sm:$0xff]  ;;  %v1286_v20 = vld [vmem:[%s14441_s1 + $0xfd0] sm:$0xff] }
 0x4de   :  { %v8548_v45 = vpop.f32.mrb[134].mxu0  ;;  %2805 = vmatprep.mubr.f32.mxu1 %v1263_v48  ;;  %9251 = vmatpush3.bf16.msra.mxu0 %v9248_v47  ;;  %v3190_v63 = vld [vmem:[#allocation2 + $0x10] sm:$0xff] }
 0x4df   :  { %v3169_v44 = vadd.f32 %v8548_v45, %v2955_v23  ;;  %v3137_v10 = vpop.f32.mrb[135].mxu0  ;;  %9253 = vmatprep.subr.bf16.mxu0 %v12519_v42  ;;  %v1291_v45 = vld [vmem:[%s14441_s1 + $0xff8] sm:$0xff] }
 0x4e0   :  { %v3168_v3 = vadd.f32 %v3137_v10, %v2954_v57  ;;  %v2542_v50 = vpop.f32.mrb[76].mxu1 }
 0x4e1   :  { %3185 = vst.msk [vmem:[#allocation2 + $0x68] sm:$0xff] %vm138_vm0, %v3169_v44  ;;  %v2544_v59 = vpop.f32.mrb[77].mxu1  ;;  %2806 = vmatmul.mubr.f32.gmra.mrb[182].mxu1 %v1262_v55  ;;  %8660 = vmatmul.mubr.msk.f32.gmra.mrb[188].mxu0 %vm2962_vm1, %v2542_v50 }
 0x4e2   :  { %3184 = vst.msk [vmem:[#allocation2 + $0x60] sm:$0xff] %vm138_vm0, %v3168_v3  ;;  %2810 = vmatprep.mubr.f32.mxu1 %v1267_v49  ;;  %v1290_v49 = vld [vmem:[%s14441_s1 + $0xff0] sm:$0xff]  ;;  %v1295_v3 = vld [vmem:[%s14441_s1 + $0x1018] sm:$0xff] }
 0x4e4   :  { %v2547_v16 = vpop.f32.mrb[78].mxu1 }
 0x4e5   :  { %v2549_v29 = vpop.f32.mrb[79].mxu1  ;;  %2811 = vmatmul.mubr.f32.gmra.mrb[184].mxu1 %v1266_v51  ;;  %8662 = vmatprep.mubr.msk.f32.mxu0 %vm2962_vm1, %v2547_v16  ;;  %v3193_v51 = vld [vmem:[#allocation2 + $0x28] sm:$0xff]  ;;  %v1294_v16 = vld [vmem:[%s14441_s1 + $0x1010] sm:$0xff] }
 0x4e6   :  { %v8551_v0 = vpop.f32.mrb[136].mxu0  ;;  %2815 = vmatprep.mubr.f32.mxu1 %v1271_v60  ;;  %v3192_v29 = vld [vmem:[#allocation2 + $0x20] sm:$0xff] }
 0x4e7   :  { %v3171_v7 = vadd.f32 %v8551_v0, %v2957_v2  ;;  %v3147_v33 = vpop.f32.mrb[137].mxu0  ;;  %v1299_v0 = vld [vmem:[%s14441_s1 + $0x1038] sm:$0xff] }
 0x4e8   :  { %v3170_v8 = vadd.f32 %v3147_v33, %v2956_v19  ;;  %v2552_v32 = vpop.f32.mrb[80].mxu1 }
 0x4e9   :  { %3187 = vst.msk [vmem:[#allocation2 + $0x78] sm:$0xff] %vm138_vm0, %v3171_v7  ;;  %v2554_v15 = vpop.f32.mrb[81].mxu1  ;;  %2816 = vmatmul.mubr.f32.gmra.mrb[186].mxu1 %v1270_v11  ;;  %8663 = vmatmul.mubr.msk.f32.gmra.mrb[190].mxu0 %vm2962_vm1, %v2552_v32 }
 0x4ea   :  { %3186 = vst.msk [vmem:[#allocation2 + $0x70] sm:$0xff] %vm138_vm0, %v3170_v8  ;;  %2820 = vmatprep.mubr.f32.mxu1 %v1275_v35  ;;  %v1298_v35 = vld [vmem:[%s14441_s1 + $0x1030] sm:$0xff]  ;;  %v1303_v8 = vld [vmem:[%s14441_s1 + $0x1058] sm:$0xff] }
 0x4ec   :  { %v2557_v17 = vpop.f32.mrb[82].mxu1 }
 0x4ed   :  { %v2559_v43 = vpop.f32.mrb[83].mxu1  ;;  %2821 = vmatmul.mubr.f32.gmra.mrb[188].mxu1 %v1274_v25  ;;  %8665 = vmatprep.mubr.msk.f32.mxu0 %vm2962_vm1, %v2557_v17  ;;  %v3195_v25 = vld [vmem:[#allocation2 + $0x38] sm:$0xff]  ;;  %v1302_v17 = vld [vmem:[%s14441_s1 + $0x1050] sm:$0xff] }
 0x4ee   :  { %v8562_v41 = vpop.f32.mrb[138].mxu0  ;;  %2825 = vmatprep.mubr.f32.mxu1 %v1279_v21 }
 0x4ef   :  { %v3403_v27 = vadd.f32 %v8562_v41, %v3189_v22  ;;  %v3323_v28 = vpop.f32.mrb[139].mxu0  ;;  %v3194_v22 = vld [vmem:[#allocation2 + $0x30] sm:$0xff] }
 0x4f0   :  { %v3402_v38 = vadd.f32 %v3323_v28, %v3188_v31  ;;  %v2562_v47 = vpop.f32.mrb[84].mxu1 }
 0x4f1   :  { %3419 = vst.msk [vmem:[#allocation2 + $0x8] sm:$0xff] %vm138_vm0, %v3403_v27  ;;  %v2564_v6 = vpop.f32.mrb[85].mxu1  ;;  %2826 = vmatmul.mubr.f32.gmra.mrb[190].mxu1 %v1278_v56  ;;  %8666 = vmatmul.mubr.msk.f32.gmra.mrb[192].mxu0 %vm2962_vm1, %v2562_v47  ;;  %v1307_v56 = vld [vmem:[%s14441_s1 + $0x1078] sm:$0xff] }
 0x4f2   :  { %3418 = vst.msk [vmem:[#allocation2] sm:$0xff] %vm138_vm0, %v3402_v38  ;;  %2830 = vmatprep.mubr.f32.mxu1 %v1283_v24  ;;  %v1306_v24 = vld [vmem:[%s14441_s1 + $0x1070] sm:$0xff]  ;;  %v1311_v38 = vld [vmem:[%s14441_s1 + $0x1098] sm:$0xff] }
 0x4f4   :  { %v2567_v36 = vpop.f32.mrb[86].mxu1 }
 0x4f5   :  { %v2569_v54 = vpop.f32.mrb[87].mxu1  ;;  %2831 = vmatmul.mubr.f32.gmra.mrb[192].mxu1 %v1282_v12  ;;  %8668 = vmatprep.mubr.msk.f32.mxu0 %vm2962_vm1, %v2567_v36  ;;  %v3197_v12 = vld [vmem:[#allocation2 + $0x48] sm:$0xff]  ;;  %v1310_v36 = vld [vmem:[%s14441_s1 + $0x1090] sm:$0xff] }
 0x4f6   :  { %v8565_v48 = vpop.f32.mrb[140].mxu0  ;;  %2835 = vmatprep.mubr.f32.mxu1 %v1287_v30 }
 0x4f7   :  { %v3405_v23 = vadd.f32 %v8565_v48, %v3191_v37  ;;  %v3333_v57 = vpop.f32.mrb[141].mxu0  ;;  %v3196_v37 = vld [vmem:[#allocation2 + $0x40] sm:$0xff] }
 0x4f8   :  { %v3404_v55 = vadd.f32 %v3333_v57, %v3190_v63  ;;  %v2572_v44 = vpop.f32.mrb[88].mxu1 }
 0x4f9   :  { %3421 = vst.msk [vmem:[#allocation2 + $0x18] sm:$0xff] %vm138_vm0, %v3405_v23  ;;  %v2574_v10 = vpop.f32.mrb[89].mxu1  ;;  %2836 = vmatmul.mubr.f32.gmra.mrb[194].mxu1 %v1286_v20  ;;  %8669 = vmatmul.mubr.msk.f32.gmra.mrb[194].mxu0 %vm2962_vm1, %v2572_v44  ;;  %v1315_v20 = vld [vmem:[%s14441_s1 + $0x10b8] sm:$0xff] }
 0x4fa   :  { %3420 = vst.msk [vmem:[#allocation2 + $0x10] sm:$0xff] %vm138_vm0, %v3404_v55  ;;  %2840 = vmatprep.mubr.f32.mxu1 %v1291_v45  ;;  %v1314_v45 = vld [vmem:[%s14441_s1 + $0x10b0] sm:$0xff]  ;;  %v1319_v55 = vld [vmem:[%s14441_s1 + $0x10d8] sm:$0xff] }
 0x4fb   :  { %v7798_v10 = vld [vmem:[%s14418_s4 + $0xd0] sm:$0xff] }
 0x4fc   :  { %v2577_v50 = vpop.f32.mrb[90].mxu1 }
 0x4fd   :  { %v2579_v59 = vpop.f32.mrb[91].mxu1  ;;  %2841 = vmatmul.mubr.f32.gmra.mrb[196].mxu1 %v1290_v49  ;;  %8671 = vmatprep.mubr.msk.f32.mxu0 %vm2962_vm1, %v2577_v50  ;;  %v7799_v49 = vld [vmem:[%s14418_s4 + $0xd8] sm:$0xff] }
 0x4fe   :  { %v8568_v60 = vpop.f32.mrb[142].mxu0  ;;  %2845 = vmatprep.mubr.f32.mxu1 %v1295_v3  ;;  %v3199_v50 = vld [vmem:[#allocation2 + $0x58] sm:$0xff] }
 0x4ff   :  { %v3407_v2 = vadd.f32 %v8568_v60, %v3193_v51  ;;  %v3343_v19 = vpop.f32.mrb[143].mxu0  ;;  %v1318_v51 = vld [vmem:[%s14441_s1 + $0x10d0] sm:$0xff] }
 0x500   :  { %v3406_v11 = vadd.f32 %v3343_v19, %v3192_v29  ;;  %v2582_v7 = vpop.f32.mrb[92].mxu1  ;;  %v1323_v29 = vld [vmem:[%s14441_s1 + $0x10f8] sm:$0xff]  ;;  %v9256_v19 = vpack.c.bf16 %v7799_v49, %v7798_v10  ;;  %v3435_v49 = vld [vmem:[#allocation2 + $0x8] sm:$0xff] }
 0x501   :  { %3423 = vst.msk [vmem:[#allocation2 + $0x28] sm:$0xff] %vm138_vm0, %v3407_v2  ;;  %v2584_v33 = vpop.f32.mrb[93].mxu1  ;;  %2846 = vmatmul.mubr.f32.gmra.mrb[198].mxu1 %v1294_v16  ;;  %8672 = vmatmul.mubr.msk.f32.gmra.mrb[196].mxu0 %vm2962_vm1, %v2582_v7  ;;  %v3198_v16 = vld [vmem:[#allocation2 + $0x50] sm:$0xff]  ;;  %v7816_v7 = vld [vmem:[%s14418_s4 + $0xe0] sm:$0xff] }
 0x502   :  { %3422 = vst.msk [vmem:[#allocation2 + $0x20] sm:$0xff] %vm138_vm0, %v3406_v11  ;;  %2850 = vmatprep.mubr.f32.mxu1 %v1299_v0  ;;  %v7817_v33 = vld [vmem:[%s14418_s4 + $0xe8] sm:$0xff] }
 0x504   :  { %v2587_v32 = vpop.f32.mrb[94].mxu1 }
 0x505   :  { %v2589_v15 = vpop.f32.mrb[95].mxu1  ;;  %2851 = vmatmul.mubr.f32.gmra.mrb[200].mxu1 %v1298_v35  ;;  %8674 = vmatprep.mubr.msk.f32.mxu0 %vm2962_vm1, %v2587_v32  ;;  %v1327_v32 = vld [vmem:[%s14441_s1 + $0x1118] sm:$0xff] }
 0x506   :  { %v8571_v21 = vpop.f32.mrb[144].mxu0  ;;  %2855 = vmatprep.mubr.f32.mxu1 %v1303_v8  ;;  %v1322_v8 = vld [vmem:[%s14441_s1 + $0x10f0] sm:$0xff]  ;;  %v12663_v15 = vpack.c.bf16 %v7817_v33, %v7816_v7  ;;  %v1351_v7 = vld [vmem:[%s14441_s1 + $0x11d8] sm:$0xff] }
 0x507   :  { %v3409_v43 = vadd.f32 %v8571_v21, %v3195_v25  ;;  %v3353_v41 = vpop.f32.mrb[145].mxu0  ;;  %v3201_v21 = vld [vmem:[#allocation2 + $0x68] sm:$0xff] }
 0x508   :  { %v3408_v27 = vadd.f32 %v3353_v41, %v3194_v22  ;;  %v2592_v31 = vpop.f32.mrb[96].mxu1  ;;  %v3200_v41 = vld [vmem:[#allocation2 + $0x60] sm:$0xff] }
 0x509   :  { %3425 = vst.msk [vmem:[#allocation2 + $0x38] sm:$0xff] %vm138_vm0, %v3409_v43  ;;  %v2594_v28 = vpop.f32.mrb[97].mxu1  ;;  %2856 = vmatmul.mubr.f32.gmra.mrb[202].mxu1 %v1302_v17  ;;  %8675 = vmatmul.mubr.msk.f32.gmra.mrb[198].mxu0 %vm2962_vm1, %v2592_v31  ;;  %v1331_v31 = vld [vmem:[%s14441_s1 + $0x1138] sm:$0xff] }
 0x50a   :  { %3424 = vst.msk [vmem:[#allocation2 + $0x30] sm:$0xff] %vm138_vm0, %v3408_v27  ;;  %2860 = vmatprep.mubr.f32.mxu1 %v1307_v56 }
 0x50c   :  { %v2597_v47 = vpop.f32.mrb[98].mxu1 }
 0x50d   :  { %v2599_v6 = vpop.f32.mrb[99].mxu1  ;;  %2861 = vmatmul.mubr.f32.gmra.mrb[204].mxu1 %v1306_v24  ;;  %8677 = vmatprep.mubr.msk.f32.mxu0 %vm2962_vm1, %v2597_v47  ;;  %v1335_v47 = vld [vmem:[%s14441_s1 + $0x1158] sm:$0xff] }
 0x50e   :  { %v8574_v30 = vpop.f32.mrb[146].mxu0  ;;  %2865 = vmatprep.mubr.f32.mxu1 %v1311_v38  ;;  %v1330_v38 = vld [vmem:[%s14441_s1 + $0x1130] sm:$0xff] }
 0x50f   :  { %v3411_v54 = vadd.f32 %v8574_v30, %v3197_v12  ;;  %v3363_v48 = vpop.f32.mrb[147].mxu0  ;;  %v3203_v12 = vld [vmem:[#allocation2 + $0x78] sm:$0xff] }
 0x510   :  { %v3410_v23 = vadd.f32 %v3363_v48, %v3196_v37  ;;  %v2602_v63 = vpop.f32.mrb[100].mxu1  ;;  %v3202_v37 = vld [vmem:[#allocation2 + $0x70] sm:$0xff] }
 0x511   :  { %3427 = vst.msk [vmem:[#allocation2 + $0x48] sm:$0xff] %vm138_vm0, %v3411_v54  ;;  %v2604_v57 = vpop.f32.mrb[101].mxu1  ;;  %2866 = vmatmul.mubr.f32.gmra.mrb[206].mxu1 %v1310_v36  ;;  %8678 = vmatmul.mubr.msk.f32.gmra.mrb[200].mxu0 %vm2962_vm1, %v2602_v63  ;;  %v1339_v63 = vld [vmem:[%s14441_s1 + $0x1178] sm:$0xff] }
 0x512   :  { %3426 = vst.msk [vmem:[#allocation2 + $0x40] sm:$0xff] %vm138_vm0, %v3410_v23  ;;  %2870 = vmatprep.mubr.f32.mxu1 %v1315_v20  ;;  %v1334_v23 = vld [vmem:[%s14441_s1 + $0x1150] sm:$0xff] }
 0x514   :  { %v2607_v44 = vpop.f32.mrb[102].mxu1 }
 0x515   :  { %v2609_v3 = vpop.f32.mrb[103].mxu1  ;;  %2871 = vmatmul.mubr.f32.gmra.mrb[208].mxu1 %v1314_v45  ;;  %8688 = vmatprep.mubr.msk.f32.mxu0 %vm2962_vm1, %v2607_v44  ;;  %v1343_v44 = vld [vmem:[%s14441_s1 + $0x1198] sm:$0xff] }
 0x516   :  { %v8577_v59 = vpop.f32.mrb[148].mxu0  ;;  %2875 = vmatprep.mubr.f32.mxu1 %v1319_v55  ;;  %v1338_v55 = vld [vmem:[%s14441_s1 + $0x1170] sm:$0xff] }
 0x517   :  { %v3413_v60 = vadd.f32 %v8577_v59, %v3199_v50  ;;  %v3373_v2 = vpop.f32.mrb[149].mxu0 }
 0x518   :  { %v3412_v0 = vadd.f32 %v3373_v2, %v3198_v16  ;;  %v2612_v11 = vpop.f32.mrb[104].mxu1  ;;  %v1342_v2 = vld [vmem:[%s14441_s1 + $0x1190] sm:$0xff] }
 0x519   :  { %3429 = vst.msk [vmem:[#allocation2 + $0x58] sm:$0xff] %vm138_vm0, %v3413_v60  ;;  %v2614_v35 = vpop.f32.mrb[105].mxu1  ;;  %2876 = vmatmul.mubr.f32.gmra.mrb[210].mxu1 %v1318_v51  ;;  %8689 = vmatmul.mubr.msk.f32.vlgmr.msra.gmra.mrb[202].mxu0 %vm2962_vm1, %v2612_v11  ;;  %v3434_v51 = vld [vmem:[#allocation2] sm:$0xff]  ;;  %v1346_v11 = vld [vmem:[%s14441_s1 + $0x11b0] sm:$0xff] }
 0x51a   :  { %3428 = vst.msk [vmem:[#allocation2 + $0x50] sm:$0xff] %vm138_vm0, %v3412_v0  ;;  %2880 = vmatprep.mubr.f32.mxu1 %v1323_v29  ;;  %9255 = vmatpush3.bf16.msra.mxu0 %v12519_v42  ;;  %v1326_v42 = vld [vmem:[%s14441_s1 + $0x1110] sm:$0xff]  ;;  %v1347_v29 = vld [vmem:[%s14441_s1 + $0x11b8] sm:$0xff] }
 0x51b   :  { %9257 = vmatprep.subr.bf16.mxu0 %v9256_v19  ;;  %v3437_v35 = vld [vmem:[#allocation2 + $0x18] sm:$0xff] }
 0x51c   :  { %v2617_v25 = vpop.f32.mrb[106].mxu1  ;;  %v8580_v17 = vpop.f32.mrb[150].mxu0 }
 0x51d   :  { %v3415_v43 = vadd.f32 %v8580_v17, %v3201_v21  ;;  %v2619_v22 = vpop.f32.mrb[107].mxu1  ;;  %2881 = vmatmul.mubr.f32.gmra.mrb[212].mxu1 %v1322_v8  ;;  %v3383_v56 = vpop.f32.mrb[151].mxu0  ;;  %8691 = vmatprep.mubr.msk.f32.mxu0 %vm2962_vm1, %v2617_v25  ;;  %v3436_v21 = vld [vmem:[#allocation2 + $0x10] sm:$0xff] }
 0x51e   :  { %v3414_v27 = vadd.f32 %v3383_v56, %v3200_v41  ;;  %2885 = vmatprep.mubr.f32.mxu1 %v1327_v32  ;;  %9259 = vmatpush3.bf16.msra.mxu0 %v9256_v19  ;;  %v1350_v22 = vld [vmem:[%s14441_s1 + $0x11d0] sm:$0xff]  ;;  %v1355_v41 = vld [vmem:[%s14441_s1 + $0x11f8] sm:$0xff] }
 0x51f   :  { %3431 = vst.msk [vmem:[#allocation2 + $0x68] sm:$0xff] %vm138_vm0, %v3415_v43  ;;  %9261 = vmatprep.subr.bf16.mxu0 %v12663_v15 }
 0x520   :  { %3430 = vst.msk [vmem:[#allocation2 + $0x60] sm:$0xff] %vm138_vm0, %v3414_v27  ;;  %v2622_v28 = vpop.f32.mrb[108].mxu1 }
 0x521   :  { %v2624_v24 = vpop.f32.mrb[109].mxu1  ;;  %2886 = vmatmul.mubr.f32.gmra.mrb[214].mxu1 %v1326_v42  ;;  %8692 = vmatmul.mubr.msk.f32.gmra.mrb[204].mxu0 %vm2962_vm1, %v2622_v28  ;;  %v1354_v42 = vld [vmem:[%s14441_s1 + $0x11f0] sm:$0xff]  ;;  %v3439_v28 = vld [vmem:[#allocation2 + $0x28] sm:$0xff] }
 0x522   :  { %2890 = vmatprep.mubr.f32.mxu1 %v1331_v31 }
 0x524   :  { %v2627_v6 = vpop.f32.mrb[110].mxu1  ;;  %v8583_v30 = vpop.f32.mrb[152].mxu0 }
 0x525   :  { %v3417_v36 = vadd.f32 %v8583_v30, %v3203_v12  ;;  %v2629_v54 = vpop.f32.mrb[111].mxu1  ;;  %2891 = vmatmul.mubr.f32.gmra.mrb[216].mxu1 %v1330_v38  ;;  %v3393_v48 = vpop.f32.mrb[153].mxu0  ;;  %8694 = vmatprep.mubr.msk.f32.mxu0 %vm2962_vm1, %v2627_v6  ;;  %v3438_v6 = vld [vmem:[#allocation2 + $0x20] sm:$0xff] }
 0x526   :  { %v3416_v20 = vadd.f32 %v3393_v48, %v3202_v37  ;;  %2895 = vmatprep.mubr.f32.mxu1 %v1335_v47  ;;  %v3441_v48 = vld [vmem:[#allocation2 + $0x38] sm:$0xff] }
 0x527   :  { %3433 = vst.msk [vmem:[#allocation2 + $0x78] sm:$0xff] %vm138_vm0, %v3417_v36 }
 0x528   :  { %3432 = vst.msk [vmem:[#allocation2 + $0x70] sm:$0xff] %vm138_vm0, %v3416_v20  ;;  %v2632_v57 = vpop.f32.mrb[112].mxu1 }
 0x529   :  { %v2634_v45 = vpop.f32.mrb[113].mxu1  ;;  %2896 = vmatmul.mubr.f32.gmra.mrb[218].mxu1 %v1334_v23  ;;  %8695 = vmatmul.mubr.msk.f32.gmra.mrb[206].mxu0 %vm2962_vm1, %v2632_v57  ;;  %v3440_v57 = vld [vmem:[#allocation2 + $0x30] sm:$0xff] }
 0x52a   :  { %2900 = vmatprep.mubr.f32.mxu1 %v1339_v63 }
 0x52c   :  { %v2637_v10 = vpop.f32.mrb[114].mxu1  ;;  %v8594_v3 = vpop.f32.mrb[154].mxu0 }
 0x52d   :  { %v3649_v50 = vadd.f32 %v8594_v3, %v3435_v49  ;;  %v2639_v59 = vpop.f32.mrb[115].mxu1  ;;  %2901 = vmatmul.mubr.f32.gmra.mrb[220].mxu1 %v1338_v55  ;;  %v3569_v60 = vpop.f32.mrb[155].mxu0  ;;  %8697 = vmatprep.mubr.msk.f32.mxu0 %vm2962_vm1, %v2637_v10  ;;  %v3443_v3 = vld [vmem:[#allocation2 + $0x48] sm:$0xff] }
 0x52e   :  { %v3648_v16 = vadd.f32 %v3569_v60, %v3434_v51  ;;  %2905 = vmatprep.mubr.f32.mxu1 %v1343_v44  ;;  %v3442_v60 = vld [vmem:[#allocation2 + $0x40] sm:$0xff] }
 0x52f   :  { %3665 = vst.msk [vmem:[#allocation2 + $0x8] sm:$0xff] %vm138_vm0, %v3649_v50 }
 0x530   :  { %3664 = vst.msk [vmem:[#allocation2] sm:$0xff] %vm138_vm0, %v3648_v16  ;;  %v2642_v19 = vpop.f32.mrb[116].mxu1 }
 0x531   :  { %v2644_v0 = vpop.f32.mrb[117].mxu1  ;;  %2906 = vmatmul.mubr.f32.gmra.mrb[222].mxu1 %v1342_v2  ;;  %8698 = vmatmul.mubr.msk.f32.gmra.mrb[208].mxu0 %vm2962_vm1, %v2642_v19 }
 0x532   :  { %2910 = vmatprep.mubr.f32.mxu1 %v1347_v29 }
 0x534   :  { %v2647_v33 = vpop.f32.mrb[118].mxu1  ;;  %v8597_v8 = vpop.f32.mrb[156].mxu0 }
 0x535   :  { %v3651_v32 = vadd.f32 %v8597_v8, %v3437_v35  ;;  %v2649_v25 = vpop.f32.mrb[119].mxu1  ;;  %2911 = vmatmul.mubr.f32.gmra.mrb[224].mxu1 %v1346_v11  ;;  %v3579_v17 = vpop.f32.mrb[157].mxu0  ;;  %8700 = vmatprep.mubr.msk.f32.mxu0 %vm2962_vm1, %v2647_v33  ;;  %v3445_v11 = vld [vmem:[#allocation2 + $0x58] sm:$0xff]  ;;  %v7818_v33 = vld [vmem:[%s14418_s4 + $0xf0] sm:$0xff] }
 0x536   :  { %v3650_v43 = vadd.f32 %v3579_v17, %v3436_v21  ;;  %2915 = vmatprep.mubr.f32.mxu1 %v1351_v7  ;;  %v7819_v35 = vld [vmem:[%s14418_s4 + $0xf8] sm:$0xff]  ;;  %v3444_v25 = vld [vmem:[#allocation2 + $0x50] sm:$0xff] }
 0x537   :  { %3667 = vst.msk [vmem:[#allocation2 + $0x18] sm:$0xff] %vm138_vm0, %v3651_v32 }
 0x538   :  { %3666 = vst.msk [vmem:[#allocation2 + $0x10] sm:$0xff] %vm138_vm0, %v3650_v43  ;;  %v2652_v56 = vpop.f32.mrb[120].mxu1  ;;  %v9264_v43 = vpack.c.bf16 %v7819_v35, %v7818_v33 }
 0x539   :  { %v2654_v27 = vpop.f32.mrb[121].mxu1  ;;  %2916 = vmatmul.mubr.f32.gmra.mrb[226].mxu1 %v1350_v22  ;;  %8701 = vmatmul.mubr.msk.f32.gmra.mrb[210].mxu0 %vm2962_vm1, %v2652_v56  ;;  %v7837_v56 = vld [vmem:[%s14418_s4 + $0x108] sm:$0xff] }
 0x53a   :  { %2920 = vmatprep.mubr.f32.mxu1 %v1355_v41  ;;  %v7836_v41 = vld [vmem:[%s14418_s4 + $0x100] sm:$0xff] }
 0x53c   :  { %v2657_v31 = vpop.f32.mrb[122].mxu1  ;;  %v8600_v24 = vpop.f32.mrb[158].mxu0 }
 0x53d   :  { %v3653_v38 = vadd.f32 %v8600_v24, %v3439_v28  ;;  %v2659_v47 = vpop.f32.mrb[123].mxu1  ;;  %2921 = vmatmul.mubr.f32.gmra.mrb[228].mxu1 %v1354_v42  ;;  %v3589_v12 = vpop.f32.mrb[159].mxu0  ;;  %8703 = vmatprep.mubr.msk.f32.mxu0 %vm2962_vm1, %v2657_v31  ;;  %v12756_v42 = vpack.c.bf16 %v7837_v56, %v7836_v41  ;;  %v3447_v28 = vld [vmem:[#allocation2 + $0x68] sm:$0xff] }
 0x53e   :  { %v3652_v30 = vadd.f32 %v3589_v12, %v3438_v6  ;;  %v3446_v6 = vld [vmem:[#allocation2 + $0x60] sm:$0xff] }
 0x53f   :  { %3669 = vst.msk [vmem:[#allocation2 + $0x28] sm:$0xff] %vm138_vm0, %v3653_v38 }
 0x540   :  { %3668 = vst.msk [vmem:[#allocation2 + $0x20] sm:$0xff] %vm138_vm0, %v3652_v30  ;;  %v2662_v36 = vpop.f32.mrb[124].mxu1 }
 0x541   :  { %v2664_v54 = vpop.f32.mrb[125].mxu1  ;;  %8704 = vmatmul.mubr.msk.f32.gmra.mrb[212].mxu0 %vm2962_vm1, %v2662_v36 }
 0x544   :  { %v2667_v37 = vpop.f32.mrb[126].mxu1  ;;  %v8603_v20 = vpop.f32.mrb[160].mxu0 }
 0x545   :  { %v3655_v23 = vadd.f32 %v8603_v20, %v3441_v48  ;;  %v2669_v63 = vpop.f32.mrb[127].mxu1  ;;  %v3599_v45 = vpop.f32.mrb[161].mxu0  ;;  %8706 = vmatprep.mubr.msk.f32.mxu0 %vm2962_vm1, %v2667_v37  ;;  %v3449_v37 = vld [vmem:[#allocation2 + $0x78] sm:$0xff] }
 0x546   :  { %v3654_v55 = vadd.f32 %v3599_v45, %v3440_v57  ;;  %v3448_v63 = vld [vmem:[#allocation2 + $0x70] sm:$0xff]  ;;  %v3685_v41 = vld [vmem:[#allocation2 + $0x28] sm:$0xff] }
 0x547   :  { %3671 = vst.msk [vmem:[#allocation2 + $0x38] sm:$0xff] %vm138_vm0, %v3655_v23 }
 0x548   :  { %3670 = vst.msk [vmem:[#allocation2 + $0x30] sm:$0xff] %vm138_vm0, %v3654_v55  ;;  %v2672_v44 = vpop.f32.mrb[128].mxu1 }
 0x549   :  { %v2674_v10 = vpop.f32.mrb[129].mxu1  ;;  %8707 = vmatmul.mubr.msk.f32.gmra.mrb[214].mxu0 %vm2962_vm1, %v2672_v44 }
 0x54c   :  { %v2677_v49 = vpop.f32.mrb[130].mxu1  ;;  %v8606_v50 = vpop.f32.mrb[162].mxu0 }
 0x54d   :  { %v3657_v59 = vadd.f32 %v8606_v50, %v3443_v3  ;;  %v2679_v51 = vpop.f32.mrb[131].mxu1  ;;  %v3609_v16 = vpop.f32.mrb[163].mxu0  ;;  %8709 = vmatprep.mubr.msk.f32.mxu0 %vm2962_vm1, %v2677_v49  ;;  %v3681_v49 = vld [vmem:[#allocation2 + $0x8] sm:$0xff] }
 0x54e   :  { %v3656_v2 = vadd.f32 %v3609_v16, %v3442_v60  ;;  %v3680_v51 = vld [vmem:[#allocation2] sm:$0xff] }
 0x54f   :  { %3673 = vst.msk [vmem:[#allocation2 + $0x48] sm:$0xff] %vm138_vm0, %v3657_v59 }
 0x550   :  { %3672 = vst.msk [vmem:[#allocation2 + $0x40] sm:$0xff] %vm138_vm0, %v3656_v2  ;;  %v2682_v29 = vpop.f32.mrb[132].mxu1 }
 0x551   :  { %v2684_v19 = vpop.f32.mrb[133].mxu1  ;;  %8710 = vmatmul.mubr.msk.f32.gmra.mrb[216].mxu0 %vm2962_vm1, %v2682_v29 }
 0x554   :  { %v2687_v0 = vpop.f32.mrb[134].mxu1  ;;  %v8609_v7 = vpop.f32.mrb[164].mxu0 }
 0x555   :  { %v3659_v8 = vadd.f32 %v8609_v7, %v3445_v11  ;;  %v2689_v32 = vpop.f32.mrb[135].mxu1  ;;  %v3619_v21 = vpop.f32.mrb[165].mxu0  ;;  %8720 = vmatprep.mubr.msk.f32.mxu0 %vm2962_vm1, %v2687_v0  ;;  %v3683_v0 = vld [vmem:[#allocation2 + $0x18] sm:$0xff] }
 0x556   :  { %v3658_v17 = vadd.f32 %v3619_v21, %v3444_v25 }
 0x557   :  { %3675 = vst.msk [vmem:[#allocation2 + $0x58] sm:$0xff] %vm138_vm0, %v3659_v8  ;;  %v3682_v8 = vld [vmem:[#allocation2 + $0x10] sm:$0xff] }
 0x558   :  { %3674 = vst.msk [vmem:[#allocation2 + $0x50] sm:$0xff] %vm138_vm0, %v3658_v17  ;;  %v2692_v22 = vpop.f32.mrb[136].mxu1 }
 0x559   :  { %v2694_v27 = vpop.f32.mrb[137].mxu1  ;;  %8721 = vmatmul.mubr.msk.f32.vlgmr.msra.gmra.mrb[218].mxu0 %vm2962_vm1, %v2692_v22 }
 0x55a   :  { %9263 = vmatpush3.bf16.msra.mxu0 %v12663_v15 }
 0x55b   :  { %9265 = vmatprep.subr.bf16.mxu0 %v9264_v43 }
 0x55c   :  { %v2697_v31 = vpop.f32.mrb[138].mxu1  ;;  %v8612_v24 = vpop.f32.mrb[166].mxu0 }
 0x55d   :  { %v3661_v38 = vadd.f32 %v8612_v24, %v3447_v28  ;;  %v2699_v47 = vpop.f32.mrb[139].mxu1  ;;  %v3629_v12 = vpop.f32.mrb[167].mxu0  ;;  %8723 = vmatprep.mubr.msk.f32.mxu0 %vm2962_vm1, %v2697_v31  ;;  %v3684_v28 = vld [vmem:[#allocation2 + $0x20] sm:$0xff] }
 0x55e   :  { %v3660_v30 = vadd.f32 %v3629_v12, %v3446_v6  ;;  %9267 = vmatpush3.bf16.msra.mxu0 %v9264_v43 }
 0x55f   :  { %3677 = vst.msk [vmem:[#allocation2 + $0x68] sm:$0xff] %vm138_vm0, %v3661_v38  ;;  %9269 = vmatprep.subr.bf16.mxu0 %v12756_v42 }
 0x560   :  { %3676 = vst.msk [vmem:[#allocation2 + $0x60] sm:$0xff] %vm138_vm0, %v3660_v30  ;;  %v2702_v15 = vpop.f32.mrb[140].mxu1  ;;  %v3687_v30 = vld [vmem:[#allocation2 + $0x38] sm:$0xff] }
 0x561   :  { %v2704_v36 = vpop.f32.mrb[141].mxu1  ;;  %8724 = vmatmul.mubr.msk.f32.gmra.mrb[220].mxu0 %vm2962_vm1, %v2702_v15 }
 0x564   :  { %v2707_v54 = vpop.f32.mrb[142].mxu1  ;;  %v8615_v48 = vpop.f32.mrb[168].mxu0 }
 0x565   :  { %v3663_v20 = vadd.f32 %v8615_v48, %v3449_v37  ;;  %v2709_v23 = vpop.f32.mrb[143].mxu1  ;;  %v3639_v57 = vpop.f32.mrb[169].mxu0  ;;  %8726 = vmatprep.mubr.msk.f32.mxu0 %vm2962_vm1, %v2707_v54  ;;  %v3686_v37 = vld [vmem:[#allocation2 + $0x30] sm:$0xff] }
 0x566   :  { %v3662_v45 = vadd.f32 %v3639_v57, %v3448_v63 }
 0x567   :  { %3679 = vst.msk [vmem:[#allocation2 + $0x78] sm:$0xff] %vm138_vm0, %v3663_v20 }
 0x568   :  { %3678 = vst.msk [vmem:[#allocation2 + $0x70] sm:$0xff] %vm138_vm0, %v3662_v45  ;;  %v2712_v55 = vpop.f32.mrb[144].mxu1  ;;  %v3689_v45 = vld [vmem:[#allocation2 + $0x48] sm:$0xff] }
 0x569   :  { %v2714_v44 = vpop.f32.mrb[145].mxu1  ;;  %8727 = vmatmul.mubr.msk.f32.gmra.mrb[222].mxu0 %vm2962_vm1, %v2712_v55 }
 0x56c   :  { %v2717_v10 = vpop.f32.mrb[146].mxu1  ;;  %v8626_v3 = vpop.f32.mrb[170].mxu0 }
 0x56d   :  { %v3895_v50 = vadd.f32 %v8626_v3, %v3681_v49  ;;  %v2719_v59 = vpop.f32.mrb[147].mxu1  ;;  %v3815_v60 = vpop.f32.mrb[171].mxu0  ;;  %8729 = vmatprep.mubr.msk.f32.mxu0 %vm2962_vm1, %v2717_v10  ;;  %v3688_v49 = vld [vmem:[#allocation2 + $0x40] sm:$0xff] }
 0x56e   :  { %v3894_v16 = vadd.f32 %v3815_v60, %v3680_v51 }
 0x56f   :  { %3911 = vst.msk [vmem:[#allocation2 + $0x8] sm:$0xff] %vm138_vm0, %v3895_v50 }
 0x570   :  { %3910 = vst.msk [vmem:[#allocation2] sm:$0xff] %vm138_vm0, %v3894_v16  ;;  %v2722_v2 = vpop.f32.mrb[148].mxu1  ;;  %v3691_v16 = vld [vmem:[#allocation2 + $0x58] sm:$0xff] }
 0x571   :  { %v2724_v29 = vpop.f32.mrb[149].mxu1  ;;  %8730 = vmatmul.mubr.msk.f32.gmra.mrb[224].mxu0 %vm2962_vm1, %v2722_v2 }
 0x574   :  { %v2727_v19 = vpop.f32.mrb[230].mxu1  ;;  %v8629_v11 = vpop.f32.mrb[172].mxu0 }
 0x575   :  { %v2728_v7 = vadd.f32 %v2727_v19, %v11556_v53  ;;  %v3897_v33 = vadd.f32 %v8629_v11, %v3683_v0  ;;  %v2729_v35 = vpop.f32.mrb[231].mxu1  ;;  %v3825_v32 = vpop.f32.mrb[173].mxu0  ;;  %v3690_v0 = vld [vmem:[#allocation2 + $0x50] sm:$0xff] }
 0x576   :  { %v3896_v25 = vadd.f32 %v3825_v32, %v3682_v8 }
 0x577   :  { %3913 = vst.msk [vmem:[#allocation2 + $0x18] sm:$0xff] %vm138_vm0, %v3897_v33  ;;  %8732 = vmatprep.mubr.msk.f32.mxu0 %vm2962_vm1, %v2728_v7  ;;  %v7838_v33 = vld [vmem:[%s14418_s4 + $0x110] sm:$0xff] }
 0x578   :  { %3912 = vst.msk [vmem:[#allocation2 + $0x10] sm:$0xff] %vm138_vm0, %v3896_v25  ;;  %v2732_v21 = vpop.f32.mrb[232].mxu1 }
 0x579   :  { %v2733_v17 = vadd.f32 %v2732_v21, %v11564_v58  ;;  %v2734_v43 = vpop.f32.mrb[233].mxu1  ;;  %v3693_v21 = vld [vmem:[#allocation2 + $0x68] sm:$0xff] }
 0x57b   :  { %8733 = vmatmul.mubr.msk.f32.gmra.mrb[226].mxu0 %vm2962_vm1, %v2733_v17 }
 0x57c   :  { %v2737_v22 = vpop.f32.mrb[234].mxu1  ;;  %v8632_v53 = vpop.f32.mrb[174].mxu0 }
 0x57d   :  { %v2738_v56 = vadd.f32 %v2737_v22, %v11572_v62  ;;  %v3899_v27 = vadd.f32 %v8632_v53, %v3685_v41  ;;  %v2739_v31 = vpop.f32.mrb[235].mxu1  ;;  %v3835_v24 = vpop.f32.mrb[175].mxu0  ;;  %v3692_v53 = vld [vmem:[#allocation2 + $0x60] sm:$0xff] }
 0x57e   :  { %v3898_v38 = vadd.f32 %v3835_v24, %v3684_v28 }
 0x57f   :  { %3915 = vst.msk [vmem:[#allocation2 + $0x28] sm:$0xff] %vm138_vm0, %v3899_v27  ;;  %8735 = vmatprep.mubr.msk.f32.mxu0 %vm2962_vm1, %v2738_v56 }
 0x580   :  { %3914 = vst.msk [vmem:[#allocation2 + $0x20] sm:$0xff] %vm138_vm0, %v3898_v38  ;;  %v2742_v58 = vpop.f32.mrb[236].mxu1 }
 0x581   :  { %v2743_v47 = vadd.f32 %v2742_v58, %v11580_v1  ;;  %v2744_v6 = vpop.f32.mrb[237].mxu1 }
 0x582   :  { %v3694_v6 = vld [vmem:[#allocation2 + $0x70] sm:$0xff] }
 0x583   :  { %8736 = vmatmul.mubr.msk.f32.gmra.mrb[228].mxu0 %vm2962_vm1, %v2743_v47 }
 0x584   :  { %v2747_v12 = vpop.f32.mrb[238].mxu1  ;;  %v8635_v62 = vpop.f32.mrb[176].mxu0 }
 0x585   :  { %v2748_v15 = vadd.f32 %v2747_v12, %v11588_v5  ;;  %v3901_v36 = vadd.f32 %v8635_v62, %v3687_v30  ;;  %v2749_v54 = vpop.f32.mrb[239].mxu1  ;;  %v3845_v48 = vpop.f32.mrb[177].mxu0 }
 0x586   :  { %v3900_v20 = vadd.f32 %v3845_v48, %v3686_v37  ;;  %v3927_v54 = vld [vmem:[#allocation2 + $0x8] sm:$0xff] }
 0x587   :  { %3917 = vst.msk [vmem:[#allocation2 + $0x38] sm:$0xff] %vm138_vm0, %v3901_v36  ;;  %8738 = vmatprep.mubr.msk.f32.mxu0 %vm2962_vm1, %v2748_v15 }
 0x588   :  { %3916 = vst.msk [vmem:[#allocation2 + $0x30] sm:$0xff] %vm138_vm0, %v3900_v20  ;;  %v2752_v1 = vpop.f32.mrb[240].mxu1 }
 0x589   :  { %v2753_v23 = vadd.f32 %v2752_v1, %v11596_v9  ;;  %v2754_v63 = vpop.f32.mrb[241].mxu1  ;;  %v3926_v1 = vld [vmem:[#allocation2] sm:$0xff] }
 0x58b   :  { %8739 = vmatmul.mubr.msk.f32.gmra.mrb[230].mxu0 %vm2962_vm1, %v2753_v23 }
 0x58c   :  { %v2757_v57 = vpop.f32.mrb[242].mxu1  ;;  %v8638_v5 = vpop.f32.mrb[178].mxu0 }
 0x58d   :  { %v2758_v55 = vadd.f32 %v2757_v57, %v11604_v14  ;;  %v3903_v44 = vadd.f32 %v8638_v5, %v3689_v45  ;;  %v2759_v10 = vpop.f32.mrb[243].mxu1  ;;  %v3855_v3 = vpop.f32.mrb[179].mxu0 }
 0x58e   :  { %v3902_v50 = vadd.f32 %v3855_v3, %v3688_v49  ;;  %v3928_v49 = vld [vmem:[#allocation2 + $0x10] sm:$0xff] }
 0x58f   :  { %3919 = vst.msk [vmem:[#allocation2 + $0x48] sm:$0xff] %vm138_vm0, %v3903_v44  ;;  %8741 = vmatprep.mubr.msk.f32.mxu0 %vm2962_vm1, %v2758_v55  ;;  %v3929_v55 = vld [vmem:[#allocation2 + $0x18] sm:$0xff] }
 0x590   :  { %3918 = vst.msk [vmem:[#allocation2 + $0x40] sm:$0xff] %vm138_vm0, %v3902_v50  ;;  %v2762_v9 = vpop.f32.mrb[244].mxu1 }
 0x591   :  { %v2763_v59 = vadd.f32 %v2762_v9, %v11612_v18  ;;  %v2764_v51 = vpop.f32.mrb[245].mxu1  ;;  %v7839_v18 = vld [vmem:[%s14418_s4 + $0x118] sm:$0xff] }
 0x592   :  { %v9272_v32 = vpack.c.bf16 %v7839_v18, %v7838_v33  ;;  %v3931_v51 = vld [vmem:[#allocation2 + $0x28] sm:$0xff]  ;;  %v3933_v33 = vld [vmem:[#allocation2 + $0x38] sm:$0xff] }
 0x593   :  { %8742 = vmatmul.mubr.msk.f32.gmra.mrb[232].mxu0 %vm2962_vm1, %v2763_v59 }
 0x594   :  { %v2767_v60 = vpop.f32.mrb[246].mxu1  ;;  %v8641_v14 = vpop.f32.mrb[180].mxu0 }
 0x595   :  { %v2768_v2 = vadd.f32 %v2767_v60, %v11628_v26  ;;  %v3905_v29 = vadd.f32 %v8641_v14, %v3691_v16  ;;  %v2769_v19 = vpop.f32.mrb[247].mxu1  ;;  %v3865_v11 = vpop.f32.mrb[181].mxu0 }
 0x596   :  { %v3904_v7 = vadd.f32 %v3865_v11, %v3690_v0 }
 0x597   :  { %3921 = vst.msk [vmem:[#allocation2 + $0x58] sm:$0xff] %vm138_vm0, %v3905_v29  ;;  %8752 = vmatprep.mubr.msk.f32.mxu0 %vm2962_vm1, %v2768_v2  ;;  %v3930_v2 = vld [vmem:[#allocation2 + $0x20] sm:$0xff] }
 0x598   :  { %3920 = vst.msk [vmem:[#allocation2 + $0x50] sm:$0xff] %vm138_vm0, %v3904_v7  ;;  %v2772_v26 = vpop.f32.mrb[248].mxu1 }
 0x599   :  { %v2773_v35 = vadd.f32 %v2772_v26, %v11644_v34  ;;  %v2774_v8 = vpop.f32.mrb[249].mxu1 }
 0x59a   :  { %v3932_v8 = vld [vmem:[#allocation2 + $0x30] sm:$0xff] }
 0x59b   :  { %8753 = vmatmul.mubr.msk.f32.vlgmr.msra.gmra.mrb[234].mxu0 %vm2962_vm1, %v2773_v35 }
 0x59c   :  { %v2777_v25 = vpop.f32.mrb[250].mxu1  ;;  %v8644_v17 = vpop.f32.mrb[182].mxu0  ;;  %9271 = vmatpush3.bf16.msra.mxu0 %v12756_v42  ;;  %v3695_v42 = vld [vmem:[#allocation2 + $0x78] sm:$0xff] }
 0x59d   :  { %v2778_v43 = vadd.f32 %v2777_v25, %v11654_v40  ;;  %v3907_v22 = vadd.f32 %v8644_v17, %v3693_v21  ;;  %v2779_v41 = vpop.f32.mrb[251].mxu1  ;;  %v3875_v56 = vpop.f32.mrb[183].mxu0  ;;  %9273 = vmatprep.subr.bf16.mxu0 %v9272_v32 }
 0x59e   :  { %v3906_v27 = vadd.f32 %v3875_v56, %v3692_v53 }
 0x59f   :  { %3923 = vst.msk [vmem:[#allocation2 + $0x68] sm:$0xff] %vm138_vm0, %v3907_v22  ;;  %8755 = vmatprep.mubr.msk.f32.mxu0 %vm2962_vm1, %v2778_v43  ;;  %v3935_v22 = vld [vmem:[#allocation2 + $0x48] sm:$0xff] }
 0x5a0   :  { %3922 = vst.msk [vmem:[#allocation2 + $0x60] sm:$0xff] %vm138_vm0, %v3906_v27  ;;  %v2782_v34 = vpop.f32.mrb[252].mxu1  ;;  %9275 = vmatpush3.bf16.msra.mxu0 %v9272_v32  ;;  %v3934_v27 = vld [vmem:[#allocation2 + $0x40] sm:$0xff] }
 0x5a1   :  { %v2783_v31 = vadd.f32 %v2782_v34, %v11664_v46  ;;  %v2784_v28 = vpop.f32.mrb[253].mxu1 }
 0x5a3   :  { %8756 = vmatmul.mubr.msk.f32.gmra.mrb[236].mxu0 %vm2962_vm1, %v2783_v31 }
 0x5a4   :  { %v2787_v40 = vpop.f32.mrb[254].mxu1  ;;  %v8647_v24 = vpop.f32.mrb[184].mxu0 }
 0x5a5   :  { %v2788_v38 = vadd.f32 %v2787_v40, %v11674_v52  ;;  %v3909_v58 = vadd.f32 %v8647_v24, %v3695_v42  ;;  %v2789_v47 = vpop.f32.mrb[255].mxu1  ;;  %v3885_v12 = vpop.f32.mrb[185].mxu0  ;;  %v3937_v24 = vld [vmem:[#allocation2 + $0x58] sm:$0xff] }
 0x5a6   :  { %v3908_v30 = vadd.f32 %v3885_v12, %v3694_v6  ;;  %v3936_v6 = vld [vmem:[#allocation2 + $0x50] sm:$0xff] }
 0x5a7   :  { %3925 = vst.msk [vmem:[#allocation2 + $0x78] sm:$0xff] %vm138_vm0, %v3909_v58  ;;  %8758 = vmatprep.mubr.msk.f32.mxu0 %vm2962_vm1, %v2788_v38 }
 0x5a8   :  { %3924 = vst.msk [vmem:[#allocation2 + $0x70] sm:$0xff] %vm138_vm0, %v3908_v30  ;;  %v2792_v46 = vpop.f32.mrb[150].mxu1 }
 0x5a9   :  { %v2793_v62 = vadd.f32 %v2792_v46, %v11684_v61  ;;  %v2794_v15 = vpop.f32.mrb[151].mxu1 }
 0x5ab   :  { %8759 = vmatmul.mubr.msk.f32.gmra.mrb[238].mxu0 %vm2962_vm1, %v2793_v62 }
 0x5ac   :  { %v2797_v36 = vpop.f32.mrb[152].mxu1  ;;  %v8658_v52 = vpop.f32.mrb[186].mxu0 }
 0x5ad   :  { %v2798_v37 = vadd.f32 %v2797_v36, %v11694_v4  ;;  %v4141_v48 = vadd.f32 %v8658_v52, %v3927_v54  ;;  %v2799_v20 = vpop.f32.mrb[153].mxu1  ;;  %v4061_v23 = vpop.f32.mrb[187].mxu0  ;;  %v3939_v36 = vld [vmem:[#allocation2 + $0x68] sm:$0xff] }
 0x5ae   :  { %v4140_v63 = vadd.f32 %v4061_v23, %v3926_v1 }
 0x5af   :  { %4157 = vst.msk [vmem:[#allocation2 + $0x8] sm:$0xff] %vm138_vm0, %v4141_v48  ;;  %8761 = vmatprep.mubr.msk.f32.mxu0 %vm2962_vm1, %v2798_v37  ;;  %v3938_v48 = vld [vmem:[#allocation2 + $0x60] sm:$0xff] }
 0x5b0   :  { %4156 = vst.msk [vmem:[#allocation2] sm:$0xff] %vm138_vm0, %v4140_v63  ;;  %v2802_v61 = vpop.f32.mrb[154].mxu1 }
 0x5b1   :  { %v2803_v57 = vadd.f32 %v2802_v61, %v11704_v13  ;;  %v2804_v45 = vpop.f32.mrb[155].mxu1 }
 0x5b3   :  { %8762 = vmatmul.mubr.msk.f32.gmra.mrb[240].mxu0 %vm2962_vm1, %v2803_v57  ;;  %v3941_v57 = vld [vmem:[#allocation2 + $0x78] sm:$0xff] }
 0x5b4   :  { %v2807_v5 = vpop.f32.mrb[182].mxu1  ;;  %v8661_v4 = vpop.f32.mrb[188].mxu0 }
 0x5b5   :  { %v4143_v44 = vadd.f32 %v8661_v4, %v3929_v55  ;;  %v2809_v10 = vpop.f32.mrb[183].mxu1  ;;  %v4071_v3 = vpop.f32.mrb[189].mxu0  ;;  %8764 = vmatprep.mubr.msk.f32.mxu0 %vm2962_vm1, %v2807_v5  ;;  %v3940_v4 = vld [vmem:[#allocation2 + $0x70] sm:$0xff] }
 0x5b6   :  { %v4142_v50 = vadd.f32 %v4071_v3, %v3928_v49 }
 0x5b7   :  { %4159 = vst.msk [vmem:[#allocation2 + $0x18] sm:$0xff] %vm138_vm0, %v4143_v44 }
 0x5b8   :  { %4158 = vst.msk [vmem:[#allocation2 + $0x10] sm:$0xff] %vm138_vm0, %v4142_v50  ;;  %v2812_v9 = vpop.f32.mrb[184].mxu1 }
 0x5b9   :  { %v2814_v59 = vpop.f32.mrb[185].mxu1  ;;  %8765 = vmatmul.mubr.msk.f32.gmra.mrb[242].mxu0 %vm2962_vm1, %v2812_v9  ;;  %v4173_v9 = vld [vmem:[#allocation2 + $0x8] sm:$0xff] }
 0x5bc   :  { %v2817_v13 = vpop.f32.mrb[186].mxu1  ;;  %v8664_v60 = vpop.f32.mrb[190].mxu0 }
 0x5bd   :  { %v4145_v16 = vadd.f32 %v8664_v60, %v3931_v51  ;;  %v2819_v14 = vpop.f32.mrb[187].mxu1  ;;  %v4081_v29 = vpop.f32.mrb[191].mxu0  ;;  %8767 = vmatprep.mubr.msk.f32.mxu0 %vm2962_vm1, %v2817_v13  ;;  %v4172_v60 = vld [vmem:[#allocation2] sm:$0xff] }
 0x5be   :  { %v4144_v19 = vadd.f32 %v4081_v29, %v3930_v2 }
 0x5bf   :  { %4161 = vst.msk [vmem:[#allocation2 + $0x28] sm:$0xff] %vm138_vm0, %v4145_v16 }
 0x5c0   :  { %4160 = vst.msk [vmem:[#allocation2 + $0x20] sm:$0xff] %vm138_vm0, %v4144_v19  ;;  %v2822_v0 = vpop.f32.mrb[188].mxu1 }
 0x5c1   :  { %v2824_v11 = vpop.f32.mrb[189].mxu1  ;;  %8768 = vmatmul.mubr.msk.f32.gmra.mrb[244].mxu0 %vm2962_vm1, %v2822_v0  ;;  %v4175_v0 = vld [vmem:[#allocation2 + $0x18] sm:$0xff] }
 0x5c4   :  { %v2827_v7 = vpop.f32.mrb[190].mxu1  ;;  %v8667_v18 = vpop.f32.mrb[192].mxu0 }
 0x5c5   :  { %v4147_v26 = vadd.f32 %v8667_v18, %v3933_v33  ;;  %v2829_v35 = vpop.f32.mrb[191].mxu1  ;;  %v4091_v32 = vpop.f32.mrb[193].mxu0  ;;  %8770 = vmatprep.mubr.msk.f32.mxu0 %vm2962_vm1, %v2827_v7  ;;  %v4174_v18 = vld [vmem:[#allocation2 + $0x10] sm:$0xff] }
 0x5c6   :  { %v4146_v25 = vadd.f32 %v4091_v32, %v3932_v8 }
 0x5c7   :  { %4163 = vst.msk [vmem:[#allocation2 + $0x38] sm:$0xff] %vm138_vm0, %v4147_v26 }
 0x5c8   :  { %4162 = vst.msk [vmem:[#allocation2 + $0x30] sm:$0xff] %vm138_vm0, %v4146_v25  ;;  %v2832_v21 = vpop.f32.mrb[192].mxu1 }
 0x5c9   :  { %v2834_v17 = vpop.f32.mrb[193].mxu1  ;;  %8771 = vmatmul.mubr.msk.f32.gmra.mrb[246].mxu0 %vm2962_vm1, %v2832_v21  ;;  %v4177_v21 = vld [vmem:[#allocation2 + $0x28] sm:$0xff] }
 0x5cc   :  { %v2837_v43 = vpop.f32.mrb[194].mxu1  ;;  %v8670_v41 = vpop.f32.mrb[194].mxu0 }
 0x5cd   :  { %v4149_v53 = vadd.f32 %v8670_v41, %v3935_v22  ;;  %v2839_v56 = vpop.f32.mrb[195].mxu1  ;;  %v4101_v34 = vpop.f32.mrb[195].mxu0  ;;  %8773 = vmatprep.mubr.msk.f32.mxu0 %vm2962_vm1, %v2837_v43  ;;  %v4176_v41 = vld [vmem:[#allocation2 + $0x20] sm:$0xff] }
 0x5ce   :  { %v4148_v31 = vadd.f32 %v4101_v34, %v3934_v27 }
 0x5cf   :  { %4165 = vst.msk [vmem:[#allocation2 + $0x48] sm:$0xff] %vm138_vm0, %v4149_v53 }
 0x5d0   :  { %4164 = vst.msk [vmem:[#allocation2 + $0x40] sm:$0xff] %vm138_vm0, %v4148_v31  ;;  %v2842_v28 = vpop.f32.mrb[196].mxu1 }
 0x5d1   :  { %v2844_v40 = vpop.f32.mrb[197].mxu1  ;;  %8774 = vmatmul.mubr.msk.f32.gmra.mrb[248].mxu0 %vm2962_vm1, %v2842_v28  ;;  %v4179_v28 = vld [vmem:[#allocation2 + $0x38] sm:$0xff] }
 0x5d4   :  { %v2847_v42 = vpop.f32.mrb[198].mxu1  ;;  %v8673_v38 = vpop.f32.mrb[196].mxu0 }
 0x5d5   :  { %v4151_v58 = vadd.f32 %v8673_v38, %v3937_v24  ;;  %v2849_v47 = vpop.f32.mrb[199].mxu1  ;;  %v4111_v12 = vpop.f32.mrb[197].mxu0  ;;  %8784 = vmatprep.mubr.msk.f32.mxu0 %vm2962_vm1, %v2847_v42  ;;  %v4178_v38 = vld [vmem:[#allocation2 + $0x30] sm:$0xff] }
 0x5d6   :  { %v4150_v30 = vadd.f32 %v4111_v12, %v3936_v6 }
 0x5d7   :  { %4167 = vst.msk [vmem:[#allocation2 + $0x58] sm:$0xff] %vm138_vm0, %v4151_v58 }
 0x5d8   :  { %4166 = vst.msk [vmem:[#allocation2 + $0x50] sm:$0xff] %vm138_vm0, %v4150_v30  ;;  %v2852_v46 = vpop.f32.mrb[200].mxu1 }
 0x5d9   :  { %v2854_v62 = vpop.f32.mrb[201].mxu1  ;;  %8785 = vmatmul.mubr.msk.f32.vlgmr.msra.gmra.mrb[250].mxu0 %vm2962_vm1, %v2852_v46  ;;  %v4181_v46 = vld [vmem:[#allocation2 + $0x48] sm:$0xff] }
 0x5dc   :  { %v2857_v15 = vpop.f32.mrb[202].mxu1  ;;  %v8676_v54 = vpop.f32.mrb[198].mxu0 }
 0x5dd   :  { %v4153_v52 = vadd.f32 %v8676_v54, %v3939_v36  ;;  %v2859_v37 = vpop.f32.mrb[203].mxu1  ;;  %v4121_v20 = vpop.f32.mrb[199].mxu0  ;;  %8787 = vmatprep.mubr.msk.f32.mxu0 %vm2962_vm1, %v2857_v15  ;;  %v4180_v54 = vld [vmem:[#allocation2 + $0x40] sm:$0xff] }
 0x5de   :  { %v4152_v1 = vadd.f32 %v4121_v20, %v3938_v48 }
 0x5df   :  { %4169 = vst.msk [vmem:[#allocation2 + $0x68] sm:$0xff] %vm138_vm0, %v4153_v52 }
 0x5e0   :  { %4168 = vst.msk [vmem:[#allocation2 + $0x60] sm:$0xff] %vm138_vm0, %v4152_v1  ;;  %v2862_v23 = vpop.f32.mrb[204].mxu1  ;;  %v4183_v1 = vld [vmem:[#allocation2 + $0x58] sm:$0xff] }
 0x5e1   :  { %v2864_v63 = vpop.f32.mrb[205].mxu1  ;;  %8788 = vmatmul.mubr.msk.f32.gmra.mrb[252].mxu0 %vm2962_vm1, %v2862_v23 }
 0x5e4   :  { %v2867_v61 = vpop.f32.mrb[206].mxu1  ;;  %v8679_v45 = vpop.f32.mrb[200].mxu0 }
 0x5e5   :  { %v4155_v5 = vadd.f32 %v8679_v45, %v3941_v57  ;;  %v2869_v55 = vpop.f32.mrb[207].mxu1  ;;  %v4131_v44 = vpop.f32.mrb[201].mxu0  ;;  %8790 = vmatprep.mubr.msk.f32.mxu0 %vm2962_vm1, %v2867_v61  ;;  %v4182_v61 = vld [vmem:[#allocation2 + $0x50] sm:$0xff] }
 0x5e6   :  { %v4154_v10 = vadd.f32 %v4131_v44, %v3940_v4 }
 0x5e7   :  { %4171 = vst.msk [vmem:[#allocation2 + $0x78] sm:$0xff] %vm138_vm0, %v4155_v5  ;;  %v4185_v5 = vld [vmem:[#allocation2 + $0x68] sm:$0xff]  ;;  %v4184_v44 = vld [vmem:[#allocation2 + $0x60] sm:$0xff] }
 0x5e8   :  { %4170 = vst.msk [vmem:[#allocation2 + $0x70] sm:$0xff] %vm138_vm0, %v4154_v10  ;;  %v2872_v49 = vpop.f32.mrb[208].mxu1 }
 0x5e9   :  { %v2874_v3 = vpop.f32.mrb[209].mxu1  ;;  %8791 = vmatmul.mubr.msk.f32.gmra.mrb[254].mxu0 %vm2962_vm1, %v2872_v49 }
 0x5ec   :  { %v2877_v50 = vpop.f32.mrb[210].mxu1  ;;  %v8690_v59 = vpop.f32.mrb[202].mxu0 }
 0x5ed   :  { %v4387_v13 = vadd.f32 %v8690_v59, %v4173_v9  ;;  %v2879_v51 = vpop.f32.mrb[211].mxu1  ;;  %v4307_v16 = vpop.f32.mrb[203].mxu0  ;;  %8793 = vmatprep.mubr.msk.f32.mxu0 %vm2962_vm1, %v2877_v50 }
 0x5ee   :  { %v4386_v14 = vadd.f32 %v4307_v16, %v4172_v60  ;;  %v4187_v3 = vld [vmem:[#allocation2 + $0x78] sm:$0xff] }
 0x5ef   :  { %4403 = vst.msk [vmem:[#allocation2 + $0x8] sm:$0xff] %vm138_vm0, %v4387_v13  ;;  %v4186_v59 = vld [vmem:[#allocation2 + $0x70] sm:$0xff] }
 0x5f0   :  { %4402 = vst.msk [vmem:[#allocation2] sm:$0xff] %vm138_vm0, %v4386_v14  ;;  %v2882_v2 = vpop.f32.mrb[212].mxu1 }
 0x5f1   :  { %v2884_v29 = vpop.f32.mrb[213].mxu1  ;;  %8794 = vmatmul.mubr.msk.f32.gmra.mrb[0].mxu0 %vm2962_vm1, %v2882_v2 }
 0x5f4   :  { %v2887_v19 = vpop.f32.mrb[214].mxu1  ;;  %v8693_v11 = vpop.f32.mrb[204].mxu0 }
 0x5f5   :  { %v4389_v7 = vadd.f32 %v8693_v11, %v4175_v0  ;;  %v2889_v33 = vpop.f32.mrb[215].mxu1  ;;  %v4317_v26 = vpop.f32.mrb[205].mxu0  ;;  %8796 = vmatprep.mubr.msk.f32.mxu0 %vm2962_vm1, %v2887_v19 }
 0x5f6   :  { %v4388_v35 = vadd.f32 %v4317_v26, %v4174_v18  ;;  %v4419_v60 = vld [vmem:[#allocation2 + $0x8] sm:$0xff] }
 0x5f7   :  { %4405 = vst.msk [vmem:[#allocation2 + $0x18] sm:$0xff] %vm138_vm0, %v4389_v7  ;;  %v4418_v2 = vld [vmem:[#allocation2] sm:$0xff] }
 0x5f8   :  { %4404 = vst.msk [vmem:[#allocation2 + $0x10] sm:$0xff] %vm138_vm0, %v4388_v35  ;;  %v2892_v8 = vpop.f32.mrb[216].mxu1 }
 0x5f9   :  { %v2894_v32 = vpop.f32.mrb[217].mxu1  ;;  %8797 = vmatmul.mubr.msk.f32.gmra.mrb[2].mxu0 %vm2962_vm1, %v2892_v8 }
 0x5fc   :  { %v2897_v25 = vpop.f32.mrb[218].mxu1  ;;  %v8696_v17 = vpop.f32.mrb[206].mxu0 }
 0x5fd   :  { %v4391_v43 = vadd.f32 %v8696_v17, %v4177_v21  ;;  %v2899_v22 = vpop.f32.mrb[219].mxu1  ;;  %v4327_v53 = vpop.f32.mrb[207].mxu0  ;;  %8799 = vmatprep.mubr.msk.f32.mxu0 %vm2962_vm1, %v2897_v25 }
 0x5fe   :  { %v4390_v56 = vadd.f32 %v4327_v53, %v4176_v41  ;;  %v4421_v0 = vld [vmem:[#allocation2 + $0x18] sm:$0xff] }
 0x5ff   :  { %4407 = vst.msk [vmem:[#allocation2 + $0x28] sm:$0xff] %vm138_vm0, %v4391_v43  ;;  %v4420_v33 = vld [vmem:[#allocation2 + $0x10] sm:$0xff] }
 0x600   :  { %4406 = vst.msk [vmem:[#allocation2 + $0x20] sm:$0xff] %vm138_vm0, %v4390_v56  ;;  %v2902_v27 = vpop.f32.mrb[220].mxu1 }
 0x601   :  { %v2904_v34 = vpop.f32.mrb[221].mxu1  ;;  %8800 = vmatmul.mubr.msk.f32.gmra.mrb[4].mxu0 %vm2962_vm1, %v2902_v27 }
 0x604   :  { %v2907_v31 = vpop.f32.mrb[222].mxu1  ;;  %v8699_v40 = vpop.f32.mrb[208].mxu0 }
 0x605   :  { %v4393_v42 = vadd.f32 %v8699_v40, %v4179_v28  ;;  %v2909_v24 = vpop.f32.mrb[223].mxu1  ;;  %v4337_v58 = vpop.f32.mrb[209].mxu0  ;;  %8802 = vmatprep.mubr.msk.f32.mxu0 %vm2962_vm1, %v2907_v31 }
 0x606   :  { %v4392_v47 = vadd.f32 %v4337_v58, %v4178_v38  ;;  %v4423_v35 = vld [vmem:[#allocation2 + $0x28] sm:$0xff] }
 0x607   :  { %4409 = vst.msk [vmem:[#allocation2 + $0x38] sm:$0xff] %vm138_vm0, %v4393_v42  ;;  %v4422_v25 = vld [vmem:[#allocation2 + $0x20] sm:$0xff] }
 0x608   :  { %4408 = vst.msk [vmem:[#allocation2 + $0x30] sm:$0xff] %vm138_vm0, %v4392_v47  ;;  %v2912_v6 = vpop.f32.mrb[224].mxu1 }
 0x609   :  { %v2914_v12 = vpop.f32.mrb[225].mxu1  ;;  %8803 = vmatmul.mubr.msk.f32.gmra.mrb[6].mxu0 %vm2962_vm1, %v2912_v6 }
 0x60c   :  { %v2917_v30 = vpop.f32.mrb[226].mxu1  ;;  %v8702_v62 = vpop.f32.mrb[210].mxu0 }
 0x60d   :  { %v4395_v15 = vadd.f32 %v8702_v62, %v4181_v46  ;;  %v2919_v36 = vpop.f32.mrb[227].mxu1  ;;  %v4347_v52 = vpop.f32.mrb[211].mxu0  ;;  %8805 = vmatprep.mubr.msk.f32.mxu0 %vm2962_vm1, %v2917_v30 }
 0x60e   :  { %v4394_v37 = vadd.f32 %v4347_v52, %v4180_v54  ;;  %v4425_v43 = vld [vmem:[#allocation2 + $0x38] sm:$0xff] }
 0x60f   :  { %4411 = vst.msk [vmem:[#allocation2 + $0x48] sm:$0xff] %vm138_vm0, %v4395_v15  ;;  %v4424_v53 = vld [vmem:[#allocation2 + $0x30] sm:$0xff] }
 0x610   :  { %4410 = vst.msk [vmem:[#allocation2 + $0x40] sm:$0xff] %vm138_vm0, %v4394_v37  ;;  %v2922_v48 = vpop.f32.mrb[228].mxu1 }
 0x611   :  { %v2924_v20 = vpop.f32.mrb[229].mxu1  ;;  %8806 = vmatmul.mubr.msk.f32.gmra.mrb[8].mxu0 %vm2962_vm1, %v2922_v48 }
 0x614   :  { %v8705_v23 = vpop.f32.mrb[212].mxu0 }
 0x615   :  { %v4397_v63 = vadd.f32 %v8705_v23, %v4183_v1  ;;  %v4357_v57 = vpop.f32.mrb[213].mxu0 }
 0x616   :  { %v4396_v45 = vadd.f32 %v4357_v57, %v4182_v61  ;;  %v4427_v34 = vld [vmem:[#allocation2 + $0x48] sm:$0xff] }
 0x617   :  { %4413 = vst.msk [vmem:[#allocation2 + $0x58] sm:$0xff] %vm138_vm0, %v4397_v63  ;;  %v4426_v40 = vld [vmem:[#allocation2 + $0x40] sm:$0xff] }
 0x618   :  { %4412 = vst.msk [vmem:[#allocation2 + $0x50] sm:$0xff] %vm138_vm0, %v4396_v45 }
 0x61c   :  { %v8708_v55 = vpop.f32.mrb[214].mxu0 }
 0x61d   :  { %v4399_v4 = vadd.f32 %v8708_v55, %v4185_v5  ;;  %v4367_v10 = vpop.f32.mrb[215].mxu0 }
 0x61e   :  { %v4398_v49 = vadd.f32 %v4367_v10, %v4184_v44  ;;  %v4429_v38 = vld [vmem:[#allocation2 + $0x58] sm:$0xff] }
 0x61f   :  { %4415 = vst.msk [vmem:[#allocation2 + $0x68] sm:$0xff] %vm138_vm0, %v4399_v4  ;;  %v4428_v6 = vld [vmem:[#allocation2 + $0x50] sm:$0xff] }
 0x620   :  { %4414 = vst.msk [vmem:[#allocation2 + $0x60] sm:$0xff] %vm138_vm0, %v4398_v49 }
 0x624   :  { %v8711_v50 = vpop.f32.mrb[216].mxu0 }
 0x625   :  { %v4401_v9 = vadd.f32 %v8711_v50, %v4187_v3  ;;  %v4377_v13 = vpop.f32.mrb[217].mxu0 }
 0x626   :  { %v4400_v51 = vadd.f32 %v4377_v13, %v4186_v59  ;;  %v4431_v46 = vld [vmem:[#allocation2 + $0x68] sm:$0xff]  ;;  %v5211_v59 = vld [vmem:[%s14419_s6] sm:$0xff] }
 0x627   :  { %4417 = vst.msk [vmem:[#allocation2 + $0x78] sm:$0xff] %vm138_vm0, %v4401_v9  ;;  %v4430_v36 = vld [vmem:[#allocation2 + $0x60] sm:$0xff]  ;;  %8840 = vmatprep.mubr.f32.mxu0 %v5211_v59 }
 0x628   :  { %4416 = vst.msk [vmem:[#allocation2 + $0x70] sm:$0xff] %vm138_vm0, %v4400_v51 }
 0x62c   :  { %v8722_v16 = vpop.f32.mrb[218].mxu0 }
 0x62d   :  { %v4633_v14 = vadd.f32 %v8722_v16, %v4419_v60  ;;  %v4553_v29 = vpop.f32.mrb[219].mxu0 }
 0x62e   :  { %v4632_v19 = vadd.f32 %v4553_v29, %v4418_v2  ;;  %v4433_v37 = vld [vmem:[#allocation2 + $0x78] sm:$0xff] }
 0x62f   :  { %4649 = vst.msk [vmem:[#allocation2 + $0x8] sm:$0xff] %vm138_vm0, %v4633_v14  ;;  %v4432_v1 = vld [vmem:[#allocation2 + $0x70] sm:$0xff] }
 0x630   :  { %4648 = vst.msk [vmem:[#allocation2] sm:$0xff] %vm138_vm0, %v4632_v19 }
 0x634   :  { %v8725_v11 = vpop.f32.mrb[220].mxu0 }
 0x635   :  { %v4635_v7 = vadd.f32 %v8725_v11, %v4421_v0  ;;  %v4563_v18 = vpop.f32.mrb[221].mxu0 }
 0x636   :  { %v4634_v26 = vadd.f32 %v4563_v18, %v4420_v33  ;;  %v4665_v61 = vld [vmem:[#allocation2 + $0x8] sm:$0xff] }
 0x637   :  { %4651 = vst.msk [vmem:[#allocation2 + $0x18] sm:$0xff] %vm138_vm0, %v4635_v7  ;;  %v4664_v5 = vld [vmem:[#allocation2] sm:$0xff] }
 0x638   :  { %4650 = vst.msk [vmem:[#allocation2 + $0x10] sm:$0xff] %vm138_vm0, %v4634_v26 }
 0x63c   :  { %v8728_v8 = vpop.f32.mrb[222].mxu0 }
 0x63d   :  { %v4637_v32 = vadd.f32 %v8728_v8, %v4423_v35  ;;  %v4573_v21 = vpop.f32.mrb[223].mxu0 }
 0x63e   :  { %v4636_v17 = vadd.f32 %v4573_v21, %v4422_v25  ;;  %v4667_v44 = vld [vmem:[#allocation2 + $0x18] sm:$0xff] }
 0x63f   :  { %4653 = vst.msk [vmem:[#allocation2 + $0x28] sm:$0xff] %vm138_vm0, %v4637_v32  ;;  %v4666_v3 = vld [vmem:[#allocation2 + $0x10] sm:$0xff] }
 0x640   :  { %4652 = vst.msk [vmem:[#allocation2 + $0x20] sm:$0xff] %vm138_vm0, %v4636_v17 }
 0x644   :  { %v8731_v22 = vpop.f32.mrb[224].mxu0 }
 0x645   :  { %v4639_v41 = vadd.f32 %v8731_v22, %v4425_v43  ;;  %v4583_v56 = vpop.f32.mrb[225].mxu0 }
 0x646   :  { %v4638_v27 = vadd.f32 %v4583_v56, %v4424_v53  ;;  %v4669_v13 = vld [vmem:[#allocation2 + $0x28] sm:$0xff] }
 0x647   :  { %4655 = vst.msk [vmem:[#allocation2 + $0x38] sm:$0xff] %vm138_vm0, %v4639_v41  ;;  %v4668_v16 = vld [vmem:[#allocation2 + $0x20] sm:$0xff] }
 0x648   :  { %4654 = vst.msk [vmem:[#allocation2 + $0x30] sm:$0xff] %vm138_vm0, %v4638_v27 }
 0x64e   :  { %v8734_v31 = vpop.f32.mrb[226].mxu0  ;;  %v4671_v29 = vld [vmem:[#allocation2 + $0x38] sm:$0xff] }
 0x64f   :  { %v4641_v28 = vadd.f32 %v8734_v31, %v4427_v34  ;;  %v4593_v42 = vpop.f32.mrb[227].mxu0  ;;  %v4670_v11 = vld [vmem:[#allocation2 + $0x30] sm:$0xff] }
 0x650   :  { %v4640_v24 = vadd.f32 %v4593_v42, %v4426_v40 }
 0x651   :  { %4657 = vst.msk [vmem:[#allocation2 + $0x48] sm:$0xff] %vm138_vm0, %v4641_v28 }
 0x652   :  { %4656 = vst.msk [vmem:[#allocation2 + $0x40] sm:$0xff] %vm138_vm0, %v4640_v24 }
 0x656   :  { %v8737_v58 = vpop.f32.mrb[228].mxu0 }
 0x657   :  { %v4643_v47 = vadd.f32 %v8737_v58, %v4429_v38  ;;  %v4603_v12 = vpop.f32.mrb[229].mxu0 }
 0x658   :  { %v4642_v30 = vadd.f32 %v4603_v12, %v4428_v6  ;;  %v4673_v18 = vld [vmem:[#allocation2 + $0x48] sm:$0xff] }
 0x659   :  { %4659 = vst.msk [vmem:[#allocation2 + $0x58] sm:$0xff] %vm138_vm0, %v4643_v47  ;;  %v4672_v8 = vld [vmem:[#allocation2 + $0x40] sm:$0xff] }
 0x65a   :  { %4658 = vst.msk [vmem:[#allocation2 + $0x50] sm:$0xff] %vm138_vm0, %v4642_v30 }
 0x65e   :  { %v8740_v62 = vpop.f32.mrb[230].mxu0 }
 0x65f   :  { %v4645_v15 = vadd.f32 %v8740_v62, %v4431_v46  ;;  %v4613_v54 = vpop.f32.mrb[231].mxu0 }
 0x660   :  { %v4644_v52 = vadd.f32 %v4613_v54, %v4430_v36  ;;  %v4675_v21 = vld [vmem:[#allocation2 + $0x58] sm:$0xff] }
 0x661   :  { %4661 = vst.msk [vmem:[#allocation2 + $0x68] sm:$0xff] %vm138_vm0, %v4645_v15  ;;  %v4674_v22 = vld [vmem:[#allocation2 + $0x50] sm:$0xff] }
 0x662   :  { %4660 = vst.msk [vmem:[#allocation2 + $0x60] sm:$0xff] %vm138_vm0, %v4644_v52 }
 0x666   :  { %v8743_v48 = vpop.f32.mrb[232].mxu0 }
 0x667   :  { %v4647_v20 = vadd.f32 %v8743_v48, %v4433_v37  ;;  %v4623_v23 = vpop.f32.mrb[233].mxu0  ;;  %v12920_v37 = vld [vmem:[%s14420_s5] ss:$0 sm:$0xff] }
 0x668   :  { %v4646_v63 = vadd.f32 %v4623_v23, %v4432_v1  ;;  %v4677_v56 = vld [vmem:[#allocation2 + $0x68] sm:$0xff] }
 0x669   :  { %4663 = vst.msk [vmem:[#allocation2 + $0x78] sm:$0xff] %vm138_vm0, %v4647_v20  ;;  %v4676_v31 = vld [vmem:[#allocation2 + $0x60] sm:$0xff] }
 0x66a   :  { %4662 = vst.msk [vmem:[#allocation2 + $0x70] sm:$0xff] %vm138_vm0, %v4646_v63 }
 0x66e   :  { %v8754_v57 = vpop.f32.mrb[234].mxu0 }
 0x66f   :  { %v4879_v45 = vadd.f32 %v8754_v57, %v4665_v61  ;;  %v4799_v55 = vpop.f32.mrb[235].mxu0 }
 0x670   :  { %v4878_v4 = vadd.f32 %v4799_v55, %v4664_v5  ;;  %v4679_v42 = vld [vmem:[#allocation2 + $0x78] sm:$0xff] }
 0x671   :  { %4895 = vst.msk [vmem:[#allocation2 + $0x8] sm:$0xff] %vm138_vm0, %v4879_v45  ;;  %v4678_v58 = vld [vmem:[#allocation2 + $0x70] sm:$0xff] }
 0x672   :  { %4894 = vst.msk [vmem:[#allocation2] sm:$0xff] %vm138_vm0, %v4878_v4 }
 0x676   :  { %v8757_v10 = vpop.f32.mrb[236].mxu0 }
 0x677   :  { %v4881_v49 = vadd.f32 %v8757_v10, %v4667_v44  ;;  %v4809_v50 = vpop.f32.mrb[237].mxu0 }
 0x678   :  { %v4880_v9 = vadd.f32 %v4809_v50, %v4666_v3  ;;  %v4911_v12 = vld [vmem:[#allocation2 + $0x8] sm:$0xff] }
 0x679   :  { %4897 = vst.msk [vmem:[#allocation2 + $0x18] sm:$0xff] %vm138_vm0, %v4881_v49  ;;  %v4910_v62 = vld [vmem:[#allocation2] sm:$0xff] }
 0x67a   :  { %4896 = vst.msk [vmem:[#allocation2 + $0x10] sm:$0xff] %vm138_vm0, %v4880_v9 }
 0x67e   :  { %v8760_v51 = vpop.f32.mrb[238].mxu0 }
 0x67f   :  { %v4883_v60 = vadd.f32 %v8760_v51, %v4669_v13  ;;  %v4819_v14 = vpop.f32.mrb[239].mxu0 }
 0x680   :  { %v4882_v2 = vadd.f32 %v4819_v14, %v4668_v16  ;;  %v4913_v54 = vld [vmem:[#allocation2 + $0x18] sm:$0xff] }
 0x681   :  { %4899 = vst.msk [vmem:[#allocation2 + $0x28] sm:$0xff] %vm138_vm0, %v4883_v60  ;;  %v4912_v20 = vld [vmem:[#allocation2 + $0x10] sm:$0xff] }
 0x682   :  { %4898 = vst.msk [vmem:[#allocation2 + $0x20] sm:$0xff] %vm138_vm0, %v4882_v2 }
 0x686   :  { %v8763_v19 = vpop.f32.mrb[240].mxu0 }
 0x687   :  { %v4885_v0 = vadd.f32 %v8763_v19, %v4671_v29  ;;  %v4829_v7 = vpop.f32.mrb[241].mxu0 }
 0x688   :  { %v4884_v33 = vadd.f32 %v4829_v7, %v4670_v11  ;;  %v4915_v4 = vld [vmem:[#allocation2 + $0x28] sm:$0xff] }
 0x689   :  { %4901 = vst.msk [vmem:[#allocation2 + $0x38] sm:$0xff] %vm138_vm0, %v4885_v0  ;;  %v4914_v3 = vld [vmem:[#allocation2 + $0x20] sm:$0xff] }
 0x68a   :  { %4900 = vst.msk [vmem:[#allocation2 + $0x30] sm:$0xff] %vm138_vm0, %v4884_v33 }
 0x68c   :  { %v8766_v26 = vpop.f32.mrb[242].mxu0 }
 0x68d   :  { %v4887_v35 = vadd.f32 %v8766_v26, %v4673_v18  ;;  %v4839_v32 = vpop.f32.mrb[243].mxu0 }
 0x68e   :  { %v4886_v25 = vadd.f32 %v4839_v32, %v4672_v8 }
 0x68f   :  { %4903 = vst.msk [vmem:[#allocation2 + $0x48] sm:$0xff] %vm138_vm0, %v4887_v35 }
 0x690   :  { %4902 = vst.msk [vmem:[#allocation2 + $0x40] sm:$0xff] %vm138_vm0, %v4886_v25  ;;  %v4917_v2 = vld [vmem:[#allocation2 + $0x38] sm:$0xff] }
 0x691   :  { %v4916_v11 = vld [vmem:[#allocation2 + $0x30] sm:$0xff] }
 0x694   :  { %v8769_v17 = vpop.f32.mrb[244].mxu0 }
 0x695   :  { %v4889_v43 = vadd.f32 %v8769_v17, %v4675_v21  ;;  %v4849_v41 = vpop.f32.mrb[245].mxu0 }
 0x696   :  { %v4888_v53 = vadd.f32 %v4849_v41, %v4674_v22  ;;  %v4919_v21 = vld [vmem:[#allocation2 + $0x48] sm:$0xff] }
 0x697   :  { %4905 = vst.msk [vmem:[#allocation2 + $0x58] sm:$0xff] %vm138_vm0, %v4889_v43  ;;  %v4918_v41 = vld [vmem:[#allocation2 + $0x40] sm:$0xff] }
 0x698   :  { %4904 = vst.msk [vmem:[#allocation2 + $0x50] sm:$0xff] %vm138_vm0, %v4888_v53 }
 0x69c   :  { %v8772_v27 = vpop.f32.mrb[246].mxu0 }
 0x69d   :  { %v4891_v34 = vadd.f32 %v8772_v27, %v4677_v56  ;;  %v4859_v28 = vpop.f32.mrb[247].mxu0 }
 0x69e   :  { %v4890_v40 = vadd.f32 %v4859_v28, %v4676_v31 }
 0x69f   :  { %4907 = vst.msk [vmem:[#allocation2 + $0x68] sm:$0xff] %vm138_vm0, %v4891_v34 }
 0x6a0   :  { %4906 = vst.msk [vmem:[#allocation2 + $0x60] sm:$0xff] %vm138_vm0, %v4890_v40 }
 0x6a4   :  { %v8775_v24 = vpop.f32.mrb[248].mxu0 }
 0x6a5   :  { %v4893_v38 = vadd.f32 %v8775_v24, %v4679_v42  ;;  %v4869_v47 = vpop.f32.mrb[249].mxu0  ;;  %v4921_v24 = vld [vmem:[#allocation2 + $0x58] sm:$0xff] }
 0x6a6   :  { %v4892_v6 = vadd.f32 %v4869_v47, %v4678_v58 }
 0x6a7   :  { %4909 = vst.msk [vmem:[#allocation2 + $0x78] sm:$0xff] %vm138_vm0, %v4893_v38 }
 0x6a8   :  { %4908 = vst.msk [vmem:[#allocation2 + $0x70] sm:$0xff] %vm138_vm0, %v4892_v6  ;;  %v4920_v6 = vld [vmem:[#allocation2 + $0x50] sm:$0xff] }
 0x6ac   :  { %v8786_v30 = vpop.f32.mrb[250].mxu0 }
 0x6ad   :  { %v5125_v46 = vadd.f32 %v8786_v30, %v4911_v12  ;;  %v5045_v15 = vpop.f32.mrb[251].mxu0 }
 0x6ae   :  { %v5124_v36 = vadd.f32 %v5045_v15, %v4910_v62 }
 0x6af   :  { %5141 = vst.msk [vmem:[#allocation2 + $0x8] sm:$0xff] %vm138_vm0, %v5125_v46 }
 0x6b0   :  { %5140 = vst.msk [vmem:[#allocation2] sm:$0xff] %vm138_vm0, %v5124_v36 }
 0x6b4   :  { %v8789_v52 = vpop.f32.mrb[252].mxu0 }
 0x6b5   :  { %v5127_v48 = vadd.f32 %v8789_v52, %v4913_v54  ;;  %v5055_v1 = vpop.f32.mrb[253].mxu0 }
 0x6b6   :  { %v5126_v23 = vadd.f32 %v5055_v1, %v4912_v20  ;;  %v5157_v63 = vld [vmem:[#allocation2 + $0x8] sm:$0xff] }
 0x6b7   :  { %5143 = vst.msk [vmem:[#allocation2 + $0x18] sm:$0xff] %vm138_vm0, %v5127_v48  ;;  %v5156_v61 = vld [vmem:[#allocation2] sm:$0xff]  ;;  %v5180_v57 = vadd.f32 %v12920_v37, %v5157_v63  ;;  %v4923_v48 = vld [vmem:[#allocation2 + $0x68] sm:$0xff] }
 0x6b8   :  { %5142 = vst.msk [vmem:[#allocation2 + $0x10] sm:$0xff] %vm138_vm0, %v5126_v23  ;;  %v5179_v45 = vadd.f32 %v12920_v37, %v5156_v61  ;;  %v4922_v63 = vld [vmem:[#allocation2 + $0x60] sm:$0xff] }
 0x6b9   :  { %v5196_v5 = vmax.f32 %v5180_v57, 0.0 }
 0x6ba   :  { %v5195_v55 = vmax.f32 %v5179_v45, 0.0 }
 0x6bc   :  { %v8792_v44 = vpop.f32.mrb[254].mxu0  ;;  %v9276_v10 = vpack.c.bf16 %v5196_v5, %v5195_v55 }
 0x6bd   :  { %v5129_v49 = vadd.f32 %v8792_v44, %v4915_v4  ;;  %v5065_v50 = vpop.f32.mrb[255].mxu0 }
 0x6be   :  { %v5128_v9 = vadd.f32 %v5065_v50, %v4914_v3  ;;  %9277 = vmatprep.subr.bf16.mxu0 %v9276_v10  ;;  %v5159_v59 = vld [vmem:[#allocation2 + $0x18] sm:$0xff] }
 0x6bf   :  { %5145 = vst.msk [vmem:[#allocation2 + $0x28] sm:$0xff] %vm138_vm0, %v5129_v49  ;;  %9279 = vmatpush3.bf16.msra.mxu0 %v9276_v10  ;;  %v5158_v13 = vld [vmem:[#allocation2 + $0x10] sm:$0xff]  ;;  %v5182_v51 = vadd.f32 %v12920_v37, %v5159_v59  ;;  %v4925_v49 = vld [vmem:[#allocation2 + $0x78] sm:$0xff] }
 0x6c0   :  { %5144 = vst.msk [vmem:[#allocation2 + $0x20] sm:$0xff] %vm138_vm0, %v5128_v9  ;;  %v5181_v60 = vadd.f32 %v12920_v37, %v5158_v13  ;;  %v4924_v59 = vld [vmem:[#allocation2 + $0x70] sm:$0xff] }
 0x6c1   :  { %v5198_v16 = vmax.f32 %v5182_v51, 0.0 }
 0x6c2   :  { %v5197_v14 = vmax.f32 %v5181_v60, 0.0 }
 0x6c4   :  { %v8795_v29 = vpop.f32.mrb[0].mxu0  ;;  %v9280_v19 = vpack.c.bf16 %v5198_v16, %v5197_v14 }
 0x6c5   :  { %v5131_v0 = vadd.f32 %v8795_v29, %v4917_v2  ;;  %v5075_v7 = vpop.f32.mrb[1].mxu0 }
 0x6c6   :  { %v5130_v33 = vadd.f32 %v5075_v7, %v4916_v11  ;;  %9281 = vmatprep.subr.bf16.mxu0 %v9280_v19  ;;  %v5161_v18 = vld [vmem:[#allocation2 + $0x28] sm:$0xff] }
 0x6c7   :  { %5147 = vst.msk [vmem:[#allocation2 + $0x38] sm:$0xff] %vm138_vm0, %v5131_v0  ;;  %9283 = vmatpush3.bf16.msra.mxu0 %v9280_v19  ;;  %v5160_v26 = vld [vmem:[#allocation2 + $0x20] sm:$0xff]  ;;  %v5184_v35 = vadd.f32 %v12920_v37, %v5161_v18 }
 0x6c8   :  { %5146 = vst.msk [vmem:[#allocation2 + $0x30] sm:$0xff] %vm138_vm0, %v5130_v33  ;;  %v5183_v8 = vadd.f32 %v12920_v37, %v5160_v26 }
 0x6c9   :  { %v5200_v32 = vmax.f32 %v5184_v35, 0.0  ;;  %v5500_v35 = vld [vmem:[%s14421_s7] sm:$0xff] }
 0x6ca   :  { %v5199_v25 = vmax.f32 %v5183_v8, 0.0  ;;  %v5501_v8 = vld [vmem:[%s14421_s7 + $0x8] sm:$0xff] }
 0x6cc   :  { %v8798_v17 = vpop.f32.mrb[2].mxu0  ;;  %v9284_v43 = vpack.c.bf16 %v5200_v32, %v5199_v25 }
 0x6cd   :  { %v5133_v22 = vadd.f32 %v8798_v17, %v4919_v21  ;;  %v5085_v53 = vpop.f32.mrb[3].mxu0  ;;  %v9308_v21 = vpack.c.bf16 %v5501_v8, %v5500_v35  ;;  %v5502_v17 = vld [vmem:[%s14421_s7 + $0x10] sm:$0xff]  ;;  %v7868_v35 = vld [vmem:[%s14421_s7 + $0x78] sm:$0xff] }
 0x6ce   :  { %v5132_v56 = vadd.f32 %v5085_v53, %v4918_v41  ;;  %9285 = vmatprep.subr.bf16.mxu0 %v9284_v43  ;;  %v5163_v27 = vld [vmem:[#allocation2 + $0x38] sm:$0xff]  ;;  %v5504_v53 = vld [vmem:[%s14421_s7 + $0x20] sm:$0xff] }
 0x6cf   :  { %5149 = vst.msk [vmem:[#allocation2 + $0x48] sm:$0xff] %vm138_vm0, %v5133_v22  ;;  %9287 = vmatpush3.bf16.msra.mxu0 %v9284_v43  ;;  %v5162_v34 = vld [vmem:[#allocation2 + $0x30] sm:$0xff]  ;;  %v5186_v31 = vadd.f32 %v12920_v37, %v5163_v27  ;;  %v5212_v43 = vld [vmem:[%s14419_s6 + $0x8] sm:$0xff]  ;;  %v5214_v27 = vld [vmem:[%s14419_s6 + $0x18] sm:$0xff] }
 0x6d0   :  { %5148 = vst.msk [vmem:[#allocation2 + $0x40] sm:$0xff] %vm138_vm0, %v5132_v56  ;;  %v5185_v28 = vadd.f32 %v12920_v37, %v5162_v34  ;;  %v5213_v22 = vld [vmem:[%s14419_s6 + $0x10] sm:$0xff]  ;;  %v5505_v56 = vld [vmem:[%s14421_s7 + $0x28] sm:$0xff]  ;;  %v5215_v34 = vld [vmem:[%s14419_s6 + $0x20] sm:$0xff] }
 0x6d1   :  { %v5202_v40 = vmax.f32 %v5186_v31, 0.0  ;;  %v9316_v31 = vpack.c.bf16 %v5505_v56, %v5504_v53  ;;  %v7876_v53 = vld [vmem:[%s14421_s7 + $0x98] sm:$0xff] }
 0x6d2   :  { %v5201_v42 = vmax.f32 %v5185_v28, 0.0  ;;  %v5506_v28 = vld [vmem:[%s14421_s7 + $0x30] sm:$0xff] }
 0x6d4   :  { %v8801_v38 = vpop.f32.mrb[4].mxu0  ;;  %v9288_v58 = vpack.c.bf16 %v5202_v40, %v5201_v42  ;;  %v5507_v40 = vld [vmem:[%s14421_s7 + $0x38] sm:$0xff]  ;;  %v5216_v42 = vld [vmem:[%s14419_s6 + $0x28] sm:$0xff] }
 0x6d5   :  { %v5135_v47 = vadd.f32 %v8801_v38, %v4921_v24  ;;  %v5095_v12 = vpop.f32.mrb[5].mxu0  ;;  %v5217_v24 = vld [vmem:[%s14419_s6 + $0x30] sm:$0xff]  ;;  %v9320_v38 = vpack.c.bf16 %v5507_v40, %v5506_v28  ;;  %v7878_v28 = vld [vmem:[%s14421_s7 + $0xa8] sm:$0xff] }
 0x6d6   :  { %v5134_v30 = vadd.f32 %v5095_v12, %v4920_v6  ;;  %9289 = vmatprep.subr.bf16.mxu0 %v9288_v58  ;;  %v5165_v46 = vld [vmem:[#allocation2 + $0x48] sm:$0xff]  ;;  %v5221_v12 = vld [vmem:[%s14419_s6 + $0x50] sm:$0xff] }
 0x6d7   :  { %5151 = vst.msk [vmem:[#allocation2 + $0x58] sm:$0xff] %vm138_vm0, %v5135_v47  ;;  %9291 = vmatpush3.bf16.msra.mxu0 %v9288_v58  ;;  %v5164_v62 = vld [vmem:[#allocation2 + $0x40] sm:$0xff]  ;;  %v5188_v15 = vadd.f32 %v12920_v37, %v5165_v46  ;;  %v5218_v58 = vld [vmem:[%s14419_s6 + $0x38] sm:$0xff]  ;;  %v5220_v6 = vld [vmem:[%s14419_s6 + $0x48] sm:$0xff] }
 0x6d8   :  { %5150 = vst.msk [vmem:[#allocation2 + $0x50] sm:$0xff] %vm138_vm0, %v5134_v30  ;;  %v5187_v36 = vadd.f32 %v12920_v37, %v5164_v62  ;;  %v5219_v47 = vld [vmem:[%s14419_s6 + $0x40] sm:$0xff]  ;;  %v5222_v30 = vld [vmem:[%s14419_s6 + $0x58] sm:$0xff]  ;;  %v5224_v62 = vld [vmem:[%s14419_s6 + $0x68] sm:$0xff] }
 0x6d9   :  { %v5204_v54 = vmax.f32 %v5188_v15, 0.0  ;;  %v5223_v46 = vld [vmem:[%s14419_s6 + $0x60] sm:$0xff]  ;;  %v5225_v15 = vld [vmem:[%s14419_s6 + $0x70] sm:$0xff] }
 0x6da   :  { %v5203_v52 = vmax.f32 %v5187_v36, 0.0  ;;  %v5226_v36 = vld [vmem:[%s14419_s6 + $0x78] sm:$0xff] }
 0x6dc   :  { %v8804_v20 = vpop.f32.mrb[6].mxu0  ;;  %v9292_v1 = vpack.c.bf16 %v5204_v54, %v5203_v52  ;;  %v5227_v54 = vld [vmem:[%s14419_s6 + $0x80] sm:$0xff]  ;;  %v5228_v52 = vld [vmem:[%s14419_s6 + $0x88] sm:$0xff] }
 0x6dd   :  { %v5137_v23 = vadd.f32 %v8804_v20, %v4923_v48  ;;  %v5105_v61 = vpop.f32.mrb[7].mxu0  ;;  %v5229_v48 = vld [vmem:[%s14419_s6 + $0x90] sm:$0xff]  ;;  %v5230_v20 = vld [vmem:[%s14419_s6 + $0x98] sm:$0xff] }
 0x6de   :  { %v5136_v57 = vadd.f32 %v5105_v61, %v4922_v63  ;;  %9293 = vmatprep.subr.bf16.mxu0 %v9292_v1  ;;  %v5167_v45 = vld [vmem:[#allocation2 + $0x58] sm:$0xff]  ;;  %v5233_v63 = vld [vmem:[%s14419_s6 + $0xb0] sm:$0xff] }
 0x6df   :  { %5153 = vst.msk [vmem:[#allocation2 + $0x68] sm:$0xff] %vm138_vm0, %v5137_v23  ;;  %9295 = vmatpush3.bf16.msra.mxu0 %v9292_v1  ;;  %v5166_v5 = vld [vmem:[#allocation2 + $0x50] sm:$0xff]  ;;  %v5190_v55 = vadd.f32 %v12920_v37, %v5167_v45  ;;  %v5231_v1 = vld [vmem:[%s14419_s6 + $0xa0] sm:$0xff]  ;;  %v5232_v23 = vld [vmem:[%s14419_s6 + $0xa8] sm:$0xff] }
 0x6e0   :  { %5152 = vst.msk [vmem:[#allocation2 + $0x60] sm:$0xff] %vm138_vm0, %v5136_v57  ;;  %v5189_v4 = vadd.f32 %v12920_v37, %v5166_v5  ;;  %v5234_v61 = vld [vmem:[%s14419_s6 + $0xb8] sm:$0xff]  ;;  %v5235_v57 = vld [vmem:[%s14419_s6 + $0xc0] sm:$0xff]  ;;  %v5236_v45 = vld [vmem:[%s14419_s6 + $0xc8] sm:$0xff] }
 0x6e1   :  { %v5206_v44 = vmax.f32 %v5190_v55, 0.0  ;;  %v5237_v5 = vld [vmem:[%s14419_s6 + $0xd0] sm:$0xff]  ;;  %v5238_v55 = vld [vmem:[%s14419_s6 + $0xd8] sm:$0xff] }
 0x6e2   :  { %v5205_v10 = vmax.f32 %v5189_v4, 0.0  ;;  %v5239_v4 = vld [vmem:[%s14419_s6 + $0xe0] sm:$0xff] }
 0x6e4   :  { %v8807_v3 = vpop.f32.mrb[8].mxu0  ;;  %v9296_v50 = vpack.c.bf16 %v5206_v44, %v5205_v10  ;;  %v5240_v44 = vld [vmem:[%s14419_s6 + $0xe8] sm:$0xff]  ;;  %v5241_v10 = vld [vmem:[%s14419_s6 + $0xf0] sm:$0xff] }
 0x6e5   :  { %v5139_v9 = vadd.f32 %v8807_v3, %v4925_v49  ;;  %v5115_v13 = vpop.f32.mrb[9].mxu0  ;;  %v5242_v49 = vld [vmem:[%s14419_s6 + $0xf8] sm:$0xff]  ;;  %v5243_v3 = vld [vmem:[%s14419_s6 + $0x100] sm:$0xff] }
 0x6e6   :  { %v5138_v51 = vadd.f32 %v5115_v13, %v4924_v59  ;;  %9297 = vmatprep.subr.bf16.mxu0 %v9296_v50  ;;  %v5169_v60 = vld [vmem:[#allocation2 + $0x68] sm:$0xff]  ;;  %v5246_v59 = vld [vmem:[%s14419_s6 + $0x118] sm:$0xff]  ;;  %v7861_v13 = vld [vmem:[%s14421_s7 + $0x40] sm:$0xff] }
 0x6e7   :  { %5155 = vst.msk [vmem:[#allocation2 + $0x78] sm:$0xff] %vm138_vm0, %v5139_v9  ;;  %9299 = vmatpush3.bf16.msra.mxu0 %v9296_v50  ;;  %v5168_v16 = vld [vmem:[#allocation2 + $0x60] sm:$0xff]  ;;  %v5192_v14 = vadd.f32 %v12920_v37, %v5169_v60  ;;  %v5244_v50 = vld [vmem:[%s14419_s6 + $0x108] sm:$0xff]  ;;  %v5245_v9 = vld [vmem:[%s14419_s6 + $0x110] sm:$0xff] }
 0x6e8   :  { %5154 = vst.msk [vmem:[#allocation2 + $0x70] sm:$0xff] %vm138_vm0, %v5138_v51  ;;  %v5191_v2 = vadd.f32 %v12920_v37, %v5168_v16  ;;  %v7862_v51 = vld [vmem:[%s14421_s7 + $0x48] sm:$0xff]  ;;  %v7863_v16 = vld [vmem:[%s14421_s7 + $0x50] sm:$0xff] }
 0x6e9   :  { %v5208_v29 = vmax.f32 %v5192_v14, 0.0  ;;  %v9324_v60 = vpack.c.bf16 %v7862_v51, %v7861_v13  ;;  %v7864_v14 = vld [vmem:[%s14421_s7 + $0x58] sm:$0xff]  ;;  %v7899_v13 = vld [vmem:[%s14421_s7 + $0x110] sm:$0xff] }
 0x6ea   :  { %v5207_v19 = vmax.f32 %v5191_v2, 0.0  ;;  %v7900_v51 = vld [vmem:[%s14421_s7 + $0x118] sm:$0xff] }
 0x6ec   :  { %v9300_v0 = vpack.c.bf16 %v5208_v29, %v5207_v19  ;;  %v9328_v19 = vpack.c.bf16 %v7864_v14, %v7863_v16  ;;  %v9376_v16 = vpack.c.bf16 %v7900_v51, %v7899_v13  ;;  %v7949_v13 = vld [vmem:[%s14421_s7 + $0x220] sm:$0xff]  ;;  %v7950_v51 = vld [vmem:[%s14421_s7 + $0x228] sm:$0xff] }
 0x6ee   :  { %9301 = vmatprep.subr.bf16.mxu0 %v9300_v0  ;;  %v5171_v11 = vld [vmem:[#allocation2 + $0x78] sm:$0xff] }
 0x6ef   :  { %9303 = vmatpush3.bf16.msra.mxu0 %v9300_v0  ;;  %v5170_v7 = vld [vmem:[#allocation2 + $0x70] sm:$0xff]  ;;  %v5194_v33 = vadd.f32 %v12920_v37, %v5171_v11  ;;  %v7865_v0 = vld [vmem:[%s14421_s7 + $0x60] sm:$0xff]  ;;  %v7866_v11 = vld [vmem:[%s14421_s7 + $0x68] sm:$0xff] }
 0x6f0   :  { %v5193_v18 = vadd.f32 %v12920_v37, %v5170_v7  ;;  %v5503_v37 = vld [vmem:[%s14421_s7 + $0x18] sm:$0xff] }
 0x6f1   :  { %v5210_v26 = vmax.f32 %v5194_v33, 0.0  ;;  %v9312_v41 = vpack.c.bf16 %v5503_v37, %v5502_v17  ;;  %v9332_v33 = vpack.c.bf16 %v7866_v11, %v7865_v0  ;;  %v7874_v17 = vld [vmem:[%s14421_s7 + $0x88] sm:$0xff] }
 0x6f2   :  { %v5209_v32 = vmax.f32 %v5193_v18, 0.0 }
 0x6f4   :  { %v9304_v25 = vpack.c.bf16 %v5210_v26, %v5209_v32  ;;  %v7867_v26 = vld [vmem:[%s14421_s7 + $0x70] sm:$0xff] }
 0x6f5   :  { %v9336_v32 = vpack.c.bf16 %v7868_v35, %v7867_v26 }
 0x6f6   :  { %9305 = vmatprep.subr.bf16.mxu0 %v9304_v25 }
 0x6f7   :  { %9307 = vmatpush3.bf16.msra.mxu0 %v9304_v25 }
 0x6f8   :  { %9309 = vmatprep.subr.bf16.mxu0 %v9308_v21 }
 0x6fa   :  { %8841 = vmatmul.mubr.f32.vlgmr.msra.gmra.mrb[10].mxu0 %v5212_v43 }
 0x6fb   :  { %8843 = vmatprep.mubr.f32.mxu0 %v5213_v22  ;;  %9311 = vmatpush3.bf16.msra.mxu0 %v9308_v21  ;;  %v7873_v21 = vld [vmem:[%s14421_s7 + $0x80] sm:$0xff] }
 0x6fc   :  { %9313 = vmatprep.subr.bf16.mxu0 %v9312_v41  ;;  %v9340_v43 = vpack.c.bf16 %v7874_v17, %v7873_v21 }
 0x6fe   :  { %8844 = vmatmul.mubr.f32.gmra.mrb[12].mxu0 %v5214_v27 }
 0x6ff   :  { %8846 = vmatprep.mubr.f32.mxu0 %v5215_v34  ;;  %9315 = vmatpush3.bf16.msra.mxu0 %v9312_v41  ;;  %v7875_v41 = vld [vmem:[%s14421_s7 + $0x90] sm:$0xff] }
 0x700   :  { %9317 = vmatprep.subr.bf16.mxu0 %v9316_v31  ;;  %v9344_v27 = vpack.c.bf16 %v7876_v53, %v7875_v41 }
 0x702   :  { %8847 = vmatmul.mubr.f32.gmra.mrb[14].mxu0 %v5216_v42 }
 0x703   :  { %8849 = vmatprep.mubr.f32.mxu0 %v5217_v24  ;;  %9319 = vmatpush3.bf16.msra.mxu0 %v9316_v31  ;;  %v7877_v31 = vld [vmem:[%s14421_s7 + $0xa0] sm:$0xff] }
 0x704   :  { %9321 = vmatprep.subr.bf16.mxu0 %v9320_v38  ;;  %v9348_v42 = vpack.c.bf16 %v7878_v28, %v7877_v31 }
 0x706   :  { %8850 = vmatmul.mubr.f32.gmra.mrb[16].mxu0 %v5218_v58  ;;  %v7880_v58 = vld [vmem:[%s14421_s7 + $0xb8] sm:$0xff] }
 0x707   :  { %8852 = vmatprep.mubr.f32.mxu0 %v5219_v47  ;;  %9323 = vmatpush3.bf16.msra.mxu0 %v9320_v38  ;;  %v7879_v38 = vld [vmem:[%s14421_s7 + $0xb0] sm:$0xff] }
 0x708   :  { %9325 = vmatprep.subr.bf16.mxu0 %v9324_v60 }
 0x70a   :  { %8853 = vmatmul.mubr.f32.gmra.mrb[18].mxu0 %v5220_v6  ;;  %v9352_v6 = vpack.c.bf16 %v7880_v58, %v7879_v38  ;;  %v7921_v38 = vld [vmem:[%s14421_s7 + $0x180] sm:$0xff]  ;;  %v7922_v58 = vld [vmem:[%s14421_s7 + $0x188] sm:$0xff] }
 0x70b   :  { %8855 = vmatprep.mubr.f32.mxu0 %v5221_v12 }
 0x70e   :  { %8856 = vmatmul.mubr.f32.gmra.mrb[20].mxu0 %v5222_v30  ;;  %v7885_v30 = vld [vmem:[%s14421_s7 + $0xc0] sm:$0xff] }
 0x70f   :  { %8858 = vmatprep.mubr.f32.mxu0 %v5223_v46  ;;  %v7886_v46 = vld [vmem:[%s14421_s7 + $0xc8] sm:$0xff] }
 0x712   :  { %8859 = vmatmul.mubr.f32.gmra.mrb[22].mxu0 %v5224_v62 }
 0x713   :  { %8861 = vmatprep.mubr.f32.mxu0 %v5225_v15  ;;  %v9356_v15 = vpack.c.bf16 %v7886_v46, %v7885_v30  ;;  %v7925_v46 = vld [vmem:[%s14421_s7 + $0x1a0] sm:$0xff] }
 0x716   :  { %8862 = vmatmul.mubr.f32.gmra.mrb[24].mxu0 %v5226_v36 }
 0x717   :  { %8864 = vmatprep.mubr.f32.mxu0 %v5227_v54  ;;  %v7887_v54 = vld [vmem:[%s14421_s7 + $0xd0] sm:$0xff] }
 0x71a   :  { %8865 = vmatmul.mubr.f32.gmra.mrb[26].mxu0 %v5228_v52  ;;  %v7888_v52 = vld [vmem:[%s14421_s7 + $0xd8] sm:$0xff] }
 0x71b   :  { %8867 = vmatprep.mubr.f32.mxu0 %v5229_v48 }
 0x71e   :  { %8868 = vmatmul.mubr.f32.gmra.mrb[28].mxu0 %v5230_v20  ;;  %v9360_v20 = vpack.c.bf16 %v7888_v52, %v7887_v54  ;;  %v7928_v54 = vld [vmem:[%s14421_s7 + $0x1b8] sm:$0xff] }
 0x71f   :  { %8870 = vmatprep.mubr.f32.mxu0 %v5231_v1 }
 0x722   :  { %8871 = vmatmul.mubr.f32.gmra.mrb[30].mxu0 %v5232_v23  ;;  %v7889_v23 = vld [vmem:[%s14421_s7 + $0xe0] sm:$0xff] }
 0x723   :  { %8873 = vmatprep.mubr.f32.mxu0 %v5233_v63  ;;  %v7890_v63 = vld [vmem:[%s14421_s7 + $0xe8] sm:$0xff] }
 0x726   :  { %8874 = vmatmul.mubr.f32.gmra.mrb[32].mxu0 %v5234_v61 }
 0x727   :  { %8876 = vmatprep.mubr.f32.mxu0 %v5235_v57  ;;  %v9364_v57 = vpack.c.bf16 %v7890_v63, %v7889_v23  ;;  %v7935_v23 = vld [vmem:[%s14421_s7 + $0x1d0] sm:$0xff]  ;;  %v7936_v63 = vld [vmem:[%s14421_s7 + $0x1d8] sm:$0xff] }
 0x72a   :  { %8877 = vmatmul.mubr.f32.gmra.mrb[34].mxu0 %v5236_v45 }
 0x72b   :  { %8879 = vmatprep.mubr.f32.mxu0 %v5237_v5  ;;  %v7891_v5 = vld [vmem:[%s14421_s7 + $0xf0] sm:$0xff] }
 0x72e   :  { %8880 = vmatmul.mubr.f32.gmra.mrb[36].mxu0 %v5238_v55  ;;  %v7892_v55 = vld [vmem:[%s14421_s7 + $0xf8] sm:$0xff] }
 0x72f   :  { %8882 = vmatprep.mubr.f32.mxu0 %v5239_v4 }
 0x732   :  { %8883 = vmatmul.mubr.f32.gmra.mrb[38].mxu0 %v5240_v44  ;;  %v9368_v44 = vpack.c.bf16 %v7892_v55, %v7891_v5  ;;  %v7939_v55 = vld [vmem:[%s14421_s7 + $0x1f0] sm:$0xff] }
 0x733   :  { %8885 = vmatprep.mubr.f32.mxu0 %v5241_v10 }
 0x736   :  { %8886 = vmatmul.mubr.f32.gmra.mrb[40].mxu0 %v5242_v49  ;;  %v7897_v49 = vld [vmem:[%s14421_s7 + $0x100] sm:$0xff] }
 0x737   :  { %8888 = vmatprep.mubr.f32.mxu0 %v5243_v3  ;;  %v7898_v3 = vld [vmem:[%s14421_s7 + $0x108] sm:$0xff] }
 0x73a   :  { %8889 = vmatmul.mubr.f32.gmra.mrb[42].mxu0 %v5244_v50 }
 0x73b   :  { %8891 = vmatprep.mubr.f32.mxu0 %v5245_v9  ;;  %v9372_v9 = vpack.c.bf16 %v7898_v3, %v7897_v49  ;;  %v7946_v49 = vld [vmem:[%s14421_s7 + $0x208] sm:$0xff] }
 0x73e   :  { %8892 = vmatmul.mubr.f32.gmra.mrb[44].mxu0 %v5246_v59 }
 0x7cd   :  { %v8842_v2 = vpop.f32.mrb[10].mxu0 }
 0x7ce   :  { %v5313_v29 = vpop.f32.mrb[11].mxu0 }
 0x7cf   :  { %8910 = vmatprep.mubr.msk.f32.mxu0 %vm138_vm0, %v5313_v29  ;;  %v7902_v29 = vld [vmem:[%s14421_s7 + $0x128] sm:$0xff] }
 0x7d0   :  { %8911 = vmatmul.mubr.msk.f32.vlgmr.msra.gmra.mrb[46].mxu0 %vm138_vm0, %v8842_v2  ;;  %v7901_v2 = vld [vmem:[%s14421_s7 + $0x120] sm:$0xff] }
 0x7d1   :  { %9327 = vmatpush3.bf16.msra.mxu0 %v9324_v60  ;;  %v8845_v7 = vpop.f32.mrb[12].mxu0  ;;  %v9380_v0 = vpack.c.bf16 %v7902_v29, %v7901_v2  ;;  %v6577_v29 = vld [vmem:[%s14422_s9 + $0x8] sm:$0xff] }
 0x7d2   :  { %9329 = vmatprep.subr.bf16.mxu0 %v9328_v19  ;;  %v5323_v18 = vpop.f32.mrb[13].mxu0 }
 0x7d3   :  { %8913 = vmatprep.mubr.msk.f32.mxu0 %vm138_vm0, %v5323_v18 }
 0x7d4   :  { %8914 = vmatmul.mubr.msk.f32.gmra.mrb[48].mxu0 %vm138_vm0, %v8845_v7  ;;  %v7903_v7 = vld [vmem:[%s14421_s7 + $0x130] sm:$0xff] }
 0x7d5   :  { %9331 = vmatpush3.bf16.msra.mxu0 %v9328_v19  ;;  %v8848_v8 = vpop.f32.mrb[14].mxu0 }
 0x7d6   :  { %9333 = vmatprep.subr.bf16.mxu0 %v9332_v33  ;;  %v5333_v25 = vpop.f32.mrb[15].mxu0 }
 0x7d7   :  { %8932 = vmatprep.mubr.msk.f32.mxu0 %vm138_vm0, %v5333_v25 }
 0x7d9   :  { %9335 = vmatpush3.bf16.msra.mxu0 %v9332_v33  ;;  %v8851_v37 = vpop.f32.mrb[16].mxu0  ;;  %v7904_v33 = vld [vmem:[%s14421_s7 + $0x138] sm:$0xff] }
 0x7da   :  { %9337 = vmatprep.subr.bf16.mxu0 %v9336_v32  ;;  %v5343_v22 = vpop.f32.mrb[17].mxu0  ;;  %v9384_v26 = vpack.c.bf16 %v7904_v33, %v7903_v7  ;;  %v6578_v7 = vld [vmem:[%s14422_s9 + $0x10] sm:$0xff]  ;;  %v6581_v33 = vld [vmem:[%s14422_s9 + $0x28] sm:$0xff] }
 0x7dd   :  { %9339 = vmatpush3.bf16.msra.mxu0 %v9336_v32  ;;  %v8854_v56 = vpop.f32.mrb[18].mxu0  ;;  %v7910_v32 = vld [vmem:[%s14421_s7 + $0x148] sm:$0xff] }
 0x7de   :  { %9341 = vmatprep.subr.bf16.mxu0 %v9340_v43  ;;  %v5353_v34 = vpop.f32.mrb[19].mxu0 }
 0x7e0   :  { %8933 = vmatmul.mubr.msk.f32.vlgmr.msra.gmra.mrb[46].mxu0 %vm138_vm0, %v8848_v8  ;;  %v7909_v8 = vld [vmem:[%s14421_s7 + $0x140] sm:$0xff] }
 0x7e1   :  { %9343 = vmatpush3.bf16.msra.mxu0 %v9340_v43  ;;  %8935 = vmatprep.mubr.msk.f32.mxu0 %vm138_vm0, %v5343_v22  ;;  %v8857_v40 = vpop.f32.mrb[20].mxu0  ;;  %v9388_v21 = vpack.c.bf16 %v7910_v32, %v7909_v8  ;;  %v7912_v43 = vld [vmem:[%s14421_s7 + $0x158] sm:$0xff]  ;;  %v6580_v8 = vld [vmem:[%s14422_s9 + $0x20] sm:$0xff]  ;;  %v6582_v32 = vld [vmem:[%s14422_s9 + $0x30] sm:$0xff] }
 0x7e2   :  { %9345 = vmatprep.subr.bf16.mxu0 %v9344_v27  ;;  %v5363_v24 = vpop.f32.mrb[21].mxu0 }
 0x7e4   :  { %8936 = vmatmul.mubr.msk.f32.gmra.mrb[48].mxu0 %vm138_vm0, %v8851_v37  ;;  %v7911_v37 = vld [vmem:[%s14421_s7 + $0x150] sm:$0xff] }
 0x7e5   :  { %9347 = vmatpush3.bf16.msra.mxu0 %v9344_v27  ;;  %8954 = vmatprep.mubr.msk.f32.mxu0 %vm138_vm0, %v5353_v34  ;;  %v8860_v47 = vpop.f32.mrb[22].mxu0  ;;  %v9392_v41 = vpack.c.bf16 %v7912_v43, %v7911_v37  ;;  %v7914_v27 = vld [vmem:[%s14421_s7 + $0x168] sm:$0xff]  ;;  %v6584_v43 = vld [vmem:[%s14422_s9 + $0x40] sm:$0xff] }
 0x7e6   :  { %9349 = vmatprep.subr.bf16.mxu0 %v9348_v42  ;;  %v5373_v12 = vpop.f32.mrb[23].mxu0 }
 0x7e9   :  { %9351 = vmatpush3.bf16.msra.mxu0 %v9348_v42  ;;  %v8863_v62 = vpop.f32.mrb[24].mxu0  ;;  %v7916_v42 = vld [vmem:[%s14421_s7 + $0x178] sm:$0xff] }
 0x7ea   :  { %9353 = vmatprep.subr.bf16.mxu0 %v9352_v6  ;;  %v5383_v36 = vpop.f32.mrb[25].mxu0 }
 0x7ed   :  { %9355 = vmatpush3.bf16.msra.mxu0 %v9352_v6  ;;  %v13150_v48 = vpop.f32.mrb[26].mxu0  ;;  %v7923_v6 = vld [vmem:[%s14421_s7 + $0x190] sm:$0xff] }
 0x7ee   :  { %9357 = vmatprep.subr.bf16.mxu0 %v9356_v15  ;;  %v5393_v1 = vpop.f32.mrb[27].mxu0 }
 0x7f0   :  { %8955 = vmatmul.mubr.msk.f32.vlgmr.msra.gmra.mrb[46].mxu0 %vm138_vm0, %v8854_v56  ;;  %v7913_v56 = vld [vmem:[%s14421_s7 + $0x160] sm:$0xff] }
 0x7f1   :  { %9359 = vmatpush3.bf16.msra.mxu0 %v9356_v15  ;;  %8957 = vmatprep.mubr.msk.f32.mxu0 %vm138_vm0, %v5363_v24  ;;  %v13160_v61 = vpop.f32.mrb[28].mxu0  ;;  %v9396_v31 = vpack.c.bf16 %v7914_v27, %v7913_v56 }
 0x7f2   :  { %9361 = vmatprep.subr.bf16.mxu0 %v9360_v20  ;;  %v5403_v45 = vpop.f32.mrb[29].mxu0 }
 0x7f4   :  { %8958 = vmatmul.mubr.msk.f32.gmra.mrb[48].mxu0 %vm138_vm0, %v8857_v40  ;;  %v7915_v40 = vld [vmem:[%s14421_s7 + $0x170] sm:$0xff] }
 0x7f5   :  { %9363 = vmatpush3.bf16.msra.mxu0 %v9360_v20  ;;  %8976 = vmatprep.mubr.msk.f32.mxu0 %vm138_vm0, %v5373_v12  ;;  %v13170_v4 = vpop.f32.mrb[30].mxu0  ;;  %v9400_v24 = vpack.c.bf16 %v7916_v42, %v7915_v40  ;;  %v7924_v12 = vld [vmem:[%s14421_s7 + $0x198] sm:$0xff]  ;;  %v7934_v20 = vld [vmem:[%s14421_s7 + $0x1c8] sm:$0xff] }
 0x7f6   :  { %9365 = vmatprep.subr.bf16.mxu0 %v9364_v57  ;;  %v5413_v10 = vpop.f32.mrb[31].mxu0  ;;  %v9408_v30 = vpack.c.bf16 %v7924_v12, %v7923_v6  ;;  %v6593_v40 = vld [vmem:[%s14422_s9 + $0x88] sm:$0xff]  ;;  %v6599_v6 = vld [vmem:[%s14422_s9 + $0xb8] sm:$0xff] }
 0x7f9   :  { %9367 = vmatpush3.bf16.msra.mxu0 %v9364_v57  ;;  %v13178_v50 = vpop.f32.mrb[32].mxu0  ;;  %v7937_v57 = vld [vmem:[%s14421_s7 + $0x1e0] sm:$0xff] }
 0x7fa   :  { %9369 = vmatprep.subr.bf16.mxu0 %v9368_v44  ;;  %v13180_v59 = vpop.f32.mrb[33].mxu0 }
 0x7fd   :  { %9371 = vmatpush3.bf16.msra.mxu0 %v9368_v44  ;;  %v13188_v60 = vpop.f32.mrb[34].mxu0 }
 0x7fe   :  { %9373 = vmatprep.subr.bf16.mxu0 %v9372_v9  ;;  %v13190_v14 = vpop.f32.mrb[35].mxu0 }
 0x800   :  { %8977 = vmatmul.mubr.msk.f32.vlgmr.msra.gmra.mrb[46].mxu0 %vm138_vm0, %v8860_v47  ;;  %v9404_v47 = vpack.c.bf16 %v7922_v58, %v7921_v38  ;;  %v6592_v38 = vld [vmem:[%s14422_s9 + $0x80] sm:$0xff]  ;;  %v6594_v58 = vld [vmem:[%s14422_s9 + $0x90] sm:$0xff] }
 0x801   :  { %9375 = vmatpush3.bf16.msra.mxu0 %v9372_v9  ;;  %8979 = vmatprep.mubr.msk.f32.mxu0 %vm138_vm0, %v5383_v36  ;;  %v13200_v19 = vpop.f32.mrb[36].mxu0  ;;  %v7927_v36 = vld [vmem:[%s14421_s7 + $0x1b0] sm:$0xff]  ;;  %v7948_v9 = vld [vmem:[%s14421_s7 + $0x218] sm:$0xff]  ;;  %v9470_v12 = vpack.c.bf16 %v6594_v58, %v6592_v38  ;;  %v6758_v38 = vld [vmem:[%s14423_s11 + $0x148] sm:$0xff] }
 0x802   :  { %9377 = vmatprep.subr.bf16.mxu0 %v9376_v16  ;;  %v13202_v11 = vpop.f32.mrb[37].mxu0  ;;  %v9416_v52 = vpack.c.bf16 %v7928_v54, %v7927_v36  ;;  %v6603_v36 = vld [vmem:[%s14422_s9 + $0xd8] sm:$0xff]  ;;  %v6762_v58 = vld [vmem:[%s14423_s11 + $0x168] sm:$0xff] }
 0x804   :  { %8980 = vmatmul.mubr.msk.f32.gmra.mrb[48].mxu0 %vm138_vm0, %v8863_v62  ;;  %v7926_v62 = vld [vmem:[%s14421_s7 + $0x1a8] sm:$0xff] }
 0x805   :  { %9379 = vmatpush3.bf16.msra.mxu0 %v9376_v16  ;;  %8998 = vmatprep.mubr.msk.f32.mxu0 %vm138_vm0, %v5393_v1  ;;  %v13212_v18 = vpop.f32.mrb[38].mxu0  ;;  %v9412_v15 = vpack.c.bf16 %v7926_v62, %v7925_v46  ;;  %v7951_v16 = vld [vmem:[%s14421_s7 + $0x230] sm:$0xff]  ;;  %v6596_v46 = vld [vmem:[%s14422_s9 + $0xa0] sm:$0xff] }
 0x806   :  { %9381 = vmatprep.subr.bf16.mxu0 %v9380_v0  ;;  %v13214_v35 = vpop.f32.mrb[39].mxu0  ;;  %v6598_v62 = vld [vmem:[%s14422_s9 + $0xb0] sm:$0xff] }
 0x807   :  { %v9474_v54 = vpack.c.bf16 %v6598_v62, %v6596_v46  ;;  %v6766_v46 = vld [vmem:[%s14423_s11 + $0x188] sm:$0xff] }
 0x808   :  { %v6770_v62 = vld [vmem:[%s14423_s11 + $0x1a8] sm:$0xff] }
 0x809   :  { %9383 = vmatpush3.bf16.msra.mxu0 %v9380_v0  ;;  %v13222_v25 = vpop.f32.mrb[40].mxu0 }
 0x80a   :  { %9385 = vmatprep.subr.bf16.mxu0 %v9384_v26  ;;  %v13224_v17 = vpop.f32.mrb[41].mxu0 }
 0x80d   :  { %9387 = vmatpush3.bf16.msra.mxu0 %v9384_v26  ;;  %v13232_v22 = vpop.f32.mrb[42].mxu0 }
 0x80e   :  { %9389 = vmatprep.subr.bf16.mxu0 %v9388_v21  ;;  %v13234_v53 = vpop.f32.mrb[43].mxu0 }
 0x810   :  { %8999 = vmatmul.mubr.msk.f32.vlgmr.msra.gmra.mrb[46].mxu0 %vm138_vm0, %v13150_v48  ;;  %v7933_v48 = vld [vmem:[%s14421_s7 + $0x1c0] sm:$0xff] }
 0x811   :  { %9391 = vmatpush3.bf16.msra.mxu0 %v9388_v21  ;;  %9001 = vmatprep.mubr.msk.f32.mxu0 %vm138_vm0, %v5403_v45  ;;  %v13245_v34 = vpop.f32.mrb[44].mxu0  ;;  %v9420_v1 = vpack.c.bf16 %v7934_v20, %v7933_v48  ;;  %v7938_v45 = vld [vmem:[%s14421_s7 + $0x1e8] sm:$0xff]  ;;  %v6587_v21 = vld [vmem:[%s14422_s9 + $0x58] sm:$0xff]  ;;  %v6600_v48 = vld [vmem:[%s14422_s9 + $0xc0] sm:$0xff] }
 0x812   :  { %9393 = vmatprep.subr.bf16.mxu0 %v9392_v41  ;;  %v13247_v28 = vpop.f32.mrb[45].mxu0  ;;  %v9428_v5 = vpack.c.bf16 %v7938_v45, %v7937_v57  ;;  %v6602_v20 = vld [vmem:[%s14422_s9 + $0xd0] sm:$0xff]  ;;  %v6604_v57 = vld [vmem:[%s14422_s9 + $0xe0] sm:$0xff] }
 0x813   :  { %v6606_v45 = vld [vmem:[%s14422_s9 + $0xf0] sm:$0xff] }
 0x814   :  { %9002 = vmatmul.mubr.msk.f32.gmra.mrb[48].mxu0 %vm138_vm0, %v13160_v61  ;;  %v9424_v61 = vpack.c.bf16 %v7936_v63, %v7935_v23  ;;  %v6605_v23 = vld [vmem:[%s14422_s9 + $0xe8] sm:$0xff]  ;;  %v6607_v63 = vld [vmem:[%s14422_s9 + $0xf8] sm:$0xff] }
 0x815   :  { %9395 = vmatpush3.bf16.msra.mxu0 %v9392_v41  ;;  %9020 = vmatprep.mubr.msk.f32.mxu0 %vm138_vm0, %v5413_v10  ;;  %v7945_v10 = vld [vmem:[%s14421_s7 + $0x200] sm:$0xff]  ;;  %v6586_v41 = vld [vmem:[%s14422_s9 + $0x50] sm:$0xff] }
 0x816   :  { %9397 = vmatprep.subr.bf16.mxu0 %v9396_v31  ;;  %v9436_v3 = vpack.c.bf16 %v7946_v49, %v7945_v10  ;;  %v9462_v56 = vpack.c.bf16 %v6586_v41, %v6584_v43  ;;  %v7957_v10 = vld [vmem:[%s14424_s8] ss:$0 sm:$0xff] }
 0x819   :  { %9399 = vmatpush3.bf16.msra.mxu0 %v9396_v31  ;;  %v6588_v31 = vld [vmem:[%s14422_s9 + $0x60] sm:$0xff] }
 0x81a   :  { %9401 = vmatprep.subr.bf16.mxu0 %v9400_v24 }
 0x81d   :  { %9403 = vmatpush3.bf16.msra.mxu0 %v9400_v24 }
 0x81e   :  { %9405 = vmatprep.subr.bf16.mxu0 %v9404_v47 }
 0x820   :  { %9021 = vmatmul.mubr.msk.f32.vlgmr.msra.gmra.mrb[46].mxu0 %vm138_vm0, %v13170_v4  ;;  %v7940_v4 = vld [vmem:[%s14421_s7 + $0x1f8] sm:$0xff] }
 0x821   :  { %9407 = vmatpush3.bf16.msra.mxu0 %v9404_v47  ;;  %9023 = vmatprep.mubr.msk.f32.mxu0 %vm138_vm0, %v13180_v59  ;;  %v9432_v44 = vpack.c.bf16 %v7940_v4, %v7939_v55  ;;  %v6597_v47 = vld [vmem:[%s14422_s9 + $0xa8] sm:$0xff] }
 0x822   :  { %9409 = vmatprep.subr.bf16.mxu0 %v9408_v30  ;;  %v6718_v55 = vld [vmem:[%s14423_s11 + $0x8] sm:$0xff] }
 0x823   :  { %v6722_v4 = vld [vmem:[%s14423_s11 + $0x28] sm:$0xff] }
 0x824   :  { %9024 = vmatmul.mubr.msk.f32.gmra.mrb[48].mxu0 %vm138_vm0, %v13178_v50  ;;  %v7947_v50 = vld [vmem:[%s14421_s7 + $0x210] sm:$0xff] }
 0x825   :  { %9411 = vmatpush3.bf16.msra.mxu0 %v9408_v30  ;;  %9042 = vmatprep.mubr.msk.f32.mxu0 %vm138_vm0, %v13190_v14  ;;  %v9440_v59 = vpack.c.bf16 %v7948_v9, %v7947_v50  ;;  %v7952_v14 = vld [vmem:[%s14421_s7 + $0x238] sm:$0xff]  ;;  %v9472_v30 = vpack.c.bf16 %v6599_v6, %v6597_v47  ;;  %v6721_v50 = vld [vmem:[%s14423_s11 + $0x20] sm:$0xff]  ;;  %v9504_v6 = vpack.c.bf16 %v6762_v58, %v6758_v38 }
 0x826   :  { %9413 = vmatprep.subr.bf16.mxu0 %v9412_v15  ;;  %v9448_v2 = vpack.c.bf16 %v7952_v14, %v7951_v16  ;;  %v6837_v58 = vld [vmem:[%s14423_s11 + $0x3c0] sm:$0xff] }
 0x829   :  { %9415 = vmatpush3.bf16.msra.mxu0 %v9412_v15  ;;  %v6601_v15 = vld [vmem:[%s14422_s9 + $0xc8] sm:$0xff] }
 0x82a   :  { %9417 = vmatprep.subr.bf16.mxu0 %v9416_v52 }
 0x82d   :  { %9419 = vmatpush3.bf16.msra.mxu0 %v9416_v52  ;;  %v9476_v52 = vpack.c.bf16 %v6603_v36, %v6601_v15  ;;  %v9508_v36 = vpack.c.bf16 %v6770_v62, %v6766_v46  ;;  %v6610_v62 = vlaneseq }
 0x82e   :  { %9421 = vmatprep.subr.bf16.mxu0 %v9420_v1 }
 0x830   :  { %9043 = vmatmul.mubr.msk.f32.vlgmr.msra.gmra.mrb[46].mxu0 %vm138_vm0, %v13188_v60  ;;  %v9444_v60 = vpack.c.bf16 %v7950_v51, %v7949_v13  ;;  %v6730_v13 = vld [vmem:[%s14423_s11 + $0x68] sm:$0xff] }
 0x831   :  { %9423 = vmatpush3.bf16.msra.mxu0 %v9420_v1  ;;  %9045 = vmatprep.mubr.msk.f32.mxu0 %vm138_vm0, %v13202_v11  ;;  %v6576_v11 = vld [vmem:[%s14422_s9] sm:$0xff]  ;;  %v9478_v1 = vpack.c.bf16 %v6602_v20, %v6600_v48  ;;  %v6774_v48 = vld [vmem:[%s14423_s11 + $0x1c8] sm:$0xff] }
 0x832   :  { %9425 = vmatprep.subr.bf16.mxu0 %v9424_v61  ;;  %v9454_v26 = vpack.c.bf16 %v6578_v7, %v6576_v11  ;;  %v6734_v7 = vld [vmem:[%s14423_s11 + $0x88] sm:$0xff] }
 0x833   :  { %v6778_v20 = vld [vmem:[%s14423_s11 + $0x1e8] sm:$0xff] }
 0x834   :  { %9046 = vmatmul.mubr.msk.f32.gmra.mrb[48].mxu0 %vm138_vm0, %v13200_v19  ;;  %v6579_v19 = vld [vmem:[%s14422_s9 + $0x18] sm:$0xff] }
 0x835   :  { %9427 = vmatpush3.bf16.msra.mxu0 %v9424_v61  ;;  %9064 = vmatprep.mubr.msk.f32.mxu0 %vm138_vm0, %v13214_v35  ;;  %v9452_v0 = vpack.c.bf16 %v6579_v19, %v6577_v29  ;;  %v9480_v61 = vpack.c.bf16 %v6607_v63, %v6605_v23  ;;  %v6725_v19 = vld [vmem:[%s14423_s11 + $0x40] sm:$0xff]  ;;  %v9512_v23 = vpack.c.bf16 %v6778_v20, %v6774_v48 }
 0x836   :  { %9429 = vmatprep.subr.bf16.mxu0 %v9428_v5  ;;  %v6773_v63 = vld [vmem:[%s14423_s11 + $0x1c0] sm:$0xff] }
 0x839   :  { %9431 = vmatpush3.bf16.msra.mxu0 %v9428_v5  ;;  %v9482_v5 = vpack.c.bf16 %v6606_v45, %v6604_v57  ;;  %v6782_v57 = vld [vmem:[%s14423_s11 + $0x208] sm:$0xff] }
 0x83a   :  { %9433 = vmatprep.subr.bf16.mxu0 %v9432_v44  ;;  %v6786_v45 = vld [vmem:[%s14423_s11 + $0x228] sm:$0xff] }
 0x83d   :  { %9435 = vmatpush3.bf16.msra.mxu0 %v9432_v44  ;;  %v9484_v44 = vpack.c.bf16 %v6722_v4, %v6718_v55  ;;  %v9516_v55 = vpack.c.bf16 %v6786_v45, %v6782_v57  ;;  %v6781_v4 = vld [vmem:[%s14423_s11 + $0x200] sm:$0xff]  ;;  %v6723_v57 = vld [vmem:[%s14423_s11 + $0x30] sm:$0xff] }
 0x83e   :  { %9437 = vmatprep.subr.bf16.mxu0 %v9436_v3 }
 0x840   :  { %9065 = vmatmul.mubr.msk.f32.vlgmr.msra.gmra.mrb[46].mxu0 %vm138_vm0, %v13212_v18  ;;  %v6583_v18 = vld [vmem:[%s14422_s9 + $0x38] sm:$0xff] }
 0x841   :  { %9439 = vmatpush3.bf16.msra.mxu0 %v9436_v3  ;;  %9067 = vmatprep.mubr.msk.f32.mxu0 %vm138_vm0, %v13224_v17  ;;  %v9456_v35 = vpack.c.bf16 %v6583_v18, %v6581_v33  ;;  %v9458_v17 = vpack.c.bf16 %v6582_v32, %v6580_v8  ;;  %v6717_v3 = vld [vmem:[%s14423_s11] sm:$0xff]  ;;  %v6738_v33 = vld [vmem:[%s14423_s11 + $0xa8] sm:$0xff] }
 0x842   :  { %9441 = vmatprep.subr.bf16.mxu0 %v9440_v59  ;;  %v9492_v8 = vpack.c.bf16 %v6738_v33, %v6734_v7  ;;  %v6733_v32 = vld [vmem:[%s14423_s11 + $0x80] sm:$0xff] }
 0x843   :  { %v6805_v7 = vld [vmem:[%s14423_s11 + $0x2c0] sm:$0xff] }
 0x844   :  { %9068 = vmatmul.mubr.msk.f32.gmra.mrb[48].mxu0 %vm138_vm0, %v13222_v25  ;;  %v6585_v25 = vld [vmem:[%s14422_s9 + $0x48] sm:$0xff]  ;;  %v6809_v33 = vld [vmem:[%s14423_s11 + $0x2e0] sm:$0xff] }
 0x845   :  { %9443 = vmatpush3.bf16.msra.mxu0 %v9440_v59  ;;  %9086 = vmatprep.mubr.msk.f32.mxu0 %vm138_vm0, %v13234_v53  ;;  %v9460_v37 = vpack.c.bf16 %v6587_v21, %v6585_v25  ;;  %v6589_v53 = vld [vmem:[%s14422_s9 + $0x68] sm:$0xff]  ;;  %v6737_v25 = vld [vmem:[%s14423_s11 + $0xa0] sm:$0xff] }
 0x846   :  { %9445 = vmatprep.subr.bf16.mxu0 %v9444_v60  ;;  %v6726_v59 = vld [vmem:[%s14423_s11 + $0x48] sm:$0xff] }
 0x847   :  { %v9488_v29 = vpack.c.bf16 %v6730_v13, %v6726_v59  ;;  %v6742_v21 = vld [vmem:[%s14423_s11 + $0xc8] sm:$0xff]  ;;  %v6793_v59 = vld [vmem:[%s14423_s11 + $0x260] sm:$0xff] }
 0x848   :  { %v6798_v13 = vld [vmem:[%s14423_s11 + $0x288] sm:$0xff] }
 0x849   :  { %9447 = vmatpush3.bf16.msra.mxu0 %v9444_v60  ;;  %v9486_v60 = vpack.c.bf16 %v6721_v50, %v6717_v3 }
 0x84a   :  { %9449 = vmatprep.subr.bf16.mxu0 %v9448_v2 }
 0x84d   :  { %9451 = vmatpush3.bf16.msra.mxu0 %v9448_v2 }
 0x84e   :  { %9453 = vmatprep.subr.bf16.mxu0 %v9452_v0  ;;  %v6729_v0 = vld [vmem:[%s14423_s11 + $0x60] sm:$0xff] }
 0x84f   :  { %v9490_v18 = vpack.c.bf16 %v6729_v0, %v6725_v19  ;;  %v6810_v19 = vld [vmem:[%s14423_s11 + $0x2e8] sm:$0xff] }
 0x850   :  { %9087 = vmatmul.mubr.msk.f32.vlgmr.msra.gmra.mrb[46].mxu0 %vm138_vm0, %v13232_v22  ;;  %v6591_v22 = vld [vmem:[%s14422_s9 + $0x78] sm:$0xff] }
 0x851   :  { %9089 = vmatprep.mubr.msk.f32.mxu0 %vm138_vm0, %v13247_v28  ;;  %9455 = vmatpush1.bf16.msra.mxu0 %v9454_v26  ;;  %v9464_v27 = vpack.c.bf16 %v6591_v22, %v6589_v53  ;;  %v6590_v28 = vld [vmem:[%s14422_s9 + $0x70] sm:$0xff]  ;;  %v6741_v22 = vld [vmem:[%s14423_s11 + $0xc0] sm:$0xff] }
 0x852   :  { %9457 = vmatprep.subr.bf16.mxu0 %v9456_v35  ;;  %v9466_v42 = vpack.c.bf16 %v6590_v28, %v6588_v31  ;;  %v6754_v31 = vld [vmem:[%s14423_s11 + $0x128] sm:$0xff] }
 0x854   :  { %9090 = vmatmul.mubr.msk.f32.gmra.mrb[48].mxu0 %vm138_vm0, %v13245_v34  ;;  %v6595_v34 = vld [vmem:[%s14422_s9 + $0x98] sm:$0xff] }
 0x855   :  { %9459 = vmatpush1.bf16.msra.mxu0 %v9458_v17  ;;  %6684 = vmatprep.mubr.f32.mxu0 %v10107_v39  ;;  %v9468_v24 = vpack.c.bf16 %v6595_v34, %v6593_v40  ;;  %v6746_v17 = vld [vmem:[%s14423_s11 + $0xe8] sm:$0xff] }
 0x856   :  { %9461 = vmatprep.subr.bf16.mxu0 %v9460_v37  ;;  %v9494_v37 = vpack.c.bf16 %v6737_v25, %v6733_v32  ;;  %v9496_v53 = vpack.c.bf16 %v6746_v17, %v6742_v21  ;;  %v6813_v32 = vld [vmem:[%s14423_s11 + $0x300] sm:$0xff]  ;;  %v6822_v21 = vld [vmem:[%s14423_s11 + $0x348] sm:$0xff] }
 0x857   :  { %v6817_v25 = vld [vmem:[%s14423_s11 + $0x320] sm:$0xff]  ;;  %v6826_v17 = vld [vmem:[%s14423_s11 + $0x368] sm:$0xff] }
 0x859   :  { %9463 = vmatpush1.bf16.msra.mxu0 %v9462_v56  ;;  %v6745_v56 = vld [vmem:[%s14423_s11 + $0xe0] sm:$0xff] }
 0x85a   :  { %9465 = vmatprep.subr.bf16.mxu0 %v9464_v27  ;;  %v6750_v27 = vld [vmem:[%s14423_s11 + $0x108] sm:$0xff]  ;;  %v9498_v28 = vpack.c.bf16 %v6745_v56, %v6741_v22 }
 0x85b   :  { %v9500_v34 = vpack.c.bf16 %v6754_v31, %v6750_v27  ;;  %v6830_v22 = vld [vmem:[%s14423_s11 + $0x388] sm:$0xff] }
 0x85c   :  { %v6834_v56 = vld [vmem:[%s14423_s11 + $0x3a8] sm:$0xff] }
 0x85d   :  { %9467 = vmatpush1.bf16.msra.mxu0 %v9466_v42  ;;  %v6749_v42 = vld [vmem:[%s14423_s11 + $0x100] sm:$0xff]  ;;  %v9540_v31 = vpack.c.bf16 %v6834_v56, %v6830_v22  ;;  %v6747_v22 = vld [vmem:[%s14423_s11 + $0xf0] sm:$0xff] }
 0x85e   :  { %9469 = vmatprep.subr.bf16.mxu0 %v9468_v24  ;;  %v6753_v24 = vld [vmem:[%s14423_s11 + $0x120] sm:$0xff] }
 0x85f   :  { %v9502_v47 = vpack.c.bf16 %v6753_v24, %v6749_v42  ;;  %v6838_v42 = vld [vmem:[%s14423_s11 + $0x3c8] sm:$0xff] }
 0x860   :  { %v6842_v24 = vld [vmem:[%s14423_s11 + $0x3e8] sm:$0xff] }
 0x861   :  { %9471 = vmatpush1.bf16.msra.mxu0 %v9470_v12  ;;  %v6757_v12 = vld [vmem:[%s14423_s11 + $0x140] sm:$0xff]  ;;  %v9544_v38 = vpack.c.bf16 %v6842_v24, %v6838_v42  ;;  %v6751_v24 = vld [vmem:[%s14423_s11 + $0x110] sm:$0xff] }
 0x862   :  { %9473 = vmatprep.subr.bf16.mxu0 %v9472_v30  ;;  %v6761_v30 = vld [vmem:[%s14423_s11 + $0x160] sm:$0xff] }
 0x863   :  { %v9506_v15 = vpack.c.bf16 %v6761_v30, %v6757_v12  ;;  %v6720_v12 = vld [vmem:[%s14423_s11 + $0x18] sm:$0xff] }
 0x864   :  { %v6724_v30 = vld [vmem:[%s14423_s11 + $0x38] sm:$0xff] }
 0x865   :  { %9475 = vmatpush1.bf16.msra.mxu0 %v9474_v54  ;;  %v6765_v54 = vld [vmem:[%s14423_s11 + $0x180] sm:$0xff]  ;;  %v9548_v46 = vpack.c.bf16 %v6724_v30, %v6720_v12  ;;  %v6759_v30 = vld [vmem:[%s14423_s11 + $0x150] sm:$0xff] }
 0x866   :  { %9477 = vmatprep.subr.bf16.mxu0 %v9476_v52  ;;  %v6769_v52 = vld [vmem:[%s14423_s11 + $0x1a0] sm:$0xff] }
 0x869   :  { %9479 = vmatpush1.bf16.msra.mxu0 %v9478_v1  ;;  %v9510_v1 = vpack.c.bf16 %v6769_v52, %v6765_v54  ;;  %v6608_v54 = vld [vmem:[%s14425_s10] sm:$0x3] }
 0x86a   :  { %9481 = vmatprep.subr.bf16.mxu0 %v9480_v61  ;;  %v6777_v61 = vld [vmem:[%s14423_s11 + $0x1e0] sm:$0xff] }
 0x86d   :  { %9483 = vmatpush1.bf16.msra.mxu0 %v9482_v5  ;;  %v9514_v5 = vpack.c.bf16 %v6777_v61, %v6773_v63  ;;  %v6719_v61 = vld [vmem:[%s14423_s11 + $0x10] sm:$0xff] }
 0x86e   :  { %9485 = vmatprep.subr.bf16.mxu0 %v9484_v44  ;;  %v6785_v44 = vld [vmem:[%s14423_s11 + $0x220] sm:$0xff] }
 0x86f   :  { %v9518_v3 = vpack.c.bf16 %v6785_v44, %v6781_v4 }
 0x923   :  { %v9088_v49 = vpop.f32.mrb[46].mxu0 }
 0x924   :  { %v6530_v9 = vpop.f32.mrb[47].mxu0  ;;  %v6569_v16 = vadd.f32 %v9088_v49, %v7957_v10  ;;  %v6794_v49 = vld [vmem:[%s14423_s11 + $0x268] sm:$0xff] }
 0x925   :  { %v6568_v51 = vadd.f32 %v7957_v10, %v6530_v9  ;;  %v6789_v9 = vld [vmem:[%s14423_s11 + $0x240] sm:$0xff] }
 0x926   :  { %v6573_v26 = vmax.f32 %v6569_v16, 0.0 }
 0x927   :  { %v6572_v14 = vmax.f32 %v6568_v51, 0.0  ;;  %v9091_v2 = vpop.f32.mrb[48].mxu0  ;;  %v6802_v51 = vld [vmem:[%s14423_s11 + $0x2a8] sm:$0xff] }
 0x928   :  { %v6540_v11 = vpop.f32.mrb[49].mxu0  ;;  %v6571_v43 = vadd.f32 %v9091_v2, %v7957_v10  ;;  %v9524_v16 = vpack.c.bf16 %v6802_v51, %v6798_v13  ;;  %v6801_v2 = vld [vmem:[%s14423_s11 + $0x2a0] sm:$0xff]  ;;  %v6731_v13 = vld [vmem:[%s14423_s11 + $0x70] sm:$0xff] }
 0x929   :  { %6685 = vmatmul.mubr.f32.vlgmr.msra.gmra.mrb[50].mxu0 %v6572_v14  ;;  %v6570_v35 = vadd.f32 %v7957_v10, %v6540_v11  ;;  %v6790_v10 = vld [vmem:[%s14423_s11 + $0x248] sm:$0xff]  ;;  %v6797_v14 = vld [vmem:[%s14423_s11 + $0x280] sm:$0xff] }
 0x92a   :  { %6690 = vmatprep.mubr.f32.mxu0 %v10107_v39  ;;  %9487 = vmatpush1.bf16.msra.mxu0 %v9486_v60  ;;  %v6575_v40 = vmax.f32 %v6571_v43, 0.0  ;;  %v9520_v50 = vpack.c.bf16 %v6794_v49, %v6790_v10  ;;  %v9522_v60 = vpack.c.bf16 %v6793_v59, %v6789_v9  ;;  %v9526_v0 = vpack.c.bf16 %v6801_v2, %v6797_v14  ;;  %v6727_v59 = vld [vmem:[%s14423_s11 + $0x50] sm:$0xff] }
 0x92b   :  { %9489 = vmatprep.subr.bf16.mxu0 %v9488_v29  ;;  %v6574_v41 = vmax.f32 %v6570_v35, 0.0  ;;  %v6806_v29 = vld [vmem:[%s14423_s11 + $0x2c8] sm:$0xff]  ;;  %v9530_v35 = vpack.c.bf16 %v6809_v33, %v6805_v7  ;;  %v9536_v43 = vpack.c.bf16 %v6826_v17, %v6822_v21  ;;  %v9550_v10 = vpack.c.bf16 %v6723_v57, %v6719_v61  ;;  %v6735_v33 = vld [vmem:[%s14423_s11 + $0x90] sm:$0xff]  ;;  %v6776_v61 = vld [vmem:[%s14423_s11 + $0x1d8] sm:$0xff] }
 0x92c   :  { %v9528_v11 = vpack.c.bf16 %v6810_v19, %v6806_v29  ;;  %v9554_v29 = vpack.c.bf16 %v6731_v13, %v6727_v59  ;;  %v6780_v57 = vld [vmem:[%s14423_s11 + $0x1f8] sm:$0xff]  ;;  %v6783_v59 = vld [vmem:[%s14423_s11 + $0x210] sm:$0xff] }
 0x92d   :  { %6691 = vmatmul.mubr.f32.gmra.mrb[52].mxu0 %v6573_v26  ;;  %v6818_v26 = vld [vmem:[%s14423_s11 + $0x328] sm:$0xff]  ;;  %v6787_v13 = vld [vmem:[%s14423_s11 + $0x230] sm:$0xff] }
 0x92e   :  { %6696 = vmatprep.mubr.f32.mxu0 %v10107_v39  ;;  %9491 = vmatpush1.bf16.msra.mxu0 %v9490_v18  ;;  %v6814_v18 = vld [vmem:[%s14423_s11 + $0x308] sm:$0xff] }
 0x92f   :  { %9493 = vmatprep.subr.bf16.mxu0 %v9492_v8  ;;  %v9532_v8 = vpack.c.bf16 %v6818_v26, %v6814_v18  ;;  %v6739_v18 = vld [vmem:[%s14423_s11 + $0xb0] sm:$0xff] }
 0x930   :  { %v9558_v21 = vpack.c.bf16 %v6739_v18, %v6735_v33  ;;  %v6800_v33 = vld [vmem:[%s14423_s11 + $0x298] sm:$0xff] }
 0x931   :  { %6697 = vmatmul.mubr.f32.gmra.mrb[54].mxu0 %v6574_v41  ;;  %v6821_v41 = vld [vmem:[%s14423_s11 + $0x340] sm:$0xff]  ;;  %v6804_v18 = vld [vmem:[%s14423_s11 + $0x2b8] sm:$0xff] }
 0x932   :  { %6702 = vmatprep.mubr.f32.mxu0 %v10107_v39  ;;  %9495 = vmatpush1.bf16.msra.mxu0 %v9494_v37  ;;  %v9534_v37 = vpack.c.bf16 %v6817_v25, %v6813_v32 }
 0x933   :  { %9497 = vmatprep.subr.bf16.mxu0 %v9496_v53  ;;  %v6825_v53 = vld [vmem:[%s14423_s11 + $0x360] sm:$0xff] }
 0x934   :  { %v9538_v27 = vpack.c.bf16 %v6825_v53, %v6821_v41  ;;  %v6743_v53 = vld [vmem:[%s14423_s11 + $0xd0] sm:$0xff] }
 0x935   :  { %6703 = vmatmul.mubr.f32.gmra.mrb[56].mxu0 %v6575_v40  ;;  %v6833_v40 = vld [vmem:[%s14423_s11 + $0x3a0] sm:$0xff] }
 0x936   :  { %9499 = vmatpush1.bf16.msra.mxu0 %v9498_v28  ;;  %v6829_v28 = vld [vmem:[%s14423_s11 + $0x380] sm:$0xff] }
 0x937   :  { %9501 = vmatprep.subr.bf16.mxu0 %v9500_v34  ;;  %v9542_v34 = vpack.c.bf16 %v6833_v40, %v6829_v28  ;;  %v9562_v40 = vpack.c.bf16 %v6747_v22, %v6743_v53 }
 0x93a   :  { %9503 = vmatpush1.bf16.msra.mxu0 %v9502_v47  ;;  %v6841_v47 = vld [vmem:[%s14423_s11 + $0x3e0] sm:$0xff] }
 0x93b   :  { %9505 = vmatprep.subr.bf16.mxu0 %v9504_v6  ;;  %v9546_v6 = vpack.c.bf16 %v6841_v47, %v6837_v58  ;;  %v6760_v58 = vld [vmem:[%s14423_s11 + $0x158] sm:$0xff] }
 0x93c   :  { %v6764_v47 = vld [vmem:[%s14423_s11 + $0x178] sm:$0xff] }
 0x93d   :  { %v9568_v12 = vpack.c.bf16 %v6764_v47, %v6760_v58  ;;  %v6815_v58 = vld [vmem:[%s14423_s11 + $0x310] sm:$0xff] }
 0x93e   :  { %9507 = vmatpush1.bf16.msra.mxu0 %v9506_v15  ;;  %v13661_v15 = vshrl.u32 %v6610_v62, 7  ;;  %v6768_v62 = vld [vmem:[%s14423_s11 + $0x198] sm:$0xff]  ;;  %v6819_v47 = vld [vmem:[%s14423_s11 + $0x330] sm:$0xff] }
 0x93f   :  { %9509 = vmatprep.subr.bf16.mxu0 %v9508_v36 }
 0x940   :  { %v13664_v36 = vsub.s32 0, %v13661_v15  ;;  %v13670_v52 = vsub.s32 1, %v13661_v15 }
 0x942   :  { %9511 = vmatpush1.bf16.msra.mxu0 %v9510_v1  ;;  %v6613_v48 = vrot.slane %v6608_v54, %v13664_v36  ;;  %v6617_v20 = vrot.slane %v6608_v54, %v13670_v52  ;;  %v6772_v54 = vld [vmem:[%s14423_s11 + $0x1b8] sm:$0xff] }
 0x943   :  { %9513 = vmatprep.subr.bf16.mxu0 %v9512_v23 }
 0x946   :  { %9515 = vmatpush1.bf16.msra.mxu0 %v9514_v5  ;;  %v6728_v5 = vld [vmem:[%s14423_s11 + $0x58] sm:$0xff] }
 0x947   :  { %9517 = vmatprep.subr.bf16.mxu0 %v9516_v55  ;;  %v6732_v55 = vld [vmem:[%s14423_s11 + $0x78] sm:$0xff] }
 0x948   :  { %v9552_v9 = vpack.c.bf16 %v6732_v55, %v6728_v5  ;;  %v9576_v5 = vpack.c.bf16 %v6780_v57, %v6776_v61  ;;  %v6775_v55 = vld [vmem:[%s14423_s11 + $0x1d0] sm:$0xff] }
 0x949   :  { %v6831_v61 = vld [vmem:[%s14423_s11 + $0x390] sm:$0xff] }
 0x94a   :  { %9519 = vmatpush1.bf16.msra.mxu0 %v9518_v3  ;;  %v6835_v57 = vld [vmem:[%s14423_s11 + $0x3b0] sm:$0xff] }
 0x94b   :  { %9521 = vmatprep.subr.bf16.mxu0 %v9520_v50 }
 0x94e   :  { %9523 = vmatpush1.bf16.msra.mxu0 %v9522_v60  ;;  %v6736_v60 = vld [vmem:[%s14423_s11 + $0x98] sm:$0xff] }
 0x94f   :  { %9525 = vmatprep.subr.bf16.mxu0 %v9524_v16  ;;  %v6740_v16 = vld [vmem:[%s14423_s11 + $0xb8] sm:$0xff] }
 0x950   :  { %v9556_v7 = vpack.c.bf16 %v6740_v16, %v6736_v60  ;;  %v6792_v60 = vld [vmem:[%s14423_s11 + $0x258] sm:$0xff] }
 0x951   :  { %v6796_v16 = vld [vmem:[%s14423_s11 + $0x278] sm:$0xff] }
 0x952   :  { %9527 = vmatpush1.bf16.msra.mxu0 %v9526_v0 }
 0x953   :  { %9529 = vmatprep.subr.bf16.mxu0 %v9528_v11 }
 0x956   :  { %9531 = vmatpush1.bf16.msra.mxu0 %v9530_v35  ;;  %v6744_v35 = vld [vmem:[%s14423_s11 + $0xd8] sm:$0xff] }
 0x957   :  { %9533 = vmatprep.subr.bf16.mxu0 %v9532_v8  ;;  %v6748_v8 = vld [vmem:[%s14423_s11 + $0xf8] sm:$0xff] }
 0x958   :  { %v9560_v41 = vpack.c.bf16 %v6748_v8, %v6744_v35  ;;  %v9588_v8 = vpack.c.bf16 %v6804_v18, %v6800_v33 }
 0x95a   :  { %9535 = vmatpush1.bf16.msra.mxu0 %v9534_v37 }
 0x95b   :  { %9537 = vmatprep.subr.bf16.mxu0 %v9536_v43 }
 0x95e   :  { %9539 = vmatpush1.bf16.msra.mxu0 %v9538_v27  ;;  %v6752_v27 = vld [vmem:[%s14423_s11 + $0x118] sm:$0xff] }
 0x95f   :  { %9541 = vmatprep.subr.bf16.mxu0 %v9540_v31  ;;  %v6756_v31 = vld [vmem:[%s14423_s11 + $0x138] sm:$0xff] }
 0x960   :  { %v9564_v42 = vpack.c.bf16 %v6756_v31, %v6752_v27  ;;  %v6807_v27 = vld [vmem:[%s14423_s11 + $0x2d0] sm:$0xff] }
 0x961   :  { %v6811_v31 = vld [vmem:[%s14423_s11 + $0x2f0] sm:$0xff] }
 0x962   :  { %9543 = vmatpush1.bf16.msra.mxu0 %v9542_v34 }
 0x963   :  { %9545 = vmatprep.subr.bf16.mxu0 %v9544_v38  ;;  %v6755_v38 = vld [vmem:[%s14423_s11 + $0x130] sm:$0xff] }
 0x966   :  { %9547 = vmatpush1.bf16.msra.mxu0 %v9546_v6  ;;  %v9566_v6 = vpack.c.bf16 %v6755_v38, %v6751_v24  ;;  %v9594_v24 = vpack.c.bf16 %v6811_v31, %v6807_v27  ;;  %v6861_v27 = vsub.s32 3, %v13661_v15 }
 0x967   :  { %9549 = vmatprep.subr.bf16.mxu0 %v9548_v46  ;;  %v6763_v46 = vld [vmem:[%s14423_s11 + $0x170] sm:$0xff] }
 0x9fc   :  { %v6686_v1 = vpop.f32.mrb[50].mxu0 }
 0x9fd   :  { %v13674_v23 = vadd.f32 %v6686_v1, %v6613_v48  ;;  %v6688_v63 = vpop.f32.mrb[51].mxu0  ;;  %v6767_v1 = vld [vmem:[%s14423_s11 + $0x190] sm:$0xff] }
 0x9fe   :  { %v6689_v45 = vadd.f32 %v6688_v63, %v6617_v20  ;;  %v6771_v63 = vld [vmem:[%s14423_s11 + $0x1b0] sm:$0xff] }
 0x9ff   :  { %v6709_v49 = vmax.f32 %v13674_v23, 0.0  ;;  %v6845_v23 = vld [vmem:[%s14426_s12] sm:$0xf] }
 0xa00   :  { %v6710_v4 = vmax.f32 %v6689_v45, 0.0  ;;  %v6692_v44 = vpop.f32.mrb[52].mxu0  ;;  %v9574_v45 = vpack.c.bf16 %v6771_v63, %v6767_v1 }
 0xa01   :  { %v13689_v3 = vadd.f32 %v6692_v44, %v6613_v48  ;;  %v6694_v50 = vpop.f32.mrb[53].mxu0  ;;  %v6784_v44 = vld [vmem:[%s14423_s11 + $0x218] sm:$0xff] }
 0xa02   :  { %v13697_v51 = vadd.f32 %v6694_v50, %v6617_v20  ;;  %6931 = vmatprep.mubr.f32.mxu0 %v6710_v4 }
 0xa03   :  { %6932 = vmatmul.mubr.f32.vlgmr.msra.gmra.mrb[58].mxu0 %v6709_v49  ;;  %v6711_v19 = vmax.f32 %v13689_v3, 0.0 }
 0xa04   :  { %v6712_v14 = vmax.f32 %v13697_v51, 0.0  ;;  %9551 = vmatpush1.bf16.msra.mxu0 %v9550_v10  ;;  %v6698_v2 = vpop.f32.mrb[54].mxu0  ;;  %v6788_v10 = vld [vmem:[%s14423_s11 + $0x238] sm:$0xff]  ;;  %v6854_v51 = vrot.slane %v6845_v23, %v13670_v52 }
 0xa05   :  { %v13709_v0 = vadd.f32 %v6698_v2, %v6613_v48  ;;  %v6700_v11 = vpop.f32.mrb[55].mxu0  ;;  %9553 = vmatprep.subr.bf16.mxu0 %v9552_v9  ;;  %v9580_v9 = vpack.c.bf16 %v6788_v10, %v6784_v44  ;;  %v9582_v2 = vpack.c.bf16 %v6787_v13, %v6783_v59  ;;  %v6839_v44 = vld [vmem:[%s14423_s11 + $0x3d0] sm:$0xff] }
 0xa06   :  { %v13717_v26 = vadd.f32 %v6700_v11, %v6617_v20  ;;  %6937 = vmatprep.mubr.f32.mxu0 %v6712_v14  ;;  %v6791_v11 = vld [vmem:[%s14423_s11 + $0x250] sm:$0xff] }
 0xa07   :  { %6938 = vmatmul.mubr.f32.gmra.mrb[60].mxu0 %v6711_v19  ;;  %v6713_v17 = vmax.f32 %v13709_v0, 0.0  ;;  %v6843_v10 = vld [vmem:[%s14423_s11 + $0x3f0] sm:$0xff] }
 0xa08   :  { %v6714_v32 = vmax.f32 %v13717_v26, 0.0  ;;  %9555 = vmatpush1.bf16.msra.mxu0 %v9554_v29  ;;  %v6704_v25 = vpop.f32.mrb[56].mxu0  ;;  %v9584_v29 = vpack.c.bf16 %v6796_v16, %v6792_v60 }
 0xa09   :  { %v13731_v37 = vadd.f32 %v6704_v25, %v6613_v48  ;;  %v6706_v43 = vpop.f32.mrb[57].mxu0  ;;  %9557 = vmatprep.subr.bf16.mxu0 %v9556_v7  ;;  %v9570_v48 = vpack.c.bf16 %v6763_v46, %v6759_v30  ;;  %v6795_v7 = vld [vmem:[%s14423_s11 + $0x270] sm:$0xff]  ;;  %v9598_v30 = vpack.c.bf16 %v6819_v47, %v6815_v58 }
 0xa0a   :  { %v13739_v56 = vadd.f32 %v6706_v43, %v6617_v20  ;;  %6943 = vmatprep.mubr.f32.mxu0 %v6714_v32  ;;  %v9572_v20 = vpack.c.bf16 %v6772_v54, %v6768_v62  ;;  %v9586_v35 = vpack.c.bf16 %v6795_v7, %v6791_v11  ;;  %v6799_v25 = vld [vmem:[%s14423_s11 + $0x290] sm:$0xff]  ;;  %v6808_v43 = vld [vmem:[%s14423_s11 + $0x2d8] sm:$0xff] }
 0xa0b   :  { %6944 = vmatmul.mubr.f32.gmra.mrb[62].mxu0 %v6713_v17  ;;  %v6715_v34 = vmax.f32 %v13731_v37, 0.0  ;;  %v6823_v62 = vld [vmem:[%s14423_s11 + $0x350] sm:$0xff] }
 0xa0c   :  { %v6716_v28 = vmax.f32 %v13739_v56, 0.0  ;;  %9559 = vmatpush1.bf16.msra.mxu0 %v9558_v21  ;;  %v6803_v21 = vld [vmem:[%s14423_s11 + $0x2b0] sm:$0xff] }
 0xa0d   :  { %9561 = vmatprep.subr.bf16.mxu0 %v9560_v41  ;;  %v6812_v41 = vld [vmem:[%s14423_s11 + $0x2f8] sm:$0xff]  ;;  %v9590_v53 = vpack.c.bf16 %v6803_v21, %v6799_v25  ;;  %v6827_v54 = vld [vmem:[%s14423_s11 + $0x370] sm:$0xff] }
 0xa0e   :  { %6949 = vmatprep.mubr.f32.mxu0 %v6716_v28  ;;  %v9592_v22 = vpack.c.bf16 %v6812_v41, %v6808_v43  ;;  %v9602_v1 = vpack.c.bf16 %v6827_v54, %v6823_v62 }
 0xa0f   :  { %6950 = vmatmul.mubr.f32.gmra.mrb[64].mxu0 %v6715_v34 }
 0xa10   :  { %9563 = vmatpush1.bf16.msra.mxu0 %v9562_v40  ;;  %7020 = vmatprep.mubr.f32.mxu0 %v6710_v4  ;;  %v6779_v4 = vld [vmem:[%s14423_s11 + $0x1f0] sm:$0xff]  ;;  %v6816_v40 = vld [vmem:[%s14423_s11 + $0x318] sm:$0xff] }
 0xa11   :  { %9565 = vmatprep.subr.bf16.mxu0 %v9564_v42  ;;  %v9578_v50 = vpack.c.bf16 %v6779_v4, %v6775_v55  ;;  %v6820_v42 = vld [vmem:[%s14423_s11 + $0x338] sm:$0xff]  ;;  %v9606_v55 = vpack.c.bf16 %v6835_v57, %v6831_v61 }
 0xa12   :  { %v9596_v38 = vpack.c.bf16 %v6820_v42, %v6816_v40  ;;  %v6862_v42 = vrot.slane %v6845_v23, %v6861_v27 }
 0xa14   :  { %9567 = vmatpush1.bf16.msra.mxu0 %v9566_v6  ;;  %v6824_v6 = vld [vmem:[%s14423_s11 + $0x358] sm:$0xff] }
 0xa15   :  { %9569 = vmatprep.subr.bf16.mxu0 %v9568_v12  ;;  %v6828_v12 = vld [vmem:[%s14423_s11 + $0x378] sm:$0xff] }
 0xa16   :  { %v9600_v46 = vpack.c.bf16 %v6828_v12, %v6824_v6 }
 0xa18   :  { %9571 = vmatpush1.bf16.msra.mxu0 %v9570_v48  ;;  %v6832_v48 = vld [vmem:[%s14423_s11 + $0x398] sm:$0xff] }
 0xa19   :  { %9573 = vmatprep.subr.bf16.mxu0 %v9572_v20  ;;  %v6836_v20 = vld [vmem:[%s14423_s11 + $0x3b8] sm:$0xff] }
 0xa1a   :  { %v9604_v63 = vpack.c.bf16 %v6836_v20, %v6832_v48 }
 0xa1c   :  { %9575 = vmatpush1.bf16.msra.mxu0 %v9574_v45  ;;  %v6840_v45 = vld [vmem:[%s14423_s11 + $0x3d8] sm:$0xff] }
 0xa1d   :  { %9577 = vmatprep.subr.bf16.mxu0 %v9576_v5  ;;  %v6844_v5 = vld [vmem:[%s14423_s11 + $0x3f8] sm:$0xff] }
 0xa1e   :  { %v9608_v4 = vpack.c.bf16 %v6844_v5, %v6840_v45 }
 0xa20   :  { %9579 = vmatpush1.bf16.msra.mxu0 %v9578_v50  ;;  %v9610_v50 = vpack.c.bf16 %v6843_v10, %v6839_v44  ;;  %v7208_v10 = vld [vmem:[%s14428_s14 + $0x8] sm:$0xff] }
 0xa21   :  { %9581 = vmatprep.subr.bf16.mxu0 %v9580_v9 }
 0xa24   :  { %9583 = vmatpush1.bf16.msra.mxu0 %v9582_v2 }
 0xa25   :  { %9585 = vmatprep.subr.bf16.mxu0 %v9584_v29 }
 0xa28   :  { %9587 = vmatpush1.bf16.msra.mxu0 %v9586_v35 }
 0xa29   :  { %9589 = vmatprep.subr.bf16.mxu0 %v9588_v8 }
 0xa2c   :  { %9591 = vmatpush1.bf16.msra.mxu0 %v9590_v53  ;;  %v7061_v53 = vld [vmem:[%s14427_s13] sm:$0xff] }
 0xa2d   :  { %9593 = vmatprep.subr.bf16.mxu0 %v9592_v22  ;;  %v6857_v22 = vsub.s32 2, %v13661_v15 }
 0xa2f   :  { %v6858_v31 = vrot.slane %v6845_v23, %v6857_v22  ;;  %v7230_v22 = vld [vmem:[%s14428_s14 + $0xb8] sm:$0xff] }
 0xa30   :  { %9595 = vmatpush1.bf16.msra.mxu0 %v9594_v24 }
 0xa31   :  { %9597 = vmatprep.subr.bf16.mxu0 %v9596_v38 }
 0xa34   :  { %9599 = vmatpush1.bf16.msra.mxu0 %v9598_v30 }
 0xa35   :  { %9601 = vmatprep.subr.bf16.mxu0 %v9600_v46 }
 0xa38   :  { %9603 = vmatpush1.bf16.msra.mxu0 %v9602_v1 }
 0xa39   :  { %9605 = vmatprep.subr.bf16.mxu0 %v9604_v63 }
 0xa3c   :  { %9607 = vmatpush1.bf16.msra.mxu0 %v9606_v55 }
 0xa3d   :  { %9609 = vmatprep.subr.bf16.mxu0 %v9608_v4 }
 0xa40   :  { %9611 = vmatpush1.bf16.msra.mxu0 %v9610_v50  ;;  %v7210_v50 = vld [vmem:[%s14428_s14 + $0x18] sm:$0xff] }
 0xa43   :  { %7021 = vmatmul.mubr.f32.vlgmr.msra.gmra.mrb[66].mxu0 %v6709_v49  ;;  %v6850_v49 = vrot.slane %v6845_v23, %v13664_v36 }
 0xa44   :  { %7026 = vmatprep.mubr.f32.mxu0 %v6712_v14 }
 0xa47   :  { %7027 = vmatmul.mubr.f32.gmra.mrb[68].mxu0 %v6711_v19 }
 0xa48   :  { %7032 = vmatprep.mubr.f32.mxu0 %v6714_v32 }
 0xa4b   :  { %7033 = vmatmul.mubr.f32.gmra.mrb[70].mxu0 %v6713_v17 }
 0xa4c   :  { %7038 = vmatprep.mubr.f32.mxu0 %v6716_v28 }
 0xa4f   :  { %7039 = vmatmul.mubr.f32.gmra.mrb[72].mxu0 %v6715_v34 }
 0xa50   :  { %7129 = vmatprep.mubr.f32.mxu0 %v10107_v39 }
 0xad6   :  { %v6933_v3 = vpop.f32.mrb[58].mxu0 }
 0xad7   :  { %v6935_v14 = vpop.f32.mrb[59].mxu0  ;;  %v6934_v19 = vadd.f32 %v6933_v3, %v6850_v49 }
 0xad8   :  { %v6936_v0 = vadd.f32 %v6935_v14, %v6854_v51  ;;  %v9628_v14 = vpack.c.bf16 %v7210_v50, %v7208_v10  ;;  %v7245_v10 = vld [vmem:[%s14428_s14 + $0x130] sm:$0xff]  ;;  %v7248_v50 = vld [vmem:[%s14428_s14 + $0x148] sm:$0xff] }
 0xad9   :  { %v7045_v37 = vmax.f32 %v6934_v19, 0.0  ;;  %v7207_v19 = vld [vmem:[%s14428_s14] sm:$0xff] }
 0xada   :  { %v6939_v26 = vpop.f32.mrb[60].mxu0  ;;  %v7046_v34 = vmax.f32 %v6936_v0, 0.0  ;;  %v7209_v0 = vld [vmem:[%s14428_s14 + $0x10] sm:$0xff] }
 0xadb   :  { %v6940_v32 = vadd.f32 %v6939_v26, %v6850_v49  ;;  %v6941_v17 = vpop.f32.mrb[61].mxu0  ;;  %v7212_v26 = vld [vmem:[%s14428_s14 + $0x28] sm:$0xff] }
 0xadc   :  { %v6942_v56 = vadd.f32 %v6941_v17, %v6854_v51  ;;  %v9630_v17 = vpack.c.bf16 %v7209_v0, %v7207_v19  ;;  %v7252_v19 = vld [vmem:[%s14428_s14 + $0x168] sm:$0xff]  ;;  %v7254_v0 = vld [vmem:[%s14428_s14 + $0x178] sm:$0xff] }
 0xadd   :  { %v7049_v28 = vmax.f32 %v6940_v32, 0.0  ;;  %v7214_v32 = vld [vmem:[%s14428_s14 + $0x38] sm:$0xff] }
 0xade   :  { %v7050_v9 = vmax.f32 %v6942_v56, 0.0  ;;  %v6945_v59 = vpop.f32.mrb[62].mxu0  ;;  %v9632_v56 = vpack.c.bf16 %v7214_v32, %v7212_v26  ;;  %v9672_v32 = vpack.c.bf16 %v7254_v0, %v7252_v19  ;;  %v7292_v19 = vld [vmem:[%s14428_s14 + $0x2a8] sm:$0xff]  ;;  %v7294_v0 = vld [vmem:[%s14428_s14 + $0x2b8] sm:$0xff] }
 0xadf   :  { %v9614_v13 = vpack.c.bf16 %v7049_v28, %v7045_v37  ;;  %v6947_v60 = vpop.f32.mrb[63].mxu0  ;;  %v6946_v2 = vadd.f32 %v6945_v59, %v6850_v49  ;;  %v7211_v37 = vld [vmem:[%s14428_s14 + $0x20] sm:$0xff]  ;;  %v7213_v28 = vld [vmem:[%s14428_s14 + $0x30] sm:$0xff] }
 0xae0   :  { %v9612_v16 = vpack.c.bf16 %v7050_v9, %v7046_v34  ;;  %v6948_v29 = vadd.f32 %v6947_v60, %v6854_v51  ;;  %v7216_v34 = vld [vmem:[%s14428_s14 + $0x48] sm:$0xff]  ;;  %v7218_v9 = vld [vmem:[%s14428_s14 + $0x58] sm:$0xff]  ;;  %v9634_v59 = vpack.c.bf16 %v7213_v28, %v7211_v37  ;;  %v7215_v60 = vld [vmem:[%s14428_s14 + $0x40] sm:$0xff] }
 0xae1   :  { %v7053_v35 = vmax.f32 %v6946_v2, 0.0  ;;  %v7220_v2 = vld [vmem:[%s14428_s14 + $0x68] sm:$0xff]  ;;  %v7258_v28 = vld [vmem:[%s14428_s14 + $0x198] sm:$0xff] }
 0xae2   :  { %v6951_v11 = vpop.f32.mrb[64].mxu0  ;;  %9613 = vmatprep.subr.bf16.mxu0 %v9612_v16  ;;  %v7054_v25 = vmax.f32 %v6948_v29, 0.0  ;;  %v7217_v16 = vld [vmem:[%s14428_s14 + $0x50] sm:$0xff]  ;;  %v7222_v29 = vld [vmem:[%s14428_s14 + $0x78] sm:$0xff]  ;;  %v7256_v37 = vld [vmem:[%s14428_s14 + $0x188] sm:$0xff] }
 0xae3   :  { %v6952_v7 = vadd.f32 %v6951_v11, %v6850_v49  ;;  %v6953_v33 = vpop.f32.mrb[65].mxu0  ;;  %9615 = vmatpush1.bf16.msra.mxu0 %v9614_v13  ;;  %v9636_v13 = vpack.c.bf16 %v7218_v9, %v7216_v34  ;;  %v9638_v11 = vpack.c.bf16 %v7217_v16, %v7215_v60  ;;  %v9676_v9 = vpack.c.bf16 %v7258_v28, %v7256_v37  ;;  %v7260_v60 = vld [vmem:[%s14428_s14 + $0x1a8] sm:$0xff]  ;;  %v7262_v16 = vld [vmem:[%s14428_s14 + $0x1b8] sm:$0xff] }
 0xae4   :  { %v6954_v18 = vadd.f32 %v6953_v33, %v6854_v51  ;;  %v7219_v33 = vld [vmem:[%s14428_s14 + $0x60] sm:$0xff]  ;;  %v7296_v37 = vld [vmem:[%s14428_s14 + $0x2c8] sm:$0xff]  ;;  %v7298_v28 = vld [vmem:[%s14428_s14 + $0x2d8] sm:$0xff] }
 0xae5   :  { %v7057_v8 = vmax.f32 %v6952_v7, 0.0  ;;  %v9640_v7 = vpack.c.bf16 %v7222_v29, %v7220_v2  ;;  %v9680_v29 = vpack.c.bf16 %v7262_v16, %v7260_v60  ;;  %v7300_v60 = vld [vmem:[%s14428_s14 + $0x2e8] sm:$0xff]  ;;  %v7302_v16 = vld [vmem:[%s14428_s14 + $0x2f8] sm:$0xff] }
 0xae6   :  { %v7058_v21 = vmax.f32 %v6954_v18, 0.0  ;;  %v7221_v18 = vld [vmem:[%s14428_s14 + $0x70] sm:$0xff] }
 0xae7   :  { %v9618_v43 = vpack.c.bf16 %v7057_v8, %v7053_v35  ;;  %v7224_v35 = vld [vmem:[%s14428_s14 + $0x88] sm:$0xff]  ;;  %v7226_v8 = vld [vmem:[%s14428_s14 + $0x98] sm:$0xff] }
 0xae8   :  { %v9616_v41 = vpack.c.bf16 %v7058_v21, %v7054_v25  ;;  %v9642_v25 = vpack.c.bf16 %v7221_v18, %v7219_v33  ;;  %v9644_v21 = vpack.c.bf16 %v7226_v8, %v7224_v35  ;;  %v7264_v33 = vld [vmem:[%s14428_s14 + $0x1c8] sm:$0xff]  ;;  %v7266_v18 = vld [vmem:[%s14428_s14 + $0x1d8] sm:$0xff] }
 0xae9   :  { %v9684_v8 = vpack.c.bf16 %v7266_v18, %v7264_v33  ;;  %v7304_v33 = vld [vmem:[%s14428_s14 + $0x308] sm:$0xff]  ;;  %v7306_v18 = vld [vmem:[%s14428_s14 + $0x318] sm:$0xff] }
 0xaea   :  { %9617 = vmatprep.subr.bf16.mxu0 %v9616_v41  ;;  %v7225_v41 = vld [vmem:[%s14428_s14 + $0x90] sm:$0xff] }
 0xaeb   :  { %9619 = vmatpush1.bf16.msra.mxu0 %v9618_v43  ;;  %v7223_v43 = vld [vmem:[%s14428_s14 + $0x80] sm:$0xff] }
 0xaec   :  { %v9646_v27 = vpack.c.bf16 %v7225_v41, %v7223_v43  ;;  %v7268_v43 = vld [vmem:[%s14428_s14 + $0x1e8] sm:$0xff]  ;;  %v7270_v41 = vld [vmem:[%s14428_s14 + $0x1f8] sm:$0xff] }
 0xaee   :  { %7958 = vmatmul.mubr.msk.f32.vlgmr.msra.gmra.mrb[74].mxu0 %vm2962_vm1, %v7061_v53 }
 0xaef   :  { %7200 = vmatprep.mubr.f32.mxu0 %v10107_v39 }
 0xb16   :  { %v7022_v40 = vpop.f32.mrb[66].mxu0 }
 0xb17   :  { %v7024_v24 = vpop.f32.mrb[67].mxu0  ;;  %v7023_v38 = vadd.f32 %v7022_v40, %v6858_v31  ;;  %v7227_v40 = vld [vmem:[%s14428_s14 + $0xa0] sm:$0xff] }
 0xb18   :  { %v7025_v58 = vadd.f32 %v7024_v24, %v6862_v42  ;;  %v7232_v24 = vld [vmem:[%s14428_s14 + $0xc8] sm:$0xff] }
 0xb19   :  { %v7047_v46 = vmax.f32 %v7023_v38, 0.0  ;;  %v7234_v38 = vld [vmem:[%s14428_s14 + $0xd8] sm:$0xff] }
 0xb1a   :  { %v7028_v47 = vpop.f32.mrb[68].mxu0  ;;  %v7048_v54 = vmax.f32 %v7025_v58, 0.0 }
 0xb1b   :  { %v7029_v6 = vadd.f32 %v7028_v47, %v6858_v31  ;;  %v7030_v12 = vpop.f32.mrb[69].mxu0  ;;  %v9652_v47 = vpack.c.bf16 %v7234_v38, %v7232_v24 }
 0xb1c   :  { %v7031_v30 = vadd.f32 %v7030_v12, %v6862_v42  ;;  %v7233_v12 = vld [vmem:[%s14428_s14 + $0xd0] sm:$0xff] }
 0xb1d   :  { %v7051_v62 = vmax.f32 %v7029_v6, 0.0  ;;  %v7231_v6 = vld [vmem:[%s14428_s14 + $0xc0] sm:$0xff] }
 0xb1e   :  { %v7052_v48 = vmax.f32 %v7031_v30, 0.0  ;;  %v7034_v20 = vpop.f32.mrb[70].mxu0  ;;  %v7236_v30 = vld [vmem:[%s14428_s14 + $0xe8] sm:$0xff] }
 0xb1f   :  { %v9622_v39 = vpack.c.bf16 %v7051_v62, %v7047_v46  ;;  %v7036_v1 = vpop.f32.mrb[71].mxu0  ;;  %v7035_v61 = vadd.f32 %v7034_v20, %v6858_v31  ;;  %v7238_v46 = vld [vmem:[%s14428_s14 + $0xf8] sm:$0xff]  ;;  %v9654_v62 = vpack.c.bf16 %v7233_v12, %v7231_v6  ;;  %v7237_v20 = vld [vmem:[%s14428_s14 + $0xf0] sm:$0xff]  ;;  %v7276_v6 = vld [vmem:[%s14428_s14 + $0x228] sm:$0xff] }
 0xb20   :  { %v9620_v63 = vpack.c.bf16 %v7052_v48, %v7048_v54  ;;  %v7037_v15 = vadd.f32 %v7036_v1, %v6862_v42  ;;  %v9656_v54 = vpack.c.bf16 %v7238_v46, %v7236_v30  ;;  %v7235_v48 = vld [vmem:[%s14428_s14 + $0xe0] sm:$0xff]  ;;  %v7242_v1 = vld [vmem:[%s14428_s14 + $0x118] sm:$0xff] }
 0xb21   :  { %v7055_v4 = vmax.f32 %v7035_v61, 0.0  ;;  %v7278_v12 = vld [vmem:[%s14428_s14 + $0x238] sm:$0xff] }
 0xb22   :  { %v7040_v57 = vpop.f32.mrb[72].mxu0  ;;  %9621 = vmatprep.subr.bf16.mxu0 %v9620_v63  ;;  %v7056_v23 = vmax.f32 %v7037_v15, 0.0  ;;  %v9658_v63 = vpack.c.bf16 %v7237_v20, %v7235_v48  ;;  %v7239_v15 = vld [vmem:[%s14428_s14 + $0x100] sm:$0xff]  ;;  %v7277_v20 = vld [vmem:[%s14428_s14 + $0x230] sm:$0xff] }
 0xb23   :  { %v7041_v45 = vadd.f32 %v7040_v57, %v6858_v31  ;;  %v7042_v5 = vpop.f32.mrb[73].mxu0  ;;  %9623 = vmatpush1.bf16.msra.mxu0 %v9622_v39  ;;  %v7240_v39 = vld [vmem:[%s14428_s14 + $0x108] sm:$0xff]  ;;  %v7241_v57 = vld [vmem:[%s14428_s14 + $0x110] sm:$0xff]  ;;  %v7275_v48 = vld [vmem:[%s14428_s14 + $0x220] sm:$0xff] }
 0xb24   :  { %v7043_v55 = vadd.f32 %v7042_v5, %v6862_v42  ;;  %v7229_v42 = vld [vmem:[%s14428_s14 + $0xb0] sm:$0xff]  ;;  %v9660_v61 = vpack.c.bf16 %v7242_v1, %v7240_v39  ;;  %v7246_v5 = vld [vmem:[%s14428_s14 + $0x138] sm:$0xff]  ;;  %v7280_v39 = vld [vmem:[%s14428_s14 + $0x248] sm:$0xff] }
 0xb25   :  { %v7059_v44 = vmax.f32 %v7041_v45, 0.0  ;;  %v9650_v58 = vpack.c.bf16 %v7229_v42, %v7227_v40  ;;  %v7244_v45 = vld [vmem:[%s14428_s14 + $0x128] sm:$0xff]  ;;  %v7274_v42 = vld [vmem:[%s14428_s14 + $0x218] sm:$0xff] }
 0xb26   :  { %v7060_v49 = vmax.f32 %v7043_v55, 0.0  ;;  %v9662_v55 = vpack.c.bf16 %v7241_v57, %v7239_v15  ;;  %v7272_v40 = vld [vmem:[%s14428_s14 + $0x208] sm:$0xff]  ;;  %v7282_v1 = vld [vmem:[%s14428_s14 + $0x258] sm:$0xff]  ;;  %v7279_v15 = vld [vmem:[%s14428_s14 + $0x240] sm:$0xff] }
 0xb27   :  { %v9626_v3 = vpack.c.bf16 %v7059_v44, %v7055_v4  ;;  %v9664_v4 = vpack.c.bf16 %v7246_v5, %v7244_v45  ;;  %v7243_v44 = vld [vmem:[%s14428_s14 + $0x120] sm:$0xff]  ;;  %v9692_v38 = vpack.c.bf16 %v7274_v42, %v7272_v40  ;;  %v7281_v57 = vld [vmem:[%s14428_s14 + $0x250] sm:$0xff]  ;;  %v7284_v45 = vld [vmem:[%s14428_s14 + $0x268] sm:$0xff] }
 0xb28   :  { %v9624_v51 = vpack.c.bf16 %v7060_v49, %v7056_v23  ;;  %v7250_v23 = vld [vmem:[%s14428_s14 + $0x158] sm:$0xff]  ;;  %v9666_v49 = vpack.c.bf16 %v7245_v10, %v7243_v44  ;;  %v7283_v44 = vld [vmem:[%s14428_s14 + $0x260] sm:$0xff]  ;;  %v7285_v10 = vld [vmem:[%s14428_s14 + $0x270] sm:$0xff] }
 0xb29   :  { %v7286_v5 = vld [vmem:[%s14428_s14 + $0x278] sm:$0xff]  ;;  %v7312_v40 = vld [vmem:[%s14428_s14 + $0x348] sm:$0xff] }
 0xb2a   :  { %9625 = vmatprep.subr.bf16.mxu0 %v9624_v51  ;;  %v7247_v51 = vld [vmem:[%s14428_s14 + $0x140] sm:$0xff]  ;;  %v7314_v42 = vld [vmem:[%s14428_s14 + $0x358] sm:$0xff] }
 0xb2b   :  { %9627 = vmatpush1.bf16.msra.mxu0 %v9626_v3  ;;  %v9668_v3 = vpack.c.bf16 %v7250_v23, %v7248_v50  ;;  %v7288_v50 = vld [vmem:[%s14428_s14 + $0x288] sm:$0xff]  ;;  %v7290_v23 = vld [vmem:[%s14428_s14 + $0x298] sm:$0xff] }
 0xb2c   :  { %9629 = vmatprep.subr.bf16.mxu0 %v9628_v14  ;;  %v7249_v14 = vld [vmem:[%s14428_s14 + $0x150] sm:$0xff] }
 0xb2d   :  { %v9670_v26 = vpack.c.bf16 %v7249_v14, %v7247_v51  ;;  %v7287_v51 = vld [vmem:[%s14428_s14 + $0x280] sm:$0xff]  ;;  %v7289_v14 = vld [vmem:[%s14428_s14 + $0x290] sm:$0xff] }
 0xb2e   :  { %7959 = vmatmul.mubr.msk.f32.vlgmr.msra.gmra.mrb[76].mxu0 %vm2962_vm1, %v7061_v53  ;;  %v7228_v53 = vld [vmem:[%s14428_s14 + $0xa8] sm:$0xff] }
 0xb2f   :  { %9631 = vmatpush1.bf16.msra.mxu0 %v9630_v17  ;;  %v9648_v31 = vpack.c.bf16 %v7230_v22, %v7228_v53  ;;  %v7251_v17 = vld [vmem:[%s14428_s14 + $0x160] sm:$0xff]  ;;  %v9688_v22 = vpack.c.bf16 %v7270_v41, %v7268_v43  ;;  %v7308_v43 = vld [vmem:[%s14428_s14 + $0x328] sm:$0xff]  ;;  %v7310_v41 = vld [vmem:[%s14428_s14 + $0x338] sm:$0xff] }
 0xb30   :  { %9633 = vmatprep.subr.bf16.mxu0 %v9632_v56  ;;  %v7253_v56 = vld [vmem:[%s14428_s14 + $0x170] sm:$0xff] }
 0xb31   :  { %v9674_v34 = vpack.c.bf16 %v7253_v56, %v7251_v17  ;;  %v7291_v17 = vld [vmem:[%s14428_s14 + $0x2a0] sm:$0xff]  ;;  %v7293_v56 = vld [vmem:[%s14428_s14 + $0x2b0] sm:$0xff] }
 0xb33   :  { %9635 = vmatpush1.bf16.msra.mxu0 %v9634_v59  ;;  %v7255_v59 = vld [vmem:[%s14428_s14 + $0x180] sm:$0xff] }
 0xb34   :  { %9637 = vmatprep.subr.bf16.mxu0 %v9636_v13  ;;  %v7257_v13 = vld [vmem:[%s14428_s14 + $0x190] sm:$0xff] }
 0xb35   :  { %v9678_v2 = vpack.c.bf16 %v7257_v13, %v7255_v59  ;;  %v7295_v59 = vld [vmem:[%s14428_s14 + $0x2c0] sm:$0xff]  ;;  %v7297_v13 = vld [vmem:[%s14428_s14 + $0x2d0] sm:$0xff] }
 0xb37   :  { %9639 = vmatpush1.bf16.msra.mxu0 %v9638_v11  ;;  %v7259_v11 = vld [vmem:[%s14428_s14 + $0x1a0] sm:$0xff] }
 0xb38   :  { %9641 = vmatprep.subr.bf16.mxu0 %v9640_v7  ;;  %v7261_v7 = vld [vmem:[%s14428_s14 + $0x1b0] sm:$0xff] }
 0xb39   :  { %v9682_v35 = vpack.c.bf16 %v7261_v7, %v7259_v11  ;;  %v7299_v11 = vld [vmem:[%s14428_s14 + $0x2e0] sm:$0xff]  ;;  %v7301_v7 = vld [vmem:[%s14428_s14 + $0x2f0] sm:$0xff] }
 0xb3b   :  { %9643 = vmatpush1.bf16.msra.mxu0 %v9642_v25  ;;  %v7263_v25 = vld [vmem:[%s14428_s14 + $0x1c0] sm:$0xff] }
 0xb3c   :  { %9645 = vmatprep.subr.bf16.mxu0 %v9644_v21  ;;  %v7265_v21 = vld [vmem:[%s14428_s14 + $0x1d0] sm:$0xff] }
 0xb3d   :  { %v9686_v53 = vpack.c.bf16 %v7265_v21, %v7263_v25  ;;  %v7303_v25 = vld [vmem:[%s14428_s14 + $0x300] sm:$0xff]  ;;  %v7305_v21 = vld [vmem:[%s14428_s14 + $0x310] sm:$0xff] }
 0xb3f   :  { %9647 = vmatpush1.bf16.msra.mxu0 %v9646_v27  ;;  %v7267_v27 = vld [vmem:[%s14428_s14 + $0x1e0] sm:$0xff] }
 0xb40   :  { %9649 = vmatprep.subr.bf16.mxu0 %v9648_v31  ;;  %v7269_v31 = vld [vmem:[%s14428_s14 + $0x1f0] sm:$0xff] }
 0xb41   :  { %v9690_v24 = vpack.c.bf16 %v7269_v31, %v7267_v27  ;;  %v7307_v27 = vld [vmem:[%s14428_s14 + $0x320] sm:$0xff]  ;;  %v7309_v31 = vld [vmem:[%s14428_s14 + $0x330] sm:$0xff] }
 0xb43   :  { %9651 = vmatpush1.bf16.msra.mxu0 %v9650_v58  ;;  %v7271_v58 = vld [vmem:[%s14428_s14 + $0x200] sm:$0xff] }
 0xb44   :  { %9653 = vmatprep.subr.bf16.mxu0 %v9652_v47  ;;  %v7273_v47 = vld [vmem:[%s14428_s14 + $0x210] sm:$0xff] }
 0xb45   :  { %v9694_v46 = vpack.c.bf16 %v7273_v47, %v7271_v58  ;;  %v7311_v58 = vld [vmem:[%s14428_s14 + $0x340] sm:$0xff]  ;;  %v7313_v47 = vld [vmem:[%s14428_s14 + $0x350] sm:$0xff] }
 0xb47   :  { %9655 = vmatpush1.bf16.msra.mxu0 %v9654_v62 }
 0xb48   :  { %9657 = vmatprep.subr.bf16.mxu0 %v9656_v54  ;;  %v9696_v54 = vpack.c.bf16 %v7278_v12, %v7276_v6  ;;  %v7316_v6 = vld [vmem:[%s14428_s14 + $0x368] sm:$0xff]  ;;  %v7318_v12 = vld [vmem:[%s14428_s14 + $0x378] sm:$0xff] }
 0xb4b   :  { %9659 = vmatpush1.bf16.msra.mxu0 %v9658_v63  ;;  %v9698_v63 = vpack.c.bf16 %v7277_v20, %v7275_v48  ;;  %v7320_v48 = vld [vmem:[%s14428_s14 + $0x388] sm:$0xff]  ;;  %v7322_v20 = vld [vmem:[%s14428_s14 + $0x398] sm:$0xff] }
 0xb4c   :  { %9661 = vmatprep.subr.bf16.mxu0 %v9660_v61  ;;  %v9700_v61 = vpack.c.bf16 %v7282_v1, %v7280_v39  ;;  %v9740_v1 = vpack.c.bf16 %v7322_v20, %v7320_v48  ;;  %v7519_v48 = vld [vmem:[%s14429_s16 + $0xe0] sm:$0xff]  ;;  %v7520_v20 = vld [vmem:[%s14429_s16 + $0xe8] sm:$0xff] }
 0xb4f   :  { %9663 = vmatpush1.bf16.msra.mxu0 %v9662_v55  ;;  %v9702_v55 = vpack.c.bf16 %v7281_v57, %v7279_v15  ;;  %v7324_v15 = vld [vmem:[%s14428_s14 + $0x3a8] sm:$0xff]  ;;  %v7326_v57 = vld [vmem:[%s14428_s14 + $0x3b8] sm:$0xff] }
 0xb50   :  { %9665 = vmatprep.subr.bf16.mxu0 %v9664_v4  ;;  %v9704_v4 = vpack.c.bf16 %v7286_v5, %v7284_v45  ;;  %v9744_v5 = vpack.c.bf16 %v7326_v57, %v7324_v15  ;;  %v7521_v57 = vld [vmem:[%s14429_s16 + $0xf0] sm:$0xff] }
 0xb53   :  { %9667 = vmatpush1.bf16.msra.mxu0 %v9666_v49  ;;  %v9706_v49 = vpack.c.bf16 %v7285_v10, %v7283_v44  ;;  %v7328_v44 = vld [vmem:[%s14428_s14 + $0x3c8] sm:$0xff]  ;;  %v7330_v10 = vld [vmem:[%s14428_s14 + $0x3d8] sm:$0xff] }
 0xb54   :  { %9669 = vmatprep.subr.bf16.mxu0 %v9668_v3  ;;  %v9708_v3 = vpack.c.bf16 %v7290_v23, %v7288_v50  ;;  %v9748_v23 = vpack.c.bf16 %v7330_v10, %v7328_v44  ;;  %v7335_v10 = vld [vmem:[%s14430_s15] sm:$0x3] }
 0xb57   :  { %9671 = vmatpush1.bf16.msra.mxu0 %v9670_v26  ;;  %v9710_v26 = vpack.c.bf16 %v7289_v14, %v7287_v51  ;;  %v7332_v51 = vld [vmem:[%s14428_s14 + $0x3e8] sm:$0xff]  ;;  %v7334_v14 = vld [vmem:[%s14428_s14 + $0x3f8] sm:$0xff] }
 0xb58   :  { %9673 = vmatprep.subr.bf16.mxu0 %v9672_v32  ;;  %v9712_v32 = vpack.c.bf16 %v7294_v0, %v7292_v19  ;;  %v9752_v0 = vpack.c.bf16 %v7334_v14, %v7332_v51 }
 0xb5b   :  { %9675 = vmatpush1.bf16.msra.mxu0 %v9674_v34  ;;  %v9714_v34 = vpack.c.bf16 %v7293_v56, %v7291_v17  ;;  %v7507_v17 = vld [vmem:[%s14429_s16 + $0x80] sm:$0xff]  ;;  %v7508_v56 = vld [vmem:[%s14429_s16 + $0x88] sm:$0xff] }
 0xb5c   :  { %9677 = vmatprep.subr.bf16.mxu0 %v9676_v9  ;;  %v9716_v9 = vpack.c.bf16 %v7298_v28, %v7296_v37  ;;  %v9756_v28 = vpack.c.bf16 %v7508_v56, %v7507_v17  ;;  %v7960_v17 = vld [vmem:[%s14431_s17] ss:$0 sm:$0xff] }
 0xb5f   :  { %9679 = vmatpush1.bf16.msra.mxu0 %v9678_v2  ;;  %v9718_v2 = vpack.c.bf16 %v7297_v13, %v7295_v59  ;;  %v7509_v59 = vld [vmem:[%s14429_s16 + $0x90] sm:$0xff]  ;;  %v7510_v13 = vld [vmem:[%s14429_s16 + $0x98] sm:$0xff] }
 0xb60   :  { %9681 = vmatprep.subr.bf16.mxu0 %v9680_v29  ;;  %v9720_v29 = vpack.c.bf16 %v7302_v16, %v7300_v60 }
 0xb63   :  { %9683 = vmatpush1.bf16.msra.mxu0 %v9682_v35  ;;  %v9722_v35 = vpack.c.bf16 %v7301_v7, %v7299_v11  ;;  %v7493_v11 = vld [vmem:[%s14429_s16 + $0x10] sm:$0xff]  ;;  %v7494_v7 = vld [vmem:[%s14429_s16 + $0x18] sm:$0xff] }
 0xb64   :  { %9685 = vmatprep.subr.bf16.mxu0 %v9684_v8  ;;  %v9724_v8 = vpack.c.bf16 %v7306_v18, %v7304_v33  ;;  %v7511_v33 = vld [vmem:[%s14429_s16 + $0xa0] sm:$0xff]  ;;  %v7512_v18 = vld [vmem:[%s14429_s16 + $0xa8] sm:$0xff] }
 0xb67   :  { %9687 = vmatpush1.bf16.msra.mxu0 %v9686_v53  ;;  %v9726_v53 = vpack.c.bf16 %v7305_v21, %v7303_v25  ;;  %v7495_v25 = vld [vmem:[%s14429_s16 + $0x20] sm:$0xff]  ;;  %v7496_v21 = vld [vmem:[%s14429_s16 + $0x28] sm:$0xff] }
 0xb68   :  { %9689 = vmatprep.subr.bf16.mxu0 %v9688_v22  ;;  %v9728_v22 = vpack.c.bf16 %v7310_v41, %v7308_v43  ;;  %v7513_v43 = vld [vmem:[%s14429_s16 + $0xb0] sm:$0xff]  ;;  %v7514_v41 = vld [vmem:[%s14429_s16 + $0xb8] sm:$0xff] }
 0xb6b   :  { %9691 = vmatpush1.bf16.msra.mxu0 %v9690_v24  ;;  %v9730_v24 = vpack.c.bf16 %v7309_v31, %v7307_v27  ;;  %v7497_v27 = vld [vmem:[%s14429_s16 + $0x30] sm:$0xff]  ;;  %v7498_v31 = vld [vmem:[%s14429_s16 + $0x38] sm:$0xff] }
 0xb6c   :  { %9693 = vmatprep.subr.bf16.mxu0 %v9692_v38  ;;  %v9732_v38 = vpack.c.bf16 %v7314_v42, %v7312_v40  ;;  %v7515_v40 = vld [vmem:[%s14429_s16 + $0xc0] sm:$0xff]  ;;  %v7516_v42 = vld [vmem:[%s14429_s16 + $0xc8] sm:$0xff] }
 0xbc1   :  { %v7131_v30 = vpop.f32.mrb[74].mxu0 }
 0xbc2   :  { %v7133_v62 = vpop.f32.mrb[75].mxu0 }
 0xbc3   :  { %7411 = vmatprep.mubr.f32.mxu0 %v7133_v62  ;;  %v7315_v62 = vld [vmem:[%s14428_s14 + $0x360] sm:$0xff] }
 0xbc4   :  { %7412 = vmatmul.mubr.f32.vlgmr.msra.gmra.mrb[78].mxu0 %v7131_v30  ;;  %v9734_v30 = vpack.c.bf16 %v7313_v47, %v7311_v58  ;;  %v7499_v58 = vld [vmem:[%s14429_s16 + $0x40] sm:$0xff]  ;;  %v7500_v47 = vld [vmem:[%s14429_s16 + $0x48] sm:$0xff] }
 0xbc5   :  { %9695 = vmatpush1.bf16.msra.mxu0 %v9694_v46  ;;  %v9736_v46 = vpack.c.bf16 %v7318_v12, %v7316_v6  ;;  %v7517_v6 = vld [vmem:[%s14429_s16 + $0xd0] sm:$0xff]  ;;  %v7518_v12 = vld [vmem:[%s14429_s16 + $0xd8] sm:$0xff] }
 0xbc6   :  { %9697 = vmatprep.subr.bf16.mxu0 %v9696_v54  ;;  %v7317_v54 = vld [vmem:[%s14428_s14 + $0x370] sm:$0xff] }
 0xbc7   :  { %v9738_v39 = vpack.c.bf16 %v7317_v54, %v7315_v62  ;;  %v7501_v62 = vld [vmem:[%s14429_s16 + $0x50] sm:$0xff]  ;;  %v7502_v54 = vld [vmem:[%s14429_s16 + $0x58] sm:$0xff] }
 0xbc9   :  { %9699 = vmatpush1.bf16.msra.mxu0 %v9698_v63  ;;  %v7319_v63 = vld [vmem:[%s14428_s14 + $0x380] sm:$0xff] }
 0xbca   :  { %9701 = vmatprep.subr.bf16.mxu0 %v9700_v61  ;;  %v7321_v61 = vld [vmem:[%s14428_s14 + $0x390] sm:$0xff] }
 0xbcb   :  { %v9742_v45 = vpack.c.bf16 %v7321_v61, %v7319_v63  ;;  %v7503_v63 = vld [vmem:[%s14429_s16 + $0x60] sm:$0xff]  ;;  %v7504_v61 = vld [vmem:[%s14429_s16 + $0x68] sm:$0xff] }
 0xbcc   :  { %v9782_v15 = vpack.c.bf16 %v7504_v61, %v7503_v63 }
 0xbcd   :  { %9703 = vmatpush1.bf16.msra.mxu0 %v9702_v55  ;;  %v7323_v55 = vld [vmem:[%s14428_s14 + $0x3a0] sm:$0xff] }
 0xbce   :  { %9705 = vmatprep.subr.bf16.mxu0 %v9704_v4  ;;  %v7325_v4 = vld [vmem:[%s14428_s14 + $0x3b0] sm:$0xff] }
 0xbcf   :  { %v9746_v50 = vpack.c.bf16 %v7325_v4, %v7323_v55  ;;  %v7505_v55 = vld [vmem:[%s14429_s16 + $0x70] sm:$0xff]  ;;  %v7506_v4 = vld [vmem:[%s14429_s16 + $0x78] sm:$0xff] }
 0xbd0   :  { %v9786_v44 = vpack.c.bf16 %v7506_v4, %v7505_v55 }
 0xbd1   :  { %9707 = vmatpush1.bf16.msra.mxu0 %v9706_v49  ;;  %v7327_v49 = vld [vmem:[%s14428_s14 + $0x3c0] sm:$0xff] }
 0xbd2   :  { %9709 = vmatprep.subr.bf16.mxu0 %v9708_v3  ;;  %v7329_v3 = vld [vmem:[%s14428_s14 + $0x3d0] sm:$0xff] }
 0xbd3   :  { %v9750_v19 = vpack.c.bf16 %v7329_v3, %v7327_v49 }
 0xbd5   :  { %9711 = vmatpush1.bf16.msra.mxu0 %v9710_v26  ;;  %v7331_v26 = vld [vmem:[%s14428_s14 + $0x3e0] sm:$0xff] }
 0xbd6   :  { %9713 = vmatprep.subr.bf16.mxu0 %v9712_v32  ;;  %v7333_v32 = vld [vmem:[%s14428_s14 + $0x3f0] sm:$0xff] }
 0xbd7   :  { %v9754_v37 = vpack.c.bf16 %v7333_v32, %v7331_v26 }
 0xbd9   :  { %9715 = vmatpush1.bf16.msra.mxu0 %v9714_v34  ;;  %v7491_v34 = vld [vmem:[%s14429_s16] sm:$0xff] }
 0xbda   :  { %9717 = vmatprep.subr.bf16.mxu0 %v9716_v9  ;;  %v7492_v9 = vld [vmem:[%s14429_s16 + $0x8] sm:$0xff] }
 0xbdb   :  { %v9758_v16 = vpack.c.bf16 %v7492_v9, %v7491_v34 }
 0xbdd   :  { %9719 = vmatpush1.bf16.msra.mxu0 %v9718_v2 }
 0xbde   :  { %9721 = vmatprep.subr.bf16.mxu0 %v9720_v29  ;;  %v9760_v29 = vpack.c.bf16 %v7510_v13, %v7509_v59 }
 0xbe1   :  { %9723 = vmatpush1.bf16.msra.mxu0 %v9722_v35  ;;  %v9762_v35 = vpack.c.bf16 %v7494_v7, %v7493_v11 }
 0xbe2   :  { %9725 = vmatprep.subr.bf16.mxu0 %v9724_v8  ;;  %v9764_v8 = vpack.c.bf16 %v7512_v18, %v7511_v33 }
 0xbe5   :  { %9727 = vmatpush1.bf16.msra.mxu0 %v9726_v53  ;;  %v9766_v53 = vpack.c.bf16 %v7496_v21, %v7495_v25 }
 0xbe6   :  { %9729 = vmatprep.subr.bf16.mxu0 %v9728_v22  ;;  %v9768_v22 = vpack.c.bf16 %v7514_v41, %v7513_v43 }
 0xbe9   :  { %9731 = vmatpush1.bf16.msra.mxu0 %v9730_v24  ;;  %v9770_v24 = vpack.c.bf16 %v7498_v31, %v7497_v27 }
 0xbea   :  { %9733 = vmatprep.subr.bf16.mxu0 %v9732_v38  ;;  %v9772_v38 = vpack.c.bf16 %v7516_v42, %v7515_v40 }
 0xbed   :  { %9735 = vmatpush1.bf16.msra.mxu0 %v9734_v30  ;;  %v9774_v30 = vpack.c.bf16 %v7500_v47, %v7499_v58 }
 0xbee   :  { %9737 = vmatprep.subr.bf16.mxu0 %v9736_v46  ;;  %v9776_v46 = vpack.c.bf16 %v7518_v12, %v7517_v6 }
 0xbf1   :  { %9739 = vmatpush1.bf16.msra.mxu0 %v9738_v39  ;;  %v9778_v39 = vpack.c.bf16 %v7502_v54, %v7501_v62 }
 0xbf2   :  { %9741 = vmatprep.subr.bf16.mxu0 %v9740_v1  ;;  %v9780_v1 = vpack.c.bf16 %v7520_v20, %v7519_v48 }
 0xbf5   :  { %9743 = vmatpush1.bf16.msra.mxu0 %v9742_v45  ;;  %v7522_v45 = vld [vmem:[%s14429_s16 + $0xf8] sm:$0xff] }
 0xbf6   :  { %9745 = vmatprep.subr.bf16.mxu0 %v9744_v5  ;;  %v9784_v5 = vpack.c.bf16 %v7522_v45, %v7521_v57 }
 0xbf9   :  { %9747 = vmatpush1.bf16.msra.mxu0 %v9746_v50  ;;  %v7340_v50 = vrot.slane %v7335_v10, %v13664_v36 }
 0xbfa   :  { %9749 = vmatprep.subr.bf16.mxu0 %v9748_v23  ;;  %v7344_v23 = vrot.slane %v7335_v10, %v13670_v52 }
 0xbfd   :  { %9751 = vmatpush1.bf16.msra.mxu0 %v9750_v19 }
 0xbfe   :  { %9753 = vmatprep.subr.bf16.mxu0 %v9752_v0 }
 0xc01   :  { %v7202_v60 = vpop.f32.mrb[76].mxu0  ;;  %9755 = vmatpush1.bf16.msra.mxu0 %v9754_v37 }
 0xc02   :  { %v7204_v2 = vpop.f32.mrb[77].mxu0  ;;  %9757 = vmatprep.subr.bf16.mxu0 %v9756_v28 }
 0xc03   :  { %7482 = vmatprep.mubr.f32.mxu0 %v7204_v2 }
 0xc04   :  { %7483 = vmatmul.mubr.f32.vlgmr.msra.gmra.mrb[78].mxu0 %v7202_v60 }
 0xc05   :  { %9759 = vmatpush3.bf16.msra.mxu0 %v9758_v16 }
 0xc06   :  { %9761 = vmatprep.subr.bf16.mxu0 %v9760_v29 }
 0xc09   :  { %9763 = vmatpush3.bf16.msra.mxu0 %v9762_v35 }
 0xc0a   :  { %9765 = vmatprep.subr.bf16.mxu0 %v9764_v8 }
 0xc0d   :  { %9767 = vmatpush3.bf16.msra.mxu0 %v9766_v53 }
 0xc0e   :  { %9769 = vmatprep.subr.bf16.mxu0 %v9768_v22 }
 0xc11   :  { %9771 = vmatpush3.bf16.msra.mxu0 %v9770_v24 }
 0xc12   :  { %9773 = vmatprep.subr.bf16.mxu0 %v9772_v38 }
 0xc15   :  { %9775 = vmatpush3.bf16.msra.mxu0 %v9774_v30 }
 0xc16   :  { %9777 = vmatprep.subr.bf16.mxu0 %v9776_v46 }
 0xc19   :  { %9779 = vmatpush3.bf16.msra.mxu0 %v9778_v39 }
 0xc1a   :  { %9781 = vmatprep.subr.bf16.mxu0 %v9780_v1 }
 0xc1d   :  { %9783 = vmatpush3.bf16.msra.mxu0 %v9782_v15 }
 0xc1e   :  { %9785 = vmatprep.subr.bf16.mxu0 %v9784_v5 }
 0xc21   :  { %9787 = vmatpush3.bf16.msra.mxu0 %v9786_v44 }
 0xcd7   :  { %v7484_v49 = vpop.f32.mrb[78].mxu0 }
 0xcd8   :  { %v9865_v3 = vadd.f32 %v7484_v49, %v7340_v50  ;;  %v7486_v51 = vpop.f32.mrb[79].mxu0 }
 0xcd9   :  { %v9866_v14 = vadd.f32 %v7486_v51, %v7344_v23 }
 0xcda   :  { %v7489_v0 = vmax.f32 %v9865_v3, 0.0 }
 0xcdb   :  { %v7490_v19 = vmax.f32 %v9866_v14, 0.0 }
 0xcdd   :  { %7594 = vmatprep.mubr.f32.mxu0 %v7490_v19 }
 0xcde   :  { %7595 = vmatmul.mubr.f32.vlgmr.msra.gmra.mrb[80].mxu0 %v7489_v0 }
 0xdb1   :  { %v8405_v26 = vpop.f32.mrb[80].mxu0 }
 0xdb2   :  { %v8406_v32 = vpop.f32.mrb[81].mxu0 }
 0xdb3   :  { %v8407_v56 = vadd.f32 %v8406_v32, %v8405_v26 }
 0xdb5   :  { %v7597_v37 = vadd.f32 %v8407_v56, %v7960_v17 }
 0xdb7   :  { %7600 = vmax.xlane.f32.xlu0 %v7597_v37 }
 0xe44   :  { %v7601_v36 = vpop.xlane.xlu0 %7600 }
 0xe45   :  { %v7602_v28 = vsub.f32 %v7597_v37, %v7601_v36 }
 0xe47   :  { %v7603_v52 = vmul.f32 1.442695, %v7602_v28 }
 0xe49   :  { %10101 = vpow2.f32 %v7603_v52 }
 0xe53   :  { %v10102_v34 = vpop.eup %10101 }
 0xe54   :  { %7605 = vadd.xlane.f32.xlu0 %v10102_v34 }
 0xee1   :  { %v7606_v9 = vpop.xlane.xlu0 %7605 }
 0xee2   :  { %10103 = vlog2.f32 %v7606_v9 }
 0xeec   :  { %v10104_v59 = vpop.eup %10103 }
 0xeed   :  { %v7608_v13 = vmul.f32 0.6931472, %v10104_v59 }
 0xeef   :  { %v7609_v60 = vsub.f32 %v7602_v28, %v7608_v13 }
 0xef1   :  { %7610 = vst [vmem:[%s14432_s18] sm:$0xff] %v7609_v60 }

</bundles_post_ra>
